<compile_context>
chip_gen: v7x
topology: tpu7x:2x2x1
jax: 0.10.0
libtpu: 0.0.40
codegen_flags: <defaults>
</compile_context>

<pallas_src>
import functools

import jax
import jax.numpy as jnp
from jax import lax
from jax.experimental import pallas as pl
from jax.experimental.pallas import tpu as pltpu

KH = KW = 3

_VMEM = pl.BlockSpec(memory_space=pltpu.MemorySpace.VMEM)
_SMEM = pl.BlockSpec(memory_space=pltpu.MemorySpace.SMEM)


# ------------------------------ fused kernel -------------------------------

def _dream_kernel(img_ref, mask_ref, w1p_ref, w1tp_ref, w2p_ref, s2_ref,
                  b1_ref, b2_ref, step_ref,
                  out_ref, loss_ref,
                  a1_ref, dy1_ref, ga1_ref, stk_ref,
                  *, steps, G, Lp, deltas, R, inv_n1, inv_n2, n_img):
    """All DeepDream iterations fused in VMEM.

    Layouts (lane axis = flattened zero-padded spatial grid, 128-aligned):
      img/out : (C,  Mx)   current image, padded-flat; valid region [G, G+Lp)
      mask    : (1,  Mx)   1.0 at real pixels, 0.0 at padding / slack
      w*p     : (cout, 9*R) tap-packed conv matrices (slot stride R rows)
      a1/dy1  : (c1, Mx)   scratch with zero halo (read via shifted slices)
      ga1     : (c1, Lp)   loop-invariant dL/da1 from mean(y2)
      stk     : (9*R, Lp)  stacked shifted slabs = RHS of the packed matmuls
    """
    C = out_ref.shape[0]
    c1 = a1_ref.shape[0]

    # ---- one-time init: image state lives in the VMEM-resident output ----
    out_ref[...] = img_ref[...]
    a1_ref[...] = jnp.zeros_like(a1_ref)      # halo must stay zero
    dy1_ref[...] = jnp.zeros_like(dy1_ref)    # halo must stay zero
    stk_ref[...] = jnp.zeros_like(stk_ref)    # zero tap-slot filler rows
    loss_ref[...] = jnp.zeros_like(loss_ref)

    # dL/da1 contributed by mean(y2) is constant across steps (dy2 == inv_n2):
    #   ga1[ci, p] = inv_n2 * sum_t (sum_co2 w2[co2, ci, t]) * valid(p - d_t)
    acc = s2_ref[0] * mask_ref[:, G - deltas[0]:G - deltas[0] + Lp]
    for t in range(1, 9):
        d = deltas[t]
        acc = acc + s2_ref[t] * mask_ref[:, G - d:G - d + Lp]
    ga1_ref[...] = acc * inv_n2

    step_size = step_ref[0, 0]

    def dream_step(last):
        mvalid = mask_ref[:, G:G + Lp]                           # (1, Lp)

        # ---------- forward conv1: tap-packed single MXU matmul ----------
        for t in range(9):
            d = deltas[t]
            stk_ref[t * R:t * R + C, :] = out_ref[:, G + d:G + d + Lp]
        y1 = jnp.dot(w1p_ref[...], stk_ref[...],
                     preferred_element_type=jnp.float32) + b1_ref[...]   # (c1,Lp)

        if last:
            # conv2 forward + loss reductions only feed the reported loss;
            # they are dead work on all non-final iterations.
            a1 = jnp.maximum(y1, 0.0) * mvalid
            a1_ref[:, G:G + Lp] = a1
            for t in range(9):
                d = deltas[t]
                stk_ref[t * R:t * R + c1, :] = a1_ref[:, G + d:G + d + Lp]
            y2 = jnp.dot(w2p_ref[...], stk_ref[...],
                         preferred_element_type=jnp.float32) + b2_ref[...]
            loss_ref[...] = (jnp.sum(y1 * mvalid, keepdims=True) * inv_n1
                             + jnp.sum(y2 * mvalid, keepdims=True) * inv_n2)

        # -------- backward: dL/dy1, then tap-packed transposed conv1 --------
        dy1_ref[:, G:G + Lp] = (
            inv_n1 + jnp.where(y1 > 0.0, ga1_ref[...], 0.0)) * mvalid
        for t in range(9):
            d = deltas[t]
            stk_ref[t * R:t * R + c1, :] = dy1_ref[:, G - d:G - d + Lp]
        g = jnp.dot(w1tp_ref[...], stk_ref[...],
                    preferred_element_type=jnp.float32)                  # (C,Lp)

        # ------ g / (g.std() + 1e-8); img += step * g; clamp to [-1, 1] ------
        gm = g * mvalid
        mu = jnp.sum(gm, keepdims=True) * (1.0 / n_img)
        dd = (g - mu) * mvalid
        std = jnp.sqrt(jnp.sum(dd * dd, keepdims=True) * (1.0 / (n_img - 1.0)))
        scale = step_size / (std + 1e-8)
        x = out_ref[:, G:G + Lp]
        out_ref[:, G:G + Lp] = jnp.clip(x + g * scale, -1.0, 1.0) * mvalid

    # steps-1 "warm" iterations (no conv2 / no loss), then one peeled final
    # iteration producing the reported loss — no traced conditionals needed.
    n_warm = steps - 1
    if n_warm > 0:
        def warm_body(i, carry):
            dream_step(False)
            return carry
        lax.fori_loop(0, n_warm, warm_body, 0, unroll=n_warm <= 8)
    dream_step(True)


# ------------------------------- wrapper ------------------------------------

def init_params(key, c_in=3, c1=8, c2=16):
    k1, k2, k3, k4 = jax.random.split(key, 4)
    w1 = 0.1 * jax.random.normal(k1, (c1, c_in, KH, KW), jnp.float32)
    b1 = 0.1 * jax.random.normal(k2, (c1,), jnp.float32)
    w2 = 0.1 * jax.random.normal(k3, (c2, c1, KH, KW), jnp.float32)
    b2 = 0.1 * jax.random.normal(k4, (c2,), jnp.float32)
    return w1, b1, w2, b2


def deep_dream(img, params, steps, step_size):
    """Mirrors DeepDreamer.forward(img, steps, step_size) -> (loss, img)."""
    assert steps >= 1
    w1, b1, w2, b2 = params
    B, C, H, W = img.shape
    c1, c2 = w1.shape[0], w2.shape[0]
    Hp, Wp = H + 2, W + 2
    L = B * Hp * Wp                                 # padded-flat spatial length
    gmin = Wp + 1                                   # largest |tap shift| + 1
    G = max(128, ((gmin + 127) // 128) * 128)       # 128-aligned halo / slack
    Lp = ((L + 127) // 128) * 128                   # 128-aligned valid width
    Mx = G + Lp + G                                 # lane-dense buffer width

    # one-time layout plumbing: channel-major padded-flat image + validity mask
    x = jnp.pad(jnp.transpose(img, (1, 0, 2, 3)),
                ((0, 0), (0, 0), (1, 1), (1, 1)))             # (C, B, Hp, Wp)
    img_buf = jnp.pad(x.reshape(C, L), ((0, 0), (G, Mx - G - L)))
    m = jnp.pad(jnp.ones((1, B, H, W), jnp.float32),
                ((0, 0), (0, 0), (1, 1), (1, 1)))
    mask_buf = jnp.pad(m.reshape(1, L), ((0, 0), (G, Mx - G - L)))

    # tap-packed conv matrices (tap t = 3*(dh+1)+(dw+1); 8-row slot stride R)
    R = max(((C + 7) // 8) * 8, ((c1 + 7) // 8) * 8)
    Kp = 9 * R
    w1_taps = jnp.transpose(w1, (2, 3, 0, 1)).reshape(9, c1, C)     # [t, co, ci]
    w1t_taps = jnp.transpose(w1, (2, 3, 1, 0)).reshape(9, C, c1)    # [t, ci, co]
    w2_taps = jnp.transpose(w2, (2, 3, 0, 1)).reshape(9, c2, c1)    # [t, co2, ci]
    w1_pack = jnp.zeros((c1, 9, R), jnp.float32).at[:, :, :C].set(
        jnp.transpose(w1_taps, (1, 0, 2))).reshape(c1, Kp)
    w1t_pack = jnp.zeros((C, 9, R), jnp.float32).at[:, :, :c1].set(
        jnp.transpose(w1t_taps, (1, 0, 2))).reshape(C, Kp)
    w2_pack = jnp.zeros((c2, 9, R), jnp.float32).at[:, :, :c1].set(
        jnp.transpose(w2_taps, (1, 0, 2))).reshape(c2, Kp)
    s2_taps = jnp.sum(w2_taps, axis=1)[..., None]                   # (9, c1, 1)
    b1c = b1.reshape(c1, 1)
    b2c = b2.reshape(c2, 1)
    step_arr = jnp.asarray(step_size, jnp.float32).reshape(1, 1)

    deltas = tuple(dh * Wp + dw for dh in (-1, 0, 1) for dw in (-1, 0, 1))

    kernel = functools.partial(
        _dream_kernel, steps=steps, G=G, Lp=Lp, deltas=deltas, R=R,
        inv_n1=1.0 / float(c1 * B * H * W),
        inv_n2=1.0 / float(c2 * B * H * W),
        n_img=float(B * C * H * W))

    out_buf, loss = pl.pallas_call(
        kernel,
        out_shape=(jax.ShapeDtypeStruct((C, Mx), jnp.float32),
                   jax.ShapeDtypeStruct((1, 1), jnp.float32)),
        in_specs=[_VMEM] * 8 + [_SMEM],
        out_specs=[_VMEM, _VMEM],
        scratch_shapes=[pltpu.VMEM((c1, Mx), jnp.float32),   # relu(conv1), halo
                        pltpu.VMEM((c1, Mx), jnp.float32),   # dL/dy1, halo
                        pltpu.VMEM((c1, Lp), jnp.float32),   # loop-invariant ga1
                        pltpu.VMEM((Kp, Lp), jnp.float32)],  # tap-stacked RHS
    )(img_buf, mask_buf, w1_pack, w1t_pack, w2_pack, s2_taps, b1c, b2c, step_arr)

    out = out_buf[:, G:G + L].reshape(C, B, Hp, Wp)[:, :, 1:H + 1, 1:W + 1]
    return loss[0, 0], jnp.transpose(out, (1, 0, 2, 3))


deep_dream_jit = jax.jit(deep_dream, static_argnums=(2,))


# --------------------------- pure-JAX reference ----------------------------

def _ref_loss(img, params):
    w1, b1, w2, b2 = params
    dn = ('NCHW', 'OIHW', 'NCHW')
    y1 = jax.lax.conv_general_dilated(img, w1, (1, 1), ((1, 1), (1, 1)),
                                      dimension_numbers=dn,
                                      precision=jax.lax.Precision.HIGHEST)
    y1 = y1 + b1[None, :, None, None]
    a1 = jnp.maximum(y1, 0.0)
    y2 = jax.lax.conv_general_dilated(a1, w2, (1, 1), ((1, 1), (1, 1)),
                                      dimension_numbers=dn,
                                      precision=jax.lax.Precision.HIGHEST)
    y2 = y2 + b2[None, :, None, None]
    return jnp.mean(y1) + jnp.mean(y2)


def _ref_deep_dream(img, params, steps, step_size):
    n = img.size
    loss = jnp.float32(0.0)
    for _ in range(steps):
        loss, g = jax.value_and_grad(_ref_loss)(img, params)
        mu = jnp.mean(g)
        std = jnp.sqrt(jnp.sum((g - mu) ** 2) / (n - 1))
        img = jnp.clip(img + g / (std + 1e-8) * step_size, -1.0, 1.0)
    return loss, img


if __name__ == "__main__":
    key = jax.random.PRNGKey(0)
    kp, ki = jax.random.split(key)
    params = init_params(kp)
    img = jax.random.uniform(ki, (2, 3, 16, 16), jnp.float32, -1.0, 1.0)
    steps = 3
    step_size = jnp.float32(0.01)

    loss, out = deep_dream_jit(img, params, steps, step_size)
    jax.block_until_ready((loss, out))

    ref_loss, ref_out = _ref_deep_dream(img, params, steps, step_size)
    assert abs(float(loss) - float(ref_loss)) < 5e-3, (float(loss), float(ref_loss))
    assert float(jnp.max(jnp.abs(out - ref_out))) < 5e-3

    print("KERNEL_OK")
</pallas_src>

<mosaic_0001>
module attributes {stable_mosaic.version = 11 : i64} {
  func.func @_dream_kernel(%arg0: memref<3x1024xf32, #tpu.memory_space<vmem>>, %arg1: memref<1x1024xf32, #tpu.memory_space<vmem>>, %arg2: memref<8x72xf32, #tpu.memory_space<vmem>>, %arg3: memref<3x72xf32, #tpu.memory_space<vmem>>, %arg4: memref<16x72xf32, #tpu.memory_space<vmem>>, %arg5: memref<9x8x1xf32, #tpu.memory_space<vmem>>, %arg6: memref<8x1xf32, #tpu.memory_space<vmem>>, %arg7: memref<16x1xf32, #tpu.memory_space<vmem>>, %arg8: memref<1x1xf32, #tpu.memory_space<smem>>, %arg9: memref<3x1024xf32, #tpu.memory_space<vmem>>, %arg10: memref<1x1xf32, #tpu.memory_space<vmem>>, %arg11: memref<8x1024xf32, #tpu.memory_space<vmem>>, %arg12: memref<8x1024xf32, #tpu.memory_space<vmem>>, %arg13: memref<8x768xf32, #tpu.memory_space<vmem>>, %arg14: memref<72x768xf32, #tpu.memory_space<vmem>>) attributes {dimension_semantics = [], scalar_prefetch = 0 : i64, scratch_operands = 4 : i64, tpu.core_type = #tpu.core_type<tc>} {
    %c0 = arith.constant 0 : index
    %c0_0 = arith.constant 0 : index
    %0 = vector.load %arg0[%c0, %c0_0] : memref<3x1024xf32, #tpu.memory_space<vmem>>, vector<3x1024xf32>
    %c0_1 = arith.constant 0 : index
    %c0_2 = arith.constant 0 : index
    %1 = vector.load %arg9[%c0_1, %c0_2] : memref<3x1024xf32, #tpu.memory_space<vmem>>, vector<3x1024xf32>
    tpu.vector_store %arg9[%c0_1, %c0_2], %0 {strides = array<i32>} : memref<3x1024xf32, #tpu.memory_space<vmem>>, vector<3x1024xf32>,
    %cst = arith.constant 0.000000e+00 : f32
    %2 = vector.broadcast %cst : f32 to vector<8x1024xf32>
    %c0_3 = arith.constant 0 : index
    %c0_4 = arith.constant 0 : index
    %3 = vector.load %arg11[%c0_3, %c0_4] : memref<8x1024xf32, #tpu.memory_space<vmem>>, vector<8x1024xf32>
    tpu.vector_store %arg11[%c0_3, %c0_4], %2 {strides = array<i32>} : memref<8x1024xf32, #tpu.memory_space<vmem>>, vector<8x1024xf32>,
    %cst_5 = arith.constant 0.000000e+00 : f32
    %4 = vector.broadcast %cst_5 : f32 to vector<8x1024xf32>
    %c0_6 = arith.constant 0 : index
    %c0_7 = arith.constant 0 : index
    %5 = vector.load %arg12[%c0_6, %c0_7] : memref<8x1024xf32, #tpu.memory_space<vmem>>, vector<8x1024xf32>
    tpu.vector_store %arg12[%c0_6, %c0_7], %4 {strides = array<i32>} : memref<8x1024xf32, #tpu.memory_space<vmem>>, vector<8x1024xf32>,
    %cst_8 = arith.constant 0.000000e+00 : f32
    %6 = vector.broadcast %cst_8 : f32 to vector<72x768xf32>
    %c0_9 = arith.constant 0 : index
    %c0_10 = arith.constant 0 : index
    %7 = vector.load %arg14[%c0_9, %c0_10] : memref<72x768xf32, #tpu.memory_space<vmem>>, vector<72x768xf32>
    tpu.vector_store %arg14[%c0_9, %c0_10], %6 {strides = array<i32>} : memref<72x768xf32, #tpu.memory_space<vmem>>, vector<72x768xf32>,
    %cst_11 = arith.constant 0.000000e+00 : f32
    %8 = vector.broadcast %cst_11 : f32 to vector<1x1xf32>
    %c0_12 = arith.constant 0 : index
    %c0_13 = arith.constant 0 : index
    %9 = vector.load %arg10[%c0_12, %c0_13] : memref<1x1xf32, #tpu.memory_space<vmem>>, vector<1x1xf32>
    tpu.vector_store %arg10[%c0_12, %c0_13], %8 {strides = array<i32>} : memref<1x1xf32, #tpu.memory_space<vmem>>, vector<1x1xf32>,
    %c0_14 = arith.constant 0 : index
    %c0_15 = arith.constant 0 : index
    %c0_16 = arith.constant 0 : index
    %10 = vector.load %arg5[%c0_14, %c0_15, %c0_16] : memref<9x8x1xf32, #tpu.memory_space<vmem>>, vector<1x8x1xf32>
    %11 = vector.shape_cast %10 : vector<1x8x1xf32> to vector<8x1xf32>
    %c0_17 = arith.constant 0 : index
    %c147 = arith.constant 147 : index
    %12 = vector.load %arg1[%c0_17, %c147] : memref<1x1024xf32, #tpu.memory_space<vmem>>, vector<1x768xf32>
    %13 = vector.broadcast %11 : vector<8x1xf32> to vector<8x768xf32>
    %14 = vector.broadcast %12 : vector<1x768xf32> to vector<8x768xf32>
    %15 = arith.mulf %13, %14 : vector<8x768xf32>
    %c1 = arith.constant 1 : index
    %c0_18 = arith.constant 0 : index
    %c0_19 = arith.constant 0 : index
    %16 = vector.load %arg5[%c1, %c0_18, %c0_19] : memref<9x8x1xf32, #tpu.memory_space<vmem>>, vector<1x8x1xf32>
    %17 = vector.shape_cast %16 : vector<1x8x1xf32> to vector<8x1xf32>
    %c0_20 = arith.constant 0 : index
    %c146 = arith.constant 146 : index
    %18 = vector.load %arg1[%c0_20, %c146] : memref<1x1024xf32, #tpu.memory_space<vmem>>, vector<1x768xf32>
    %19 = vector.broadcast %17 : vector<8x1xf32> to vector<8x768xf32>
    %20 = vector.broadcast %18 : vector<1x768xf32> to vector<8x768xf32>
    %21 = arith.mulf %19, %20 : vector<8x768xf32>
    %22 = arith.addf %15, %21 : vector<8x768xf32>
    %c2 = arith.constant 2 : index
    %c0_21 = arith.constant 0 : index
    %c0_22 = arith.constant 0 : index
    %23 = vector.load %arg5[%c2, %c0_21, %c0_22] : memref<9x8x1xf32, #tpu.memory_space<vmem>>, vector<1x8x1xf32>
    %24 = vector.shape_cast %23 : vector<1x8x1xf32> to vector<8x1xf32>
    %c0_23 = arith.constant 0 : index
    %c145 = arith.constant 145 : index
    %25 = vector.load %arg1[%c0_23, %c145] : memref<1x1024xf32, #tpu.memory_space<vmem>>, vector<1x768xf32>
    %26 = vector.broadcast %24 : vector<8x1xf32> to vector<8x768xf32>
    %27 = vector.broadcast %25 : vector<1x768xf32> to vector<8x768xf32>
    %28 = arith.mulf %26, %27 : vector<8x768xf32>
    %29 = arith.addf %22, %28 : vector<8x768xf32>
    %c3 = arith.constant 3 : index
    %c0_24 = arith.constant 0 : index
    %c0_25 = arith.constant 0 : index
    %30 = vector.load %arg5[%c3, %c0_24, %c0_25] : memref<9x8x1xf32, #tpu.memory_space<vmem>>, vector<1x8x1xf32>
    %31 = vector.shape_cast %30 : vector<1x8x1xf32> to vector<8x1xf32>
    %c0_26 = arith.constant 0 : index
    %c129 = arith.constant 129 : index
    %32 = vector.load %arg1[%c0_26, %c129] : memref<1x1024xf32, #tpu.memory_space<vmem>>, vector<1x768xf32>
    %33 = vector.broadcast %31 : vector<8x1xf32> to vector<8x768xf32>
    %34 = vector.broadcast %32 : vector<1x768xf32> to vector<8x768xf32>
    %35 = arith.mulf %33, %34 : vector<8x768xf32>
    %36 = arith.addf %29, %35 : vector<8x768xf32>
    %c4 = arith.constant 4 : index
    %c0_27 = arith.constant 0 : index
    %c0_28 = arith.constant 0 : index
    %37 = vector.load %arg5[%c4, %c0_27, %c0_28] : memref<9x8x1xf32, #tpu.memory_space<vmem>>, vector<1x8x1xf32>
    %38 = vector.shape_cast %37 : vector<1x8x1xf32> to vector<8x1xf32>
    %c0_29 = arith.constant 0 : index
    %c128 = arith.constant 128 : index
    %39 = vector.load %arg1[%c0_29, %c128] : memref<1x1024xf32, #tpu.memory_space<vmem>>, vector<1x768xf32>
    %40 = vector.broadcast %38 : vector<8x1xf32> to vector<8x768xf32>
    %41 = vector.broadcast %39 : vector<1x768xf32> to vector<8x768xf32>
    %42 = arith.mulf %40, %41 : vector<8x768xf32>
    %43 = arith.addf %36, %42 : vector<8x768xf32>
    %c5 = arith.constant 5 : index
    %c0_30 = arith.constant 0 : index
    %c0_31 = arith.constant 0 : index
    %44 = vector.load %arg5[%c5, %c0_30, %c0_31] : memref<9x8x1xf32, #tpu.memory_space<vmem>>, vector<1x8x1xf32>
    %45 = vector.shape_cast %44 : vector<1x8x1xf32> to vector<8x1xf32>
    %c0_32 = arith.constant 0 : index
    %c127 = arith.constant 127 : index
    %46 = vector.load %arg1[%c0_32, %c127] : memref<1x1024xf32, #tpu.memory_space<vmem>>, vector<1x768xf32>
    %47 = vector.broadcast %45 : vector<8x1xf32> to vector<8x768xf32>
    %48 = vector.broadcast %46 : vector<1x768xf32> to vector<8x768xf32>
    %49 = arith.mulf %47, %48 : vector<8x768xf32>
    %50 = arith.addf %43, %49 : vector<8x768xf32>
    %c6 = arith.constant 6 : index
    %c0_33 = arith.constant 0 : index
    %c0_34 = arith.constant 0 : index
    %51 = vector.load %arg5[%c6, %c0_33, %c0_34] : memref<9x8x1xf32, #tpu.memory_space<vmem>>, vector<1x8x1xf32>
    %52 = vector.shape_cast %51 : vector<1x8x1xf32> to vector<8x1xf32>
    %c0_35 = arith.constant 0 : index
    %c111 = arith.constant 111 : index
    %53 = vector.load %arg1[%c0_35, %c111] : memref<1x1024xf32, #tpu.memory_space<vmem>>, vector<1x768xf32>
    %54 = vector.broadcast %52 : vector<8x1xf32> to vector<8x768xf32>
    %55 = vector.broadcast %53 : vector<1x768xf32> to vector<8x768xf32>
    %56 = arith.mulf %54, %55 : vector<8x768xf32>
    %57 = arith.addf %50, %56 : vector<8x768xf32>
    %c7 = arith.constant 7 : index
    %c0_36 = arith.constant 0 : index
    %c0_37 = arith.constant 0 : index
    %58 = vector.load %arg5[%c7, %c0_36, %c0_37] : memref<9x8x1xf32, #tpu.memory_space<vmem>>, vector<1x8x1xf32>
    %59 = vector.shape_cast %58 : vector<1x8x1xf32> to vector<8x1xf32>
    %c0_38 = arith.constant 0 : index
    %c110 = arith.constant 110 : index
    %60 = vector.load %arg1[%c0_38, %c110] : memref<1x1024xf32, #tpu.memory_space<vmem>>, vector<1x768xf32>
    %61 = vector.broadcast %59 : vector<8x1xf32> to vector<8x768xf32>
    %62 = vector.broadcast %60 : vector<1x768xf32> to vector<8x768xf32>
    %63 = arith.mulf %61, %62 : vector<8x768xf32>
    %64 = arith.addf %57, %63 : vector<8x768xf32>
    %c8 = arith.constant 8 : index
    %c0_39 = arith.constant 0 : index
    %c0_40 = arith.constant 0 : index
    %65 = vector.load %arg5[%c8, %c0_39, %c0_40] : memref<9x8x1xf32, #tpu.memory_space<vmem>>, vector<1x8x1xf32>
    %66 = vector.shape_cast %65 : vector<1x8x1xf32> to vector<8x1xf32>
    %c0_41 = arith.constant 0 : index
    %c109 = arith.constant 109 : index
    %67 = vector.load %arg1[%c0_41, %c109] : memref<1x1024xf32, #tpu.memory_space<vmem>>, vector<1x768xf32>
    %68 = vector.broadcast %66 : vector<8x1xf32> to vector<8x768xf32>
    %69 = vector.broadcast %67 : vector<1x768xf32> to vector<8x768xf32>
    %70 = arith.mulf %68, %69 : vector<8x768xf32>
    %71 = arith.addf %64, %70 : vector<8x768xf32>
    %cst_42 = arith.constant 1.22070313E-4 : f32
    %72 = vector.broadcast %cst_42 : f32 to vector<8x768xf32>
    %73 = arith.mulf %71, %72 : vector<8x768xf32>
    %c0_43 = arith.constant 0 : index
    %c0_44 = arith.constant 0 : index
    %74 = vector.load %arg13[%c0_43, %c0_44] : memref<8x768xf32, #tpu.memory_space<vmem>>, vector<8x768xf32>
    tpu.vector_store %arg13[%c0_43, %c0_44], %73 {strides = array<i32>} : memref<8x768xf32, #tpu.memory_space<vmem>>, vector<8x768xf32>,
    %c0_45 = arith.constant 0 : index
    %c0_46 = arith.constant 0 : index
    %75 = memref.load %arg8[%c0_45, %c0_46] : memref<1x1xf32, #tpu.memory_space<smem>>
    %c0_i32 = arith.constant 0 : i32
    %c0_47 = arith.constant 0 : index
    %c128_48 = arith.constant 128 : index
    %76 = vector.load %arg1[%c0_47, %c128_48] : memref<1x1024xf32, #tpu.memory_space<vmem>>, vector<1x768xf32>
    %c0_49 = arith.constant 0 : index
    %c109_50 = arith.constant 109 : index
    %77 = vector.load %arg9[%c0_49, %c109_50] : memref<3x1024xf32, #tpu.memory_space<vmem>>, vector<3x768xf32>
    %c0_51 = arith.constant 0 : index
    %c0_52 = arith.constant 0 : index
    %78 = vector.load %arg14[%c0_51, %c0_52] : memref<72x768xf32, #tpu.memory_space<vmem>>, vector<3x768xf32>
    tpu.vector_store %arg14[%c0_51, %c0_52], %77 {strides = array<i32>} : memref<72x768xf32, #tpu.memory_space<vmem>>, vector<3x768xf32>,
    %c0_53 = arith.constant 0 : index
    %c110_54 = arith.constant 110 : index
    %79 = vector.load %arg9[%c0_53, %c110_54] : memref<3x1024xf32, #tpu.memory_space<vmem>>, vector<3x768xf32>
    %c8_55 = arith.constant 8 : index
    %c0_56 = arith.constant 0 : index
    %80 = vector.load %arg14[%c8_55, %c0_56] : memref<72x768xf32, #tpu.memory_space<vmem>>, vector<3x768xf32>
    tpu.vector_store %arg14[%c8_55, %c0_56], %79 {strides = array<i32>} : memref<72x768xf32, #tpu.memory_space<vmem>>, vector<3x768xf32>,
    %c0_57 = arith.constant 0 : index
    %c111_58 = arith.constant 111 : index
    %81 = vector.load %arg9[%c0_57, %c111_58] : memref<3x1024xf32, #tpu.memory_space<vmem>>, vector<3x768xf32>
    %c16 = arith.constant 16 : index
    %c0_59 = arith.constant 0 : index
    %82 = vector.load %arg14[%c16, %c0_59] : memref<72x768xf32, #tpu.memory_space<vmem>>, vector<3x768xf32>
    tpu.vector_store %arg14[%c16, %c0_59], %81 {strides = array<i32>} : memref<72x768xf32, #tpu.memory_space<vmem>>, vector<3x768xf32>,
    %c0_60 = arith.constant 0 : index
    %c127_61 = arith.constant 127 : index
    %83 = vector.load %arg9[%c0_60, %c127_61] : memref<3x1024xf32, #tpu.memory_space<vmem>>, vector<3x768xf32>
    %c24 = arith.constant 24 : index
    %c0_62 = arith.constant 0 : index
    %84 = vector.load %arg14[%c24, %c0_62] : memref<72x768xf32, #tpu.memory_space<vmem>>, vector<3x768xf32>
    tpu.vector_store %arg14[%c24, %c0_62], %83 {strides = array<i32>} : memref<72x768xf32, #tpu.memory_space<vmem>>, vector<3x768xf32>,
    %c0_63 = arith.constant 0 : index
    %c128_64 = arith.constant 128 : index
    %85 = vector.load %arg9[%c0_63, %c128_64] : memref<3x1024xf32, #tpu.memory_space<vmem>>, vector<3x768xf32>
    %c32 = arith.constant 32 : index
    %c0_65 = arith.constant 0 : index
    %86 = vector.load %arg14[%c32, %c0_65] : memref<72x768xf32, #tpu.memory_space<vmem>>, vector<3x768xf32>
    tpu.vector_store %arg14[%c32, %c0_65], %85 {strides = array<i32>} : memref<72x768xf32, #tpu.memory_space<vmem>>, vector<3x768xf32>,
    %c0_66 = arith.constant 0 : index
    %c129_67 = arith.constant 129 : index
    %87 = vector.load %arg9[%c0_66, %c129_67] : memref<3x1024xf32, #tpu.memory_space<vmem>>, vector<3x768xf32>
    %c40 = arith.constant 40 : index
    %c0_68 = arith.constant 0 : index
    %88 = vector.load %arg14[%c40, %c0_68] : memref<72x768xf32, #tpu.memory_space<vmem>>, vector<3x768xf32>
    tpu.vector_store %arg14[%c40, %c0_68], %87 {strides = array<i32>} : memref<72x768xf32, #tpu.memory_space<vmem>>, vector<3x768xf32>,
    %c0_69 = arith.constant 0 : index
    %c145_70 = arith.constant 145 : index
    %89 = vector.load %arg9[%c0_69, %c145_70] : memref<3x1024xf32, #tpu.memory_space<vmem>>, vector<3x768xf32>
    %c48 = arith.constant 48 : index
    %c0_71 = arith.constant 0 : index
    %90 = vector.load %arg14[%c48, %c0_71] : memref<72x768xf32, #tpu.memory_space<vmem>>, vector<3x768xf32>
    tpu.vector_store %arg14[%c48, %c0_71], %89 {strides = array<i32>} : memref<72x768xf32, #tpu.memory_space<vmem>>, vector<3x768xf32>,
    %c0_72 = arith.constant 0 : index
    %c146_73 = arith.constant 146 : index
    %91 = vector.load %arg9[%c0_72, %c146_73] : memref<3x1024xf32, #tpu.memory_space<vmem>>, vector<3x768xf32>
    %c56 = arith.constant 56 : index
    %c0_74 = arith.constant 0 : index
    %92 = vector.load %arg14[%c56, %c0_74] : memref<72x768xf32, #tpu.memory_space<vmem>>, vector<3x768xf32>
    tpu.vector_store %arg14[%c56, %c0_74], %91 {strides = array<i32>} : memref<72x768xf32, #tpu.memory_space<vmem>>, vector<3x768xf32>,
    %c0_75 = arith.constant 0 : index
    %c147_76 = arith.constant 147 : index
    %93 = vector.load %arg9[%c0_75, %c147_76] : memref<3x1024xf32, #tpu.memory_space<vmem>>, vector<3x768xf32>
    %c64 = arith.constant 64 : index
    %c0_77 = arith.constant 0 : index
    %94 = vector.load %arg14[%c64, %c0_77] : memref<72x768xf32, #tpu.memory_space<vmem>>, vector<3x768xf32>
    tpu.vector_store %arg14[%c64, %c0_77], %93 {strides = array<i32>} : memref<72x768xf32, #tpu.memory_space<vmem>>, vector<3x768xf32>,
    %c0_78 = arith.constant 0 : index
    %c0_79 = arith.constant 0 : index
    %95 = vector.load %arg2[%c0_78, %c0_79] : memref<8x72xf32, #tpu.memory_space<vmem>>, vector<8x72xf32>
    %c0_80 = arith.constant 0 : index
    %c0_81 = arith.constant 0 : index
    %96 = vector.load %arg14[%c0_80, %c0_81] : memref<72x768xf32, #tpu.memory_space<vmem>>, vector<72x768xf32>
    %cst_82 = arith.constant dense<0.000000e+00> : vector<8x768xf32>
    %97 = tpu.matmul %95, %96, %cst_82 {dimension_numbers = #tpu.dot_dimension_numbers<[1], [0], [0], [1], [0, 0, 1, 1], [], []>} : vector<8x72xf32>, vector<72x768xf32>, vector<8x768xf32> -> vector<8x768xf32>
    %c0_83 = arith.constant 0 : index
    %c0_84 = arith.constant 0 : index
    %98 = vector.load %arg6[%c0_83, %c0_84] : memref<8x1xf32, #tpu.memory_space<vmem>>, vector<8x1xf32>
    %99 = vector.broadcast %98 : vector<8x1xf32> to vector<8x768xf32>
    %100 = arith.addf %97, %99 : vector<8x768xf32>
    %cst_85 = arith.constant 0.000000e+00 : f32
    %101 = vector.broadcast %cst_85 : f32 to vector<8x768xf32>
    %102 = arith.cmpf ogt, %100, %101 : vector<8x768xf32>
    %c0_86 = arith.constant 0 : index
    %c0_87 = arith.constant 0 : index
    %103 = vector.load %arg13[%c0_86, %c0_87] : memref<8x768xf32, #tpu.memory_space<vmem>>, vector<8x768xf32>
    %cst_88 = arith.constant 0.000000e+00 : f32
    %104 = vector.broadcast %cst_88 : f32 to vector<8x768xf32>
    %105 = arith.select %102, %103, %104 : vector<8x768xi1>, vector<8x768xf32>
    %cst_89 = arith.constant 2.44140625E-4 : f32
    %106 = vector.broadcast %cst_89 : f32 to vector<8x768xf32>
    %107 = arith.addf %106, %105 : vector<8x768xf32>
    %108 = vector.broadcast %76 : vector<1x768xf32> to vector<8x768xf32>
    %109 = arith.mulf %107, %108 : vector<8x768xf32>
    %c0_90 = arith.constant 0 : index
    %c128_91 = arith.constant 128 : index
    %110 = vector.load %arg12[%c0_90, %c128_91] : memref<8x1024xf32, #tpu.memory_space<vmem>>, vector<8x768xf32>
    tpu.vector_store %arg12[%c0_90, %c128_91], %109 {strides = array<i32>} : memref<8x1024xf32, #tpu.memory_space<vmem>>, vector<8x768xf32>,
    %c0_92 = arith.constant 0 : index
    %c147_93 = arith.constant 147 : index
    %111 = vector.load %arg12[%c0_92, %c147_93] : memref<8x1024xf32, #tpu.memory_space<vmem>>, vector<8x768xf32>
    %c0_94 = arith.constant 0 : index
    %c0_95 = arith.constant 0 : index
    %112 = vector.load %arg14[%c0_94, %c0_95] : memref<72x768xf32, #tpu.memory_space<vmem>>, vector<8x768xf32>
    tpu.vector_store %arg14[%c0_94, %c0_95], %111 {strides = array<i32>} : memref<72x768xf32, #tpu.memory_space<vmem>>, vector<8x768xf32>,
    %c0_96 = arith.constant 0 : index
    %c146_97 = arith.constant 146 : index
    %113 = vector.load %arg12[%c0_96, %c146_97] : memref<8x1024xf32, #tpu.memory_space<vmem>>, vector<8x768xf32>
    %c8_98 = arith.constant 8 : index
    %c0_99 = arith.constant 0 : index
    %114 = vector.load %arg14[%c8_98, %c0_99] : memref<72x768xf32, #tpu.memory_space<vmem>>, vector<8x768xf32>
    tpu.vector_store %arg14[%c8_98, %c0_99], %113 {strides = array<i32>} : memref<72x768xf32, #tpu.memory_space<vmem>>, vector<8x768xf32>,
    %c0_100 = arith.constant 0 : index
    %c145_101 = arith.constant 145 : index
    %115 = vector.load %arg12[%c0_100, %c145_101] : memref<8x1024xf32, #tpu.memory_space<vmem>>, vector<8x768xf32>
    %c16_102 = arith.constant 16 : index
    %c0_103 = arith.constant 0 : index
    %116 = vector.load %arg14[%c16_102, %c0_103] : memref<72x768xf32, #tpu.memory_space<vmem>>, vector<8x768xf32>
    tpu.vector_store %arg14[%c16_102, %c0_103], %115 {strides = array<i32>} : memref<72x768xf32, #tpu.memory_space<vmem>>, vector<8x768xf32>,
    %c0_104 = arith.constant 0 : index
    %c129_105 = arith.constant 129 : index
    %117 = vector.load %arg12[%c0_104, %c129_105] : memref<8x1024xf32, #tpu.memory_space<vmem>>, vector<8x768xf32>
    %c24_106 = arith.constant 24 : index
    %c0_107 = arith.constant 0 : index
    %118 = vector.load %arg14[%c24_106, %c0_107] : memref<72x768xf32, #tpu.memory_space<vmem>>, vector<8x768xf32>
    tpu.vector_store %arg14[%c24_106, %c0_107], %117 {strides = array<i32>} : memref<72x768xf32, #tpu.memory_space<vmem>>, vector<8x768xf32>,
    %c0_108 = arith.constant 0 : index
    %c128_109 = arith.constant 128 : index
    %119 = vector.load %arg12[%c0_108, %c128_109] : memref<8x1024xf32, #tpu.memory_space<vmem>>, vector<8x768xf32>
    %c32_110 = arith.constant 32 : index
    %c0_111 = arith.constant 0 : index
    %120 = vector.load %arg14[%c32_110, %c0_111] : memref<72x768xf32, #tpu.memory_space<vmem>>, vector<8x768xf32>
    tpu.vector_store %arg14[%c32_110, %c0_111], %119 {strides = array<i32>} : memref<72x768xf32, #tpu.memory_space<vmem>>, vector<8x768xf32>,
    %c0_112 = arith.constant 0 : index
    %c127_113 = arith.constant 127 : index
    %121 = vector.load %arg12[%c0_112, %c127_113] : memref<8x1024xf32, #tpu.memory_space<vmem>>, vector<8x768xf32>
    %c40_114 = arith.constant 40 : index
    %c0_115 = arith.constant 0 : index
    %122 = vector.load %arg14[%c40_114, %c0_115] : memref<72x768xf32, #tpu.memory_space<vmem>>, vector<8x768xf32>
    tpu.vector_store %arg14[%c40_114, %c0_115], %121 {strides = array<i32>} : memref<72x768xf32, #tpu.memory_space<vmem>>, vector<8x768xf32>,
    %c0_116 = arith.constant 0 : index
    %c111_117 = arith.constant 111 : index
    %123 = vector.load %arg12[%c0_116, %c111_117] : memref<8x1024xf32, #tpu.memory_space<vmem>>, vector<8x768xf32>
    %c48_118 = arith.constant 48 : index
    %c0_119 = arith.constant 0 : index
    %124 = vector.load %arg14[%c48_118, %c0_119] : memref<72x768xf32, #tpu.memory_space<vmem>>, vector<8x768xf32>
    tpu.vector_store %arg14[%c48_118, %c0_119], %123 {strides = array<i32>} : memref<72x768xf32, #tpu.memory_space<vmem>>, vector<8x768xf32>,
    %c0_120 = arith.constant 0 : index
    %c110_121 = arith.constant 110 : index
    %125 = vector.load %arg12[%c0_120, %c110_121] : memref<8x1024xf32, #tpu.memory_space<vmem>>, vector<8x768xf32>
    %c56_122 = arith.constant 56 : index
    %c0_123 = arith.constant 0 : index
    %126 = vector.load %arg14[%c56_122, %c0_123] : memref<72x768xf32, #tpu.memory_space<vmem>>, vector<8x768xf32>
    tpu.vector_store %arg14[%c56_122, %c0_123], %125 {strides = array<i32>} : memref<72x768xf32, #tpu.memory_space<vmem>>, vector<8x768xf32>,
    %c0_124 = arith.constant 0 : index
    %c109_125 = arith.constant 109 : index
    %127 = vector.load %arg12[%c0_124, %c109_125] : memref<8x1024xf32, #tpu.memory_space<vmem>>, vector<8x768xf32>
    %c64_126 = arith.constant 64 : index
    %c0_127 = arith.constant 0 : index
    %128 = vector.load %arg14[%c64_126, %c0_127] : memref<72x768xf32, #tpu.memory_space<vmem>>, vector<8x768xf32>
    tpu.vector_store %arg14[%c64_126, %c0_127], %127 {strides = array<i32>} : memref<72x768xf32, #tpu.memory_space<vmem>>, vector<8x768xf32>,
    %c0_128 = arith.constant 0 : index
    %c0_129 = arith.constant 0 : index
    %129 = vector.load %arg3[%c0_128, %c0_129] : memref<3x72xf32, #tpu.memory_space<vmem>>, vector<3x72xf32>
    %c0_130 = arith.constant 0 : index
    %c0_131 = arith.constant 0 : index
    %130 = vector.load %arg14[%c0_130, %c0_131] : memref<72x768xf32, #tpu.memory_space<vmem>>, vector<72x768xf32>
    %cst_132 = arith.constant dense<0.000000e+00> : vector<3x768xf32>
    %131 = tpu.matmul %129, %130, %cst_132 {dimension_numbers = #tpu.dot_dimension_numbers<[1], [0], [0], [1], [0, 0, 1, 1], [], []>} : vector<3x72xf32>, vector<72x768xf32>, vector<3x768xf32> -> vector<3x768xf32>
    %132 = vector.broadcast %76 : vector<1x768xf32> to vector<3x768xf32>
    %133 = arith.mulf %131, %132 : vector<3x768xf32>
    %134 = vector.shape_cast %133 : vector<3x768xf32> to vector<1x3x768xf32>
    %cst_133 = arith.constant dense<0.000000e+00> : vector<1xf32>
    %135 = vector.multi_reduction <add>, %134, %cst_133 [1, 2] : vector<1x3x768xf32> to vector<1xf32>
    %136 = vector.shape_cast %135 : vector<1xf32> to vector<1x1x1xf32>
    %137 = vector.extract %136[0, 0, 0] : f32 from vector<1x1x1xf32>
    %138 = vector.broadcast %137 : f32 to vector<1x1xf32>
    %cst_134 = arith.constant 6.51041686E-4 : f32
    %139 = vector.broadcast %cst_134 : f32 to vector<1x1xf32>
    %140 = arith.mulf %138, %139 : vector<1x1xf32>
    %141 = vector.broadcast %140 : vector<1x1xf32> to vector<3x768xf32>
    %142 = arith.subf %131, %141 : vector<3x768xf32>
    %143 = vector.broadcast %76 : vector<1x768xf32> to vector<3x768xf32>
    %144 = arith.mulf %142, %143 : vector<3x768xf32>
    %145 = arith.mulf %144, %144 : vector<3x768xf32>
    %146 = vector.shape_cast %145 : vector<3x768xf32> to vector<1x3x768xf32>
    %cst_135 = arith.constant dense<0.000000e+00> : vector<1xf32>
    %147 = vector.multi_reduction <add>, %146, %cst_135 [1, 2] : vector<1x3x768xf32> to vector<1xf32>
    %148 = vector.shape_cast %147 : vector<1xf32> to vector<1x1x1xf32>
    %149 = vector.extract %148[0, 0, 0] : f32 from vector<1x1x1xf32>
    %150 = vector.broadcast %149 : f32 to vector<1x1xf32>
    %cst_136 = arith.constant 6.51465787E-4 : f32
    %151 = vector.broadcast %cst_136 : f32 to vector<1x1xf32>
    %152 = arith.mulf %150, %151 : vector<1x1xf32>
    %153 = math.sqrt %152 : vector<1x1xf32>
    %cst_137 = arith.constant 9.99999993E-9 : f32
    %154 = vector.broadcast %cst_137 : f32 to vector<1x1xf32>
    %155 = arith.addf %153, %154 : vector<1x1xf32>
    %156 = vector.broadcast %75 : f32 to vector<1x1xf32>
    %157 = arith.divf %156, %155 : vector<1x1xf32>
    %c0_138 = arith.constant 0 : index
    %c128_139 = arith.constant 128 : index
    %158 = vector.load %arg9[%c0_138, %c128_139] : memref<3x1024xf32, #tpu.memory_space<vmem>>, vector<3x768xf32>
    %159 = vector.broadcast %157 : vector<1x1xf32> to vector<3x768xf32>
    %160 = arith.mulf %131, %159 : vector<3x768xf32>
    %161 = arith.addf %158, %160 : vector<3x768xf32>
    %cst_140 = arith.constant -1.000000e+00 : f32
    %cst_141 = arith.constant 1.000000e+00 : f32
    %162 = vector.broadcast %cst_140 : f32 to vector<3x768xf32>
    %163 = arith.maximumf %162, %161 : vector<3x768xf32>
    %164 = vector.broadcast %cst_141 : f32 to vector<3x768xf32>
    %165 = arith.minimumf %164, %163 : vector<3x768xf32>
    %166 = vector.broadcast %76 : vector<1x768xf32> to vector<3x768xf32>
    %167 = arith.mulf %165, %166 : vector<3x768xf32>
    %c0_142 = arith.constant 0 : index
    %c128_143 = arith.constant 128 : index
    %168 = vector.load %arg9[%c0_142, %c128_143] : memref<3x1024xf32, #tpu.memory_space<vmem>>, vector<3x768xf32>
    tpu.vector_store %arg9[%c0_142, %c128_143], %167 {strides = array<i32>} : memref<3x1024xf32, #tpu.memory_space<vmem>>, vector<3x768xf32>,
    %c1_i32 = arith.constant 1 : i32
    %c0_144 = arith.constant 0 : index
    %c128_145 = arith.constant 128 : index
    %169 = vector.load %arg1[%c0_144, %c128_145] : memref<1x1024xf32, #tpu.memory_space<vmem>>, vector<1x768xf32>
    %c0_146 = arith.constant 0 : index
    %c109_147 = arith.constant 109 : index
    %170 = vector.load %arg9[%c0_146, %c109_147] : memref<3x1024xf32, #tpu.memory_space<vmem>>, vector<3x768xf32>
    %c0_148 = arith.constant 0 : index
    %c0_149 = arith.constant 0 : index
    %171 = vector.load %arg14[%c0_148, %c0_149] : memref<72x768xf32, #tpu.memory_space<vmem>>, vector<3x768xf32>
    tpu.vector_store %arg14[%c0_148, %c0_149], %170 {strides = array<i32>} : memref<72x768xf32, #tpu.memory_space<vmem>>, vector<3x768xf32>,
    %c0_150 = arith.constant 0 : index
    %c110_151 = arith.constant 110 : index
    %172 = vector.load %arg9[%c0_150, %c110_151] : memref<3x1024xf32, #tpu.memory_space<vmem>>, vector<3x768xf32>
    %c8_152 = arith.constant 8 : index
    %c0_153 = arith.constant 0 : index
    %173 = vector.load %arg14[%c8_152, %c0_153] : memref<72x768xf32, #tpu.memory_space<vmem>>, vector<3x768xf32>
    tpu.vector_store %arg14[%c8_152, %c0_153], %172 {strides = array<i32>} : memref<72x768xf32, #tpu.memory_space<vmem>>, vector<3x768xf32>,
    %c0_154 = arith.constant 0 : index
    %c111_155 = arith.constant 111 : index
    %174 = vector.load %arg9[%c0_154, %c111_155] : memref<3x1024xf32, #tpu.memory_space<vmem>>, vector<3x768xf32>
    %c16_156 = arith.constant 16 : index
    %c0_157 = arith.constant 0 : index
    %175 = vector.load %arg14[%c16_156, %c0_157] : memref<72x768xf32, #tpu.memory_space<vmem>>, vector<3x768xf32>
    tpu.vector_store %arg14[%c16_156, %c0_157], %174 {strides = array<i32>} : memref<72x768xf32, #tpu.memory_space<vmem>>, vector<3x768xf32>,
    %c0_158 = arith.constant 0 : index
    %c127_159 = arith.constant 127 : index
    %176 = vector.load %arg9[%c0_158, %c127_159] : memref<3x1024xf32, #tpu.memory_space<vmem>>, vector<3x768xf32>
    %c24_160 = arith.constant 24 : index
    %c0_161 = arith.constant 0 : index
    %177 = vector.load %arg14[%c24_160, %c0_161] : memref<72x768xf32, #tpu.memory_space<vmem>>, vector<3x768xf32>
    tpu.vector_store %arg14[%c24_160, %c0_161], %176 {strides = array<i32>} : memref<72x768xf32, #tpu.memory_space<vmem>>, vector<3x768xf32>,
    %c0_162 = arith.constant 0 : index
    %c128_163 = arith.constant 128 : index
    %178 = vector.load %arg9[%c0_162, %c128_163] : memref<3x1024xf32, #tpu.memory_space<vmem>>, vector<3x768xf32>
    %c32_164 = arith.constant 32 : index
    %c0_165 = arith.constant 0 : index
    %179 = vector.load %arg14[%c32_164, %c0_165] : memref<72x768xf32, #tpu.memory_space<vmem>>, vector<3x768xf32>
    tpu.vector_store %arg14[%c32_164, %c0_165], %178 {strides = array<i32>} : memref<72x768xf32, #tpu.memory_space<vmem>>, vector<3x768xf32>,
    %c0_166 = arith.constant 0 : index
    %c129_167 = arith.constant 129 : index
    %180 = vector.load %arg9[%c0_166, %c129_167] : memref<3x1024xf32, #tpu.memory_space<vmem>>, vector<3x768xf32>
    %c40_168 = arith.constant 40 : index
    %c0_169 = arith.constant 0 : index
    %181 = vector.load %arg14[%c40_168, %c0_169] : memref<72x768xf32, #tpu.memory_space<vmem>>, vector<3x768xf32>
    tpu.vector_store %arg14[%c40_168, %c0_169], %180 {strides = array<i32>} : memref<72x768xf32, #tpu.memory_space<vmem>>, vector<3x768xf32>,
    %c0_170 = arith.constant 0 : index
    %c145_171 = arith.constant 145 : index
    %182 = vector.load %arg9[%c0_170, %c145_171] : memref<3x1024xf32, #tpu.memory_space<vmem>>, vector<3x768xf32>
    %c48_172 = arith.constant 48 : index
    %c0_173 = arith.constant 0 : index
    %183 = vector.load %arg14[%c48_172, %c0_173] : memref<72x768xf32, #tpu.memory_space<vmem>>, vector<3x768xf32>
    tpu.vector_store %arg14[%c48_172, %c0_173], %182 {strides = array<i32>} : memref<72x768xf32, #tpu.memory_space<vmem>>, vector<3x768xf32>,
    %c0_174 = arith.constant 0 : index
    %c146_175 = arith.constant 146 : index
    %184 = vector.load %arg9[%c0_174, %c146_175] : memref<3x1024xf32, #tpu.memory_space<vmem>>, vector<3x768xf32>
    %c56_176 = arith.constant 56 : index
    %c0_177 = arith.constant 0 : index
    %185 = vector.load %arg14[%c56_176, %c0_177] : memref<72x768xf32, #tpu.memory_space<vmem>>, vector<3x768xf32>
    tpu.vector_store %arg14[%c56_176, %c0_177], %184 {strides = array<i32>} : memref<72x768xf32, #tpu.memory_space<vmem>>, vector<3x768xf32>,
    %c0_178 = arith.constant 0 : index
    %c147_179 = arith.constant 147 : index
    %186 = vector.load %arg9[%c0_178, %c147_179] : memref<3x1024xf32, #tpu.memory_space<vmem>>, vector<3x768xf32>
    %c64_180 = arith.constant 64 : index
    %c0_181 = arith.constant 0 : index
    %187 = vector.load %arg14[%c64_180, %c0_181] : memref<72x768xf32, #tpu.memory_space<vmem>>, vector<3x768xf32>
    tpu.vector_store %arg14[%c64_180, %c0_181], %186 {strides = array<i32>} : memref<72x768xf32, #tpu.memory_space<vmem>>, vector<3x768xf32>,
    %c0_182 = arith.constant 0 : index
    %c0_183 = arith.constant 0 : index
    %188 = vector.load %arg2[%c0_182, %c0_183] : memref<8x72xf32, #tpu.memory_space<vmem>>, vector<8x72xf32>
    %c0_184 = arith.constant 0 : index
    %c0_185 = arith.constant 0 : index
    %189 = vector.load %arg14[%c0_184, %c0_185] : memref<72x768xf32, #tpu.memory_space<vmem>>, vector<72x768xf32>
    %cst_186 = arith.constant dense<0.000000e+00> : vector<8x768xf32>
    %190 = tpu.matmul %188, %189, %cst_186 {dimension_numbers = #tpu.dot_dimension_numbers<[1], [0], [0], [1], [0, 0, 1, 1], [], []>} : vector<8x72xf32>, vector<72x768xf32>, vector<8x768xf32> -> vector<8x768xf32>
    %c0_187 = arith.constant 0 : index
    %c0_188 = arith.constant 0 : index
    %191 = vector.load %arg6[%c0_187, %c0_188] : memref<8x1xf32, #tpu.memory_space<vmem>>, vector<8x1xf32>
    %192 = vector.broadcast %191 : vector<8x1xf32> to vector<8x768xf32>
    %193 = arith.addf %190, %192 : vector<8x768xf32>
    %cst_189 = arith.constant 0.000000e+00 : f32
    %194 = vector.broadcast %cst_189 : f32 to vector<8x768xf32>
    %195 = arith.cmpf ogt, %193, %194 : vector<8x768xf32>
    %c0_190 = arith.constant 0 : index
    %c0_191 = arith.constant 0 : index
    %196 = vector.load %arg13[%c0_190, %c0_191] : memref<8x768xf32, #tpu.memory_space<vmem>>, vector<8x768xf32>
    %cst_192 = arith.constant 0.000000e+00 : f32
    %197 = vector.broadcast %cst_192 : f32 to vector<8x768xf32>
    %198 = arith.select %195, %196, %197 : vector<8x768xi1>, vector<8x768xf32>
    %cst_193 = arith.constant 2.44140625E-4 : f32
    %199 = vector.broadcast %cst_193 : f32 to vector<8x768xf32>
    %200 = arith.addf %199, %198 : vector<8x768xf32>
    %201 = vector.broadcast %169 : vector<1x768xf32> to vector<8x768xf32>
    %202 = arith.mulf %200, %201 : vector<8x768xf32>
    %c0_194 = arith.constant 0 : index
    %c128_195 = arith.constant 128 : index
    %203 = vector.load %arg12[%c0_194, %c128_195] : memref<8x1024xf32, #tpu.memory_space<vmem>>, vector<8x768xf32>
    tpu.vector_store %arg12[%c0_194, %c128_195], %202 {strides = array<i32>} : memref<8x1024xf32, #tpu.memory_space<vmem>>, vector<8x768xf32>,
    %c0_196 = arith.constant 0 : index
    %c147_197 = arith.constant 147 : index
    %204 = vector.load %arg12[%c0_196, %c147_197] : memref<8x1024xf32, #tpu.memory_space<vmem>>, vector<8x768xf32>
    %c0_198 = arith.constant 0 : index
    %c0_199 = arith.constant 0 : index
    %205 = vector.load %arg14[%c0_198, %c0_199] : memref<72x768xf32, #tpu.memory_space<vmem>>, vector<8x768xf32>
    tpu.vector_store %arg14[%c0_198, %c0_199], %204 {strides = array<i32>} : memref<72x768xf32, #tpu.memory_space<vmem>>, vector<8x768xf32>,
    %c0_200 = arith.constant 0 : index
    %c146_201 = arith.constant 146 : index
    %206 = vector.load %arg12[%c0_200, %c146_201] : memref<8x1024xf32, #tpu.memory_space<vmem>>, vector<8x768xf32>
    %c8_202 = arith.constant 8 : index
    %c0_203 = arith.constant 0 : index
    %207 = vector.load %arg14[%c8_202, %c0_203] : memref<72x768xf32, #tpu.memory_space<vmem>>, vector<8x768xf32>
    tpu.vector_store %arg14[%c8_202, %c0_203], %206 {strides = array<i32>} : memref<72x768xf32, #tpu.memory_space<vmem>>, vector<8x768xf32>,
    %c0_204 = arith.constant 0 : index
    %c145_205 = arith.constant 145 : index
    %208 = vector.load %arg12[%c0_204, %c145_205] : memref<8x1024xf32, #tpu.memory_space<vmem>>, vector<8x768xf32>
    %c16_206 = arith.constant 16 : index
    %c0_207 = arith.constant 0 : index
    %209 = vector.load %arg14[%c16_206, %c0_207] : memref<72x768xf32, #tpu.memory_space<vmem>>, vector<8x768xf32>
    tpu.vector_store %arg14[%c16_206, %c0_207], %208 {strides = array<i32>} : memref<72x768xf32, #tpu.memory_space<vmem>>, vector<8x768xf32>,
    %c0_208 = arith.constant 0 : index
    %c129_209 = arith.constant 129 : index
    %210 = vector.load %arg12[%c0_208, %c129_209] : memref<8x1024xf32, #tpu.memory_space<vmem>>, vector<8x768xf32>
    %c24_210 = arith.constant 24 : index
    %c0_211 = arith.constant 0 : index
    %211 = vector.load %arg14[%c24_210, %c0_211] : memref<72x768xf32, #tpu.memory_space<vmem>>, vector<8x768xf32>
    tpu.vector_store %arg14[%c24_210, %c0_211], %210 {strides = array<i32>} : memref<72x768xf32, #tpu.memory_space<vmem>>, vector<8x768xf32>,
    %c0_212 = arith.constant 0 : index
    %c128_213 = arith.constant 128 : index
    %212 = vector.load %arg12[%c0_212, %c128_213] : memref<8x1024xf32, #tpu.memory_space<vmem>>, vector<8x768xf32>
    %c32_214 = arith.constant 32 : index
    %c0_215 = arith.constant 0 : index
    %213 = vector.load %arg14[%c32_214, %c0_215] : memref<72x768xf32, #tpu.memory_space<vmem>>, vector<8x768xf32>
    tpu.vector_store %arg14[%c32_214, %c0_215], %212 {strides = array<i32>} : memref<72x768xf32, #tpu.memory_space<vmem>>, vector<8x768xf32>,
    %c0_216 = arith.constant 0 : index
    %c127_217 = arith.constant 127 : index
    %214 = vector.load %arg12[%c0_216, %c127_217] : memref<8x1024xf32, #tpu.memory_space<vmem>>, vector<8x768xf32>
    %c40_218 = arith.constant 40 : index
    %c0_219 = arith.constant 0 : index
    %215 = vector.load %arg14[%c40_218, %c0_219] : memref<72x768xf32, #tpu.memory_space<vmem>>, vector<8x768xf32>
    tpu.vector_store %arg14[%c40_218, %c0_219], %214 {strides = array<i32>} : memref<72x768xf32, #tpu.memory_space<vmem>>, vector<8x768xf32>,
    %c0_220 = arith.constant 0 : index
    %c111_221 = arith.constant 111 : index
    %216 = vector.load %arg12[%c0_220, %c111_221] : memref<8x1024xf32, #tpu.memory_space<vmem>>, vector<8x768xf32>
    %c48_222 = arith.constant 48 : index
    %c0_223 = arith.constant 0 : index
    %217 = vector.load %arg14[%c48_222, %c0_223] : memref<72x768xf32, #tpu.memory_space<vmem>>, vector<8x768xf32>
    tpu.vector_store %arg14[%c48_222, %c0_223], %216 {strides = array<i32>} : memref<72x768xf32, #tpu.memory_space<vmem>>, vector<8x768xf32>,
    %c0_224 = arith.constant 0 : index
    %c110_225 = arith.constant 110 : index
    %218 = vector.load %arg12[%c0_224, %c110_225] : memref<8x1024xf32, #tpu.memory_space<vmem>>, vector<8x768xf32>
    %c56_226 = arith.constant 56 : index
    %c0_227 = arith.constant 0 : index
    %219 = vector.load %arg14[%c56_226, %c0_227] : memref<72x768xf32, #tpu.memory_space<vmem>>, vector<8x768xf32>
    tpu.vector_store %arg14[%c56_226, %c0_227], %218 {strides = array<i32>} : memref<72x768xf32, #tpu.memory_space<vmem>>, vector<8x768xf32>,
    %c0_228 = arith.constant 0 : index
    %c109_229 = arith.constant 109 : index
    %220 = vector.load %arg12[%c0_228, %c109_229] : memref<8x1024xf32, #tpu.memory_space<vmem>>, vector<8x768xf32>
    %c64_230 = arith.constant 64 : index
    %c0_231 = arith.constant 0 : index
    %221 = vector.load %arg14[%c64_230, %c0_231] : memref<72x768xf32, #tpu.memory_space<vmem>>, vector<8x768xf32>
    tpu.vector_store %arg14[%c64_230, %c0_231], %220 {strides = array<i32>} : memref<72x768xf32, #tpu.memory_space<vmem>>, vector<8x768xf32>,
    %c0_232 = arith.constant 0 : index
    %c0_233 = arith.constant 0 : index
    %222 = vector.load %arg3[%c0_232, %c0_233] : memref<3x72xf32, #tpu.memory_space<vmem>>, vector<3x72xf32>
    %c0_234 = arith.constant 0 : index
    %c0_235 = arith.constant 0 : index
    %223 = vector.load %arg14[%c0_234, %c0_235] : memref<72x768xf32, #tpu.memory_space<vmem>>, vector<72x768xf32>
    %cst_236 = arith.constant dense<0.000000e+00> : vector<3x768xf32>
    %224 = tpu.matmul %222, %223, %cst_236 {dimension_numbers = #tpu.dot_dimension_numbers<[1], [0], [0], [1], [0, 0, 1, 1], [], []>} : vector<3x72xf32>, vector<72x768xf32>, vector<3x768xf32> -> vector<3x768xf32>
    %225 = vector.broadcast %169 : vector<1x768xf32> to vector<3x768xf32>
    %226 = arith.mulf %224, %225 : vector<3x768xf32>
    %227 = vector.shape_cast %226 : vector<3x768xf32> to vector<1x3x768xf32>
    %cst_237 = arith.constant dense<0.000000e+00> : vector<1xf32>
    %228 = vector.multi_reduction <add>, %227, %cst_237 [1, 2] : vector<1x3x768xf32> to vector<1xf32>
    %229 = vector.shape_cast %228 : vector<1xf32> to vector<1x1x1xf32>
    %230 = vector.extract %229[0, 0, 0] : f32 from vector<1x1x1xf32>
    %231 = vector.broadcast %230 : f32 to vector<1x1xf32>
    %cst_238 = arith.constant 6.51041686E-4 : f32
    %232 = vector.broadcast %cst_238 : f32 to vector<1x1xf32>
    %233 = arith.mulf %231, %232 : vector<1x1xf32>
    %234 = vector.broadcast %233 : vector<1x1xf32> to vector<3x768xf32>
    %235 = arith.subf %224, %234 : vector<3x768xf32>
    %236 = vector.broadcast %169 : vector<1x768xf32> to vector<3x768xf32>
    %237 = arith.mulf %235, %236 : vector<3x768xf32>
    %238 = arith.mulf %237, %237 : vector<3x768xf32>
    %239 = vector.shape_cast %238 : vector<3x768xf32> to vector<1x3x768xf32>
    %cst_239 = arith.constant dense<0.000000e+00> : vector<1xf32>
    %240 = vector.multi_reduction <add>, %239, %cst_239 [1, 2] : vector<1x3x768xf32> to vector<1xf32>
    %241 = vector.shape_cast %240 : vector<1xf32> to vector<1x1x1xf32>
    %242 = vector.extract %241[0, 0, 0] : f32 from vector<1x1x1xf32>
    %243 = vector.broadcast %242 : f32 to vector<1x1xf32>
    %cst_240 = arith.constant 6.51465787E-4 : f32
    %244 = vector.broadcast %cst_240 : f32 to vector<1x1xf32>
    %245 = arith.mulf %243, %244 : vector<1x1xf32>
    %246 = math.sqrt %245 : vector<1x1xf32>
    %cst_241 = arith.constant 9.99999993E-9 : f32
    %247 = vector.broadcast %cst_241 : f32 to vector<1x1xf32>
    %248 = arith.addf %246, %247 : vector<1x1xf32>
    %249 = vector.broadcast %75 : f32 to vector<1x1xf32>
    %250 = arith.divf %249, %248 : vector<1x1xf32>
    %c0_242 = arith.constant 0 : index
    %c128_243 = arith.constant 128 : index
    %251 = vector.load %arg9[%c0_242, %c128_243] : memref<3x1024xf32, #tpu.memory_space<vmem>>, vector<3x768xf32>
    %252 = vector.broadcast %250 : vector<1x1xf32> to vector<3x768xf32>
    %253 = arith.mulf %224, %252 : vector<3x768xf32>
    %254 = arith.addf %251, %253 : vector<3x768xf32>
    %cst_244 = arith.constant -1.000000e+00 : f32
    %cst_245 = arith.constant 1.000000e+00 : f32
    %255 = vector.broadcast %cst_244 : f32 to vector<3x768xf32>
    %256 = arith.maximumf %255, %254 : vector<3x768xf32>
    %257 = vector.broadcast %cst_245 : f32 to vector<3x768xf32>
    %258 = arith.minimumf %257, %256 : vector<3x768xf32>
    %259 = vector.broadcast %169 : vector<1x768xf32> to vector<3x768xf32>
    %260 = arith.mulf %258, %259 : vector<3x768xf32>
    %c0_246 = arith.constant 0 : index
    %c128_247 = arith.constant 128 : index
    %261 = vector.load %arg9[%c0_246, %c128_247] : memref<3x1024xf32, #tpu.memory_space<vmem>>, vector<3x768xf32>
    tpu.vector_store %arg9[%c0_246, %c128_247], %260 {strides = array<i32>} : memref<3x1024xf32, #tpu.memory_space<vmem>>, vector<3x768xf32>,
    %c0_248 = arith.constant 0 : index
    %c128_249 = arith.constant 128 : index
    %262 = vector.load %arg1[%c0_248, %c128_249] : memref<1x1024xf32, #tpu.memory_space<vmem>>, vector<1x768xf32>
    %c0_250 = arith.constant 0 : index
    %c109_251 = arith.constant 109 : index
    %263 = vector.load %arg9[%c0_250, %c109_251] : memref<3x1024xf32, #tpu.memory_space<vmem>>, vector<3x768xf32>
    %c0_252 = arith.constant 0 : index
    %c0_253 = arith.constant 0 : index
    %264 = vector.load %arg14[%c0_252, %c0_253] : memref<72x768xf32, #tpu.memory_space<vmem>>, vector<3x768xf32>
    tpu.vector_store %arg14[%c0_252, %c0_253], %263 {strides = array<i32>} : memref<72x768xf32, #tpu.memory_space<vmem>>, vector<3x768xf32>,
    %c0_254 = arith.constant 0 : index
    %c110_255 = arith.constant 110 : index
    %265 = vector.load %arg9[%c0_254, %c110_255] : memref<3x1024xf32, #tpu.memory_space<vmem>>, vector<3x768xf32>
    %c8_256 = arith.constant 8 : index
    %c0_257 = arith.constant 0 : index
    %266 = vector.load %arg14[%c8_256, %c0_257] : memref<72x768xf32, #tpu.memory_space<vmem>>, vector<3x768xf32>
    tpu.vector_store %arg14[%c8_256, %c0_257], %265 {strides = array<i32>} : memref<72x768xf32, #tpu.memory_space<vmem>>, vector<3x768xf32>,
    %c0_258 = arith.constant 0 : index
    %c111_259 = arith.constant 111 : index
    %267 = vector.load %arg9[%c0_258, %c111_259] : memref<3x1024xf32, #tpu.memory_space<vmem>>, vector<3x768xf32>
    %c16_260 = arith.constant 16 : index
    %c0_261 = arith.constant 0 : index
    %268 = vector.load %arg14[%c16_260, %c0_261] : memref<72x768xf32, #tpu.memory_space<vmem>>, vector<3x768xf32>
    tpu.vector_store %arg14[%c16_260, %c0_261], %267 {strides = array<i32>} : memref<72x768xf32, #tpu.memory_space<vmem>>, vector<3x768xf32>,
    %c0_262 = arith.constant 0 : index
    %c127_263 = arith.constant 127 : index
    %269 = vector.load %arg9[%c0_262, %c127_263] : memref<3x1024xf32, #tpu.memory_space<vmem>>, vector<3x768xf32>
    %c24_264 = arith.constant 24 : index
    %c0_265 = arith.constant 0 : index
    %270 = vector.load %arg14[%c24_264, %c0_265] : memref<72x768xf32, #tpu.memory_space<vmem>>, vector<3x768xf32>
    tpu.vector_store %arg14[%c24_264, %c0_265], %269 {strides = array<i32>} : memref<72x768xf32, #tpu.memory_space<vmem>>, vector<3x768xf32>,
    %c0_266 = arith.constant 0 : index
    %c128_267 = arith.constant 128 : index
    %271 = vector.load %arg9[%c0_266, %c128_267] : memref<3x1024xf32, #tpu.memory_space<vmem>>, vector<3x768xf32>
    %c32_268 = arith.constant 32 : index
    %c0_269 = arith.constant 0 : index
    %272 = vector.load %arg14[%c32_268, %c0_269] : memref<72x768xf32, #tpu.memory_space<vmem>>, vector<3x768xf32>
    tpu.vector_store %arg14[%c32_268, %c0_269], %271 {strides = array<i32>} : memref<72x768xf32, #tpu.memory_space<vmem>>, vector<3x768xf32>,
    %c0_270 = arith.constant 0 : index
    %c129_271 = arith.constant 129 : index
    %273 = vector.load %arg9[%c0_270, %c129_271] : memref<3x1024xf32, #tpu.memory_space<vmem>>, vector<3x768xf32>
    %c40_272 = arith.constant 40 : index
    %c0_273 = arith.constant 0 : index
    %274 = vector.load %arg14[%c40_272, %c0_273] : memref<72x768xf32, #tpu.memory_space<vmem>>, vector<3x768xf32>
    tpu.vector_store %arg14[%c40_272, %c0_273], %273 {strides = array<i32>} : memref<72x768xf32, #tpu.memory_space<vmem>>, vector<3x768xf32>,
    %c0_274 = arith.constant 0 : index
    %c145_275 = arith.constant 145 : index
    %275 = vector.load %arg9[%c0_274, %c145_275] : memref<3x1024xf32, #tpu.memory_space<vmem>>, vector<3x768xf32>
    %c48_276 = arith.constant 48 : index
    %c0_277 = arith.constant 0 : index
    %276 = vector.load %arg14[%c48_276, %c0_277] : memref<72x768xf32, #tpu.memory_space<vmem>>, vector<3x768xf32>
    tpu.vector_store %arg14[%c48_276, %c0_277], %275 {strides = array<i32>} : memref<72x768xf32, #tpu.memory_space<vmem>>, vector<3x768xf32>,
    %c0_278 = arith.constant 0 : index
    %c146_279 = arith.constant 146 : index
    %277 = vector.load %arg9[%c0_278, %c146_279] : memref<3x1024xf32, #tpu.memory_space<vmem>>, vector<3x768xf32>
    %c56_280 = arith.constant 56 : index
    %c0_281 = arith.constant 0 : index
    %278 = vector.load %arg14[%c56_280, %c0_281] : memref<72x768xf32, #tpu.memory_space<vmem>>, vector<3x768xf32>
    tpu.vector_store %arg14[%c56_280, %c0_281], %277 {strides = array<i32>} : memref<72x768xf32, #tpu.memory_space<vmem>>, vector<3x768xf32>,
    %c0_282 = arith.constant 0 : index
    %c147_283 = arith.constant 147 : index
    %279 = vector.load %arg9[%c0_282, %c147_283] : memref<3x1024xf32, #tpu.memory_space<vmem>>, vector<3x768xf32>
    %c64_284 = arith.constant 64 : index
    %c0_285 = arith.constant 0 : index
    %280 = vector.load %arg14[%c64_284, %c0_285] : memref<72x768xf32, #tpu.memory_space<vmem>>, vector<3x768xf32>
    tpu.vector_store %arg14[%c64_284, %c0_285], %279 {strides = array<i32>} : memref<72x768xf32, #tpu.memory_space<vmem>>, vector<3x768xf32>,
    %c0_286 = arith.constant 0 : index
    %c0_287 = arith.constant 0 : index
    %281 = vector.load %arg2[%c0_286, %c0_287] : memref<8x72xf32, #tpu.memory_space<vmem>>, vector<8x72xf32>
    %c0_288 = arith.constant 0 : index
    %c0_289 = arith.constant 0 : index
    %282 = vector.load %arg14[%c0_288, %c0_289] : memref<72x768xf32, #tpu.memory_space<vmem>>, vector<72x768xf32>
    %cst_290 = arith.constant dense<0.000000e+00> : vector<8x768xf32>
    %283 = tpu.matmul %281, %282, %cst_290 {dimension_numbers = #tpu.dot_dimension_numbers<[1], [0], [0], [1], [0, 0, 1, 1], [], []>} : vector<8x72xf32>, vector<72x768xf32>, vector<8x768xf32> -> vector<8x768xf32>
    %c0_291 = arith.constant 0 : index
    %c0_292 = arith.constant 0 : index
    %284 = vector.load %arg6[%c0_291, %c0_292] : memref<8x1xf32, #tpu.memory_space<vmem>>, vector<8x1xf32>
    %285 = vector.broadcast %284 : vector<8x1xf32> to vector<8x768xf32>
    %286 = arith.addf %283, %285 : vector<8x768xf32>
    %cst_293 = arith.constant 0.000000e+00 : f32
    %287 = vector.broadcast %cst_293 : f32 to vector<8x768xf32>
    %288 = arith.maximumf %286, %287 : vector<8x768xf32>
    %289 = vector.broadcast %262 : vector<1x768xf32> to vector<8x768xf32>
    %290 = arith.mulf %288, %289 : vector<8x768xf32>
    %c0_294 = arith.constant 0 : index
    %c128_295 = arith.constant 128 : index
    %291 = vector.load %arg11[%c0_294, %c128_295] : memref<8x1024xf32, #tpu.memory_space<vmem>>, vector<8x768xf32>
    tpu.vector_store %arg11[%c0_294, %c128_295], %290 {strides = array<i32>} : memref<8x1024xf32, #tpu.memory_space<vmem>>, vector<8x768xf32>,
    %c0_296 = arith.constant 0 : index
    %c109_297 = arith.constant 109 : index
    %292 = vector.load %arg11[%c0_296, %c109_297] : memref<8x1024xf32, #tpu.memory_space<vmem>>, vector<8x768xf32>
    %c0_298 = arith.constant 0 : index
    %c0_299 = arith.constant 0 : index
    %293 = vector.load %arg14[%c0_298, %c0_299] : memref<72x768xf32, #tpu.memory_space<vmem>>, vector<8x768xf32>
    tpu.vector_store %arg14[%c0_298, %c0_299], %292 {strides = array<i32>} : memref<72x768xf32, #tpu.memory_space<vmem>>, vector<8x768xf32>,
    %c0_300 = arith.constant 0 : index
    %c110_301 = arith.constant 110 : index
    %294 = vector.load %arg11[%c0_300, %c110_301] : memref<8x1024xf32, #tpu.memory_space<vmem>>, vector<8x768xf32>
    %c8_302 = arith.constant 8 : index
    %c0_303 = arith.constant 0 : index
    %295 = vector.load %arg14[%c8_302, %c0_303] : memref<72x768xf32, #tpu.memory_space<vmem>>, vector<8x768xf32>
    tpu.vector_store %arg14[%c8_302, %c0_303], %294 {strides = array<i32>} : memref<72x768xf32, #tpu.memory_space<vmem>>, vector<8x768xf32>,
    %c0_304 = arith.constant 0 : index
    %c111_305 = arith.constant 111 : index
    %296 = vector.load %arg11[%c0_304, %c111_305] : memref<8x1024xf32, #tpu.memory_space<vmem>>, vector<8x768xf32>
    %c16_306 = arith.constant 16 : index
    %c0_307 = arith.constant 0 : index
    %297 = vector.load %arg14[%c16_306, %c0_307] : memref<72x768xf32, #tpu.memory_space<vmem>>, vector<8x768xf32>
    tpu.vector_store %arg14[%c16_306, %c0_307], %296 {strides = array<i32>} : memref<72x768xf32, #tpu.memory_space<vmem>>, vector<8x768xf32>,
    %c0_308 = arith.constant 0 : index
    %c127_309 = arith.constant 127 : index
    %298 = vector.load %arg11[%c0_308, %c127_309] : memref<8x1024xf32, #tpu.memory_space<vmem>>, vector<8x768xf32>
    %c24_310 = arith.constant 24 : index
    %c0_311 = arith.constant 0 : index
    %299 = vector.load %arg14[%c24_310, %c0_311] : memref<72x768xf32, #tpu.memory_space<vmem>>, vector<8x768xf32>
    tpu.vector_store %arg14[%c24_310, %c0_311], %298 {strides = array<i32>} : memref<72x768xf32, #tpu.memory_space<vmem>>, vector<8x768xf32>,
    %c0_312 = arith.constant 0 : index
    %c128_313 = arith.constant 128 : index
    %300 = vector.load %arg11[%c0_312, %c128_313] : memref<8x1024xf32, #tpu.memory_space<vmem>>, vector<8x768xf32>
    %c32_314 = arith.constant 32 : index
    %c0_315 = arith.constant 0 : index
    %301 = vector.load %arg14[%c32_314, %c0_315] : memref<72x768xf32, #tpu.memory_space<vmem>>, vector<8x768xf32>
    tpu.vector_store %arg14[%c32_314, %c0_315], %300 {strides = array<i32>} : memref<72x768xf32, #tpu.memory_space<vmem>>, vector<8x768xf32>,
    %c0_316 = arith.constant 0 : index
    %c129_317 = arith.constant 129 : index
    %302 = vector.load %arg11[%c0_316, %c129_317] : memref<8x1024xf32, #tpu.memory_space<vmem>>, vector<8x768xf32>
    %c40_318 = arith.constant 40 : index
    %c0_319 = arith.constant 0 : index
    %303 = vector.load %arg14[%c40_318, %c0_319] : memref<72x768xf32, #tpu.memory_space<vmem>>, vector<8x768xf32>
    tpu.vector_store %arg14[%c40_318, %c0_319], %302 {strides = array<i32>} : memref<72x768xf32, #tpu.memory_space<vmem>>, vector<8x768xf32>,
    %c0_320 = arith.constant 0 : index
    %c145_321 = arith.constant 145 : index
    %304 = vector.load %arg11[%c0_320, %c145_321] : memref<8x1024xf32, #tpu.memory_space<vmem>>, vector<8x768xf32>
    %c48_322 = arith.constant 48 : index
    %c0_323 = arith.constant 0 : index
    %305 = vector.load %arg14[%c48_322, %c0_323] : memref<72x768xf32, #tpu.memory_space<vmem>>, vector<8x768xf32>
    tpu.vector_store %arg14[%c48_322, %c0_323], %304 {strides = array<i32>} : memref<72x768xf32, #tpu.memory_space<vmem>>, vector<8x768xf32>,
    %c0_324 = arith.constant 0 : index
    %c146_325 = arith.constant 146 : index
    %306 = vector.load %arg11[%c0_324, %c146_325] : memref<8x1024xf32, #tpu.memory_space<vmem>>, vector<8x768xf32>
    %c56_326 = arith.constant 56 : index
    %c0_327 = arith.constant 0 : index
    %307 = vector.load %arg14[%c56_326, %c0_327] : memref<72x768xf32, #tpu.memory_space<vmem>>, vector<8x768xf32>
    tpu.vector_store %arg14[%c56_326, %c0_327], %306 {strides = array<i32>} : memref<72x768xf32, #tpu.memory_space<vmem>>, vector<8x768xf32>,
    %c0_328 = arith.constant 0 : index
    %c147_329 = arith.constant 147 : index
    %308 = vector.load %arg11[%c0_328, %c147_329] : memref<8x1024xf32, #tpu.memory_space<vmem>>, vector<8x768xf32>
    %c64_330 = arith.constant 64 : index
    %c0_331 = arith.constant 0 : index
    %309 = vector.load %arg14[%c64_330, %c0_331] : memref<72x768xf32, #tpu.memory_space<vmem>>, vector<8x768xf32>
    tpu.vector_store %arg14[%c64_330, %c0_331], %308 {strides = array<i32>} : memref<72x768xf32, #tpu.memory_space<vmem>>, vector<8x768xf32>,
    %c0_332 = arith.constant 0 : index
    %c0_333 = arith.constant 0 : index
    %310 = vector.load %arg4[%c0_332, %c0_333] : memref<16x72xf32, #tpu.memory_space<vmem>>, vector<16x72xf32>
    %c0_334 = arith.constant 0 : index
    %c0_335 = arith.constant 0 : index
    %311 = vector.load %arg14[%c0_334, %c0_335] : memref<72x768xf32, #tpu.memory_space<vmem>>, vector<72x768xf32>
    %cst_336 = arith.constant dense<0.000000e+00> : vector<16x768xf32>
    %312 = tpu.matmul %310, %311, %cst_336 {dimension_numbers = #tpu.dot_dimension_numbers<[1], [0], [0], [1], [0, 0, 1, 1], [], []>} : vector<16x72xf32>, vector<72x768xf32>, vector<16x768xf32> -> vector<16x768xf32>
    %c0_337 = arith.constant 0 : index
    %c0_338 = arith.constant 0 : index
    %313 = vector.load %arg7[%c0_337, %c0_338] : memref<16x1xf32, #tpu.memory_space<vmem>>, vector<16x1xf32>
    %314 = vector.broadcast %313 : vector<16x1xf32> to vector<16x768xf32>
    %315 = arith.addf %312, %314 : vector<16x768xf32>
    %316 = vector.broadcast %262 : vector<1x768xf32> to vector<8x768xf32>
    %317 = arith.mulf %286, %316 : vector<8x768xf32>
    %318 = vector.shape_cast %317 : vector<8x768xf32> to vector<1x8x768xf32>
    %cst_339 = arith.constant dense<0.000000e+00> : vector<1xf32>
    %319 = vector.multi_reduction <add>, %318, %cst_339 [1, 2] : vector<1x8x768xf32> to vector<1xf32>
    %320 = vector.shape_cast %319 : vector<1xf32> to vector<1x1x1xf32>
    %321 = vector.extract %320[0, 0, 0] : f32 from vector<1x1x1xf32>
    %322 = vector.broadcast %321 : f32 to vector<1x1xf32>
    %cst_340 = arith.constant 2.44140625E-4 : f32
    %323 = vector.broadcast %cst_340 : f32 to vector<1x1xf32>
    %324 = arith.mulf %322, %323 : vector<1x1xf32>
    %325 = vector.broadcast %262 : vector<1x768xf32> to vector<16x768xf32>
    %326 = arith.mulf %315, %325 : vector<16x768xf32>
    %327 = vector.shape_cast %326 : vector<16x768xf32> to vector<1x16x768xf32>
    %cst_341 = arith.constant dense<0.000000e+00> : vector<1xf32>
    %328 = vector.multi_reduction <add>, %327, %cst_341 [1, 2] : vector<1x16x768xf32> to vector<1xf32>
    %329 = vector.shape_cast %328 : vector<1xf32> to vector<1x1x1xf32>
    %330 = vector.extract %329[0, 0, 0] : f32 from vector<1x1x1xf32>
    %331 = vector.broadcast %330 : f32 to vector<1x1xf32>
    %cst_342 = arith.constant 1.22070313E-4 : f32
    %332 = vector.broadcast %cst_342 : f32 to vector<1x1xf32>
    %333 = arith.mulf %331, %332 : vector<1x1xf32>
    %334 = arith.addf %324, %333 : vector<1x1xf32>
    %c0_343 = arith.constant 0 : index
    %c0_344 = arith.constant 0 : index
    %335 = vector.load %arg10[%c0_343, %c0_344] : memref<1x1xf32, #tpu.memory_space<vmem>>, vector<1x1xf32>
    tpu.vector_store %arg10[%c0_343, %c0_344], %334 {strides = array<i32>} : memref<1x1xf32, #tpu.memory_space<vmem>>, vector<1x1xf32>,
    %cst_345 = arith.constant 0.000000e+00 : f32
    %336 = vector.broadcast %cst_345 : f32 to vector<8x768xf32>
    %337 = arith.cmpf ogt, %286, %336 : vector<8x768xf32>
    %c0_346 = arith.constant 0 : index
    %c0_347 = arith.constant 0 : index
    %338 = vector.load %arg13[%c0_346, %c0_347] : memref<8x768xf32, #tpu.memory_space<vmem>>, vector<8x768xf32>
    %cst_348 = arith.constant 0.000000e+00 : f32
    %339 = vector.broadcast %cst_348 : f32 to vector<8x768xf32>
    %340 = arith.select %337, %338, %339 : vector<8x768xi1>, vector<8x768xf32>
    %cst_349 = arith.constant 2.44140625E-4 : f32
    %341 = vector.broadcast %cst_349 : f32 to vector<8x768xf32>
    %342 = arith.addf %341, %340 : vector<8x768xf32>
    %343 = vector.broadcast %262 : vector<1x768xf32> to vector<8x768xf32>
    %344 = arith.mulf %342, %343 : vector<8x768xf32>
    %c0_350 = arith.constant 0 : index
    %c128_351 = arith.constant 128 : index
    %345 = vector.load %arg12[%c0_350, %c128_351] : memref<8x1024xf32, #tpu.memory_space<vmem>>, vector<8x768xf32>
    tpu.vector_store %arg12[%c0_350, %c128_351], %344 {strides = array<i32>} : memref<8x1024xf32, #tpu.memory_space<vmem>>, vector<8x768xf32>,
    %c0_352 = arith.constant 0 : index
    %c147_353 = arith.constant 147 : index
    %346 = vector.load %arg12[%c0_352, %c147_353] : memref<8x1024xf32, #tpu.memory_space<vmem>>, vector<8x768xf32>
    %c0_354 = arith.constant 0 : index
    %c0_355 = arith.constant 0 : index
    %347 = vector.load %arg14[%c0_354, %c0_355] : memref<72x768xf32, #tpu.memory_space<vmem>>, vector<8x768xf32>
    tpu.vector_store %arg14[%c0_354, %c0_355], %346 {strides = array<i32>} : memref<72x768xf32, #tpu.memory_space<vmem>>, vector<8x768xf32>,
    %c0_356 = arith.constant 0 : index
    %c146_357 = arith.constant 146 : index
    %348 = vector.load %arg12[%c0_356, %c146_357] : memref<8x1024xf32, #tpu.memory_space<vmem>>, vector<8x768xf32>
    %c8_358 = arith.constant 8 : index
    %c0_359 = arith.constant 0 : index
    %349 = vector.load %arg14[%c8_358, %c0_359] : memref<72x768xf32, #tpu.memory_space<vmem>>, vector<8x768xf32>
    tpu.vector_store %arg14[%c8_358, %c0_359], %348 {strides = array<i32>} : memref<72x768xf32, #tpu.memory_space<vmem>>, vector<8x768xf32>,
    %c0_360 = arith.constant 0 : index
    %c145_361 = arith.constant 145 : index
    %350 = vector.load %arg12[%c0_360, %c145_361] : memref<8x1024xf32, #tpu.memory_space<vmem>>, vector<8x768xf32>
    %c16_362 = arith.constant 16 : index
    %c0_363 = arith.constant 0 : index
    %351 = vector.load %arg14[%c16_362, %c0_363] : memref<72x768xf32, #tpu.memory_space<vmem>>, vector<8x768xf32>
    tpu.vector_store %arg14[%c16_362, %c0_363], %350 {strides = array<i32>} : memref<72x768xf32, #tpu.memory_space<vmem>>, vector<8x768xf32>,
    %c0_364 = arith.constant 0 : index
    %c129_365 = arith.constant 129 : index
    %352 = vector.load %arg12[%c0_364, %c129_365] : memref<8x1024xf32, #tpu.memory_space<vmem>>, vector<8x768xf32>
    %c24_366 = arith.constant 24 : index
    %c0_367 = arith.constant 0 : index
    %353 = vector.load %arg14[%c24_366, %c0_367] : memref<72x768xf32, #tpu.memory_space<vmem>>, vector<8x768xf32>
    tpu.vector_store %arg14[%c24_366, %c0_367], %352 {strides = array<i32>} : memref<72x768xf32, #tpu.memory_space<vmem>>, vector<8x768xf32>,
    %c0_368 = arith.constant 0 : index
    %c128_369 = arith.constant 128 : index
    %354 = vector.load %arg12[%c0_368, %c128_369] : memref<8x1024xf32, #tpu.memory_space<vmem>>, vector<8x768xf32>
    %c32_370 = arith.constant 32 : index
    %c0_371 = arith.constant 0 : index
    %355 = vector.load %arg14[%c32_370, %c0_371] : memref<72x768xf32, #tpu.memory_space<vmem>>, vector<8x768xf32>
    tpu.vector_store %arg14[%c32_370, %c0_371], %354 {strides = array<i32>} : memref<72x768xf32, #tpu.memory_space<vmem>>, vector<8x768xf32>,
    %c0_372 = arith.constant 0 : index
    %c127_373 = arith.constant 127 : index
    %356 = vector.load %arg12[%c0_372, %c127_373] : memref<8x1024xf32, #tpu.memory_space<vmem>>, vector<8x768xf32>
    %c40_374 = arith.constant 40 : index
    %c0_375 = arith.constant 0 : index
    %357 = vector.load %arg14[%c40_374, %c0_375] : memref<72x768xf32, #tpu.memory_space<vmem>>, vector<8x768xf32>
    tpu.vector_store %arg14[%c40_374, %c0_375], %356 {strides = array<i32>} : memref<72x768xf32, #tpu.memory_space<vmem>>, vector<8x768xf32>,
    %c0_376 = arith.constant 0 : index
    %c111_377 = arith.constant 111 : index
    %358 = vector.load %arg12[%c0_376, %c111_377] : memref<8x1024xf32, #tpu.memory_space<vmem>>, vector<8x768xf32>
    %c48_378 = arith.constant 48 : index
    %c0_379 = arith.constant 0 : index
    %359 = vector.load %arg14[%c48_378, %c0_379] : memref<72x768xf32, #tpu.memory_space<vmem>>, vector<8x768xf32>
    tpu.vector_store %arg14[%c48_378, %c0_379], %358 {strides = array<i32>} : memref<72x768xf32, #tpu.memory_space<vmem>>, vector<8x768xf32>,
    %c0_380 = arith.constant 0 : index
    %c110_381 = arith.constant 110 : index
    %360 = vector.load %arg12[%c0_380, %c110_381] : memref<8x1024xf32, #tpu.memory_space<vmem>>, vector<8x768xf32>
    %c56_382 = arith.constant 56 : index
    %c0_383 = arith.constant 0 : index
    %361 = vector.load %arg14[%c56_382, %c0_383] : memref<72x768xf32, #tpu.memory_space<vmem>>, vector<8x768xf32>
    tpu.vector_store %arg14[%c56_382, %c0_383], %360 {strides = array<i32>} : memref<72x768xf32, #tpu.memory_space<vmem>>, vector<8x768xf32>,
    %c0_384 = arith.constant 0 : index
    %c109_385 = arith.constant 109 : index
    %362 = vector.load %arg12[%c0_384, %c109_385] : memref<8x1024xf32, #tpu.memory_space<vmem>>, vector<8x768xf32>
    %c64_386 = arith.constant 64 : index
    %c0_387 = arith.constant 0 : index
    %363 = vector.load %arg14[%c64_386, %c0_387] : memref<72x768xf32, #tpu.memory_space<vmem>>, vector<8x768xf32>
    tpu.vector_store %arg14[%c64_386, %c0_387], %362 {strides = array<i32>} : memref<72x768xf32, #tpu.memory_space<vmem>>, vector<8x768xf32>,
    %c0_388 = arith.constant 0 : index
    %c0_389 = arith.constant 0 : index
    %364 = vector.load %arg3[%c0_388, %c0_389] : memref<3x72xf32, #tpu.memory_space<vmem>>, vector<3x72xf32>
    %c0_390 = arith.constant 0 : index
    %c0_391 = arith.constant 0 : index
    %365 = vector.load %arg14[%c0_390, %c0_391] : memref<72x768xf32, #tpu.memory_space<vmem>>, vector<72x768xf32>
    %cst_392 = arith.constant dense<0.000000e+00> : vector<3x768xf32>
    %366 = tpu.matmul %364, %365, %cst_392 {dimension_numbers = #tpu.dot_dimension_numbers<[1], [0], [0], [1], [0, 0, 1, 1], [], []>} : vector<3x72xf32>, vector<72x768xf32>, vector<3x768xf32> -> vector<3x768xf32>
    %367 = vector.broadcast %262 : vector<1x768xf32> to vector<3x768xf32>
    %368 = arith.mulf %366, %367 : vector<3x768xf32>
    %369 = vector.shape_cast %368 : vector<3x768xf32> to vector<1x3x768xf32>
    %cst_393 = arith.constant dense<0.000000e+00> : vector<1xf32>
    %370 = vector.multi_reduction <add>, %369, %cst_393 [1, 2] : vector<1x3x768xf32> to vector<1xf32>
    %371 = vector.shape_cast %370 : vector<1xf32> to vector<1x1x1xf32>
    %372 = vector.extract %371[0, 0, 0] : f32 from vector<1x1x1xf32>
    %373 = vector.broadcast %372 : f32 to vector<1x1xf32>
    %cst_394 = arith.constant 6.51041686E-4 : f32
    %374 = vector.broadcast %cst_394 : f32 to vector<1x1xf32>
    %375 = arith.mulf %373, %374 : vector<1x1xf32>
    %376 = vector.broadcast %375 : vector<1x1xf32> to vector<3x768xf32>
    %377 = arith.subf %366, %376 : vector<3x768xf32>
    %378 = vector.broadcast %262 : vector<1x768xf32> to vector<3x768xf32>
    %379 = arith.mulf %377, %378 : vector<3x768xf32>
    %380 = arith.mulf %379, %379 : vector<3x768xf32>
    %381 = vector.shape_cast %380 : vector<3x768xf32> to vector<1x3x768xf32>
    %cst_395 = arith.constant dense<0.000000e+00> : vector<1xf32>
    %382 = vector.multi_reduction <add>, %381, %cst_395 [1, 2] : vector<1x3x768xf32> to vector<1xf32>
    %383 = vector.shape_cast %382 : vector<1xf32> to vector<1x1x1xf32>
    %384 = vector.extract %383[0, 0, 0] : f32 from vector<1x1x1xf32>
    %385 = vector.broadcast %384 : f32 to vector<1x1xf32>
    %cst_396 = arith.constant 6.51465787E-4 : f32
    %386 = vector.broadcast %cst_396 : f32 to vector<1x1xf32>
    %387 = arith.mulf %385, %386 : vector<1x1xf32>
    %388 = math.sqrt %387 : vector<1x1xf32>
    %cst_397 = arith.constant 9.99999993E-9 : f32
    %389 = vector.broadcast %cst_397 : f32 to vector<1x1xf32>
    %390 = arith.addf %388, %389 : vector<1x1xf32>
    %391 = vector.broadcast %75 : f32 to vector<1x1xf32>
    %392 = arith.divf %391, %390 : vector<1x1xf32>
    %c0_398 = arith.constant 0 : index
    %c128_399 = arith.constant 128 : index
    %393 = vector.load %arg9[%c0_398, %c128_399] : memref<3x1024xf32, #tpu.memory_space<vmem>>, vector<3x768xf32>
    %394 = vector.broadcast %392 : vector<1x1xf32> to vector<3x768xf32>
    %395 = arith.mulf %366, %394 : vector<3x768xf32>
    %396 = arith.addf %393, %395 : vector<3x768xf32>
    %cst_400 = arith.constant -1.000000e+00 : f32
    %cst_401 = arith.constant 1.000000e+00 : f32
    %397 = vector.broadcast %cst_400 : f32 to vector<3x768xf32>
    %398 = arith.maximumf %397, %396 : vector<3x768xf32>
    %399 = vector.broadcast %cst_401 : f32 to vector<3x768xf32>
    %400 = arith.minimumf %399, %398 : vector<3x768xf32>
    %401 = vector.broadcast %262 : vector<1x768xf32> to vector<3x768xf32>
    %402 = arith.mulf %400, %401 : vector<3x768xf32>
    %c0_402 = arith.constant 0 : index
    %c128_403 = arith.constant 128 : index
    %403 = vector.load %arg9[%c0_402, %c128_403] : memref<3x1024xf32, #tpu.memory_space<vmem>>, vector<3x768xf32>
    tpu.vector_store %arg9[%c0_402, %c128_403], %402 {strides = array<i32>} : memref<3x1024xf32, #tpu.memory_space<vmem>>, vector<3x768xf32>,
    return
  }
}

</mosaic_0001>

<bundles_post_ra>
// kernel: deep_dream.1
= control target key start
LH: loop header
LB: loop body
LE: loop exit
PB: predicated region body
PF: predicated region fallthrough
CT: control target
= control target key end

     0   :  { %v6509_v4 = vmov 0   ;;  %v9707_v5 = vmov 0.0   ;;  %s9696_s0 = inlined_call_operand.vmem [shape: f32[3,1024], index: 0, kind: input, shape index: {}]   ;;  %s9697_s1 = inlined_call_operand.vmem [shape: f32[1,1024], index: 1, kind: input, shape index: {}]   ;;  %s9698_s2 = inlined_call_operand.vmem [shape: f32[8,72], index: 2, kind: input, shape index: {}]   ;;  %s9699_s3 = inlined_call_operand.vmem [shape: f32[3,72], index: 3, kind: input, shape index: {}]   ;;  %s9700_s4 = inlined_call_operand.vmem [shape: f32[16,72], index: 4, kind: input, shape index: {}]   ;;  %s9701_s5 = inlined_call_operand.vmem [shape: f32[9,8,1], index: 5, kind: input, shape index: {}]   ;;  %s9702_s6 = inlined_call_operand.vmem [shape: f32[8,1], index: 6, kind: input, shape index: {}]   ;;  %s9703_s7 = inlined_call_operand.vmem [shape: f32[16,1], index: 7, kind: input, shape index: {}]   ;;  %s9704_s8 = inlined_call_operand.<no memory space> [shape: f32[1,1], index: 8, kind: input, shape index: {}]   ;;  %s9705_s9 = inlined_call_operand.vmem [shape: f32[3,1024], index: 9, kind: output, shape index: {0}]   ;;  %s9706_s10 = inlined_call_operand.hbm [shape: f32[1,1], index: 10, kind: output, shape index: {1}]  }
   0x1   :  { %v37_v0 = vld [vmem:[%s9696_s0 + $0x8] sm:$0x77]  ;;  %v36_v1 = vld [vmem:[%s9696_s0] sm:$0x77]  ;;  %v38_v2 = vld [vmem:[%s9696_s0 + $0x10] sm:$0x77]  ;;  %6356 = vset.pattern.permute.xlu1 %v6509_v4  ;;  %6355 = vset.pattern.permute.xlu0 %v6509_v4 }
   0x2   :  { %41 = vst [vmem:[%s9705_s9 + $0x8] sm:$0x77] %v37_v0  ;;  %40 = vst [vmem:[%s9705_s9] sm:$0x77] %v36_v1  ;;  %v39_v3 = vld [vmem:[%s9696_s0 + $0x18] sm:$0x77]  ;;  %1222 = vmatprep.mubr.f32.mxu0 %v9707_v5  ;;  %1293 = vmatprep.mubr.f32.mxu1 %v9707_v5 }
   0x3   :  { %42 = vst [vmem:[%s9705_s9 + $0x10] sm:$0x77] %v38_v2  ;;  %43 = vst [vmem:[%s9705_s9 + $0x18] sm:$0x77] %v39_v3 }
   0x4   :  { %66 = vst [vmem:[#allocation5 + $0x30] sm:$0xff] %v9707_v5  ;;  %67 = vst [vmem:[#allocation5 + $0x38] sm:$0xff] %v9707_v5 }
   0x5   :  { %60 = vst [vmem:[#allocation5] sm:$0xff] %v9707_v5  ;;  %61 = vst [vmem:[#allocation5 + $0x8] sm:$0xff] %v9707_v5 }
   0x6   :  { %62 = vst [vmem:[#allocation5 + $0x10] sm:$0xff] %v9707_v5  ;;  %63 = vst [vmem:[#allocation5 + $0x18] sm:$0xff] %v9707_v5 }
   0x7   :  { %64 = vst [vmem:[#allocation5 + $0x20] sm:$0xff] %v9707_v5  ;;  %65 = vst [vmem:[#allocation5 + $0x28] sm:$0xff] %v9707_v5 }
   0x8   :  { %68 = vst [vmem:[#allocation5 + $0x40] sm:$0xff] %v9707_v5  ;;  %69 = vst [vmem:[#allocation5 + $0x48] sm:$0xff] %v9707_v5 }
   0x9   :  { %70 = vst [vmem:[#allocation5 + $0x50] sm:$0xff] %v9707_v5  ;;  %71 = vst [vmem:[#allocation5 + $0x58] sm:$0xff] %v9707_v5 }
   0xa   :  { %72 = vst [vmem:[#allocation5 + $0x60] sm:$0xff] %v9707_v5  ;;  %73 = vst [vmem:[#allocation5 + $0x68] sm:$0xff] %v9707_v5 }
   0xb   :  { %74 = vst [vmem:[#allocation5 + $0x70] sm:$0xff] %v9707_v5  ;;  %75 = vst [vmem:[#allocation5 + $0x78] sm:$0xff] %v9707_v5 }
   0xc   :  { %76 = vst [vmem:[#allocation5 + $0x80] sm:$0xff] %v9707_v5  ;;  %77 = vst [vmem:[#allocation5 + $0x88] sm:$0xff] %v9707_v5 }
   0xd   :  { %78 = vst [vmem:[#allocation5 + $0x90] sm:$0xff] %v9707_v5  ;;  %79 = vst [vmem:[#allocation5 + $0x98] sm:$0xff] %v9707_v5 }
   0xe   :  { %80 = vst [vmem:[#allocation5 + $0xa0] sm:$0xff] %v9707_v5  ;;  %81 = vst [vmem:[#allocation5 + $0xa8] sm:$0xff] %v9707_v5 }
   0xf   :  { %82 = vst [vmem:[#allocation5 + $0xb0] sm:$0xff] %v9707_v5  ;;  %83 = vst [vmem:[#allocation5 + $0xb8] sm:$0xff] %v9707_v5 }
  0x10   :  { %84 = vst [vmem:[#allocation5 + $0xc0] sm:$0xff] %v9707_v5  ;;  %85 = vst [vmem:[#allocation5 + $0xc8] sm:$0xff] %v9707_v5 }
  0x11   :  { %86 = vst [vmem:[#allocation5 + $0xd0] sm:$0xff] %v9707_v5  ;;  %87 = vst [vmem:[#allocation5 + $0xd8] sm:$0xff] %v9707_v5 }
  0x12   :  { %88 = vst [vmem:[#allocation5 + $0xe0] sm:$0xff] %v9707_v5  ;;  %89 = vst [vmem:[#allocation5 + $0xe8] sm:$0xff] %v9707_v5 }
  0x13   :  { %90 = vst [vmem:[#allocation5 + $0xf0] sm:$0xff] %v9707_v5  ;;  %91 = vst [vmem:[#allocation5 + $0xf8] sm:$0xff] %v9707_v5 }
  0x14   :  { %92 = vst [vmem:[#allocation5 + $0x100] sm:$0xff] %v9707_v5  ;;  %93 = vst [vmem:[#allocation5 + $0x108] sm:$0xff] %v9707_v5 }
  0x15   :  { %94 = vst [vmem:[#allocation5 + $0x110] sm:$0xff] %v9707_v5  ;;  %95 = vst [vmem:[#allocation5 + $0x118] sm:$0xff] %v9707_v5 }
  0x16   :  { %96 = vst [vmem:[#allocation5 + $0x120] sm:$0xff] %v9707_v5  ;;  %97 = vst [vmem:[#allocation5 + $0x128] sm:$0xff] %v9707_v5 }
  0x17   :  { %98 = vst [vmem:[#allocation5 + $0x130] sm:$0xff] %v9707_v5  ;;  %99 = vst [vmem:[#allocation5 + $0x138] sm:$0xff] %v9707_v5 }
  0x18   :  { %100 = vst [vmem:[#allocation5 + $0x140] sm:$0xff] %v9707_v5  ;;  %101 = vst [vmem:[#allocation5 + $0x148] sm:$0xff] %v9707_v5 }
  0x19   :  { %102 = vst [vmem:[#allocation5 + $0x150] sm:$0xff] %v9707_v5  ;;  %103 = vst [vmem:[#allocation5 + $0x158] sm:$0xff] %v9707_v5 }
  0x1a   :  { %104 = vst [vmem:[#allocation5 + $0x160] sm:$0xff] %v9707_v5  ;;  %105 = vst [vmem:[#allocation5 + $0x168] sm:$0xff] %v9707_v5 }
  0x1b   :  { %106 = vst [vmem:[#allocation5 + $0x170] sm:$0xff] %v9707_v5  ;;  %107 = vst [vmem:[#allocation5 + $0x178] sm:$0xff] %v9707_v5 }
  0x1c   :  { %108 = vst [vmem:[#allocation5 + $0x180] sm:$0xff] %v9707_v5  ;;  %109 = vst [vmem:[#allocation5 + $0x188] sm:$0xff] %v9707_v5 }
  0x1d   :  { %110 = vst [vmem:[#allocation5 + $0x190] sm:$0xff] %v9707_v5  ;;  %111 = vst [vmem:[#allocation5 + $0x198] sm:$0xff] %v9707_v5 }
  0x1e   :  { %112 = vst [vmem:[#allocation5 + $0x1a0] sm:$0xff] %v9707_v5  ;;  %113 = vst [vmem:[#allocation5 + $0x1a8] sm:$0xff] %v9707_v5 }
  0x1f   :  { %17 = vsyncpa [#allocation8], 0  ;;  %v771_v6 = vld [vmem:[%s9705_s9 + $0x8] sm:$0x77]  ;;  %s6511_s12 = smov 18   ;;  %s6512_s13 = smov 19   ;;  %v124_v4 = vlaneseq }
  0x20   :  { %v728_v7 = vld [vmem:[%s9705_s9 + $0x8] sm:$0x77]  ;;  %785 = vrot.lane.b32.xlu1 %v771_v6, %s6511_s12  ;;  %v770_v8 = vld [vmem:[%s9705_s9] sm:$0x77]  ;;  %v6681_v13 = vld [vmem:[%s9705_s9 + $0x10] sm:$0x77]  ;;  %v779_v14 = vcombine.high %v771_v6, %v771_v6 }
  0x21   :  { %742 = vrot.lane.b32.xlu0 %v728_v7, %s6512_s13  ;;  %v727_v9 = vld [vmem:[%s9705_s9] sm:$0x77]  ;;  %v778_v10 = vcombine.high %v770_v8, %v770_v8  ;;  %v736_v12 = vcombine.high %v728_v7, %v728_v7  ;;  %v6689_v15 = vld [vmem:[%s9705_s9 + $0x10] sm:$0x77]  ;;  %v814_v18 = vld [vmem:[%s9705_s9 + $0x8] sm:$0x77]  ;;  %v737_v44 = vcombine.high %v6681_v13, %v6681_v13 }
  0x22   :  { %v735_v11 = vcombine.high %v727_v9, %v727_v9  ;;  %v813_v16 = vld [vmem:[%s9705_s9] sm:$0x77]  ;;  %s6513_s28 = smov 17   ;;  %v858_v21 = vld [vmem:[%s9705_s9 + $0x8] sm:$0x77]  ;;  %s6514_s30 = smov 1   ;;  %v822_v24 = vcombine.high %v814_v18, %v814_v18  ;;  %v780_v46 = vcombine.high %v6689_v15, %v6689_v15 }
  0x23   :  { %v821_v17 = vcombine.high %v813_v16, %v813_v16  ;;  %v857_v19 = vld [vmem:[%s9705_s9] sm:$0x77]  ;;  %v6718_v25 = vld [vmem:[%s9705_s9 + $0x10] sm:$0x77]  ;;  %v866_v26 = vcombine.high %v858_v21, %v858_v21  ;;  %s6515_s25 = smov 127   ;;  %s6516_s15 = smov 111  }
  0x24   :  { %781 = vrot.lane.b32.xlu1 %v770_v8, %s6511_s12  ;;  %v865_v20 = vcombine.high %v857_v19, %v857_v19  ;;  %v900_v22 = vld [vmem:[%s9705_s9 + $0x4] sm:$0x77]  ;;  %v6726_v27 = vld [vmem:[%s9705_s9 + $0x10] sm:$0x77]  ;;  %s6517_s18 = smov 110   ;;  %s6518_s16 = smov 109   ;;  %v823_v52 = vcombine.high %v6718_v25, %v6718_v25 }
  0x25   :  { %738 = vrot.lane.b32.xlu0 %v727_v9, %s6512_s13  ;;  %v906_v23 = vcombine.high %v900_v22, %v900_v22  ;;  %912 = vst [vmem:[#allocation5 + $0xc0] sm:$0x7] %v900_v22  ;;  %v918_v28 = vld [vmem:[%s9705_s9 + $0x4] sm:$0x77]  ;;  %v901_v29 = vld [vmem:[%s9705_s9 + $0xc] sm:$0x77]  ;;  %v867_v56 = vcombine.high %v6726_v27, %v6726_v27 }
  0x26   :  { %v907_v30 = vcombine.high %v901_v29, %v901_v29  ;;  %914 = vst [vmem:[#allocation5 + $0xd0] sm:$0x7] %v901_v29  ;;  %v926_v31 = vcombine.high %v918_v28, %v918_v28  ;;  %v919_v32 = vld [vmem:[%s9705_s9 + $0xc] sm:$0x77]  ;;  %v962_v34 = vld [vmem:[%s9705_s9 + $0x4] sm:$0x77] }
  0x27   :  { %913 = vst [vmem:[#allocation5 + $0xc8] sm:$0x7] %v906_v23  ;;  %v927_v33 = vcombine.high %v919_v32, %v919_v32  ;;  %v970_v35 = vcombine.high %v962_v34, %v962_v34  ;;  %v920_v36 = vld [vmem:[%s9705_s9 + $0x14] sm:$0x77]  ;;  %v1006_v37 = vld [vmem:[%s9705_s9 + $0x4] sm:$0x77] }
  0x28   :  { %783 = vrot.lane.b32.xlu1 %v778_v10, %s6511_s12  ;;  %915 = vst [vmem:[#allocation5 + $0xd8] sm:$0x7] %v907_v30  ;;  %v1014_v38 = vcombine.high %v1006_v37, %v1006_v37  ;;  %v963_v39 = vld [vmem:[%s9705_s9 + $0xc] sm:$0x77]  ;;  %v964_v43 = vld [vmem:[%s9705_s9 + $0x14] sm:$0x77]  ;;  %v928_v60 = vcombine.high %v920_v36, %v920_v36 }
  0x29   :  { %740 = vrot.lane.b32.xlu0 %v735_v11, %s6512_s13  ;;  %v1007_v40 = vld [vmem:[%s9705_s9 + $0xc] sm:$0x77]  ;;  %v971_v41 = vcombine.high %v963_v39, %v963_v39  ;;  %v1008_v45 = vld [vmem:[%s9705_s9 + $0x14] sm:$0x77]  ;;  %v1050_v48 = vld [vmem:[%s9705_s9 + $0x4] sm:$0x77]  ;;  %v972_v62 = vcombine.high %v964_v43, %v964_v43 }
  0x2a   :  { %v1015_v42 = vcombine.high %v1007_v40, %v1007_v40  ;;  %v730_v47 = vld [vmem:[%s9705_s9 + $0x18] sm:$0x7]  ;;  %v1058_v49 = vcombine.high %v1050_v48, %v1050_v48  ;;  %v1051_v51 = vld [vmem:[%s9705_s9 + $0xc] sm:$0x77]  ;;  %v921_v61 = vld [vmem:[%s9705_s9 + $0x1c] sm:$0x7]  ;;  %v1016_v0 = vcombine.high %v1008_v45, %v1008_v45 }
  0x2b   :  { %v773_v50 = vld [vmem:[%s9705_s9 + $0x18] sm:$0x7]  ;;  %v1059_v58 = vcombine.high %v1051_v51, %v1051_v51  ;;  %v965_v63 = vld [vmem:[%s9705_s9 + $0x1c] sm:$0x7]  ;;  %v6839_v6 = vshrl.u32 %v124_v4, 7  ;;  %v5947_v7 = vld [vmem:[%s9701_s5 + $0x10] sm:$0xff] }
  0x2c   :  { %746 = vrot.lane.b32.xlu1 %v6681_v13, %s6512_s13  ;;  %v816_v53 = vld [vmem:[%s9705_s9 + $0x18] sm:$0x7]  ;;  %v1009_v1 = vld [vmem:[%s9705_s9 + $0x1c] sm:$0x7]  ;;  %v5946_v8 = vld [vmem:[%s9701_s5 + $0x8] sm:$0xff]  ;;  %vm313_vm0 = vcmask 146432  }
  0x2d   :  { %744 = vrot.lane.b32.xlu0 %v736_v12, %s6512_s13  ;;  %v902_v54 = vld [vmem:[%s9705_s9 + $0x14] sm:$0x77]  ;;  %v1053_v3 = vld [vmem:[%s9705_s9 + $0x1c] sm:$0x7]  ;;  %v6852_v9 = vld [vmem:[%s9697_s1 + $0x1] sm:$0x7f] }
  0x2e   :  { %v908_v55 = vcombine.high %v902_v54, %v902_v54  ;;  %916 = vst [vmem:[#allocation5 + $0xe0] sm:$0x7] %v902_v54  ;;  %v860_v57 = vld [vmem:[%s9705_s9 + $0x18] sm:$0x7]  ;;  %v150_v10 = vsub.s32 6, %v6839_v6  ;;  %v5949_v13 = vld [vmem:[%s9701_s5 + $0x20] sm:$0xff] }
  0x2f   :  { %v1052_v59 = vld [vmem:[%s9705_s9 + $0x14] sm:$0x77]  ;;  %vm397_vm1 = vcmask 154624   ;;  %v5953_v22 = vld [vmem:[%s9701_s5 + $0x40] sm:$0xff]  ;;  %vm838_vm2 = vcmask 138240   ;;  %vm201_vm3 = vcmask 7168  }
  0x30   :  { %789 = vrot.lane.b32.xlu1 %v6689_v15, %s6511_s12  ;;  %917 = vst [vmem:[#allocation5 + $0xe8] sm:$0x7] %v908_v55  ;;  %v1060_v2 = vcombine.high %v1052_v59, %v1052_v59  ;;  %v6856_v11 = vrot.slane %v6852_v9, %v150_v10  ;;  %v5948_v12 = vld [vmem:[%s9701_s5 + $0x18] sm:$0xff]  ;;  %v116_v30 = vld [vmem:[%s9701_s5] sm:$0xff]  ;;  %vm943_vm4 = vcmask 1039360   ;;  %vm987_vm5 = vcmask 908288  }
  0x31   :  { %787 = vrot.lane.b32.xlu0 %v779_v14, %s6511_s12  ;;  %vm1031_vm6 = vcmask 900096   ;;  %vm706_vm7 = vcmask 891904   ;;  %vm1154_vm8 = vcmask 588800   ;;  %s6519_s20 = smov 2   ;;  %s6520_s23 = smov 20   ;;  %vm257_vm9 = vcmask 15360  }
  0x32   :  { %s6521_s24 = smov 36   ;;  %s6522_s26 = smov 37   ;;  %vm489_vm10 = vcmask 162816   ;;  %vm545_vm11 = vcmask 293888   ;;  %vm601_vm12 = vcmask 302080   ;;  %vm657_vm13 = vcmask 310272  }
  0x33   :  { %s6523_s27 = smov 38   ;;  %s6524_s22 = smov [#allocation7]  }
  0x34   :  { %828 = vrot.lane.b32.xlu1 %v814_v18, %s6513_s28 }
  0x35   :  { %826 = vrot.lane.b32.xlu0 %v821_v17, %s6513_s28  ;;  %v5951_v17 = vld [vmem:[%s9701_s5 + $0x30] sm:$0xff] }
  0x38   :  { %872 = vrot.lane.b32.xlu1 %v858_v21, %s6514_s30  ;;  %v5952_v21 = vld [vmem:[%s9701_s5 + $0x38] sm:$0xff] }
  0x39   :  { %870 = vrot.lane.b32.xlu0 %v865_v20, %s6514_s30  ;;  %v6873_v20 = vld [vmem:[%s9697_s1] sm:$0x7f] }
  0x3a   :  { %v6882_v23 = vrot.slane %v6873_v20, %v150_v10 }
  0x3c   :  { %868 = vrot.lane.b32.xlu1 %v857_v19, %s6514_s30 }
  0x3d   :  { %824 = vrot.lane.b32.xlu0 %v813_v16, %s6513_s28  ;;  %v5950_v16 = vld [vmem:[%s9701_s5 + $0x28] sm:$0xff] }
  0x40   :  { %832 = vrot.lane.b32.xlu1 %v6718_v25, %s6513_s28 }
  0x41   :  { %830 = vrot.lane.b32.xlu0 %v822_v24, %s6513_s28 }
  0x44   :  { %876 = vrot.lane.b32.xlu1 %v6726_v27, %s6514_s30 }
  0x45   :  { %874 = vrot.lane.b32.xlu0 %v866_v26, %s6514_s30 }
  0x48   :  { %933 = vrot.lane.b32.xlu1 %v919_v32, %s6515_s25 }
  0x49   :  { %931 = vrot.lane.b32.xlu0 %v926_v31, %s6515_s25 }
  0x4c   :  { %935 = vrot.lane.b32.xlu1 %v927_v33, %s6515_s25 }
  0x4d   :  { %929 = vrot.lane.b32.xlu0 %v918_v28, %s6515_s25 }
  0x50   :  { %975 = vrot.lane.b32.xlu1 %v970_v35, %s6516_s15 }
  0x51   :  { %937 = vrot.lane.b32.xlu0 %v920_v36, %s6515_s25 }
  0x54   :  { %1019 = vrot.lane.b32.xlu1 %v1014_v38, %s6517_s18 }
  0x55   :  { %977 = vrot.lane.b32.xlu0 %v963_v39, %s6516_s15 }
  0x58   :  { %973 = vrot.lane.b32.xlu1 %v962_v34, %s6516_s15 }
  0x59   :  { %1021 = vrot.lane.b32.xlu0 %v1007_v40, %s6517_s18 }
  0x5c   :  { %979 = vrot.lane.b32.xlu1 %v971_v41, %s6516_s15 }
  0x5d   :  { %1017 = vrot.lane.b32.xlu0 %v1006_v37, %s6517_s18 }
  0x60   :  { %1023 = vrot.lane.b32.xlu1 %v1015_v42, %s6517_s18 }
  0x61   :  { %981 = vrot.lane.b32.xlu0 %v964_v43, %s6516_s15 }
  0x64   :  { %748 = vrot.lane.b32.xlu1 %v737_v44, %s6512_s13 }
  0x65   :  { %1025 = vrot.lane.b32.xlu0 %v1008_v45, %s6517_s18 }
  0x68   :  { %791 = vrot.lane.b32.xlu1 %v780_v46, %s6511_s12 }
  0x69   :  { %750 = vrot.lane.b32.xlu0 %v730_v47, %s6512_s13 }
  0x6c   :  { %1063 = vrot.lane.b32.xlu1 %v1058_v49, %s6518_s16 }
  0x6d   :  { %793 = vrot.lane.b32.xlu0 %v773_v50, %s6511_s12 }
  0x70   :  { %1061 = vrot.lane.b32.xlu1 %v1050_v48, %s6518_s16 }
  0x71   :  { %1065 = vrot.lane.b32.xlu0 %v1051_v51, %s6518_s16 }
  0x74   :  { %836 = vrot.lane.b32.xlu1 %v816_v53, %s6513_s28 }
  0x75   :  { %834 = vrot.lane.b32.xlu0 %v823_v52, %s6513_s28 }
  0x78   :  { %880 = vrot.lane.b32.xlu1 %v860_v57, %s6514_s30 }
  0x79   :  { %878 = vrot.lane.b32.xlu0 %v867_v56, %s6514_s30 }
  0x7c   :  { %1069 = vrot.lane.b32.xlu1 %v1052_v59, %s6518_s16 }
  0x7d   :  { %1067 = vrot.lane.b32.xlu0 %v1059_v58, %s6518_s16 }
  0x80   :  { %941 = vrot.lane.b32.xlu1 %v921_v61, %s6515_s25 }
  0x81   :  { %939 = vrot.lane.b32.xlu0 %v928_v60, %s6515_s25 }
  0x84   :  { %985 = vrot.lane.b32.xlu1 %v965_v63, %s6516_s15 }
  0x85   :  { %983 = vrot.lane.b32.xlu0 %v972_v62, %s6516_s15 }
  0x88   :  { %1029 = vrot.lane.b32.xlu1 %v1009_v1, %s6517_s18 }
  0x89   :  { %1027 = vrot.lane.b32.xlu0 %v1016_v0, %s6517_s18 }
  0x8c   :  { %1073 = vrot.lane.b32.xlu1 %v1053_v3, %s6518_s16 }
  0x8d   :  { %1071 = vrot.lane.b32.xlu0 %v1060_v2, %s6518_s16 }
  0x90   :  { %226 = vperm.xlu1 %6356, %v5947_v7  }
  0x91   :  { %170 = vperm.xlu0 %6355, %v5946_v8  }
  0x92   :  { %v786_v14 = vpop.permute.xlu1 %785 }
  0x93   :  { %v743_v15 = vpop.permute.xlu0 %742 }
  0x94   :  { %282 = vperm.xlu1 %6356, %v5948_v12  }
  0x95   :  { %339 = vperm.xlu0 %6355, %v5949_v13  }
  0x96   :  { %v782_v18 = vpop.permute.xlu1 %781 }
  0x97   :  { %v739_v19 = vpop.permute.xlu0 %738 }
  0x98   :  { %422 = vperm.xlu1 %6356, %v5950_v16  }
  0x99   :  { %514 = vperm.xlu0 %6355, %v5951_v17  }
  0x9a   :  { %v784_v24 = vpop.permute.xlu1 %783 }
  0x9b   :  { %v741_v25 = vpop.permute.xlu0 %740  ;;  %v795_v26 = vsel %vm313_vm0, %v782_v18, %v784_v24  ;;  %v796_v27 = vsel %vm313_vm0, %v784_v24, %v786_v14 }
  0x9c   :  { %v752_v28 = vsel %vm397_vm1, %v739_v19, %v741_v25  ;;  %v753_v29 = vsel %vm397_vm1, %v741_v25, %v743_v15  ;;  %807 = vst [vmem:[#allocation5 + $0x30] sm:$0x7] %v795_v26  ;;  %808 = vst [vmem:[#allocation5 + $0x38] sm:$0x7] %v796_v27  ;;  %570 = vperm.xlu1 %6356, %v5952_v21  }
  0x9d   :  { %764 = vst [vmem:[#allocation5] sm:$0x7] %v752_v28  ;;  %765 = vst [vmem:[#allocation5 + $0x8] sm:$0x7] %v753_v29  ;;  %626 = vperm.xlu0 %6355, %v5953_v22  }
  0x9e   :  { %v6891_v31 = vpop.permute.xlu1 %746 }
  0x9f   :  { %v745_v32 = vpop.permute.xlu0 %744 }
  0xa0   :  { %v754_v33 = vsel %vm397_vm1, %v743_v15, %v745_v32  ;;  %v755_v34 = vsel %vm397_vm1, %v745_v32, %v6891_v31  ;;  %120 = vperm.xlu1 %6356, %v116_v30   ;;  %v1119_v30 = vld [vmem:[#allocation5 + $0xc8] sm:$0xff] }
  0xa1   :  { %766 = vst [vmem:[#allocation5 + $0x10] sm:$0x7] %v754_v33  ;;  %767 = vst [vmem:[#allocation5 + $0x18] sm:$0x7] %v755_v34 }
  0xa2   :  { %v6896_v35 = vpop.permute.xlu1 %789 }
  0xa3   :  { %v788_v36 = vpop.permute.xlu0 %787  ;;  %v1101_v40 = vld [vmem:[#allocation5 + $0x38] sm:$0xff]  ;;  %v1100_v43 = vld [vmem:[#allocation5 + $0x30] sm:$0xff] }
  0xa4   :  { %v797_v37 = vsel %vm313_vm0, %v786_v14, %v788_v36  ;;  %v798_v38 = vsel %vm313_vm0, %v788_v36, %v6896_v35  ;;  %v1095_v39 = vld [vmem:[#allocation5 + $0x8] sm:$0xff]  ;;  %v1094_v41 = vld [vmem:[#allocation5] sm:$0xff] }
  0xa5   :  { %809 = vst [vmem:[#allocation5 + $0x40] sm:$0x7] %v797_v37  ;;  %810 = vst [vmem:[#allocation5 + $0x48] sm:$0x7] %v798_v38  ;;  %v5987_v42 = vpack.c.bf16 %v1101_v40, %v1095_v39  ;;  %v5989_v44 = vpack.c.bf16 %v1100_v43, %v1094_v41  ;;  %v1118_v38 = vld [vmem:[#allocation5 + $0xc0] sm:$0xff] }
  0xa6   :  { %v829_v45 = vpop.permute.xlu1 %828 }
  0xa7   :  { %5988 = vmatprep.subr.bf16.mxu0 %v5987_v42  ;;  %v827_v46 = vpop.permute.xlu0 %826 }
  0xa8   :  { %v840_v47 = vsel %vm838_vm2, %v827_v46, %v829_v45  ;;  %5990 = vmatpush1.bf16.msra.mxu0 %v5989_v44  ;;  %v1097_v50 = vld [vmem:[#allocation5 + $0x18] sm:$0xff]  ;;  %v1096_v53 = vld [vmem:[#allocation5 + $0x10] sm:$0xff] }
  0xa9   :  { %852 = vst [vmem:[#allocation5 + $0x68] sm:$0x7] %v840_v47  ;;  %v1120_v44 = vld [vmem:[#allocation5 + $0xd0] sm:$0xff] }
  0xaa   :  { %v873_v48 = vpop.permute.xlu1 %872 }
  0xab   :  { %v871_v49 = vpop.permute.xlu0 %870 }
  0xac   :  { %v883_v51 = vsel %vm201_vm3, %v871_v49, %v873_v48  ;;  %v1103_v52 = vld [vmem:[#allocation5 + $0x48] sm:$0xff]  ;;  %v1102_v54 = vld [vmem:[#allocation5 + $0x40] sm:$0xff] }
  0xad   :  { %895 = vst [vmem:[#allocation5 + $0x98] sm:$0x7] %v883_v51  ;;  %v6003_v55 = vpack.c.bf16 %v1103_v52, %v1097_v50  ;;  %v6005_v56 = vpack.c.bf16 %v1102_v54, %v1096_v53 }
  0xae   :  { %v869_v57 = vpop.permute.xlu1 %868 }
  0xaf   :  { %6004 = vmatprep.subr.bf16.mxu1 %v6003_v55  ;;  %v825_v58 = vpop.permute.xlu0 %824  ;;  %v882_v59 = vsel %vm201_vm3, %v869_v57, %v871_v49 }
  0xb0   :  { %v839_v60 = vsel %vm838_vm2, %v825_v58, %v827_v46  ;;  %6006 = vmatpush1.bf16.msra.mxu1 %v6005_v56  ;;  %894 = vst [vmem:[#allocation5 + $0x90] sm:$0x7] %v882_v59  ;;  %v1107_v1 = vld [vmem:[#allocation5 + $0x68] sm:$0xff]  ;;  %v1121_v46 = vld [vmem:[#allocation5 + $0xd8] sm:$0xff] }
  0xb1   :  { %851 = vst [vmem:[#allocation5 + $0x60] sm:$0x7] %v839_v60 }
  0xb2   :  { %v6905_v61 = vpop.permute.xlu1 %832 }
  0xb3   :  { %v831_v62 = vpop.permute.xlu0 %830 }
  0xb4   :  { %v841_v63 = vsel %vm838_vm2, %v829_v45, %v831_v62  ;;  %v842_v0 = vsel %vm838_vm2, %v831_v62, %v6905_v61  ;;  %v1113_v2 = vld [vmem:[#allocation5 + $0x98] sm:$0xff] }
  0xb5   :  { %853 = vst [vmem:[#allocation5 + $0x70] sm:$0x7] %v841_v63  ;;  %854 = vst [vmem:[#allocation5 + $0x78] sm:$0x7] %v842_v0  ;;  %v5991_v3 = vpack.c.bf16 %v1113_v2, %v1107_v1 }
  0xb6   :  { %v6910_v4 = vpop.permute.xlu1 %876 }
  0xb7   :  { %5992 = vmatprep.subr.bf16.mxu0 %v5991_v3  ;;  %v875_v7 = vpop.permute.xlu0 %874  ;;  %v1112_v13 = vld [vmem:[#allocation5 + $0x90] sm:$0xff] }
  0xb8   :  { %v884_v8 = vsel %vm201_vm3, %v873_v48, %v875_v7  ;;  %v885_v10 = vsel %vm201_vm3, %v875_v7, %v6910_v4  ;;  %v1106_v12 = vld [vmem:[#allocation5 + $0x60] sm:$0xff] }
  0xb9   :  { %896 = vst [vmem:[#allocation5 + $0xa0] sm:$0x7] %v884_v8  ;;  %897 = vst [vmem:[#allocation5 + $0xa8] sm:$0x7] %v885_v10  ;;  %v5993_v14 = vpack.c.bf16 %v1112_v13, %v1106_v12 }
  0xba   :  { %v934_v15 = vpop.permute.xlu1 %933 }
  0xbb   :  { %5994 = vmatpush1.bf16.msra.mxu0 %v5993_v14  ;;  %v932_v16 = vpop.permute.xlu0 %931 }
  0xbc   :  { %v945_v17 = vsel %vm943_vm4, %v932_v16, %v934_v15  ;;  %v1109_v21 = vld [vmem:[#allocation5 + $0x78] sm:$0xff]  ;;  %v1108_v26 = vld [vmem:[#allocation5 + $0x70] sm:$0xff] }
  0xbd   :  { %957 = vst [vmem:[#allocation5 + $0xf8] sm:$0x7] %v945_v17 }
  0xbe   :  { %v936_v18 = vpop.permute.xlu1 %935 }
  0xbf   :  { %v930_v19 = vpop.permute.xlu0 %929  ;;  %v946_v22 = vsel %vm943_vm4, %v934_v15, %v936_v18 }
  0xc0   :  { %v944_v24 = vsel %vm943_vm4, %v930_v19, %v932_v16  ;;  %v1115_v25 = vld [vmem:[#allocation5 + $0xa8] sm:$0xff]  ;;  %v1114_v27 = vld [vmem:[#allocation5 + $0xa0] sm:$0xff]  ;;  %958 = vst [vmem:[#allocation5 + $0x100] sm:$0x7] %v946_v22 }
  0xc1   :  { %956 = vst [vmem:[#allocation5 + $0xf0] sm:$0x7] %v944_v24  ;;  %v6007_v28 = vpack.c.bf16 %v1115_v25, %v1109_v21  ;;  %v6009_v29 = vpack.c.bf16 %v1114_v27, %v1108_v26 }
  0xc2   :  { %v976_v32 = vpop.permute.xlu1 %975 }
  0xc3   :  { %6008 = vmatprep.subr.bf16.mxu1 %v6007_v28  ;;  %v6918_v33 = vpop.permute.xlu0 %937 }
  0xc4   :  { %v947_v34 = vsel %vm943_vm4, %v936_v18, %v6918_v33  ;;  %6010 = vmatpush1.bf16.msra.mxu1 %v6009_v29  ;;  %v1125_v36 = vld [vmem:[#allocation5 + $0xf8] sm:$0xff] }
  0xc5   :  { %959 = vst [vmem:[#allocation5 + $0x108] sm:$0x7] %v947_v34  ;;  %v5995_v37 = vpack.c.bf16 %v1125_v36, %v1119_v30 }
  0xc6   :  { %v1020_v39 = vpop.permute.xlu1 %1019 }
  0xc7   :  { %5996 = vmatprep.subr.bf16.mxu0 %v5995_v37  ;;  %v978_v40 = vpop.permute.xlu0 %977  ;;  %v1126_v45 = vld [vmem:[#allocation5 + $0x100] sm:$0xff] }
  0xc8   :  { %v989_v41 = vsel %vm987_vm5, %v976_v32, %v978_v40  ;;  %v1124_v42 = vld [vmem:[#allocation5 + $0xf0] sm:$0xff]  ;;  %v6013_v52 = vpack.c.bf16 %v1126_v45, %v1120_v44 }
  0xc9   :  { %1001 = vst [vmem:[#allocation5 + $0x128] sm:$0x7] %v989_v41  ;;  %v5997_v43 = vpack.c.bf16 %v1124_v42, %v1118_v38  ;;  %v6950_v41 = vld [vmem:[%s9698_s2] sm:$0xff] }
  0xca   :  { %v974_v47 = vpop.permute.xlu1 %973 }
  0xcb   :  { %5998 = vmatpush1.bf16.msra.mxu0 %v5997_v43  ;;  %v1022_v48 = vpop.permute.xlu0 %1021  ;;  %v988_v49 = vsel %vm987_vm5, %v974_v47, %v976_v32 }
  0xcc   :  { %v1033_v50 = vsel %vm1031_vm6, %v1020_v39, %v1022_v48  ;;  %v1127_v51 = vld [vmem:[#allocation5 + $0x108] sm:$0xff]  ;;  %1000 = vst [vmem:[#allocation5 + $0x120] sm:$0x7] %v988_v49 }
  0xcd   :  { %1045 = vst [vmem:[#allocation5 + $0x158] sm:$0x7] %v1033_v50  ;;  %v6011_v53 = vpack.c.bf16 %v1127_v51, %v1121_v46 }
  0xce   :  { %v980_v54 = vpop.permute.xlu1 %979 }
  0xcf   :  { %6012 = vmatprep.subr.bf16.mxu1 %v6011_v53  ;;  %v1018_v55 = vpop.permute.xlu0 %1017  ;;  %v990_v56 = vsel %vm987_vm5, %v978_v40, %v980_v54 }
  0xd0   :  { %v1032_v57 = vsel %vm1031_vm6, %v1018_v55, %v1020_v39  ;;  %6014 = vmatpush1.bf16.msra.mxu1 %v6013_v52  ;;  %1002 = vst [vmem:[#allocation5 + $0x130] sm:$0x7] %v990_v56  ;;  %v1131_v63 = vld [vmem:[#allocation5 + $0x128] sm:$0xff] }
  0xd1   :  { %1044 = vst [vmem:[#allocation5 + $0x150] sm:$0x7] %v1032_v57 }
  0xd2   :  { %v1024_v58 = vpop.permute.xlu1 %1023 }
  0xd3   :  { %v6927_v59 = vpop.permute.xlu0 %981  ;;  %v1034_v60 = vsel %vm1031_vm6, %v1022_v48, %v1024_v58  ;;  %v1130_v10 = vld [vmem:[#allocation5 + $0x120] sm:$0xff] }
  0xd4   :  { %v991_v62 = vsel %vm987_vm5, %v980_v54, %v6927_v59  ;;  %v1137_v0 = vld [vmem:[#allocation5 + $0x158] sm:$0xff]  ;;  %1046 = vst [vmem:[#allocation5 + $0x160] sm:$0x7] %v1034_v60 }
  0xd5   :  { %1003 = vst [vmem:[#allocation5 + $0x138] sm:$0x7] %v991_v62  ;;  %v5999_v1 = vpack.c.bf16 %v1137_v0, %v1131_v63 }
  0xd6   :  { %v749_v2 = vpop.permute.xlu1 %748 }
  0xd7   :  { %6000 = vmatprep.subr.bf16.mxu0 %v5999_v1  ;;  %v6932_v3 = vpop.permute.xlu0 %1025  ;;  %v756_v7 = vsel %vm397_vm1, %v6891_v31, %v749_v2  ;;  %v1132_v26 = vld [vmem:[#allocation5 + $0x130] sm:$0xff] }
  0xd8   :  { %v1035_v8 = vsel %vm1031_vm6, %v1024_v58, %v6932_v3  ;;  %v1136_v12 = vld [vmem:[#allocation5 + $0x150] sm:$0xff]  ;;  %768 = vst [vmem:[#allocation5 + $0x20] sm:$0x7] %v756_v7 }
  0xd9   :  { %1047 = vst [vmem:[#allocation5 + $0x168] sm:$0x7] %v1035_v8  ;;  %v6001_v13 = vpack.c.bf16 %v1136_v12, %v1130_v10  ;;  %v1123_v12 = vld [vmem:[#allocation5 + $0xe8] sm:$0xff] }
  0xda   :  { %v792_v14 = vpop.permute.xlu1 %791 }
  0xdb   :  { %6002 = vmatpush1.bf16.msra.mxu0 %v6001_v13  ;;  %v751_v15 = vpop.permute.xlu0 %750  ;;  %v799_v16 = vsel %vm313_vm0, %v6896_v35, %v792_v14  ;;  %v1138_v19 = vld [vmem:[#allocation5 + $0x160] sm:$0xff] }
  0xdc   :  { %v757_v17 = vsel %vm397_vm1, %v749_v2, %v751_v15  ;;  %811 = vst [vmem:[#allocation5 + $0x50] sm:$0x7] %v799_v16  ;;  %v1133_v22 = vld [vmem:[#allocation5 + $0x138] sm:$0xff]  ;;  %v6017_v27 = vpack.c.bf16 %v1138_v19, %v1132_v26  ;;  %v1122_v13 = vld [vmem:[#allocation5 + $0xe0] sm:$0xff] }
  0xdd   :  { %769 = vst [vmem:[#allocation5 + $0x28] sm:$0x7] %v757_v17 }
  0xde   :  { %v1064_v18 = vpop.permute.xlu1 %1063 }
  0xdf   :  { %v794_v31 = vpop.permute.xlu0 %793  ;;  %v1098_v48 = vld [vmem:[#allocation5 + $0x20] sm:$0xff] }
  0xe0   :  { %v800_v21 = vsel %vm313_vm0, %v792_v14, %v794_v31  ;;  %v1139_v24 = vld [vmem:[#allocation5 + $0x168] sm:$0xff] }
  0xe1   :  { %812 = vst [vmem:[#allocation5 + $0x58] sm:$0x7] %v800_v21  ;;  %v6015_v25 = vpack.c.bf16 %v1139_v24, %v1133_v22 }
  0xe2   :  { %v1062_v28 = vpop.permute.xlu1 %1061 }
  0xe3   :  { %6016 = vmatprep.subr.bf16.mxu1 %v6015_v25  ;;  %v1066_v29 = vpop.permute.xlu0 %1065  ;;  %v1075_v35 = vsel %vm706_vm7, %v1062_v28, %v1064_v18  ;;  %v1104_v42 = vld [vmem:[#allocation5 + $0x50] sm:$0xff] }
  0xe4   :  { %v1076_v30 = vsel %vm706_vm7, %v1064_v18, %v1066_v29  ;;  %6018 = vmatpush1.bf16.msra.mxu1 %v6017_v27  ;;  %1087 = vst [vmem:[#allocation5 + $0x180] sm:$0x7] %v1075_v35  ;;  %v1099_v46 = vld [vmem:[#allocation5 + $0x28] sm:$0xff]  ;;  %v6021_v49 = vpack.c.bf16 %v1104_v42, %v1098_v48 }
  0xe5   :  { %1088 = vst [vmem:[#allocation5 + $0x188] sm:$0x7] %v1076_v30 }
  0xe6   :  { %v837_v32 = vpop.permute.xlu1 %836 }
  0xe7   :  { %v835_v34 = vpop.permute.xlu0 %834 }
  0xe8   :  { %v843_v36 = vsel %vm838_vm2, %v6905_v61, %v835_v34  ;;  %v844_v37 = vsel %vm838_vm2, %v835_v34, %v837_v32  ;;  %v1105_v38 = vld [vmem:[#allocation5 + $0x58] sm:$0xff]  ;;  %v6975_v32 = vsub.s32 1, %v6839_v6  ;;  %v6978_v34 = vsub.s32 0, %v6839_v6 }
  0xe9   :  { %855 = vst [vmem:[#allocation5 + $0x80] sm:$0x7] %v843_v36  ;;  %856 = vst [vmem:[#allocation5 + $0x88] sm:$0x7] %v844_v37  ;;  %v6019_v47 = vpack.c.bf16 %v1105_v38, %v1099_v46 }
  0xea   :  { %v881_v39 = vpop.permute.xlu1 %880  ;;  %v6982_v37 = vrot.slane %v6852_v9, %v6975_v32  ;;  %v6986_v38 = vrot.slane %v6852_v9, %v6978_v34 }
  0xeb   :  { %v879_v40 = vpop.permute.xlu0 %878  ;;  %v1142_v61 = vld [vmem:[#allocation5 + $0x180] sm:$0xff] }
  0xec   :  { %v886_v43 = vsel %vm201_vm3, %v6910_v4, %v879_v40  ;;  %v887_v44 = vsel %vm201_vm3, %v879_v40, %v881_v39  ;;  %v1143_v45 = vld [vmem:[#allocation5 + $0x188] sm:$0xff]  ;;  %v6989_v39 = vsub.s32 3, %v6839_v6  ;;  %v6992_v40 = vsub.s32 2, %v6839_v6 }
  0xed   :  { %898 = vst [vmem:[#allocation5 + $0xb0] sm:$0x7] %v886_v43  ;;  %899 = vst [vmem:[#allocation5 + $0xb8] sm:$0x7] %v887_v44  ;;  %1174 = vmatprep.subr.mxu0 %v1143_v45 }
  0xee   :  { %1175 = vmatpush1.msra.mxu0 %v1142_v61  ;;  %v1070_v50 = vpop.permute.xlu1 %1069  ;;  %v7005_v45 = vrot.slane %v6852_v9, %v6989_v39  ;;  %v7009_v61 = vrot.slane %v6852_v9, %v6992_v40 }
  0xef   :  { %6020 = vmatprep.subr.bf16.mxu0 %v6019_v47  ;;  %v1068_v51 = vpop.permute.xlu0 %1067  ;;  %5954 = vmatmul.mubr.msk.f32.vlgmr.msra.gmra.mrb[0].mxu0 %vm1154_vm8, %v6950_v41 }
  0xf0   :  { %v1077_v4 = vsel %vm706_vm7, %v1066_v29, %v1068_v51  ;;  %v1078_v52 = vsel %vm706_vm7, %v1068_v51, %v1070_v50  ;;  %6022 = vmatpush1.bf16.msra.mxu0 %v6021_v49  ;;  %1364 = vmatprep.mubr.f32.mxu0 %v9707_v5  ;;  %v1111_v55 = vld [vmem:[#allocation5 + $0x88] sm:$0xff]  ;;  %v1110_v60 = vld [vmem:[#allocation5 + $0x80] sm:$0xff] }
  0xf1   :  { %1089 = vst [vmem:[#allocation5 + $0x190] sm:$0x7] %v1077_v4  ;;  %1090 = vst [vmem:[#allocation5 + $0x198] sm:$0x7] %v1078_v52 }
  0xf2   :  { %v942_v53 = vpop.permute.xlu1 %941 }
  0xf3   :  { %v940_v54 = vpop.permute.xlu0 %939 }
  0xf4   :  { %v948_v56 = vsel %vm943_vm4, %v6918_v33, %v940_v54  ;;  %v949_v57 = vsel %vm943_vm4, %v940_v54, %v942_v53  ;;  %v1117_v58 = vld [vmem:[#allocation5 + $0xb8] sm:$0xff]  ;;  %v1116_v62 = vld [vmem:[#allocation5 + $0xb0] sm:$0xff]  ;;  %v7042_v54 = vld [vmem:[%s9697_s1 + $0x1] sm:$0x3f] }
  0xf5   :  { %960 = vst [vmem:[#allocation5 + $0x110] sm:$0x7] %v948_v56  ;;  %961 = vst [vmem:[#allocation5 + $0x118] sm:$0x7] %v949_v57  ;;  %v6023_v63 = vpack.c.bf16 %v1117_v58, %v1111_v55  ;;  %v6025_v0 = vpack.c.bf16 %v1116_v62, %v1110_v60  ;;  %v350_v57 = vrot.slane %v7042_v54, %v6975_v32 }
  0xf6   :  { %v986_v1 = vpop.permute.xlu1 %985  ;;  %v346_v58 = vrot.slane %v7042_v54, %v6978_v34 }
  0xf7   :  { %6024 = vmatprep.subr.bf16.mxu0 %v6023_v63  ;;  %v984_v2 = vpop.permute.xlu0 %983 }
  0xf8   :  { %v992_v7 = vsel %vm987_vm5, %v6927_v59, %v984_v2  ;;  %v993_v8 = vsel %vm987_vm5, %v984_v2, %v986_v1  ;;  %6026 = vmatpush1.bf16.msra.mxu0 %v6025_v0  ;;  %v1145_v10 = vld [vmem:[#allocation5 + $0x198] sm:$0xff]  ;;  %v1144_v33 = vld [vmem:[#allocation5 + $0x190] sm:$0xff]  ;;  %v358_v0 = vrot.slane %v7042_v54, %v6989_v39  ;;  %v354_v1 = vrot.slane %v7042_v54, %v6992_v40 }
  0xf9   :  { %1004 = vst [vmem:[#allocation5 + $0x140] sm:$0x7] %v992_v7  ;;  %1005 = vst [vmem:[#allocation5 + $0x148] sm:$0x7] %v993_v8  ;;  %1245 = vmatprep.subr.mxu1 %v1145_v10  ;;  %v437_v8 = vrot.slane %v6873_v20, %v6992_v40  ;;  %v433_v10 = vrot.slane %v6873_v20, %v6975_v32 }
  0xfa   :  { %1246 = vmatpush1.msra.mxu1 %v1144_v33  ;;  %v1030_v14 = vpop.permute.xlu1 %1029 }
  0xfb   :  { %v1028_v15 = vpop.permute.xlu0 %1027  ;;  %5955 = vmatmul.mubr.msk.f32.vlgmr.msra.gmra.mrb[0].mxu1 %vm1154_vm8, %v6950_v41 }
  0xfc   :  { %v1036_v16 = vsel %vm1031_vm6, %v6932_v3, %v1028_v15  ;;  %v1037_v59 = vsel %vm1031_vm6, %v1028_v15, %v1030_v14  ;;  %v1129_v17 = vld [vmem:[#allocation5 + $0x118] sm:$0xff]  ;;  %v1128_v18 = vld [vmem:[#allocation5 + $0x110] sm:$0xff]  ;;  %1940 = vmatprep.mubr.f32.mxu1 %v9707_v5 }
  0xfd   :  { %1048 = vst [vmem:[#allocation5 + $0x170] sm:$0x7] %v1036_v16  ;;  %1049 = vst [vmem:[#allocation5 + $0x178] sm:$0x7] %v1037_v59  ;;  %v6027_v31 = vpack.c.bf16 %v1129_v17, %v1123_v12  ;;  %v6029_v19 = vpack.c.bf16 %v1128_v18, %v1122_v13  ;;  %v7077_v12 = vsub.s32 4, %v6839_v6  ;;  %v441_v16 = vrot.slane %v6873_v20, %v6989_v39 }
  0xfe   :  { %v1074_v21 = vpop.permute.xlu1 %1073  ;;  %v429_v18 = vrot.slane %v6873_v20, %v6978_v34 }
  0xff   :  { %6028 = vmatprep.subr.bf16.mxu0 %v6027_v31  ;;  %v1072_v22 = vpop.permute.xlu0 %1071  ;;  %v445_v15 = vrot.slane %v6873_v20, %v7077_v12 }
 0x100   :  { %v1079_v24 = vsel %vm706_vm7, %v1070_v50, %v1072_v22  ;;  %v1080_v25 = vsel %vm706_vm7, %v1072_v22, %v1074_v21  ;;  %6030 = vmatpush1.bf16.msra.mxu0 %v6029_v19  ;;  %v1135_v3 = vld [vmem:[#allocation5 + $0x148] sm:$0xff]  ;;  %v1134_v27 = vld [vmem:[#allocation5 + $0x140] sm:$0xff] }
 0x101   :  { %1091 = vst [vmem:[#allocation5 + $0x1a0] sm:$0x7] %v1079_v24  ;;  %1092 = vst [vmem:[#allocation5 + $0x1a8] sm:$0x7] %v1080_v25 }
 0x104   :  { %v1141_v26 = vld [vmem:[#allocation5 + $0x178] sm:$0xff]  ;;  %v1140_v28 = vld [vmem:[#allocation5 + $0x170] sm:$0xff] }
 0x105   :  { %v6031_v29 = vpack.c.bf16 %v1141_v26, %v1135_v3  ;;  %v6033_v35 = vpack.c.bf16 %v1140_v28, %v1134_v27 }
 0x107   :  { %6032 = vmatprep.subr.bf16.mxu0 %v6031_v29 }
 0x108   :  { %6034 = vmatpush1.bf16.msra.mxu0 %v6033_v35  ;;  %v1147_v30 = vld [vmem:[#allocation5 + $0x1a8] sm:$0xff]  ;;  %v1146_v36 = vld [vmem:[#allocation5 + $0x1a0] sm:$0xff] }
 0x109   :  { %1316 = vmatprep.subr.mxu0 %v1147_v30  ;;  %v7117_v30 = vrot.slane %v6852_v9, %v7077_v12 }
 0x10c   :  { %1317 = vmatpush1.msra.mxu0 %v1146_v36  ;;  %v7120_v36 = vsub.s32 5, %v6839_v6 }
 0x10d   :  { %5956 = vmatmul.mubr.msk.f32.vlgmr.msra.gmra.mrb[2].mxu0 %vm1154_vm8, %v6950_v41 }
 0x10e   :  { %2011 = vmatprep.mubr.f32.mxu0 %v9707_v5 }
 0x10f   :  { %v7017_v47 = vpop.permute.xlu1 %226 }
 0x110   :  { %v6997_v42 = vpop.permute.xlu0 %170  ;;  %v230_v48 = vmul.f32 %v7017_v47, %v6982_v37  ;;  %v229_v49 = vmul.f32 %v7017_v47, %v6986_v38  ;;  %v232_v50 = vmul.f32 %v7017_v47, %v7005_v45  ;;  %v231_v51 = vmul.f32 %v7017_v47, %v7009_v61 }
 0x111   :  { %v174_v43 = vmul.f32 %v6997_v42, %v6982_v37  ;;  %v173_v44 = vmul.f32 %v6997_v42, %v6986_v38  ;;  %v176_v41 = vmul.f32 %v6997_v42, %v7005_v45  ;;  %v175_v46 = vmul.f32 %v6997_v42, %v7009_v61 }
 0x113   :  { %189 = vrot.lane.b32.xlu1 %v174_v43, %s6514_s30  ;;  %187 = vrot.lane.b32.xlu0 %v173_v44, %s6514_s30  ;;  %v7033_v4 = vpop.permute.xlu1 %282  ;;  %v177_v44 = vmul.f32 %v6997_v42, %v7117_v30 }
 0x114   :  { %v286_v52 = vmul.f32 %v7033_v4, %v6982_v37  ;;  %v285_v53 = vmul.f32 %v7033_v4, %v6986_v38  ;;  %v288_v55 = vmul.f32 %v7033_v4, %v7005_v45  ;;  %v287_v56 = vmul.f32 %v7033_v4, %v7009_v61  ;;  %v7054_v60 = vpop.permute.xlu0 %339 }
 0x115   :  { %v374_v62 = vmul.f32 %v350_v57, %v7054_v60  ;;  %v373_v63 = vmul.f32 %v346_v58, %v7054_v60  ;;  %v376_v2 = vmul.f32 %v358_v0, %v7054_v60  ;;  %v375_v7 = vmul.f32 %v354_v1, %v7054_v60 }
 0x116   :  { %v235_v58 = vmul.f32 %v7017_v47, %v6856_v11  ;;  %v449_v1 = vrot.slane %v6873_v20, %v7120_v36 }
 0x117   :  { %193 = vrot.lane.b32.xlu1 %v176_v41, %s6514_s30  ;;  %191 = vrot.lane.b32.xlu0 %v175_v46, %s6514_s30  ;;  %v7072_v33 = vpop.permute.xlu1 %422  ;;  %v7129_v41 = vrot.slane %v6852_v9, %v7120_v36 }
 0x118   :  { %v463_v13 = vmul.f32 %v437_v8, %v7072_v33  ;;  %v462_v14 = vmul.f32 %v433_v10, %v7072_v33  ;;  %v465_v59 = vmul.f32 %v445_v15, %v7072_v33  ;;  %v464_v17 = vmul.f32 %v441_v16, %v7072_v33  ;;  %v7091_v31 = vpop.permute.xlu0 %514 }
 0x119   :  { %v461_v19 = vmul.f32 %v429_v18, %v7072_v33  ;;  %v518_v21 = vmul.f32 %v7091_v31, %v433_v10  ;;  %v519_v22 = vmul.f32 %v7091_v31, %v437_v8  ;;  %v520_v24 = vmul.f32 %v7091_v31, %v441_v16 }
 0x11a   :  { %v521_v25 = vmul.f32 %v7091_v31, %v445_v15  ;;  %v517_v3 = vmul.f32 %v7091_v31, %v429_v18  ;;  %v178_v6 = vmul.f32 %v6997_v42, %v7129_v41  ;;  %v290_v57 = vmul.f32 %v7033_v4, %v7129_v41 }
 0x11b   :  { %245 = vrot.lane.b32.xlu1 %v230_v48, %s6519_s20  ;;  %243 = vrot.lane.b32.xlu0 %v229_v49, %s6519_s20  ;;  %v7105_v26 = vpop.permute.xlu1 %570  ;;  %v523_v20 = vmul.f32 %v7091_v31, %v6882_v23 }
 0x11c   :  { %v574_v27 = vmul.f32 %v7105_v26, %v433_v10  ;;  %v575_v28 = vmul.f32 %v7105_v26, %v437_v8  ;;  %v576_v29 = vmul.f32 %v7105_v26, %v441_v16  ;;  %v577_v35 = vmul.f32 %v7105_v26, %v445_v15  ;;  %v627_v46 = vpop.permute.xlu0 %626 }
 0x11d   :  { %v573_v43 = vmul.f32 %v7105_v26, %v429_v18  ;;  %v630_v48 = vmul.f32 %v627_v46, %v433_v10  ;;  %v631_v49 = vmul.f32 %v627_v46, %v437_v8  ;;  %v633_v9 = vmul.f32 %v627_v46, %v445_v15  ;;  %v1148_v10 = vld [vmem:[%s9702_s6] sm:$0xff] }
 0x11e   :  { %v634_v8 = vmul.f32 %v627_v46, %v449_v1 }
 0x11f   :  { %249 = vrot.lane.b32.xlu1 %v232_v50, %s6519_s20  ;;  %247 = vrot.lane.b32.xlu0 %v231_v51, %s6519_s20  ;;  %v632_v50 = vmul.f32 %v627_v46, %v441_v16  ;;  %v629_v51 = vmul.f32 %v627_v46, %v429_v18 }
 0x123   :  { %301 = vrot.lane.b32.xlu1 %v286_v52, %s6511_s12  ;;  %299 = vrot.lane.b32.xlu0 %v285_v53, %s6511_s12  ;;  %v233_v52 = vmul.f32 %v7017_v47, %v7117_v30  ;;  %v234_v53 = vmul.f32 %v7017_v47, %v7129_v41  ;;  %v291_v47 = vmul.f32 %v7033_v4, %v6856_v11 }
 0x127   :  { %305 = vrot.lane.b32.xlu1 %v288_v55, %s6511_s12  ;;  %303 = vrot.lane.b32.xlu0 %v287_v56, %s6511_s12  ;;  %v179_v55 = vmul.f32 %v6997_v42, %v6856_v11  ;;  %v289_v56 = vmul.f32 %v7033_v4, %v7117_v30  ;;  %v578_v4 = vmul.f32 %v7105_v26, %v449_v1 }
 0x12b   :  { %387 = vrot.lane.b32.xlu1 %v374_v62, %s6512_s13  ;;  %385 = vrot.lane.b32.xlu0 %v373_v63, %s6512_s13  ;;  %v362_v62 = vrot.slane %v7042_v54, %v7077_v12  ;;  %v366_v63 = vrot.slane %v7042_v54, %v7120_v36  ;;  %v466_v54 = vmul.f32 %v449_v1, %v7072_v33 }
 0x12d   :  { %v377_v42 = vmul.f32 %v362_v62, %v7054_v60  ;;  %v378_v0 = vmul.f32 %v366_v63, %v7054_v60  ;;  %v522_v60 = vmul.f32 %v7091_v31, %v449_v1 }
 0x12f   :  { %391 = vrot.lane.b32.xlu1 %v376_v2, %s6512_s13  ;;  %389 = vrot.lane.b32.xlu0 %v375_v7, %s6512_s13  ;;  %v467_v2 = vmul.f32 %v6882_v23, %v7072_v33  ;;  %v579_v7 = vmul.f32 %v7105_v26, %v6882_v23  ;;  %v635_v33 = vmul.f32 %v627_v46, %v6882_v23 }
 0x133   :  { %479 = vrot.lane.b32.xlu1 %v463_v13, %s6520_s23  ;;  %477 = vrot.lane.b32.xlu0 %v462_v14, %s6520_s23  ;;  %v7193_v13 = vpop.permute.xlu1 %120 }
 0x137   :  { %483 = vrot.lane.b32.xlu1 %v465_v59, %s6520_s23  ;;  %481 = vrot.lane.b32.xlu0 %v464_v17, %s6520_s23 }
 0x13b   :  { %475 = vrot.lane.b32.xlu0 %v461_v19, %s6520_s23  ;;  %533 = vrot.lane.b32.xlu1 %v518_v21, %s6521_s24 }
 0x13f   :  { %535 = vrot.lane.b32.xlu0 %v519_v22, %s6521_s24  ;;  %537 = vrot.lane.b32.xlu1 %v520_v24, %s6521_s24 }
 0x143   :  { %539 = vrot.lane.b32.xlu0 %v521_v25, %s6521_s24  ;;  %531 = vrot.lane.b32.xlu1 %v517_v3, %s6521_s24 }
 0x147   :  { %589 = vrot.lane.b32.xlu0 %v574_v27, %s6522_s26  ;;  %591 = vrot.lane.b32.xlu1 %v575_v28, %s6522_s26 }
 0x14b   :  { %593 = vrot.lane.b32.xlu0 %v576_v29, %s6522_s26  ;;  %595 = vrot.lane.b32.xlu1 %v577_v35, %s6522_s26 }
 0x14f   :  { %587 = vrot.lane.b32.xlu0 %v573_v43, %s6522_s26  ;;  %195 = vrot.lane.b32.xlu1 %v177_v44, %s6514_s30 }
 0x153   :  { %197 = vrot.lane.b32.xlu0 %v178_v6, %s6514_s30  ;;  %645 = vrot.lane.b32.xlu1 %v630_v48, %s6523_s27 }
 0x157   :  { %647 = vrot.lane.b32.xlu0 %v631_v49, %s6523_s27  ;;  %649 = vrot.lane.b32.xlu1 %v632_v50, %s6523_s27 }
 0x15b   :  { %651 = vrot.lane.b32.xlu0 %v633_v9, %s6523_s27  ;;  %643 = vrot.lane.b32.xlu1 %v629_v51, %s6523_s27 }
 0x15f   :  { %251 = vrot.lane.b32.xlu0 %v233_v52, %s6519_s20  ;;  %253 = vrot.lane.b32.xlu1 %v234_v53, %s6519_s20  ;;  %v160_v53 = vmul.f32 %v6982_v37, %v7193_v13  ;;  %v161_v37 = vmul.f32 %v7009_v61, %v7193_v13 }
 0x163   :  { %199 = vrot.lane.b32.xlu0 %v179_v55, %s6514_s30  ;;  %307 = vrot.lane.b32.xlu1 %v289_v56, %s6511_s12 }
 0x167   :  { %309 = vrot.lane.b32.xlu0 %v290_v57, %s6511_s12  ;;  %255 = vrot.lane.b32.xlu1 %v235_v58, %s6519_s20 }
 0x16b   :  { %393 = vrot.lane.b32.xlu0 %v377_v42, %s6512_s13  ;;  %395 = vrot.lane.b32.xlu1 %v378_v0, %s6512_s13  ;;  %v159_v42 = vmul.f32 %v6986_v38, %v7193_v13  ;;  %v162_v0 = vmul.f32 %v7005_v45, %v7193_v13 }
 0x16f   :  { %311 = vrot.lane.b32.xlu0 %v291_v47, %s6511_s12  ;;  %485 = vrot.lane.b32.xlu1 %v466_v54, %s6520_s23 }
 0x173   :  { %487 = vrot.lane.b32.xlu0 %v467_v2, %s6520_s23  ;;  %541 = vrot.lane.b32.xlu1 %v522_v60, %s6521_s24 }
 0x177   :  { %543 = vrot.lane.b32.xlu0 %v523_v20, %s6521_s24  ;;  %597 = vrot.lane.b32.xlu1 %v578_v4, %s6522_s26 }
 0x17b   :  { %599 = vrot.lane.b32.xlu0 %v579_v7, %s6522_s26  ;;  %653 = vrot.lane.b32.xlu1 %v634_v8, %s6523_s27 }
 0x17f   :  { %655 = vrot.lane.b32.xlu0 %v635_v33, %s6523_s27  ;;  %1151 = vperm.xlu1 %6356, %v1148_v10  }
 0x183   :  { %1648 = vrot.lane.b32.xlu1 %v9707_v5, %s6514_s30  ;;  %1694 = vrot.lane.b32.xlu0 %v9707_v5, %s6513_s28 }
 0x185   :  { %v190_v14 = vpop.permute.xlu1 %189  ;;  %v188_v15 = vpop.permute.xlu0 %187 }
 0x186   :  { %v202_v52 = vsel %vm201_vm3, %v188_v15, %v190_v14  ;;  %v215_v60 = vadd.f32 %v188_v15, %v159_v42 }
 0x187   :  { %1740 = vrot.lane.b32.xlu1 %v9707_v5, %s6511_s12  ;;  %v216_v56 = vadd.f32 %v202_v52, %v160_v53 }
 0x189   :  { %v7201_v16 = vpop.permute.xlu1 %193  ;;  %v192_v59 = vpop.permute.xlu0 %191 }
 0x18a   :  { %v204_v62 = vsel %vm201_vm3, %v192_v59, %v7201_v16  ;;  %v203_v47 = vsel %vm201_vm3, %v190_v14, %v192_v59 }
 0x18b   :  { %1464 = vrot.lane.b32.xlu1 %v9707_v5, %s6518_s16  ;;  %v218_v20 = vadd.f32 %v204_v62, %v162_v0  ;;  %v217_v33 = vadd.f32 %v203_v47, %v161_v37 }
 0x18d   :  { %v246_v23 = vpop.permute.xlu1 %245  ;;  %v244_v17 = vpop.permute.xlu0 %243 }
 0x18e   :  { %v258_v55 = vsel %vm257_vm9, %v244_v17, %v246_v23  ;;  %v271_v14 = vadd.f32 %v244_v17, %v215_v60 }
 0x18f   :  { %v272_v1 = vadd.f32 %v258_v55, %v216_v56 }
 0x191   :  { %v7205_v18 = vpop.permute.xlu1 %249  ;;  %v248_v31 = vpop.permute.xlu0 %247 }
 0x192   :  { %v260_v54 = vsel %vm257_vm9, %v248_v31, %v7205_v18  ;;  %v259_v7 = vsel %vm257_vm9, %v246_v23, %v248_v31 }
 0x193   :  { %v274_v15 = vadd.f32 %v260_v54, %v218_v20  ;;  %v273_v55 = vadd.f32 %v259_v7, %v217_v33 }
 0x195   :  { %v302_v19 = vpop.permute.xlu1 %301  ;;  %v300_v21 = vpop.permute.xlu0 %299 }
 0x196   :  { %v314_v63 = vsel %vm313_vm0, %v300_v21, %v302_v19  ;;  %v327_v56 = vadd.f32 %v300_v21, %v271_v14 }
 0x197   :  { %v328_v4 = vadd.f32 %v314_v63, %v272_v1 }
 0x199   :  { %v7207_v22 = vpop.permute.xlu1 %305  ;;  %v304_v24 = vpop.permute.xlu0 %303 }
 0x19a   :  { %v316_v61 = vsel %vm313_vm0, %v304_v24, %v7207_v22  ;;  %v315_v53 = vsel %vm313_vm0, %v302_v19, %v304_v24 }
 0x19b   :  { %v330_v62 = vadd.f32 %v316_v61, %v274_v15  ;;  %v329_v37 = vadd.f32 %v315_v53, %v273_v55 }
 0x19d   :  { %v388_v25 = vpop.permute.xlu1 %387  ;;  %v7209_v3 = vpop.permute.xlu0 %385 }
 0x19e   :  { %v398_v2 = vsel %vm397_vm1, %v7209_v3, %v388_v25  ;;  %v410_v47 = vadd.f32 %v7209_v3, %v327_v56 }
 0x19f   :  { %v411_v59 = vadd.f32 %v398_v2, %v328_v4 }
 0x1a1   :  { %v7211_v26 = vpop.permute.xlu1 %391  ;;  %v390_v27 = vpop.permute.xlu0 %389 }
 0x1a2   :  { %v400_v23 = vsel %vm397_vm1, %v390_v27, %v7211_v26  ;;  %v399_v17 = vsel %vm397_vm1, %v388_v25, %v390_v27 }
 0x1a3   :  { %v413_v21 = vadd.f32 %v400_v23, %v330_v62  ;;  %v412_v27 = vadd.f32 %v399_v17, %v329_v37 }
 0x1a5   :  { %v7213_v28 = vpop.permute.xlu1 %479  ;;  %v478_v29 = vpop.permute.xlu0 %477 }
 0x1a6   :  { %v491_v8 = vsel %vm489_vm10, %v478_v29, %v7213_v28 }
 0x1a7   :  { %v504_v63 = vadd.f32 %v491_v8, %v411_v59 }
 0x1a9   :  { %v7215_v35 = vpop.permute.xlu1 %483  ;;  %v482_v43 = vpop.permute.xlu0 %481 }
 0x1aa   :  { %v493_v1 = vsel %vm489_vm10, %v482_v43, %v7215_v35  ;;  %v492_v2 = vsel %vm489_vm10, %v7213_v28, %v482_v43 }
 0x1ad   :  { %v534_v44 = vpop.permute.xlu1 %533  ;;  %v476_v46 = vpop.permute.xlu0 %475 }
 0x1ae   :  { %v490_v19 = vsel %vm489_vm10, %v476_v46, %v478_v29  ;;  %v506_v29 = vadd.f32 %v493_v1, %v413_v21 }
 0x1af   :  { %v503_v46 = vadd.f32 %v490_v19, %v410_v47 }
 0x1b1   :  { %v7217_v6 = vpop.permute.xlu1 %537  ;;  %v7219_v48 = vpop.permute.xlu0 %535 }
 0x1b2   :  { %v547_v31 = vsel %vm545_vm11, %v534_v44, %v7219_v48  ;;  %v548_v3 = vsel %vm545_vm11, %v7219_v48, %v7217_v6 }
 0x1b3   :  { %v560_v54 = vadd.f32 %v547_v31, %v504_v63 }
 0x1b5   :  { %v532_v49 = vpop.permute.xlu1 %531  ;;  %v7221_v50 = vpop.permute.xlu0 %539 }
 0x1b6   :  { %v546_v60 = vsel %vm545_vm11, %v532_v49, %v534_v44  ;;  %v549_v25 = vsel %vm545_vm11, %v7217_v6, %v7221_v50  ;;  %v505_v49 = vadd.f32 %v492_v2, %v412_v27 }
 0x1b7   :  { %v559_v61 = vadd.f32 %v546_v60, %v503_v46  ;;  %v562_v8 = vadd.f32 %v549_v25, %v506_v29  ;;  %v163_v29 = vmul.f32 %v7117_v30, %v7193_v13  ;;  %v165_v46 = vmul.f32 %v6856_v11, %v7193_v13 }
 0x1b8   :  { %v561_v15 = vadd.f32 %v548_v3, %v505_v49 }
 0x1b9   :  { %v7223_v9 = vpop.permute.xlu1 %591  ;;  %v7225_v51 = vpop.permute.xlu0 %589 }
 0x1ba   :  { %v603_v24 = vsel %vm601_vm12, %v7225_v51, %v7223_v9 }
 0x1bb   :  { %v616_v20 = vadd.f32 %v603_v24, %v560_v54 }
 0x1bd   :  { %v7231_v57 = vpop.permute.xlu1 %595  ;;  %v7233_v58 = vpop.permute.xlu0 %593 }
 0x1be   :  { %v605_v28 = vsel %vm601_vm12, %v7233_v58, %v7231_v57  ;;  %v604_v14 = vsel %vm601_vm12, %v7223_v9, %v7233_v58 }
 0x1bf   :  { %v618_v59 = vadd.f32 %v605_v28, %v562_v8  ;;  %v617_v56 = vadd.f32 %v604_v14, %v561_v15 }
 0x1c1   :  { %v7249_v38 = vpop.permute.xlu1 %195  ;;  %v588_v45 = vpop.permute.xlu0 %587 }
 0x1c2   :  { %v7256_v10 = vpop.f32.mrb[0].mxu0  ;;  %v602_v43 = vsel %vm601_vm12, %v588_v45, %v7225_v51  ;;  %v205_v25 = vsel %vm201_vm3, %v7201_v16, %v7249_v38 }
 0x1c3   :  { %v7258_v52 = vpop.f32.mrb[1].mxu0  ;;  %v615_v6 = vadd.f32 %v602_v43, %v559_v61  ;;  %v219_v3 = vadd.f32 %v205_v25, %v163_v29 }
 0x1c5   :  { %v646_v42 = vpop.permute.xlu1 %645  ;;  %v7265_v0 = vpop.permute.xlu0 %197 }
 0x1c9   :  { %v650_v4 = vpop.permute.xlu1 %649  ;;  %v648_v7 = vpop.permute.xlu0 %647 }
 0x1ca   :  { %v659_v44 = vsel %vm657_vm13, %v646_v42, %v648_v7  ;;  %v660_v31 = vsel %vm657_vm13, %v648_v7, %v650_v4 }
 0x1cb   :  { %v672_v33 = vadd.f32 %v659_v44, %v616_v20  ;;  %v673_v58 = vadd.f32 %v660_v31, %v617_v56  ;;  %v206_v44 = vsel %vm201_vm3, %v7249_v38, %v7265_v0 }
 0x1cd   :  { %v679_v48 = vmul.f32 0.00012207031, %v672_v33  ;;  %v644_v53 = vpop.permute.xlu1 %643  ;;  %v7293_v23 = vpop.permute.xlu0 %651 }
 0x1ce   :  { %v658_v51 = vsel %vm657_vm13, %v644_v53, %v646_v42  ;;  %v661_v45 = vsel %vm657_vm13, %v650_v4, %v7293_v23  ;;  %v7299_v55 = vpop.f32.mrb[0].mxu1  ;;  %v680_v42 = vmul.f32 0.00012207031, %v673_v58 }
 0x1cf   :  { %v671_v62 = vadd.f32 %v658_v51, %v615_v6  ;;  %v674_v63 = vadd.f32 %v661_v45, %v618_v59  ;;  %694 = vrot.lane.b32.xlu0 %v679_v48, %s6518_s16  ;;  %v7302_v9 = vpop.f32.mrb[1].mxu1 }
 0x1d1   :  { %v678_v17 = vmul.f32 0.00012207031, %v671_v62  ;;  %v681_v1 = vmul.f32 0.00012207031, %v674_v63  ;;  %v254_v19 = vpop.permute.xlu1 %253  ;;  %v252_v24 = vpop.permute.xlu0 %251 }
 0x1d2   :  { %v261_v20 = vsel %vm257_vm9, %v7205_v18, %v252_v24  ;;  %v164_v18 = vmul.f32 %v7129_v41, %v7193_v13  ;;  %v262_v33 = vsel %vm257_vm9, %v252_v24, %v254_v19 }
 0x1d3   :  { %692 = vrot.lane.b32.xlu1 %v678_v17, %s6518_s16  ;;  %698 = vrot.lane.b32.xlu0 %v681_v1, %s6518_s16  ;;  %v275_v61 = vadd.f32 %v261_v20, %v219_v3 }
 0x1d4   :  { %v220_v15 = vadd.f32 %v206_v44, %v164_v18 }
 0x1d5   :  { %v308_v37 = vpop.permute.xlu1 %307  ;;  %v200_v47 = vpop.permute.xlu0 %199 }
 0x1d6   :  { %v207_v27 = vsel %vm201_vm3, %v7265_v0, %v200_v47  ;;  %v317_v30 = vsel %vm313_vm0, %v7207_v22, %v308_v37  ;;  %v276_v53 = vadd.f32 %v262_v33, %v220_v15 }
 0x1d7   :  { %696 = vrot.lane.b32.xlu1 %v680_v42, %s6518_s16  ;;  %v221_v28 = vadd.f32 %v207_v27, %v165_v46  ;;  %v331_v59 = vadd.f32 %v317_v30, %v275_v61  ;;  %v7374_v61 = vld [vmem:[%s9697_s1 + $0x1] sm:$0x3f] }
 0x1d9   :  { %v256_v21 = vpop.permute.xlu1 %255  ;;  %v310_v54 = vpop.permute.xlu0 %309 }
 0x1da   :  { %v263_v4 = vsel %vm257_vm9, %v254_v19, %v256_v21  ;;  %v318_v22 = vsel %vm313_vm0, %v308_v37, %v310_v54 }
 0x1db   :  { %v277_v8 = vadd.f32 %v263_v4, %v221_v28  ;;  %v332_v51 = vadd.f32 %v318_v22, %v276_v53 }
 0x1dd   :  { %v396_v2 = vpop.permute.xlu1 %395  ;;  %v394_v60 = vpop.permute.xlu0 %393 }
 0x1de   :  { %v401_v14 = vsel %vm397_vm1, %v7211_v26, %v394_v60  ;;  %v402_v41 = vsel %vm397_vm1, %v394_v60, %v396_v2 }
 0x1df   :  { %v414_v31 = vadd.f32 %v401_v14, %v331_v59  ;;  %v415_v17 = vadd.f32 %v402_v41, %v332_v51  ;;  %v7380_v14 = vrot.slane %v7374_v61, %v6978_v34 }
 0x1e0   :  { %v7319_v7 = vpop.f32.mrb[2].mxu0 }
 0x1e1   :  { %v486_v43 = vpop.permute.xlu1 %485  ;;  %v312_v16 = vpop.permute.xlu0 %311 }
 0x1e2   :  { %v319_v11 = vsel %vm313_vm0, %v310_v54, %v312_v16  ;;  %v7327_v49 = vpop.f32.mrb[3].mxu0  ;;  %v494_v48 = vsel %vm489_vm10, %v7215_v35, %v486_v43 }
 0x1e3   :  { %v333_v38 = vadd.f32 %v319_v11, %v277_v8  ;;  %v507_v45 = vadd.f32 %v494_v48, %v414_v31 }
 0x1e5   :  { %v542_v0 = vpop.permute.xlu1 %541  ;;  %v488_v6 = vpop.permute.xlu0 %487  ;;  %v416_v26 = vadd.f32 %v396_v2, %v333_v38 }
 0x1e6   :  { %v550_v13 = vsel %vm545_vm11, %v7221_v50, %v542_v0  ;;  %v495_v63 = vsel %vm489_vm10, %v486_v43, %v488_v6 }
 0x1e7   :  { %v563_v1 = vadd.f32 %v550_v13, %v507_v45  ;;  %v508_v19 = vadd.f32 %v495_v63, %v415_v17  ;;  %v509_v24 = vadd.f32 %v488_v6, %v416_v26  ;;  %v7390_v6 = vrot.slane %v7374_v61, %v6975_v32 }
 0x1e8   :  { %v7444_v63 = vrot.slane %v7374_v61, %v6989_v39 }
 0x1e9   :  { %v598_v56 = vpop.permute.xlu1 %597  ;;  %v544_v62 = vpop.permute.xlu0 %543 }
 0x1ea   :  { %v606_v58 = vsel %vm601_vm12, %v7231_v57, %v598_v56  ;;  %v551_v35 = vsel %vm545_vm11, %v542_v0, %v544_v62  ;;  %v565_v60 = vadd.f32 %v544_v62, %v509_v24 }
 0x1eb   :  { %v619_v42 = vadd.f32 %v606_v58, %v563_v1  ;;  %v564_v54 = vadd.f32 %v551_v35, %v508_v19  ;;  %v7458_v35 = vrot.slane %v7374_v61, %v7077_v12 }
 0x1ed   :  { %v654_v37 = vpop.permute.xlu1 %653  ;;  %v600_v47 = vpop.permute.xlu0 %599 }
 0x1ee   :  { %v662_v50 = vsel %vm657_vm13, %v7293_v23, %v654_v37  ;;  %v607_v21 = vsel %vm601_vm12, %v598_v56, %v600_v47  ;;  %v621_v46 = vadd.f32 %v600_v47, %v565_v60 }
 0x1ef   :  { %v675_v2 = vadd.f32 %v662_v50, %v619_v42  ;;  %v620_v27 = vadd.f32 %v607_v21, %v564_v54 }
 0x1f1   :  { %v682_v25 = vmul.f32 0.00012207031, %v675_v2  ;;  %v656_v57 = vpop.permute.xlu0 %655  ;;  %v7481_v2 = vrot.slane %v7374_v61, %v7120_v36 }
 0x1f2   :  { %v663_v29 = vsel %vm657_vm13, %v654_v37, %v656_v57  ;;  %v677_v4 = vadd.f32 %v656_v57, %v621_v46  ;;  %vm2095_vm13 = vcmask 1042432  }
 0x1f3   :  { %v676_v20 = vadd.f32 %v663_v29, %v620_v27  ;;  %700 = vrot.lane.b32.xlu0 %v682_v25, %s6518_s16 }
 0x1f4   :  { %v684_v23 = vmul.f32 0.00012207031, %v677_v4 }
 0x1f5   :  { %v683_v3 = vmul.f32 0.00012207031, %v676_v20  ;;  %v7365_v44 = vpop.permute.xlu0 %1694 }
 0x1f7   :  { %1786 = vrot.lane.b32.xlu0 %v9707_v5, %s6512_s13  ;;  %702 = vrot.lane.b32.xlu1 %v683_v3, %s6518_s16 }
 0x1fb   :  { %704 = vrot.lane.b32.xlu0 %v684_v23, %s6518_s16  ;;  %1510 = vrot.lane.b32.xlu1 %v9707_v5, %s6517_s18 }
 0x1fe   :  { %v7359_v28 = vpop.permute.xlu1 %1151 }
 0x1ff   :  { %1556 = vrot.lane.b32.xlu0 %v9707_v5, %s6516_s15  ;;  %v1225_v11 = vadd.f32 %v7256_v10, %v7359_v28  ;;  %v1227_v33 = vadd.f32 %v7258_v52, %v7359_v28  ;;  %v1296_v10 = vadd.f32 %v7299_v55, %v7359_v28  ;;  %v7394_v52 = vrot.slane %v7374_v61, %v6992_v40 }
 0x200   :  { %v1298_v56 = vadd.f32 %v7302_v9, %v7359_v28  ;;  %v1367_v17 = vadd.f32 %v7319_v7, %v7359_v28  ;;  %v1369_v37 = vadd.f32 %v7327_v49, %v7359_v28 }
 0x201   :  { %vm1371_vm14 = vcmp.gt.f32.partialorder %v1225_v11, 0.0  ;;  %vm1372_vm15 = vcmp.gt.f32.partialorder %v1227_v33, 0.0  ;;  %vm1373_vm9 = vcmp.gt.f32.partialorder %v1296_v10, 0.0 }
 0x202   :  { %v7361_v43 = vpop.permute.xlu1 %1648  ;;  %vm1374_vm10 = vcmp.gt.f32.partialorder %v1298_v56, 0.0  ;;  %vm1375_vm11 = vcmp.gt.f32.partialorder %v1367_v17, 0.0  ;;  %vm1376_vm12 = vcmp.gt.f32.partialorder %v1369_v37, 0.0 }
 0x203   :  { %1602 = vrot.lane.b32.xlu0 %v9707_v5, %s6515_s25 }
 0x206   :  { %v7363_v16 = vpop.permute.xlu1 %1740 }
 0x20a   :  { %v7367_v30 = vpop.permute.xlu1 %1464 }
 0x241   :  { %v695_v18 = vpop.permute.xlu0 %694 }
 0x245   :  { %v693_v8 = vpop.permute.xlu1 %692  ;;  %v699_v0 = vpop.permute.xlu0 %698 }
 0x246   :  { %v7383_v15 = vsel %vm706_vm7, %v693_v8, %v695_v18 }
 0x247   :  { %v1383_v59 = vsel %vm1371_vm14, %v7383_v15, 0.0 }
 0x248   :  { %v1389_v38 = vadd.f32 0.00024414063, %v1383_v59 }
 0x249   :  { %v697_v22 = vpop.permute.xlu1 %696 }
 0x24a   :  { %v7397_v48 = vmul.f32 %v7380_v14, %v1389_v38  ;;  %v7400_v55 = vsel %vm706_vm7, %v695_v18, %v697_v22  ;;  %v7403_v53 = vsel %vm706_vm7, %v697_v22, %v699_v0 }
 0x24b   :  { %v1384_v31 = vsel %vm1372_vm15, %v7400_v55, 0.0  ;;  %v1385_v41 = vsel %vm1373_vm9, %v7403_v53, 0.0 }
 0x24c   :  { %1628 = vst [vmem:[#allocation5 + $0xc0] sm:$0xff] %v7397_v48  ;;  %v1390_v13 = vadd.f32 0.00024414063, %v1384_v31  ;;  %v1391_v51 = vadd.f32 0.00024414063, %v1385_v41 }
 0x24e   :  { %v7409_v45 = vmul.f32 %v7390_v6, %v1390_v13  ;;  %v7412_v26 = vmul.f32 %v7394_v52, %v1391_v51 }
 0x250   :  { %1629 = vst [vmem:[#allocation5 + $0xc8] sm:$0xff] %v7409_v45  ;;  %1630 = vst [vmem:[#allocation5 + $0xd0] sm:$0xff] %v7412_v26  ;;  %1454 = vrot.lane.b32.xlu1 %v7409_v45, %s6518_s16  ;;  %1456 = vrot.lane.b32.xlu0 %v7412_v26, %s6518_s16 }
 0x254   :  { %1500 = vrot.lane.b32.xlu1 %v7409_v45, %s6517_s18  ;;  %1502 = vrot.lane.b32.xlu0 %v7412_v26, %s6517_s18 }
 0x258   :  { %1452 = vrot.lane.b32.xlu1 %v7397_v48, %s6518_s16  ;;  %1498 = vrot.lane.b32.xlu0 %v7397_v48, %s6517_s18 }
 0x25c   :  { %1546 = vrot.lane.b32.xlu1 %v7409_v45, %s6516_s15  ;;  %1548 = vrot.lane.b32.xlu0 %v7412_v26, %s6516_s15 }
 0x260   :  { %1592 = vrot.lane.b32.xlu1 %v7409_v45, %s6515_s25  ;;  %1594 = vrot.lane.b32.xlu0 %v7412_v26, %s6515_s25 }
 0x264   :  { %1544 = vrot.lane.b32.xlu1 %v7397_v48, %s6516_s15  ;;  %1590 = vrot.lane.b32.xlu0 %v7397_v48, %s6515_s25 }
 0x265   :  { %v701_v62 = vpop.permute.xlu0 %700 }
 0x266   :  { %v7447_v58 = vsel %vm706_vm7, %v699_v0, %v701_v62 }
 0x267   :  { %v1386_v9 = vsel %vm1374_vm10, %v7447_v58, 0.0 }
 0x268   :  { %v1392_v1 = vadd.f32 0.00024414063, %v1386_v9  ;;  %1650 = vrot.lane.b32.xlu1 %v7397_v48, %s6514_s30  ;;  %1652 = vrot.lane.b32.xlu0 %v7409_v45, %s6514_s30 }
 0x269   :  { %v703_v19 = vpop.permute.xlu1 %702  ;;  %v7460_v24 = vpop.permute.xlu0 %1786 }
 0x26a   :  { %v7463_v42 = vmul.f32 %v7444_v63, %v1392_v1  ;;  %v7466_v7 = vsel %vm706_vm7, %v701_v62, %v703_v19 }
 0x26b   :  { %v1387_v47 = vsel %vm1375_vm11, %v7466_v7, 0.0 }
 0x26c   :  { %1631 = vst [vmem:[#allocation5 + $0xd8] sm:$0xff] %v7463_v42  ;;  %v1393_v50 = vadd.f32 0.00024414063, %v1387_v47  ;;  %1698 = vrot.lane.b32.xlu1 %v7409_v45, %s6513_s28  ;;  %1696 = vrot.lane.b32.xlu0 %v7397_v48, %s6513_s28 }
 0x26d   :  { %v705_v21 = vpop.permute.xlu0 %704  ;;  %v7558_v29 = vpop.permute.xlu1 %1510 }
 0x26e   :  { %v7477_v54 = vmul.f32 %v7458_v35, %v1393_v50  ;;  %v7484_v49 = vsel %vm706_vm7, %v703_v19, %v705_v21 }
 0x26f   :  { %v1388_v60 = vsel %vm1376_vm12, %v7484_v49, 0.0 }
 0x270   :  { %1632 = vst [vmem:[#allocation5 + $0xe0] sm:$0xff] %v7477_v54  ;;  %v1394_v25 = vadd.f32 0.00024414063, %v1388_v60  ;;  %1744 = vrot.lane.b32.xlu1 %v7409_v45, %s6511_s12  ;;  %1742 = vrot.lane.b32.xlu0 %v7397_v48, %s6511_s12 }
 0x271   :  { %v7556_v57 = vpop.permute.xlu0 %1556 }
 0x272   :  { %v7493_v27 = vmul.f32 %v7481_v2, %v1394_v25 }
 0x274   :  { %1633 = vst [vmem:[#allocation5 + $0xe8] sm:$0xff] %v7493_v27  ;;  %1790 = vrot.lane.b32.xlu1 %v7409_v45, %s6512_s13  ;;  %1458 = vrot.lane.b32.xlu0 %v7463_v42, %s6518_s16 }
 0x275   :  { %v7560_v46 = vpop.permute.xlu0 %1602 }
 0x278   :  { %1654 = vrot.lane.b32.xlu1 %v7412_v26, %s6514_s30  ;;  %1504 = vrot.lane.b32.xlu0 %v7463_v42, %s6517_s18 }
 0x27c   :  { %1700 = vrot.lane.b32.xlu1 %v7412_v26, %s6513_s28  ;;  %1550 = vrot.lane.b32.xlu0 %v7463_v42, %s6516_s15 }
 0x280   :  { %1746 = vrot.lane.b32.xlu1 %v7412_v26, %s6511_s12  ;;  %1596 = vrot.lane.b32.xlu0 %v7463_v42, %s6515_s25 }
 0x284   :  { %1460 = vrot.lane.b32.xlu1 %v7477_v54, %s6518_s16  ;;  %1788 = vrot.lane.b32.xlu0 %v7397_v48, %s6512_s13 }
 0x288   :  { %1506 = vrot.lane.b32.xlu1 %v7477_v54, %s6517_s18  ;;  %1656 = vrot.lane.b32.xlu0 %v7463_v42, %s6514_s30 }
 0x28c   :  { %1552 = vrot.lane.b32.xlu1 %v7477_v54, %s6516_s15  ;;  %1702 = vrot.lane.b32.xlu0 %v7463_v42, %s6513_s28 }
 0x290   :  { %1598 = vrot.lane.b32.xlu1 %v7477_v54, %s6515_s25  ;;  %1748 = vrot.lane.b32.xlu0 %v7463_v42, %s6511_s12 }
 0x294   :  { %1658 = vrot.lane.b32.xlu1 %v7477_v54, %s6514_s30  ;;  %1462 = vrot.lane.b32.xlu0 %v7493_v27, %s6518_s16 }
 0x298   :  { %1554 = vrot.lane.b32.xlu1 %v7493_v27, %s6516_s15  ;;  %1508 = vrot.lane.b32.xlu0 %v7493_v27, %s6517_s18 }
 0x29c   :  { %1600 = vrot.lane.b32.xlu1 %v7493_v27, %s6515_s25  ;;  %1660 = vrot.lane.b32.xlu0 %v7493_v27, %s6514_s30 }
 0x2a0   :  { %1704 = vrot.lane.b32.xlu1 %v7477_v54, %s6513_s28  ;;  %1706 = vrot.lane.b32.xlu0 %v7493_v27, %s6513_s28 }
 0x2a4   :  { %1750 = vrot.lane.b32.xlu1 %v7477_v54, %s6511_s12  ;;  %1752 = vrot.lane.b32.xlu0 %v7493_v27, %s6511_s12 }
 0x2a8   :  { %1792 = vrot.lane.b32.xlu1 %v7412_v26, %s6512_s13  ;;  %1794 = vrot.lane.b32.xlu0 %v7463_v42, %s6512_s13 }
 0x2ac   :  { %1796 = vrot.lane.b32.xlu1 %v7477_v54, %s6512_s13  ;;  %1798 = vrot.lane.b32.xlu0 %v7493_v27, %s6512_s13 }
 0x2c2   :  { %v1455_v20 = vpop.permute.xlu1 %1454  ;;  %v7562_v4 = vpop.permute.xlu0 %1456 }
 0x2c3   :  { %v1467_v3 = vsel %vm706_vm7, %v1455_v20, %v7562_v4 }
 0x2c4   :  { %1479 = vst [vmem:[#allocation5 + $0x8] sm:$0xff] %v1467_v3 }
 0x2c6   :  { %v1501_v23 = vpop.permute.xlu1 %1500  ;;  %v7566_v28 = vpop.permute.xlu0 %1502 }
 0x2c7   :  { %v1513_v11 = vsel %vm1031_vm6, %v1501_v23, %v7566_v28 }
 0x2c8   :  { %1525 = vst [vmem:[#allocation5 + $0x38] sm:$0xff] %v1513_v11  ;;  %v6035_v18 = vpack.c.bf16 %v1513_v11, %v1467_v3 }
 0x2ca   :  { %v1453_v61 = vpop.permute.xlu1 %1452  ;;  %v1499_v8 = vpop.permute.xlu0 %1498  ;;  %6036 = vmatprep.subr.bf16.mxu1 %v6035_v18 }
 0x2cb   :  { %v1466_v33 = vsel %vm706_vm7, %v1453_v61, %v1455_v20  ;;  %v1512_v10 = vsel %vm1031_vm6, %v1499_v8, %v1501_v23 }
 0x2cc   :  { %1478 = vst [vmem:[#allocation5] sm:$0xff] %v1466_v33  ;;  %1524 = vst [vmem:[#allocation5 + $0x30] sm:$0xff] %v1512_v10  ;;  %v6037_v59 = vpack.c.bf16 %v1512_v10, %v1466_v33 }
 0x2ce   :  { %v1547_v38 = vpop.permute.xlu1 %1546  ;;  %v1549_v0 = vpop.permute.xlu0 %1548  ;;  %6038 = vmatpush1.bf16.msra.mxu1 %v6037_v59 }
 0x2cf   :  { %v1559_v22 = vsel %vm987_vm5, %v1547_v38, %v1549_v0 }
 0x2d0   :  { %1571 = vst [vmem:[#allocation5 + $0x68] sm:$0xff] %v1559_v22 }
 0x2d2   :  { %v1593_v31 = vpop.permute.xlu1 %1592  ;;  %v1595_v41 = vpop.permute.xlu0 %1594 }
 0x2d3   :  { %v1605_v13 = vsel %vm943_vm4, %v1593_v31, %v1595_v41 }
 0x2d4   :  { %1617 = vst [vmem:[#allocation5 + $0x98] sm:$0xff] %v1605_v13  ;;  %v6039_v51 = vpack.c.bf16 %v1605_v13, %v1559_v22 }
 0x2d6   :  { %v1545_v56 = vpop.permute.xlu1 %1544  ;;  %v1591_v62 = vpop.permute.xlu0 %1590  ;;  %6040 = vmatprep.subr.bf16.mxu1 %v6039_v51 }
 0x2d7   :  { %v1558_v17 = vsel %vm987_vm5, %v1545_v56, %v1547_v38  ;;  %v1604_v9 = vsel %vm943_vm4, %v1591_v62, %v1593_v31 }
 0x2d8   :  { %1570 = vst [vmem:[#allocation5 + $0x60] sm:$0xff] %v1558_v17  ;;  %1616 = vst [vmem:[#allocation5 + $0x90] sm:$0xff] %v1604_v9  ;;  %v6041_v1 = vpack.c.bf16 %v1604_v9, %v1558_v17 }
 0x2da   :  { %v1651_v19 = vpop.permute.xlu1 %1650  ;;  %v1653_v37 = vpop.permute.xlu0 %1652  ;;  %6042 = vmatpush1.bf16.msra.mxu1 %v6041_v1 }
 0x2db   :  { %v1662_v47 = vsel %vm201_vm3, %v7361_v43, %v1651_v19  ;;  %v1663_v50 = vsel %vm201_vm3, %v1651_v19, %v1653_v37 }
 0x2dc   :  { %1674 = vst [vmem:[#allocation5 + $0xf0] sm:$0xff] %v1662_v47  ;;  %1675 = vst [vmem:[#allocation5 + $0xf8] sm:$0xff] %v1663_v50  ;;  %v6043_v21 = vpack.c.bf16 %v1663_v50, %v7409_v45  ;;  %v6045_v60 = vpack.c.bf16 %v1662_v47, %v7397_v48 }
 0x2de   :  { %v1699_v25 = vpop.permute.xlu1 %1698  ;;  %v1697_v20 = vpop.permute.xlu0 %1696  ;;  %6044 = vmatprep.subr.bf16.mxu1 %v6043_v21 }
 0x2df   :  { %v1708_v3 = vsel %vm838_vm2, %v7365_v44, %v1697_v20  ;;  %v1709_v23 = vsel %vm838_vm2, %v1697_v20, %v1699_v25  ;;  %6046 = vmatpush1.bf16.msra.mxu1 %v6045_v60 }
 0x2e0   :  { %1720 = vst [vmem:[#allocation5 + $0x120] sm:$0xff] %v1708_v3  ;;  %1721 = vst [vmem:[#allocation5 + $0x128] sm:$0xff] %v1709_v23 }
 0x2e2   :  { %v1745_v43 = vpop.permute.xlu1 %1744  ;;  %v1743_v11 = vpop.permute.xlu0 %1742 }
 0x2e3   :  { %v1754_v18 = vsel %vm313_vm0, %v7363_v16, %v1743_v11  ;;  %v1755_v45 = vsel %vm313_vm0, %v1743_v11, %v1745_v43 }
 0x2e4   :  { %1766 = vst [vmem:[#allocation5 + $0x150] sm:$0xff] %v1754_v18  ;;  %1767 = vst [vmem:[#allocation5 + $0x158] sm:$0xff] %v1755_v45  ;;  %v6047_v48 = vpack.c.bf16 %v1755_v45, %v1709_v23  ;;  %v6049_v61 = vpack.c.bf16 %v1754_v18, %v1708_v3 }
 0x2e6   :  { %v7587_v8 = vpop.permute.xlu1 %1790  ;;  %v1459_v33 = vpop.permute.xlu0 %1458  ;;  %6048 = vmatprep.subr.bf16.mxu1 %v6047_v48 }
 0x2e7   :  { %v1468_v44 = vsel %vm706_vm7, %v7562_v4, %v1459_v33  ;;  %6050 = vmatpush1.bf16.msra.mxu1 %v6049_v61 }
 0x2e8   :  { %1480 = vst [vmem:[#allocation5 + $0x10] sm:$0xff] %v1468_v44 }
 0x2ea   :  { %v1655_v10 = vpop.permute.xlu1 %1654  ;;  %v1505_v59 = vpop.permute.xlu0 %1504 }
 0x2eb   :  { %v7592_v38 = vsel %vm201_vm3, %v1653_v37, %v1655_v10  ;;  %v1514_v16 = vsel %vm1031_vm6, %v7566_v28, %v1505_v59  ;;  %v7615_v37 = vld [vmem:[%s9699_s3] sm:$0x7] }
 0x2ec   :  { %1676 = vst [vmem:[#allocation5 + $0x100] sm:$0xff] %v7592_v38  ;;  %1526 = vst [vmem:[#allocation5 + $0x40] sm:$0xff] %v1514_v16  ;;  %v6053_v60 = vpack.c.bf16 %v1514_v16, %v1468_v44 }
 0x2ee   :  { %v1701_v22 = vpop.permute.xlu1 %1700  ;;  %v1551_v31 = vpop.permute.xlu0 %1550 }
 0x2ef   :  { %v7598_v13 = vsel %vm838_vm2, %v1699_v25, %v1701_v22  ;;  %v1560_v4 = vsel %vm987_vm5, %v1549_v0, %v1551_v31 }
 0x2f0   :  { %1722 = vst [vmem:[#allocation5 + $0x130] sm:$0xff] %v7598_v13  ;;  %1572 = vst [vmem:[#allocation5 + $0x70] sm:$0xff] %v1560_v4 }
 0x2f2   :  { %v1747_v51 = vpop.permute.xlu1 %1746  ;;  %v1597_v56 = vpop.permute.xlu0 %1596 }
 0x2f3   :  { %v7603_v62 = vsel %vm313_vm0, %v1745_v43, %v1747_v51  ;;  %v1606_v28 = vsel %vm943_vm4, %v1595_v41, %v1597_v56 }
 0x2f4   :  { %1768 = vst [vmem:[#allocation5 + $0x160] sm:$0xff] %v7603_v62  ;;  %1618 = vst [vmem:[#allocation5 + $0xa0] sm:$0xff] %v1606_v28  ;;  %v6057_v61 = vpack.c.bf16 %v1606_v28, %v1560_v4 }
 0x2f6   :  { %v1461_v17 = vpop.permute.xlu1 %1460  ;;  %v1789_v9 = vpop.permute.xlu0 %1788 }
 0x2f7   :  { %v1469_v1 = vsel %vm706_vm7, %v1459_v33, %v1461_v17  ;;  %v1800_v0 = vsel %vm397_vm1, %v7460_v24, %v1789_v9  ;;  %v1801_v19 = vsel %vm397_vm1, %v1789_v9, %v7587_v8  ;;  %v6065_v9 = vpack.c.bf16 %v7603_v62, %v7598_v13 }
 0x2f8   :  { %1481 = vst [vmem:[#allocation5 + $0x18] sm:$0xff] %v1469_v1  ;;  %1812 = vst [vmem:[#allocation5 + $0x180] sm:$0xff] %v1800_v0  ;;  %1892 = vmatprep.subr.mxu1 %v1801_v19 }
 0x2f9   :  { %1813 = vst [vmem:[#allocation5 + $0x188] sm:$0xff] %v1801_v19  ;;  %1893 = vmatpush1.msra.mxu1 %v1800_v0 }
 0x2fa   :  { %v1507_v41 = vpop.permute.xlu1 %1506  ;;  %v1657_v47 = vpop.permute.xlu0 %1656  ;;  %5957 = vmatmul.mubr.msk.f32.vlgmr.msra.gmra.mrb[2].mxu1 %vm1154_vm8, %v7615_v37 }
 0x2fb   :  { %v1515_v24 = vsel %vm1031_vm6, %v1505_v59, %v1507_v41  ;;  %v1665_v50 = vsel %vm201_vm3, %v1655_v10, %v1657_v47  ;;  %2082 = vmatprep.mubr.f32.mxu1 %v9707_v5 }
 0x2fc   :  { %1527 = vst [vmem:[#allocation5 + $0x48] sm:$0xff] %v1515_v24  ;;  %1677 = vst [vmem:[#allocation5 + $0x108] sm:$0xff] %v1665_v50  ;;  %v6051_v21 = vpack.c.bf16 %v1515_v24, %v1469_v1  ;;  %v6059_v10 = vpack.c.bf16 %v1665_v50, %v7463_v42 }
 0x2fe   :  { %v1553_v25 = vpop.permute.xlu1 %1552  ;;  %v1703_v20 = vpop.permute.xlu0 %1702  ;;  %6052 = vmatprep.subr.bf16.mxu0 %v6051_v21 }
 0x2ff   :  { %v1561_v3 = vsel %vm987_vm5, %v1551_v31, %v1553_v25  ;;  %v1711_v23 = vsel %vm838_vm2, %v1701_v22, %v1703_v20  ;;  %6054 = vmatpush1.bf16.msra.mxu0 %v6053_v60  ;;  %v6061_v31 = vpack.c.bf16 %v7592_v38, %v7412_v26 }
 0x300   :  { %1573 = vst [vmem:[#allocation5 + $0x78] sm:$0xff] %v1561_v3  ;;  %1723 = vst [vmem:[#allocation5 + $0x138] sm:$0xff] %v1711_v23 }
 0x302   :  { %v1599_v43 = vpop.permute.xlu1 %1598  ;;  %v7624_v11 = vpop.permute.xlu0 %1748 }
 0x303   :  { %v1607_v18 = vsel %vm943_vm4, %v1597_v56, %v1599_v43  ;;  %v1757_v45 = vsel %vm313_vm0, %v1747_v51, %v7624_v11 }
 0x304   :  { %1619 = vst [vmem:[#allocation5 + $0xa8] sm:$0xff] %v1607_v18  ;;  %1769 = vst [vmem:[#allocation5 + $0x168] sm:$0xff] %v1757_v45  ;;  %v6055_v48 = vpack.c.bf16 %v1607_v18, %v1561_v3  ;;  %v6063_v56 = vpack.c.bf16 %v1757_v45, %v1711_v23 }
 0x306   :  { %v1659_v33 = vpop.permute.xlu1 %1658  ;;  %v1463_v44 = vpop.permute.xlu0 %1462  ;;  %6056 = vmatprep.subr.bf16.mxu0 %v6055_v48 }
 0x307   :  { %v1666_v59 = vsel %vm201_vm3, %v1657_v47, %v1659_v33  ;;  %v1470_v16 = vsel %vm706_vm7, %v1461_v17, %v1463_v44  ;;  %v1471_v22 = vsel %vm706_vm7, %v1463_v44, %v7367_v30  ;;  %6058 = vmatpush1.bf16.msra.mxu0 %v6057_v61 }
 0x308   :  { %1678 = vst [vmem:[#allocation5 + $0x110] sm:$0xff] %v1666_v59  ;;  %1482 = vst [vmem:[#allocation5 + $0x20] sm:$0xff] %v1470_v16  ;;  %6060 = vmatprep.subr.bf16.mxu0 %v6059_v10 }
 0x309   :  { %1483 = vst [vmem:[#allocation5 + $0x28] sm:$0xff] %v1471_v22 }
 0x30a   :  { %v1555_v4 = vpop.permute.xlu1 %1554  ;;  %v1509_v51 = vpop.permute.xlu0 %1508 }
 0x30b   :  { %v1562_v42 = vsel %vm987_vm5, %v1553_v25, %v1555_v4  ;;  %v1563_v28 = vsel %vm987_vm5, %v1555_v4, %v7556_v57  ;;  %v1516_v17 = vsel %vm1031_vm6, %v1507_v41, %v1509_v51  ;;  %v1517_v30 = vsel %vm1031_vm6, %v1509_v51, %v7558_v29  ;;  %6062 = vmatpush1.bf16.msra.mxu0 %v6061_v31 }
 0x30c   :  { %1574 = vst [vmem:[#allocation5 + $0x80] sm:$0xff] %v1562_v42  ;;  %1575 = vst [vmem:[#allocation5 + $0x88] sm:$0xff] %v1563_v28  ;;  %6064 = vmatprep.subr.bf16.mxu0 %v6063_v56  ;;  %v6067_v26 = vpack.c.bf16 %v1517_v30, %v1471_v22  ;;  %v6069_v38 = vpack.c.bf16 %v1516_v17, %v1470_v16 }
 0x30d   :  { %1528 = vst [vmem:[#allocation5 + $0x50] sm:$0xff] %v1516_v17  ;;  %1529 = vst [vmem:[#allocation5 + $0x58] sm:$0xff] %v1517_v30 }
 0x30e   :  { %v1601_v1 = vpop.permute.xlu1 %1600  ;;  %v1661_v0 = vpop.permute.xlu0 %1660  ;;  %6068 = vmatprep.subr.bf16.mxu1 %v6067_v26 }
 0x30f   :  { %v1608_v57 = vsel %vm943_vm4, %v1599_v43, %v1601_v1  ;;  %v1609_v19 = vsel %vm943_vm4, %v1601_v1, %v7560_v46  ;;  %v1667_v29 = vsel %vm201_vm3, %v1659_v33, %v1661_v0  ;;  %6066 = vmatpush1.bf16.msra.mxu0 %v6065_v9  ;;  %6070 = vmatpush1.bf16.msra.mxu1 %v6069_v38 }
 0x310   :  { %1620 = vst [vmem:[#allocation5 + $0xb0] sm:$0xff] %v1608_v57  ;;  %1621 = vst [vmem:[#allocation5 + $0xb8] sm:$0xff] %v1609_v19  ;;  %v6071_v41 = vpack.c.bf16 %v1609_v19, %v1563_v28  ;;  %v6073_v47 = vpack.c.bf16 %v1608_v57, %v1562_v42  ;;  %v6075_v13 = vpack.c.bf16 %v1667_v29, %v7493_v27 }
 0x311   :  { %1679 = vst [vmem:[#allocation5 + $0x118] sm:$0xff] %v1667_v29  ;;  %v6077_v46 = vpack.c.bf16 %v1666_v59, %v7477_v54 }
 0x312   :  { %v1705_v24 = vpop.permute.xlu1 %1704  ;;  %v1707_v50 = vpop.permute.xlu0 %1706  ;;  %6072 = vmatprep.subr.bf16.mxu1 %v6071_v41 }
 0x313   :  { %v1712_v62 = vsel %vm838_vm2, %v1703_v20, %v1705_v24  ;;  %v1713_v21 = vsel %vm838_vm2, %v1705_v24, %v1707_v50  ;;  %6074 = vmatpush1.bf16.msra.mxu1 %v6073_v47 }
 0x314   :  { %1724 = vst [vmem:[#allocation5 + $0x140] sm:$0xff] %v1712_v62  ;;  %1725 = vst [vmem:[#allocation5 + $0x148] sm:$0xff] %v1713_v21  ;;  %6076 = vmatprep.subr.bf16.mxu1 %v6075_v13 }
 0x316   :  { %v1751_v60 = vpop.permute.xlu1 %1750  ;;  %v1753_v25 = vpop.permute.xlu0 %1752 }
 0x317   :  { %v1758_v3 = vsel %vm313_vm0, %v7624_v11, %v1751_v60  ;;  %v1759_v23 = vsel %vm313_vm0, %v1751_v60, %v1753_v25  ;;  %6078 = vmatpush1.bf16.msra.mxu1 %v6077_v46 }
 0x318   :  { %1770 = vst [vmem:[#allocation5 + $0x170] sm:$0xff] %v1758_v3  ;;  %1771 = vst [vmem:[#allocation5 + $0x178] sm:$0xff] %v1759_v23  ;;  %v6079_v27 = vpack.c.bf16 %v1759_v23, %v1713_v21  ;;  %v6081_v20 = vpack.c.bf16 %v1758_v3, %v1712_v62 }
 0x31a   :  { %v1793_v43 = vpop.permute.xlu1 %1792  ;;  %v1795_v18 = vpop.permute.xlu0 %1794  ;;  %6080 = vmatprep.subr.bf16.mxu1 %v6079_v27 }
 0x31b   :  { %v1802_v45 = vsel %vm397_vm1, %v7587_v8, %v1793_v43  ;;  %v1803_v54 = vsel %vm397_vm1, %v1793_v43, %v1795_v18  ;;  %6082 = vmatpush1.bf16.msra.mxu1 %v6081_v20 }
 0x31c   :  { %1814 = vst [vmem:[#allocation5 + $0x190] sm:$0xff] %v1802_v45  ;;  %1815 = vst [vmem:[#allocation5 + $0x198] sm:$0xff] %v1803_v54  ;;  %1963 = vmatprep.subr.mxu0 %v1803_v54 }
 0x31d   :  { %1964 = vmatpush1.msra.mxu0 %v1802_v45 }
 0x31e   :  { %v1797_v11 = vpop.permute.xlu1 %1796  ;;  %v1799_v48 = vpop.permute.xlu0 %1798  ;;  %5958 = vmatmul.mubr.msk.f32.vlgmr.msra.gmra.mrb[4].mxu0 %vm1154_vm8, %v7615_v37 }
 0x31f   :  { %v1804_v61 = vsel %vm397_vm1, %v1795_v18, %v1797_v11  ;;  %v1805_v33 = vsel %vm397_vm1, %v1797_v11, %v1799_v48  ;;  %2702 = vmatprep.mubr.f32.mxu0 %v9707_v5 }
 0x320   :  { %1816 = vst [vmem:[#allocation5 + $0x1a0] sm:$0xff] %v1804_v61  ;;  %1817 = vst [vmem:[#allocation5 + $0x1a8] sm:$0xff] %v1805_v33  ;;  %2034 = vmatprep.subr.mxu1 %v1805_v33 }
 0x321   :  { %2035 = vmatpush1.msra.mxu1 %v1804_v61 }
 0x322   :  { %5959 = vmatmul.mubr.msk.f32.vlgmr.msra.gmra.mrb[4].mxu1 %vm1154_vm8, %v7615_v37 }
 0x323   :  { %2773 = vmatprep.mubr.f32.mxu1 %v9707_v5 }
 0x3cd   :  { %v7666_v8 = vpop.f32.mrb[2].mxu1 }
 0x3ce   :  { %v2089_v44 = vmul.f32 %v7666_v8, %v7380_v14  ;;  %v7670_v10 = vpop.f32.mrb[3].mxu1 }
 0x3cf   :  { %v2090_v59 = vmul.f32 %v7670_v10, %v7390_v6 }
 0x3d0   :  { %v2096_v16 = vsel %vm2095_vm13, %v2089_v44, 0.0 }
 0x3d1   :  { %v2097_v22 = vsel %vm2095_vm13, %v2090_v59, 0.0 }
 0x3d2   :  { %v2098_v31 = vadd.f32 %v2097_v22, %v2096_v16 }
 0x3f1   :  { %v7676_v4 = vpop.f32.mrb[4].mxu0 }
 0x3f2   :  { %v2091_v37 = vmul.f32 %v7676_v4, %v7394_v52  ;;  %v7680_v51 = vpop.f32.mrb[5].mxu0 }
 0x3f3   :  { %v2092_v56 = vmul.f32 %v7680_v51, %v7444_v63 }
 0x3f4   :  { %v2099_v42 = vsel %vm2095_vm13, %v2091_v37, 0.0 }
 0x3f5   :  { %v2100_v28 = vadd.f32 %v2099_v42, %v2098_v31  ;;  %v2101_v17 = vsel %vm2095_vm13, %v2092_v56, 0.0  ;;  %v7686_v30 = vpop.f32.mrb[4].mxu1 }
 0x3f6   :  { %v2093_v26 = vmul.f32 %v7686_v30, %v7458_v35  ;;  %v7690_v38 = vpop.f32.mrb[5].mxu1 }
 0x3f7   :  { %v2102_v9 = vadd.f32 %v2101_v17, %v2100_v28  ;;  %v2094_v1 = vmul.f32 %v7690_v38, %v7481_v2 }
 0x3f8   :  { %v2103_v0 = vsel %vm2095_vm13, %v2093_v26, 0.0 }
 0x3f9   :  { %v2104_v57 = vadd.f32 %v2103_v0, %v2102_v9  ;;  %v2105_v19 = vsel %vm2095_vm13, %v2094_v1, 0.0 }
 0x3fb   :  { %v2106_v29 = vadd.f32 %v2105_v19, %v2104_v57 }
 0x3fd   :  { %2107 = vadd.xlane.f32.xlu1 %v2106_v29 }
 0x48a   :  { %v2108_v41 = vpop.xlane.xlu1 %2107 }
 0x48b   :  { %v2109_v47 = vrot.slane %v2108_v41, 4 }
 0x48d   :  { %v2110_v24 = vadd.f32 %v2109_v47, %v2108_v41 }
 0x48f   :  { %v2111_v50 = vrot.slane %v2110_v24, 2 }
 0x491   :  { %v2112_v13 = vadd.f32 %v2111_v50, %v2110_v24 }
 0x493   :  { %v2113_v62 = vrot.slane %v2112_v13, 1 }
 0x495   :  { %v2114_v21 = vadd.f32 %v2113_v62, %v2112_v13 }
 0x497   :  { %6323 = vpush %v2114_v21 }
 0x4c8   :  { %s6324_s19 = spop %6323 }
 0x4c9   :  { %v2116_v46 = vstv %s6324_s19 }
 0x4ca   :  { %v2117_v60 = vmul.f32 0.0006510417, %v2116_v46 }
 0x4cc   :  { %v2118_v25 = vsub.f32 %v7666_v8, %v2117_v60  ;;  %v2119_v3 = vsub.f32 %v7670_v10, %v2117_v60  ;;  %v2120_v23 = vsub.f32 %v7676_v4, %v2117_v60  ;;  %v2121_v27 = vsub.f32 %v7680_v51, %v2117_v60 }
 0x4cd   :  { %v2122_v20 = vsub.f32 %v7686_v30, %v2117_v60  ;;  %v2123_v43 = vsub.f32 %v7690_v38, %v2117_v60 }
 0x4ce   :  { %v2124_v18 = vmul.f32 %v2118_v25, %v7380_v14  ;;  %v2125_v45 = vmul.f32 %v2119_v3, %v7390_v6  ;;  %v2126_v54 = vmul.f32 %v2120_v23, %v7394_v52  ;;  %v2127_v11 = vmul.f32 %v2121_v27, %v7444_v63 }
 0x4cf   :  { %v2128_v48 = vmul.f32 %v2122_v20, %v7458_v35  ;;  %v2129_v59 = vmul.f32 %v2123_v43, %v7481_v2  ;;  %v7717_v43 = vstv %s9704_s8 }
 0x4d0   :  { %v2130_v61 = vmul.f32 %v2124_v18, %v2124_v18  ;;  %v2131_v33 = vmul.f32 %v2125_v45, %v2125_v45  ;;  %v2132_v44 = vmul.f32 %v2126_v54, %v2126_v54  ;;  %v2133_v16 = vmul.f32 %v2127_v11, %v2127_v11  ;;  %9731 = vst [vmem:[#allocation10_spill] sm:$0xff] %v7717_v43 }
 0x4d1   :  { %v2134_v56 = vmul.f32 %v2128_v48, %v2128_v48  ;;  %v2135_v17 = vmul.f32 %v2129_v59, %v2129_v59 }
 0x4d2   :  { %v2136_v22 = vsel %vm2095_vm13, %v2130_v61, 0.0  ;;  %v2137_v31 = vsel %vm2095_vm13, %v2131_v33, 0.0  ;;  %v2139_v42 = vsel %vm2095_vm13, %v2132_v44, 0.0  ;;  %v2141_v26 = vsel %vm2095_vm13, %v2133_v16, 0.0  ;;  %v2169_v33 = vld [vmem:[%s9705_s9 + $0x4] sm:$0x77] }
 0x4d3   :  { %v2138_v37 = vadd.f32 %v2137_v31, %v2136_v22  ;;  %v2143_v1 = vsel %vm2095_vm13, %v2134_v56, 0.0  ;;  %v2145_v57 = vsel %vm2095_vm13, %v2135_v17, 0.0  ;;  %v2170_v44 = vld [vmem:[%s9705_s9 + $0xc] sm:$0x77]  ;;  %v2200_v31 = vcombine.low %v7394_v52, %v7444_v63 }
 0x4d5   :  { %v2140_v28 = vadd.f32 %v2139_v42, %v2138_v37 }
 0x4d7   :  { %v2142_v9 = vadd.f32 %v2141_v26, %v2140_v28 }
 0x4d9   :  { %v2144_v0 = vadd.f32 %v2143_v1, %v2142_v9 }
 0x4db   :  { %v2146_v19 = vadd.f32 %v2145_v57, %v2144_v0 }
 0x4dd   :  { %2147 = vadd.xlane.f32.xlu0 %v2146_v19 }
 0x56a   :  { %v2148_v29 = vpop.xlane.xlu0 %2147 }
 0x56b   :  { %v2149_v41 = vrot.slane %v2148_v29, 4 }
 0x56d   :  { %v2150_v47 = vadd.f32 %v2149_v41, %v2148_v29 }
 0x56f   :  { %v2151_v24 = vrot.slane %v2150_v47, 2 }
 0x571   :  { %v2152_v50 = vadd.f32 %v2151_v24, %v2150_v47 }
 0x573   :  { %v2153_v13 = vrot.slane %v2152_v50, 1 }
 0x575   :  { %v2154_v62 = vadd.f32 %v2153_v13, %v2152_v50 }
 0x577   :  { %6325 = vpush %v2154_v62 }
 0x5a8   :  { %s6326_s20 = spop %6325 }
 0x5a9   :  { %v2156_v21 = vstv %s6326_s20 }
 0x5aa   :  { %v2157_v46 = vmul.f32 0.0006514658, %v2156_v21 }
 0x5ac   :  { %6473 = vrsqrt.f32 %v2157_v46  ;;  %vm2160_vm14 = vcmp.eq.f32.partialorder %v2157_v46, inf  ;;  %v2163_v3 = vand.u32 2147483648, %v2157_v46  ;;  %vm2162_vm15 = vcmp.eq.f32.partialorder %v2157_v46, 0.0 }
 0x5b6   :  { %v6474_v60 = vpop.eup %6473 }
 0x5b7   :  { %v2159_v25 = vmul.f32 %v6474_v60, %v2157_v46 }
 0x5b9   :  { %v2161_v23 = vsel %vm2160_vm14, %v2157_v46, %v2159_v25 }
 0x5ba   :  { %v2164_v27 = vsel %vm2162_vm15, %v2163_v3, %v2161_v23 }
 0x5bb   :  { %v2165_v20 = vadd.f32 1e-08, %v2164_v27 }
 0x5bd   :  { %6475 = vrcp.f32 %v2165_v20 }
 0x5c7   :  { %v6476_v18 = vpop.eup %6475 }
 0x5c8   :  { %v2168_v45 = vmul.f32 %v6476_v18, %v7717_v43 }
 0x5ca   :  { %v2172_v54 = vmul.f32 %v2168_v45, %v7666_v8  ;;  %v2173_v11 = vmul.f32 %v2168_v45, %v7670_v10  ;;  %v2174_v48 = vmul.f32 %v2168_v45, %v7676_v4  ;;  %v2175_v61 = vmul.f32 %v2168_v45, %v7680_v51  ;;  %v2171_v8 = vld [vmem:[%s9705_s9 + $0x14] sm:$0x77] }
 0x5cb   :  { %v2176_v59 = vmul.f32 %v2168_v45, %v7686_v30  ;;  %v2177_v16 = vmul.f32 %v2168_v45, %v7690_v38  ;;  %v2199_v51 = vcombine.low %v7380_v14, %v7390_v6  ;;  %v2201_v30 = vcombine.low %v7458_v35, %v7481_v2 }
 0x5cc   :  { %v2184_v10 = vcombine.low %v2172_v54, %v2173_v11  ;;  %v2185_v4 = vcombine.low %v2174_v48, %v2175_v61 }
 0x5cd   :  { %v2186_v22 = vcombine.low %v2176_v59, %v2177_v16 }
 0x5ce   :  { %v2190_v37 = vadd.f32 %v2184_v10, %v2169_v33  ;;  %v2191_v56 = vadd.f32 %v2185_v4, %v2170_v44 }
 0x5cf   :  { %v2192_v42 = vadd.f32 %v2186_v22, %v2171_v8 }
 0x5d0   :  { %v5960_v38 = vclamps-f32 %v2190_v37, 1.0  ;;  %v5961_v28 = vclamps-f32 %v2191_v56, 1.0 }
 0x5d1   :  { %v5962_v17 = vclamps-f32 %v2192_v42, 1.0 }
 0x5d2   :  { %v2205_v26 = vmul.f32 %v5960_v38, %v2199_v51  ;;  %v2206_v9 = vmul.f32 %v5961_v28, %v2200_v31 }
 0x5d3   :  { %v2207_v1 = vmul.f32 %v5962_v17, %v2201_v30 }
 0x5d4   :  { %2208 = vst [vmem:[%s9705_s9 + $0x4] sm:$0x77] %v2205_v26  ;;  %2209 = vst [vmem:[%s9705_s9 + $0xc] sm:$0x77] %v2206_v9 }
 0x5d5   :  { %2210 = vst [vmem:[%s9705_s9 + $0x14] sm:$0x77] %v2207_v1 }
 0x5db   :  { %v7753_v14 = vld [vmem:[%s9705_s9 + $0x8] sm:$0x77]  ;;  %v7767_v52 = vld [vmem:[%s9705_s9] sm:$0x77] }
 0x5dc   :  { %v7758_v6 = vld [vmem:[%s9705_s9 + $0x8] sm:$0x77]  ;;  %2270 = vrot.lane.b32.xlu0 %v7753_v14, %s6511_s12  ;;  %v7772_v63 = vld [vmem:[%s9705_s9] sm:$0x77]  ;;  %v7781_v35 = vld [vmem:[%s9705_s9 + $0x10] sm:$0x77]  ;;  %v2263_v59 = vcombine.high %v7767_v52, %v7767_v52  ;;  %v2264_v4 = vcombine.high %v7753_v14, %v7753_v14 }
 0x5dd   :  { %2227 = vrot.lane.b32.xlu1 %v7758_v6, %s6512_s13  ;;  %v7786_v2 = vld [vmem:[%s9705_s9] sm:$0x77]  ;;  %v2385_v0 = vld [vmem:[%s9705_s9 + $0xc] sm:$0x77]  ;;  %v2386_v41 = vld [vmem:[%s9705_s9 + $0x14] sm:$0x77]  ;;  %v2221_v8 = vcombine.high %v7758_v6, %v7758_v6  ;;  %v2220_v22 = vcombine.high %v7772_v63, %v7772_v63  ;;  %v2222_v1 = vcombine.high %v7781_v35, %v7781_v35 }
 0x5de   :  { %v2384_v57 = vld [vmem:[%s9705_s9 + $0x4] sm:$0x77]  ;;  %v2391_v19 = vcombine.high %v2385_v0, %v2385_v0  ;;  %2398 = vst [vmem:[#allocation5 + $0xd0] sm:$0x7] %v2385_v0  ;;  %v7804_v47 = vld [vmem:[%s9705_s9 + $0x10] sm:$0x77]  ;;  %v2392_v50 = vcombine.high %v2386_v41, %v2386_v41  ;;  %v2306_v51 = vcombine.high %v7786_v2, %v7786_v2 }
 0x5df   :  { %v2390_v29 = vcombine.high %v2384_v57, %v2384_v57  ;;  %2396 = vst [vmem:[#allocation5 + $0xc0] sm:$0x7] %v2384_v57  ;;  %v7809_v24 = vld [vmem:[%s9705_s9 + $0x4] sm:$0x77]  ;;  %2400 = vst [vmem:[#allocation5 + $0xe0] sm:$0x7] %v2386_v41  ;;  %v2265_v6 = vcombine.high %v7804_v47, %v7804_v47 }
 0x5e0   :  { %2266 = vrot.lane.b32.xlu0 %v7767_v52, %s6511_s12  ;;  %2399 = vst [vmem:[#allocation5 + $0xd8] sm:$0x7] %v2391_v19  ;;  %2401 = vst [vmem:[#allocation5 + $0xe8] sm:$0x7] %v2392_v50  ;;  %v2299_v13 = vld [vmem:[%s9705_s9 + $0x8] sm:$0x77]  ;;  %v2410_v17 = vcombine.high %v7809_v24, %v7809_v24 }
 0x5e1   :  { %2223 = vrot.lane.b32.xlu1 %v7772_v63, %s6512_s13  ;;  %2397 = vst [vmem:[#allocation5 + $0xc8] sm:$0x7] %v2390_v29  ;;  %v7821_v62 = vld [vmem:[%s9705_s9 + $0x14] sm:$0x77]  ;;  %v2342_v21 = vld [vmem:[%s9705_s9 + $0x8] sm:$0x77]  ;;  %v2307_v30 = vcombine.high %v2299_v13, %v2299_v13 }
 0x5e2   :  { %v2446_v46 = vld [vmem:[%s9705_s9 + $0xc] sm:$0x77]  ;;  %v2341_v60 = vld [vmem:[%s9705_s9] sm:$0x77]  ;;  %v7856_v20 = vld [vmem:[%s9705_s9 + $0x14] sm:$0x77]  ;;  %v2350_v38 = vcombine.high %v2342_v21, %v2342_v21 }
 0x5e3   :  { %v2489_v25 = vld [vmem:[%s9705_s9 + $0xc] sm:$0x77]  ;;  %v2488_v23 = vld [vmem:[%s9705_s9 + $0x4] sm:$0x77]  ;;  %v7867_v45 = vld [vmem:[%s9705_s9 + $0x14] sm:$0x77]  ;;  %v2349_v37 = vcombine.high %v2341_v60, %v2341_v60  ;;  %v2454_v28 = vcombine.high %v2446_v46, %v2446_v46  ;;  %v2455_v57 = vcombine.high %v7856_v20, %v7856_v20 }
 0x5e4   :  { %2231 = vrot.lane.b32.xlu0 %v7781_v35, %s6512_s13  ;;  %v2300_v3 = vld [vmem:[%s9705_s9 + $0x10] sm:$0x77]  ;;  %v2445_v54 = vld [vmem:[%s9705_s9 + $0x4] sm:$0x77]  ;;  %v2215_v11 = vld [vmem:[%s9705_s9 + $0x18] sm:$0x7]  ;;  %v2496_v42 = vcombine.high %v2488_v23, %v2488_v23  ;;  %v2497_v26 = vcombine.high %v2489_v25, %v2489_v25  ;;  %v2498_v29 = vcombine.high %v7867_v45, %v7867_v45 }
 0x5e5   :  { %2309 = vrot.lane.b32.xlu1 %v7786_v2, %s6513_s28  ;;  %v2343_v27 = vld [vmem:[%s9705_s9 + $0x10] sm:$0x77]  ;;  %v2531_v48 = vld [vmem:[%s9705_s9 + $0x4] sm:$0x77]  ;;  %v2258_v61 = vld [vmem:[%s9705_s9 + $0x18] sm:$0x7]  ;;  %v2453_v56 = vcombine.high %v2445_v54, %v2445_v54  ;;  %v2308_v9 = vcombine.high %v2300_v3, %v2300_v3  ;;  %v2412_v2 = vcombine.high %v7821_v62, %v7821_v62 }
 0x5e6   :  { %v2403_v18 = vld [vmem:[%s9705_s9 + $0xc] sm:$0x77]  ;;  %v2301_v33 = vld [vmem:[%s9705_s9 + $0x18] sm:$0x7]  ;;  %v2351_v14 = vcombine.high %v2343_v27, %v2343_v27  ;;  %v2539_v63 = vcombine.high %v2531_v48, %v2531_v48  ;;  %v2405_v35 = vld [vmem:[%s9705_s9 + $0x1c] sm:$0x7] }
 0x5e7   :  { %v2532_v44 = vld [vmem:[%s9705_s9 + $0xc] sm:$0x77]  ;;  %v2344_v16 = vld [vmem:[%s9705_s9 + $0x18] sm:$0x7]  ;;  %v2411_v31 = vcombine.high %v2403_v18, %v2403_v18  ;;  %v2448_v0 = vld [vmem:[%s9705_s9 + $0x1c] sm:$0x7] }
 0x5e8   :  { %2274 = vrot.lane.b32.xlu0 %v7804_v47, %s6511_s12  ;;  %v2533_v10 = vld [vmem:[%s9705_s9 + $0x14] sm:$0x77]  ;;  %v2540_v52 = vcombine.high %v2532_v44, %v2532_v44  ;;  %v2491_v19 = vld [vmem:[%s9705_s9 + $0x1c] sm:$0x7] }
 0x5e9   :  { %2413 = vrot.lane.b32.xlu1 %v7809_v24, %s6515_s25  ;;  %v2534_v41 = vld [vmem:[%s9705_s9 + $0x1c] sm:$0x7]  ;;  %v2541_v47 = vcombine.high %v2533_v10, %v2533_v10  ;;  %v2629_v24 = vld [vmem:[%s9702_s6] sm:$0xff] }
 0x5ec   :  { %2313 = vrot.lane.b32.xlu0 %v2299_v13, %s6513_s28 }
 0x5ed   :  { %2421 = vrot.lane.b32.xlu1 %v7821_v62, %s6515_s25 }
 0x5f0   :  { %2356 = vrot.lane.b32.xlu0 %v2342_v21, %s6514_s30 }
 0x5f1   :  { %2460 = vrot.lane.b32.xlu1 %v2446_v46, %s6516_s15 }
 0x5f4   :  { %2352 = vrot.lane.b32.xlu0 %v2341_v60, %s6514_s30 }
 0x5f5   :  { %2503 = vrot.lane.b32.xlu1 %v2489_v25, %s6517_s18 }
 0x5f8   :  { %2317 = vrot.lane.b32.xlu0 %v2300_v3, %s6513_s28 }
 0x5f9   :  { %2499 = vrot.lane.b32.xlu1 %v2488_v23, %s6517_s18 }
 0x5fc   :  { %2360 = vrot.lane.b32.xlu0 %v2343_v27, %s6514_s30 }
 0x5fd   :  { %2464 = vrot.lane.b32.xlu1 %v7856_v20, %s6516_s15 }
 0x600   :  { %2417 = vrot.lane.b32.xlu0 %v2403_v18, %s6515_s25 }
 0x601   :  { %2507 = vrot.lane.b32.xlu1 %v7867_v45, %s6517_s18 }
 0x604   :  { %2456 = vrot.lane.b32.xlu0 %v2445_v54, %s6516_s15 }
 0x605   :  { %2235 = vrot.lane.b32.xlu1 %v2215_v11, %s6512_s13 }
 0x608   :  { %2542 = vrot.lane.b32.xlu0 %v2531_v48, %s6518_s16 }
 0x609   :  { %2278 = vrot.lane.b32.xlu1 %v2258_v61, %s6511_s12 }
 0x60c   :  { %2321 = vrot.lane.b32.xlu0 %v2301_v33, %s6513_s28 }
 0x60d   :  { %2546 = vrot.lane.b32.xlu1 %v2532_v44, %s6518_s16 }
 0x610   :  { %2364 = vrot.lane.b32.xlu0 %v2344_v16, %s6514_s30 }
 0x611   :  { %2268 = vrot.lane.b32.xlu1 %v2263_v59, %s6511_s12 }
 0x614   :  { %2550 = vrot.lane.b32.xlu0 %v2533_v10, %s6518_s16 }
 0x615   :  { %2229 = vrot.lane.b32.xlu1 %v2221_v8, %s6512_s13 }
 0x618   :  { %2225 = vrot.lane.b32.xlu0 %v2220_v22, %s6512_s13 }
 0x619   :  { %2272 = vrot.lane.b32.xlu1 %v2264_v4, %s6511_s12 }
 0x61c   :  { %2419 = vrot.lane.b32.xlu0 %v2411_v31, %s6515_s25 }
 0x61d   :  { %2311 = vrot.lane.b32.xlu1 %v2306_v51, %s6513_s28 }
 0x620   :  { %2458 = vrot.lane.b32.xlu0 %v2453_v56, %s6516_s15 }
 0x621   :  { %2354 = vrot.lane.b32.xlu1 %v2349_v37, %s6514_s30 }
 0x624   :  { %2501 = vrot.lane.b32.xlu0 %v2496_v42, %s6517_s18 }
 0x625   :  { %2315 = vrot.lane.b32.xlu1 %v2307_v30, %s6513_s28 }
 0x628   :  { %2462 = vrot.lane.b32.xlu0 %v2454_v28, %s6516_s15 }
 0x629   :  { %2358 = vrot.lane.b32.xlu1 %v2350_v38, %s6514_s30 }
 0x62c   :  { %2505 = vrot.lane.b32.xlu0 %v2497_v26, %s6517_s18 }
 0x62d   :  { %2415 = vrot.lane.b32.xlu1 %v2410_v17, %s6515_s25 }
 0x630   :  { %2233 = vrot.lane.b32.xlu0 %v2222_v1, %s6512_s13 }
 0x631   :  { %2319 = vrot.lane.b32.xlu1 %v2308_v9, %s6513_s28 }
 0x634   :  { %2276 = vrot.lane.b32.xlu0 %v2265_v6, %s6511_s12 }
 0x635   :  { %2362 = vrot.lane.b32.xlu1 %v2351_v14, %s6514_s30 }
 0x638   :  { %2544 = vrot.lane.b32.xlu0 %v2539_v63, %s6518_s16 }
 0x639   :  { %2548 = vrot.lane.b32.xlu1 %v2540_v52, %s6518_s16 }
 0x63c   :  { %2425 = vrot.lane.b32.xlu0 %v2405_v35, %s6515_s25 }
 0x63d   :  { %2423 = vrot.lane.b32.xlu1 %v2412_v2, %s6515_s25 }
 0x640   :  { %2468 = vrot.lane.b32.xlu0 %v2448_v0, %s6516_s15 }
 0x641   :  { %2466 = vrot.lane.b32.xlu1 %v2455_v57, %s6516_s15 }
 0x644   :  { %2511 = vrot.lane.b32.xlu0 %v2491_v19, %s6517_s18 }
 0x645   :  { %2509 = vrot.lane.b32.xlu1 %v2498_v29, %s6517_s18 }
 0x648   :  { %2554 = vrot.lane.b32.xlu0 %v2534_v41, %s6518_s16 }
 0x649   :  { %2552 = vrot.lane.b32.xlu1 %v2541_v47, %s6518_s16 }
 0x64c   :  { %3128 = vrot.lane.b32.xlu0 %v9707_v5, %s6514_s30 }
 0x64d   :  { %2632 = vperm.xlu1 %6356, %v2629_v24  }
 0x64e   :  { %v2271_v50 = vpop.permute.xlu0 %2270 }
 0x64f   :  { %v2228_v13 = vpop.permute.xlu1 %2227 }
 0x650   :  { %3220 = vrot.lane.b32.xlu0 %v9707_v5, %s6511_s12 }
 0x651   :  { %3174 = vrot.lane.b32.xlu1 %v9707_v5, %s6513_s28 }
 0x652   :  { %v2267_v62 = vpop.permute.xlu0 %2266 }
 0x653   :  { %v2224_v21 = vpop.permute.xlu1 %2223 }
 0x654   :  { %2944 = vrot.lane.b32.xlu0 %v9707_v5, %s6518_s16 }
 0x655   :  { %3266 = vrot.lane.b32.xlu1 %v9707_v5, %s6512_s13 }
 0x656   :  { %v7979_v46 = vpop.permute.xlu0 %2231 }
 0x657   :  { %v2310_v60 = vpop.permute.xlu1 %2309 }
 0x658   :  { %2990 = vrot.lane.b32.xlu0 %v9707_v5, %s6517_s18 }
 0x659   :  { %3036 = vrot.lane.b32.xlu1 %v9707_v5, %s6516_s15 }
 0x65a   :  { %v7985_v25 = vpop.permute.xlu0 %2274 }
 0x65b   :  { %v7987_v3 = vpop.permute.xlu1 %2413 }
 0x65d   :  { %3082 = vrot.lane.b32.xlu1 %v9707_v5, %s6515_s25 }
 0x65e   :  { %v7991_v23 = vpop.permute.xlu0 %2313 }
 0x65f   :  { %v7993_v27 = vpop.permute.xlu1 %2421 }
 0x662   :  { %v7995_v20 = vpop.permute.xlu0 %2356 }
 0x663   :  { %v7997_v18 = vpop.permute.xlu1 %2460 }
 0x666   :  { %v2353_v45 = vpop.permute.xlu0 %2352 }
 0x667   :  { %v7999_v54 = vpop.permute.xlu1 %2503 }
 0x66a   :  { %v8001_v11 = vpop.permute.xlu0 %2317 }
 0x66b   :  { %v8003_v48 = vpop.permute.xlu1 %2499 }
 0x66e   :  { %v8005_v61 = vpop.permute.xlu0 %2360 }
 0x66f   :  { %v8007_v33 = vpop.permute.xlu1 %2464 }
 0x672   :  { %v8009_v44 = vpop.permute.xlu0 %2417 }
 0x673   :  { %v8011_v59 = vpop.permute.xlu1 %2507 }
 0x676   :  { %v2457_v16 = vpop.permute.xlu0 %2456 }
 0x677   :  { %v8013_v8 = vpop.permute.xlu1 %2235 }
 0x67a   :  { %v8015_v10 = vpop.permute.xlu0 %2542 }
 0x67b   :  { %v8017_v4 = vpop.permute.xlu1 %2278 }
 0x67e   :  { %v8019_v22 = vpop.permute.xlu0 %2321 }
 0x67f   :  { %v8021_v51 = vpop.permute.xlu1 %2546 }
 0x682   :  { %v8023_v31 = vpop.permute.xlu0 %2364 }
 0x683   :  { %v2269_v37 = vpop.permute.xlu1 %2268 }
 0x684   :  { %v2280_v56 = vsel %vm313_vm0, %v2267_v62, %v2269_v37  ;;  %v2281_v30 = vsel %vm313_vm0, %v2269_v37, %v2271_v50 }
 0x685   :  { %2292 = vst [vmem:[#allocation5 + $0x30] sm:$0x7] %v2280_v56  ;;  %2293 = vst [vmem:[#allocation5 + $0x38] sm:$0x7] %v2281_v30 }
 0x686   :  { %v8027_v42 = vpop.permute.xlu0 %2550 }
 0x687   :  { %v2230_v38 = vpop.permute.xlu1 %2229 }
 0x688   :  { %v2239_v28 = vsel %vm397_vm1, %v2228_v13, %v2230_v38  ;;  %v2240_v17 = vsel %vm397_vm1, %v2230_v38, %v7979_v46 }
 0x689   :  { %2251 = vst [vmem:[#allocation5 + $0x10] sm:$0x7] %v2239_v28  ;;  %2252 = vst [vmem:[#allocation5 + $0x18] sm:$0x7] %v2240_v17 }
 0x68a   :  { %v2226_v9 = vpop.permute.xlu0 %2225 }
 0x68b   :  { %v2273_v26 = vpop.permute.xlu1 %2272  ;;  %v2237_v6 = vsel %vm397_vm1, %v2224_v21, %v2226_v9  ;;  %v2238_v52 = vsel %vm397_vm1, %v2226_v9, %v2228_v13 }
 0x68c   :  { %v2282_v1 = vsel %vm313_vm0, %v2271_v50, %v2273_v26  ;;  %v2283_v14 = vsel %vm313_vm0, %v2273_v26, %v7985_v25  ;;  %2249 = vst [vmem:[#allocation5] sm:$0x7] %v2237_v6  ;;  %2250 = vst [vmem:[#allocation5 + $0x8] sm:$0x7] %v2238_v52  ;;  %v2582_v24 = vld [vmem:[#allocation5 + $0x38] sm:$0xff]  ;;  %v2581_v50 = vld [vmem:[#allocation5 + $0x30] sm:$0xff] }
 0x68d   :  { %2294 = vst [vmem:[#allocation5 + $0x40] sm:$0x7] %v2282_v1  ;;  %2295 = vst [vmem:[#allocation5 + $0x48] sm:$0x7] %v2283_v14 }
 0x68e   :  { %v2420_v35 = vpop.permute.xlu0 %2419 }
 0x68f   :  { %v2312_v63 = vpop.permute.xlu1 %2311  ;;  %v2429_v57 = vsel %vm943_vm4, %v8009_v44, %v2420_v35  ;;  %v2430_v19 = vsel %vm943_vm4, %v2420_v35, %v7993_v27 }
 0x690   :  { %v2323_v2 = vsel %vm838_vm2, %v2310_v60, %v2312_v63  ;;  %v2324_v0 = vsel %vm838_vm2, %v2312_v63, %v7991_v23  ;;  %2441 = vst [vmem:[#allocation5 + $0x100] sm:$0x7] %v2429_v57  ;;  %2442 = vst [vmem:[#allocation5 + $0x108] sm:$0x7] %v2430_v19  ;;  %v2578_v47 = vld [vmem:[#allocation5 + $0x18] sm:$0xff]  ;;  %v2577_v26 = vld [vmem:[#allocation5 + $0x10] sm:$0xff] }
 0x691   :  { %2335 = vst [vmem:[#allocation5 + $0x60] sm:$0x7] %v2323_v2  ;;  %2336 = vst [vmem:[#allocation5 + $0x68] sm:$0x7] %v2324_v0 }
 0x692   :  { %v2459_v41 = vpop.permute.xlu0 %2458 }
 0x693   :  { %v2355_v29 = vpop.permute.xlu1 %2354  ;;  %v2470_v21 = vsel %vm987_vm5, %v2457_v16, %v2459_v41  ;;  %v2471_v60 = vsel %vm987_vm5, %v2459_v41, %v7997_v18  ;;  %v2576_v56 = vld [vmem:[#allocation5 + $0x8] sm:$0xff]  ;;  %v2575_v30 = vld [vmem:[#allocation5] sm:$0xff] }
 0x694   :  { %v2366_v13 = vsel %vm201_vm3, %v2353_v45, %v2355_v29  ;;  %v2367_v62 = vsel %vm201_vm3, %v2355_v29, %v7995_v20  ;;  %v2584_v37 = vld [vmem:[#allocation5 + $0x48] sm:$0xff]  ;;  %2482 = vst [vmem:[#allocation5 + $0x120] sm:$0x7] %v2470_v21  ;;  %2483 = vst [vmem:[#allocation5 + $0x128] sm:$0x7] %v2471_v60  ;;  %v6083_v28 = vpack.c.bf16 %v2582_v24, %v2576_v56  ;;  %v2583_v45 = vld [vmem:[#allocation5 + $0x40] sm:$0xff] }
 0x695   :  { %2378 = vst [vmem:[#allocation5 + $0x90] sm:$0x7] %v2366_v13  ;;  %2379 = vst [vmem:[#allocation5 + $0x98] sm:$0x7] %v2367_v62  ;;  %v6099_v38 = vpack.c.bf16 %v2584_v37, %v2578_v47  ;;  %v6085_v17 = vpack.c.bf16 %v2581_v50, %v2575_v30  ;;  %v6101_v9 = vpack.c.bf16 %v2583_v45, %v2577_v26 }
 0x696   :  { %6084 = vmatprep.subr.bf16.mxu0 %v6083_v28  ;;  %v2502_v16 = vpop.permute.xlu0 %2501 }
 0x697   :  { %6100 = vmatprep.subr.bf16.mxu1 %v6099_v38  ;;  %v2316_v1 = vpop.permute.xlu1 %2315  ;;  %v2513_v52 = vsel %vm1031_vm6, %v8003_v48, %v2502_v16  ;;  %v2514_v63 = vsel %vm1031_vm6, %v2502_v16, %v7999_v54  ;;  %6086 = vmatpush1.bf16.msra.mxu0 %v6085_v17  ;;  %v2608_v38 = vld [vmem:[#allocation5 + $0x108] sm:$0xff]  ;;  %v2602_v16 = vld [vmem:[#allocation5 + $0xd8] sm:$0xff] }
 0x698   :  { %v2325_v14 = vsel %vm838_vm2, %v7991_v23, %v2316_v1  ;;  %v2326_v6 = vsel %vm838_vm2, %v2316_v1, %v8001_v11  ;;  %2525 = vst [vmem:[#allocation5 + $0x150] sm:$0x7] %v2513_v52  ;;  %2526 = vst [vmem:[#allocation5 + $0x158] sm:$0x7] %v2514_v63  ;;  %6102 = vmatpush1.bf16.msra.mxu1 %v6101_v9  ;;  %v2588_v0 = vld [vmem:[#allocation5 + $0x68] sm:$0xff]  ;;  %v2587_v41 = vld [vmem:[#allocation5 + $0x60] sm:$0xff] }
 0x699   :  { %2337 = vst [vmem:[#allocation5 + $0x70] sm:$0x7] %v2325_v14  ;;  %2338 = vst [vmem:[#allocation5 + $0x78] sm:$0x7] %v2326_v6  ;;  %v6107_v6 = vpack.c.bf16 %v2608_v38, %v2602_v16  ;;  %v2600_v52 = vld [vmem:[#allocation5 + $0xc8] sm:$0xff] }
 0x69a   :  { %v2463_v2 = vpop.permute.xlu0 %2462 }
 0x69b   :  { %v2359_v35 = vpop.permute.xlu1 %2358  ;;  %v2472_v48 = vsel %vm987_vm5, %v7997_v18, %v2463_v2  ;;  %v2473_v19 = vsel %vm987_vm5, %v2463_v2, %v8007_v33 }
 0x69c   :  { %v2368_v23 = vsel %vm201_vm3, %v7995_v20, %v2359_v35  ;;  %v2369_v57 = vsel %vm201_vm3, %v2359_v35, %v8005_v61  ;;  %v2594_v29 = vld [vmem:[#allocation5 + $0x98] sm:$0xff]  ;;  %v2593_v47 = vld [vmem:[#allocation5 + $0x90] sm:$0xff]  ;;  %2484 = vst [vmem:[#allocation5 + $0x130] sm:$0x7] %v2472_v48  ;;  %2485 = vst [vmem:[#allocation5 + $0x138] sm:$0x7] %v2473_v19 }
 0x69d   :  { %2380 = vst [vmem:[#allocation5 + $0xa0] sm:$0x7] %v2368_v23  ;;  %2381 = vst [vmem:[#allocation5 + $0xa8] sm:$0x7] %v2369_v57  ;;  %v6087_v24 = vpack.c.bf16 %v2594_v29, %v2588_v0  ;;  %v6089_v50 = vpack.c.bf16 %v2593_v47, %v2587_v41  ;;  %v2601_v29 = vld [vmem:[#allocation5 + $0xd0] sm:$0xff]  ;;  %v2612_v41 = vld [vmem:[#allocation5 + $0x128] sm:$0xff] }
 0x69e   :  { %v2506_v20 = vpop.permute.xlu0 %2505 }
 0x69f   :  { %v2416_v13 = vpop.permute.xlu1 %2415  ;;  %6088 = vmatprep.subr.bf16.mxu0 %v6087_v24  ;;  %v2515_v21 = vsel %vm1031_vm6, %v7999_v54, %v2506_v20  ;;  %v2516_v60 = vsel %vm1031_vm6, %v2506_v20, %v8011_v59  ;;  %v2618_v63 = vld [vmem:[#allocation5 + $0x158] sm:$0xff] }
 0x6a0   :  { %v2427_v62 = vsel %vm943_vm4, %v7987_v3, %v2416_v13  ;;  %v2428_v18 = vsel %vm943_vm4, %v2416_v13, %v8009_v44  ;;  %6090 = vmatpush1.bf16.msra.mxu0 %v6089_v50  ;;  %2527 = vst [vmem:[#allocation5 + $0x160] sm:$0x7] %v2515_v21  ;;  %2528 = vst [vmem:[#allocation5 + $0x168] sm:$0x7] %v2516_v60  ;;  %v2590_v30 = vld [vmem:[#allocation5 + $0x78] sm:$0xff]  ;;  %v2589_v26 = vld [vmem:[#allocation5 + $0x70] sm:$0xff]  ;;  %v6095_v50 = vpack.c.bf16 %v2618_v63, %v2612_v41 }
 0x6a1   :  { %2439 = vst [vmem:[#allocation5 + $0xf0] sm:$0x7] %v2427_v62  ;;  %2440 = vst [vmem:[#allocation5 + $0xf8] sm:$0x7] %v2428_v18  ;;  %v2617_v13 = vld [vmem:[#allocation5 + $0x150] sm:$0xff] }
 0x6a2   :  { %v2234_v56 = vpop.permute.xlu0 %2233 }
 0x6a3   :  { %v2320_v37 = vpop.permute.xlu1 %2319  ;;  %v2241_v54 = vsel %vm397_vm1, %v7979_v46, %v2234_v56  ;;  %v2242_v28 = vsel %vm397_vm1, %v2234_v56, %v8013_v8  ;;  %v2607_v46 = vld [vmem:[#allocation5 + $0x100] sm:$0xff] }
 0x6a4   :  { %v2327_v3 = vsel %vm838_vm2, %v8001_v11, %v2320_v37  ;;  %v2328_v44 = vsel %vm838_vm2, %v2320_v37, %v8019_v22  ;;  %v2596_v17 = vld [vmem:[#allocation5 + $0xa8] sm:$0xff]  ;;  %v2595_v45 = vld [vmem:[#allocation5 + $0xa0] sm:$0xff]  ;;  %2253 = vst [vmem:[#allocation5 + $0x20] sm:$0x7] %v2241_v54  ;;  %2254 = vst [vmem:[#allocation5 + $0x28] sm:$0x7] %v2242_v28  ;;  %v6109_v24 = vpack.c.bf16 %v2607_v46, %v2601_v29 }
 0x6a5   :  { %2339 = vst [vmem:[#allocation5 + $0x80] sm:$0x7] %v2327_v3  ;;  %2340 = vst [vmem:[#allocation5 + $0x88] sm:$0x7] %v2328_v44  ;;  %v6103_v9 = vpack.c.bf16 %v2596_v17, %v2590_v30  ;;  %v6105_v1 = vpack.c.bf16 %v2595_v45, %v2589_v26  ;;  %v2599_v11 = vld [vmem:[#allocation5 + $0xc0] sm:$0xff]  ;;  %v2613_v30 = vld [vmem:[#allocation5 + $0x130] sm:$0xff] }
 0x6a6   :  { %v2277_v22 = vpop.permute.xlu0 %2276  ;;  %v2611_v37 = vld [vmem:[#allocation5 + $0x120] sm:$0xff] }
 0x6a7   :  { %6104 = vmatprep.subr.bf16.mxu1 %v6103_v9  ;;  %v2363_v14 = vpop.permute.xlu1 %2362  ;;  %v2284_v2 = vsel %vm313_vm0, %v7985_v25, %v2277_v22  ;;  %v2285_v0 = vsel %vm313_vm0, %v2277_v22, %v8017_v4  ;;  %v2620_v48 = vld [vmem:[#allocation5 + $0x168] sm:$0xff]  ;;  %v2619_v60 = vld [vmem:[#allocation5 + $0x160] sm:$0xff]  ;;  %v6097_v56 = vpack.c.bf16 %v2617_v13, %v2611_v37 }
 0x6a8   :  { %v2370_v8 = vsel %vm201_vm3, %v8005_v61, %v2363_v14  ;;  %v2371_v35 = vsel %vm201_vm3, %v2363_v14, %v8023_v31  ;;  %6106 = vmatpush1.bf16.msra.mxu1 %v6105_v1  ;;  %v2606_v23 = vld [vmem:[#allocation5 + $0xf8] sm:$0xff]  ;;  %v2605_v57 = vld [vmem:[#allocation5 + $0xf0] sm:$0xff]  ;;  %2296 = vst [vmem:[#allocation5 + $0x50] sm:$0x7] %v2284_v2  ;;  %2297 = vst [vmem:[#allocation5 + $0x58] sm:$0x7] %v2285_v0  ;;  %v6113_v44 = vpack.c.bf16 %v2619_v60, %v2613_v30 }
 0x6a9   :  { %2382 = vst [vmem:[#allocation5 + $0xb0] sm:$0x7] %v2370_v8  ;;  %2383 = vst [vmem:[#allocation5 + $0xb8] sm:$0x7] %v2371_v35  ;;  %6108 = vmatprep.subr.bf16.mxu1 %v6107_v6  ;;  %v6091_v19 = vpack.c.bf16 %v2606_v23, %v2600_v52  ;;  %v6093_v61 = vpack.c.bf16 %v2605_v57, %v2599_v11  ;;  %v2614_v31 = vld [vmem:[#allocation5 + $0x138] sm:$0xff]  ;;  %v8104_v17 = vld [vmem:[%s9698_s2] sm:$0xff] }
 0x6aa   :  { %v2545_v25 = vpop.permute.xlu0 %2544  ;;  %v6111_v4 = vpack.c.bf16 %v2620_v48, %v2614_v31  ;;  %v2604_v31 = vld [vmem:[#allocation5 + $0xe8] sm:$0xff]  ;;  %v2211_v30 = vld [vmem:[%s9697_s1 + $0x1] sm:$0x3f] }
 0x6ab   :  { %v2549_v47 = vpop.permute.xlu1 %2548  ;;  %6092 = vmatprep.subr.bf16.mxu0 %v6091_v19  ;;  %v2556_v18 = vsel %vm706_vm7, %v8015_v10, %v2545_v25  ;;  %v2557_v21 = vsel %vm706_vm7, %v2545_v25, %v8021_v51  ;;  %v2580_v22 = vld [vmem:[#allocation5 + $0x28] sm:$0xff]  ;;  %v2579_v46 = vld [vmem:[#allocation5 + $0x20] sm:$0xff] }
 0x6ac   :  { %v2558_v20 = vsel %vm706_vm7, %v8021_v51, %v2549_v47  ;;  %v2559_v62 = vsel %vm706_vm7, %v2549_v47, %v8027_v42  ;;  %6094 = vmatpush1.bf16.msra.mxu0 %v6093_v61  ;;  %2568 = vst [vmem:[#allocation5 + $0x180] sm:$0x7] %v2556_v18  ;;  %2569 = vst [vmem:[#allocation5 + $0x188] sm:$0x7] %v2557_v21  ;;  %6110 = vmatpush1.bf16.msra.mxu1 %v6109_v24  ;;  %v2592_v35 = vld [vmem:[#allocation5 + $0x88] sm:$0xff]  ;;  %v2591_v19 = vld [vmem:[#allocation5 + $0x80] sm:$0xff] }
 0x6ad   :  { %2570 = vst [vmem:[#allocation5 + $0x190] sm:$0x7] %v2558_v20  ;;  %2571 = vst [vmem:[#allocation5 + $0x198] sm:$0x7] %v2559_v62  ;;  %6096 = vmatprep.subr.bf16.mxu0 %v6095_v50  ;;  %6112 = vmatprep.subr.bf16.mxu1 %v6111_v4  ;;  %v2603_v50 = vld [vmem:[#allocation5 + $0xe0] sm:$0xff] }
 0x6ae   :  { %v2426_v3 = vpop.permute.xlu0 %2425 }
 0x6af   :  { %v2424_v38 = vpop.permute.xlu1 %2423  ;;  %v2586_v26 = vld [vmem:[#allocation5 + $0x58] sm:$0xff]  ;;  %v2585_v45 = vld [vmem:[#allocation5 + $0x50] sm:$0xff] }
 0x6b0   :  { %v2431_v10 = vsel %vm943_vm4, %v7993_v27, %v2424_v38  ;;  %v2432_v51 = vsel %vm943_vm4, %v2424_v38, %v2426_v3  ;;  %6098 = vmatpush1.bf16.msra.mxu0 %v6097_v56  ;;  %6114 = vmatpush1.bf16.msra.mxu1 %v6113_v44  ;;  %v2598_v6 = vld [vmem:[#allocation5 + $0xb8] sm:$0xff]  ;;  %v6115_v52 = vpack.c.bf16 %v2586_v26, %v2580_v22  ;;  %v2597_v57 = vld [vmem:[#allocation5 + $0xb0] sm:$0xff] }
 0x6b1   :  { %2443 = vst [vmem:[#allocation5 + $0x110] sm:$0x7] %v2431_v10  ;;  %2444 = vst [vmem:[#allocation5 + $0x118] sm:$0x7] %v2432_v51  ;;  %v6117_v8 = vpack.c.bf16 %v2585_v45, %v2579_v46  ;;  %v6119_v23 = vpack.c.bf16 %v2598_v6, %v2592_v35  ;;  %v6121_v41 = vpack.c.bf16 %v2597_v57, %v2591_v19 }
 0x6b2   :  { %v2469_v28 = vpop.permute.xlu0 %2468  ;;  %v8131_v26 = vrot.slane %v2211_v30, %v6992_v40 }
 0x6b3   :  { %v2467_v54 = vpop.permute.xlu1 %2466  ;;  %v2624_v1 = vld [vmem:[#allocation5 + $0x188] sm:$0xff]  ;;  %v2623_v11 = vld [vmem:[#allocation5 + $0x180] sm:$0xff] }
 0x6b4   :  { %v2474_v9 = vsel %vm987_vm5, %v8007_v33, %v2467_v54  ;;  %v2475_v27 = vsel %vm987_vm5, %v2467_v54, %v2469_v28  ;;  %v2626_v16 = vld [vmem:[#allocation5 + $0x198] sm:$0xff]  ;;  %2654 = vmatprep.subr.mxu0 %v2624_v1  ;;  %v2625_v14 = vld [vmem:[#allocation5 + $0x190] sm:$0xff]  ;;  %v8128_v28 = vrot.slane %v2211_v30, %v6978_v34 }
 0x6b5   :  { %2486 = vst [vmem:[#allocation5 + $0x140] sm:$0x7] %v2474_v9  ;;  %2487 = vst [vmem:[#allocation5 + $0x148] sm:$0x7] %v2475_v27  ;;  %2725 = vmatprep.subr.mxu1 %v2626_v16  ;;  %2655 = vmatpush1.msra.mxu0 %v2623_v11  ;;  %v8134_v9 = vrot.slane %v2211_v30, %v6975_v32  ;;  %v8137_v27 = vrot.slane %v2211_v30, %v6989_v39 }
 0x6b6   :  { %2726 = vmatpush1.msra.mxu1 %v2625_v14  ;;  %5963 = vmatmul.mubr.msk.f32.vlgmr.msra.gmra.mrb[6].mxu0 %vm1154_vm8, %v8104_v17  ;;  %v2512_v33 = vpop.permute.xlu0 %2511 }
 0x6b7   :  { %v2510_v63 = vpop.permute.xlu1 %2509  ;;  %5964 = vmatmul.mubr.msk.f32.vlgmr.msra.gmra.mrb[6].mxu1 %vm1154_vm8, %v8104_v17  ;;  %6116 = vmatprep.subr.bf16.mxu0 %v6115_v52 }
 0x6b8   :  { %v2517_v2 = vsel %vm1031_vm6, %v8011_v59, %v2510_v63  ;;  %v2518_v0 = vsel %vm1031_vm6, %v2510_v63, %v2512_v33  ;;  %2844 = vmatprep.mubr.f32.mxu0 %v9707_v5  ;;  %6118 = vmatpush1.bf16.msra.mxu0 %v6117_v8  ;;  %v2610_v48 = vld [vmem:[#allocation5 + $0x118] sm:$0xff]  ;;  %v2609_v24 = vld [vmem:[#allocation5 + $0x110] sm:$0xff] }
 0x6b9   :  { %2529 = vst [vmem:[#allocation5 + $0x170] sm:$0x7] %v2517_v2  ;;  %2530 = vst [vmem:[#allocation5 + $0x178] sm:$0x7] %v2518_v0  ;;  %3420 = vmatprep.mubr.f32.mxu1 %v9707_v5  ;;  %6120 = vmatprep.subr.bf16.mxu0 %v6119_v23  ;;  %v6123_v25 = vpack.c.bf16 %v2610_v48, %v2604_v31  ;;  %v6125_v4 = vpack.c.bf16 %v2609_v24, %v2603_v50 }
 0x6ba   :  { %v2555_v29 = vpop.permute.xlu0 %2554  ;;  %v8176_v48 = vrot.slane %v2211_v30, %v7077_v12 }
 0x6bb   :  { %v2553_v61 = vpop.permute.xlu1 %2552 }
 0x6bc   :  { %v2560_v59 = vsel %vm706_vm7, %v8027_v42, %v2553_v61  ;;  %v2561_v47 = vsel %vm706_vm7, %v2553_v61, %v2555_v29  ;;  %6122 = vmatpush1.bf16.msra.mxu0 %v6121_v41  ;;  %v2616_v13 = vld [vmem:[#allocation5 + $0x148] sm:$0xff]  ;;  %v2615_v62 = vld [vmem:[#allocation5 + $0x140] sm:$0xff]  ;;  %v8180_v61 = vrot.slane %v2211_v30, %v7120_v36 }
 0x6bd   :  { %2572 = vst [vmem:[#allocation5 + $0x1a0] sm:$0x7] %v2560_v59  ;;  %2573 = vst [vmem:[#allocation5 + $0x1a8] sm:$0x7] %v2561_v47  ;;  %6124 = vmatprep.subr.bf16.mxu0 %v6123_v25 }
 0x6be   :  { %v3129_v24 = vpop.permute.xlu0 %3128 }
 0x6c0   :  { %v2622_v20 = vld [vmem:[#allocation5 + $0x178] sm:$0xff]  ;;  %v2621_v18 = vld [vmem:[#allocation5 + $0x170] sm:$0xff]  ;;  %6126 = vmatpush1.bf16.msra.mxu0 %v6125_v4 }
 0x6c1   :  { %v6127_v21 = vpack.c.bf16 %v2622_v20, %v2616_v13  ;;  %v6129_v60 = vpack.c.bf16 %v2621_v18, %v2615_v62 }
 0x6c2   :  { %v3221_v4 = vpop.permute.xlu0 %3220 }
 0x6c3   :  { %6128 = vmatprep.subr.bf16.mxu0 %v6127_v21 }
 0x6c4   :  { %v2628_v37 = vld [vmem:[#allocation5 + $0x1a8] sm:$0xff]  ;;  %6130 = vmatpush1.bf16.msra.mxu0 %v6129_v60  ;;  %v2627_v42 = vld [vmem:[#allocation5 + $0x1a0] sm:$0xff] }
 0x6c5   :  { %2796 = vmatprep.subr.mxu0 %v2628_v37 }
 0x6c6   :  { %v8273_v20 = vpop.permute.xlu0 %2944 }
 0x6c8   :  { %2797 = vmatpush1.msra.mxu0 %v2627_v42 }
 0x6c9   :  { %5965 = vmatmul.mubr.msk.f32.vlgmr.msra.gmra.mrb[8].mxu0 %vm1154_vm8, %v8104_v17 }
 0x6ca   :  { %3491 = vmatprep.mubr.f32.mxu0 %v9707_v5  ;;  %v8277_v18 = vpop.permute.xlu0 %2990 }
 0x6cc   :  { %v2633_v56 = vpop.permute.xlu1 %2632 }
 0x6d0   :  { %v3175_v25 = vpop.permute.xlu1 %3174 }
 0x6d4   :  { %v3267_v50 = vpop.permute.xlu1 %3266 }
 0x6d8   :  { %v8271_v13 = vpop.permute.xlu1 %3036 }
 0x6dc   :  { %v8275_v62 = vpop.permute.xlu1 %3082 }
 0x789   :  { %v2704_v38 = vpop.f32.mrb[6].mxu0 }
 0x78a   :  { %v2775_v3 = vpop.f32.mrb[6].mxu1  ;;  %v2705_v44 = vadd.f32 %v2704_v38, %v2633_v56  ;;  %v2706_v51 = vpop.f32.mrb[7].mxu0 }
 0x78b   :  { %v2776_v10 = vadd.f32 %v2775_v3, %v2633_v56  ;;  %v2777_v54 = vpop.f32.mrb[7].mxu1  ;;  %v2707_v17 = vadd.f32 %v2706_v51, %v2633_v56 }
 0x78c   :  { %v2778_v45 = vadd.f32 %v2777_v54, %v2633_v56  ;;  %vm2851_vm9 = vcmp.gt.f32.partialorder %v2705_v44, 0.0 }
 0x78d   :  { %vm2853_vm10 = vcmp.gt.f32.partialorder %v2776_v10, 0.0  ;;  %v2863_v1 = vsel %vm2851_vm9, %v7383_v15, 0.0  ;;  %vm2852_vm11 = vcmp.gt.f32.partialorder %v2707_v17, 0.0 }
 0x78e   :  { %v2865_v16 = vsel %vm2853_vm10, %v7403_v53, 0.0  ;;  %vm2854_vm12 = vcmp.gt.f32.partialorder %v2778_v45, 0.0  ;;  %v2869_v11 = vadd.f32 0.00024414063, %v2863_v1  ;;  %v2864_v22 = vsel %vm2852_vm11, %v7400_v55, 0.0 }
 0x78f   :  { %v2871_v14 = vadd.f32 0.00024414063, %v2865_v16  ;;  %v2866_v6 = vsel %vm2854_vm12, %v7447_v58, 0.0  ;;  %v2870_v52 = vadd.f32 0.00024414063, %v2864_v22 }
 0x790   :  { %v2872_v46 = vadd.f32 0.00024414063, %v2866_v6  ;;  %v8144_v63 = vmul.f32 %v8128_v28, %v2869_v11 }
 0x791   :  { %v8147_v33 = vmul.f32 %v8131_v26, %v2871_v14  ;;  %v8150_v8 = vmul.f32 %v8134_v9, %v2870_v52 }
 0x792   :  { %v8153_v35 = vmul.f32 %v8137_v27, %v2872_v46  ;;  %3108 = vst [vmem:[#allocation5 + $0xc0] sm:$0xff] %v8144_v63  ;;  %2932 = vrot.lane.b32.xlu0 %v8144_v63, %s6518_s16 }
 0x793   :  { %3110 = vst [vmem:[#allocation5 + $0xd0] sm:$0xff] %v8147_v33  ;;  %2936 = vrot.lane.b32.xlu1 %v8147_v33, %s6518_s16  ;;  %3109 = vst [vmem:[#allocation5 + $0xc8] sm:$0xff] %v8150_v8 }
 0x794   :  { %3111 = vst [vmem:[#allocation5 + $0xd8] sm:$0xff] %v8153_v35 }
 0x796   :  { %3024 = vrot.lane.b32.xlu0 %v8144_v63, %s6516_s15 }
 0x797   :  { %2982 = vrot.lane.b32.xlu1 %v8147_v33, %s6517_s18 }
 0x79a   :  { %3130 = vrot.lane.b32.xlu0 %v8144_v63, %s6514_s30 }
 0x79b   :  { %2978 = vrot.lane.b32.xlu1 %v8144_v63, %s6517_s18 }
 0x79c   :  { %v2846_v2 = vpop.f32.mrb[8].mxu0 }
 0x79d   :  { %v2847_v0 = vadd.f32 %v2846_v2, %v2633_v56  ;;  %v2848_v23 = vpop.f32.mrb[9].mxu0 }
 0x79e   :  { %v2849_v57 = vadd.f32 %v2848_v23, %v2633_v56  ;;  %3134 = vrot.lane.b32.xlu0 %v8147_v33, %s6514_s30 }
 0x79f   :  { %3028 = vrot.lane.b32.xlu1 %v8147_v33, %s6516_s15  ;;  %vm2855_vm14 = vcmp.gt.f32.partialorder %v2847_v0, 0.0 }
 0x7a0   :  { %v2867_v19 = vsel %vm2855_vm14, %v7466_v7, 0.0  ;;  %vm2856_vm15 = vcmp.gt.f32.partialorder %v2849_v57, 0.0 }
 0x7a1   :  { %v2873_v29 = vadd.f32 0.00024414063, %v2867_v19  ;;  %v2868_v41 = vsel %vm2856_vm15, %v7484_v49, 0.0 }
 0x7a2   :  { %v2874_v31 = vadd.f32 0.00024414063, %v2868_v41  ;;  %3180 = vrot.lane.b32.xlu0 %v8147_v33, %s6513_s28 }
 0x7a3   :  { %3074 = vrot.lane.b32.xlu1 %v8147_v33, %s6515_s25  ;;  %v8188_v59 = vmul.f32 %v8176_v48, %v2873_v29 }
 0x7a4   :  { %v8191_v47 = vmul.f32 %v8180_v61, %v2874_v31 }
 0x7a5   :  { %3112 = vst [vmem:[#allocation5 + $0xe0] sm:$0xff] %v8188_v59 }
 0x7a6   :  { %3113 = vst [vmem:[#allocation5 + $0xe8] sm:$0xff] %v8191_v47  ;;  %3226 = vrot.lane.b32.xlu0 %v8147_v33, %s6511_s12 }
 0x7a7   :  { %3070 = vrot.lane.b32.xlu1 %v8144_v63, %s6515_s25 }
 0x7aa   :  { %2934 = vrot.lane.b32.xlu0 %v8150_v8, %s6518_s16 }
 0x7ab   :  { %3176 = vrot.lane.b32.xlu1 %v8144_v63, %s6513_s28 }
 0x7ae   :  { %2980 = vrot.lane.b32.xlu0 %v8150_v8, %s6517_s18 }
 0x7af   :  { %3222 = vrot.lane.b32.xlu1 %v8144_v63, %s6511_s12 }
 0x7b2   :  { %3026 = vrot.lane.b32.xlu0 %v8150_v8, %s6516_s15 }
 0x7b3   :  { %3268 = vrot.lane.b32.xlu1 %v8144_v63, %s6512_s13 }
 0x7b6   :  { %3072 = vrot.lane.b32.xlu0 %v8150_v8, %s6515_s25 }
 0x7b7   :  { %3132 = vrot.lane.b32.xlu1 %v8150_v8, %s6514_s30 }
 0x7ba   :  { %3178 = vrot.lane.b32.xlu0 %v8150_v8, %s6513_s28 }
 0x7bb   :  { %2938 = vrot.lane.b32.xlu1 %v8153_v35, %s6518_s16 }
 0x7be   :  { %3224 = vrot.lane.b32.xlu0 %v8150_v8, %s6511_s12 }
 0x7bf   :  { %2984 = vrot.lane.b32.xlu1 %v8153_v35, %s6517_s18 }
 0x7c2   :  { %3270 = vrot.lane.b32.xlu0 %v8150_v8, %s6512_s13 }
 0x7c3   :  { %3030 = vrot.lane.b32.xlu1 %v8153_v35, %s6516_s15 }
 0x7c6   :  { %2940 = vrot.lane.b32.xlu0 %v8188_v59, %s6518_s16 }
 0x7c7   :  { %3076 = vrot.lane.b32.xlu1 %v8153_v35, %s6515_s25 }
 0x7ca   :  { %2986 = vrot.lane.b32.xlu0 %v8188_v59, %s6517_s18 }
 0x7cb   :  { %3136 = vrot.lane.b32.xlu1 %v8153_v35, %s6514_s30 }
 0x7ce   :  { %3032 = vrot.lane.b32.xlu0 %v8188_v59, %s6516_s15 }
 0x7cf   :  { %3182 = vrot.lane.b32.xlu1 %v8153_v35, %s6513_s28 }
 0x7d2   :  { %3078 = vrot.lane.b32.xlu0 %v8188_v59, %s6515_s25 }
 0x7d3   :  { %3228 = vrot.lane.b32.xlu1 %v8153_v35, %s6511_s12 }
 0x7d6   :  { %3138 = vrot.lane.b32.xlu0 %v8188_v59, %s6514_s30 }
 0x7d7   :  { %2942 = vrot.lane.b32.xlu1 %v8191_v47, %s6518_s16 }
 0x7da   :  { %3034 = vrot.lane.b32.xlu0 %v8191_v47, %s6516_s15 }
 0x7db   :  { %2988 = vrot.lane.b32.xlu1 %v8191_v47, %s6517_s18 }
 0x7de   :  { %3080 = vrot.lane.b32.xlu0 %v8191_v47, %s6515_s25 }
 0x7df   :  { %3140 = vrot.lane.b32.xlu1 %v8191_v47, %s6514_s30 }
 0x7e2   :  { %3184 = vrot.lane.b32.xlu0 %v8188_v59, %s6513_s28 }
 0x7e3   :  { %3186 = vrot.lane.b32.xlu1 %v8191_v47, %s6513_s28 }
 0x7e6   :  { %3230 = vrot.lane.b32.xlu0 %v8188_v59, %s6511_s12 }
 0x7e7   :  { %3232 = vrot.lane.b32.xlu1 %v8191_v47, %s6511_s12 }
 0x7ea   :  { %3272 = vrot.lane.b32.xlu0 %v8147_v33, %s6512_s13 }
 0x7eb   :  { %3274 = vrot.lane.b32.xlu1 %v8153_v35, %s6512_s13 }
 0x7ee   :  { %3276 = vrot.lane.b32.xlu0 %v8188_v59, %s6512_s13 }
 0x7ef   :  { %3278 = vrot.lane.b32.xlu1 %v8191_v47, %s6512_s13 }
 0x804   :  { %v2933_v60 = vpop.permute.xlu0 %2932 }
 0x805   :  { %v2937_v21 = vpop.permute.xlu1 %2936 }
 0x808   :  { %v3025_v42 = vpop.permute.xlu0 %3024 }
 0x809   :  { %v8279_v37 = vpop.permute.xlu1 %2982 }
 0x80c   :  { %v3131_v30 = vpop.permute.xlu0 %3130 }
 0x80d   :  { %v2979_v56 = vpop.permute.xlu1 %2978  ;;  %v8282_v38 = vsel %vm201_vm3, %v3129_v24, %v3131_v30 }
 0x80e   :  { %3154 = vst [vmem:[#allocation5 + $0xf0] sm:$0xff] %v8282_v38 }
 0x810   :  { %v8287_v44 = vpop.permute.xlu0 %3134 }
 0x811   :  { %v8285_v3 = vpop.permute.xlu1 %3028 }
 0x814   :  { %v8291_v51 = vpop.permute.xlu0 %3180 }
 0x815   :  { %v8289_v10 = vpop.permute.xlu1 %3074 }
 0x818   :  { %v8293_v17 = vpop.permute.xlu0 %3226 }
 0x819   :  { %v3071_v54 = vpop.permute.xlu1 %3070 }
 0x81c   :  { %v2935_v1 = vpop.permute.xlu0 %2934 }
 0x81d   :  { %v3177_v45 = vpop.permute.xlu1 %3176  ;;  %v2946_v11 = vsel %vm706_vm7, %v2933_v60, %v2935_v1  ;;  %v2947_v14 = vsel %vm706_vm7, %v2935_v1, %v2937_v21 }
 0x81e   :  { %v8296_v16 = vsel %vm838_vm2, %v3175_v25, %v3177_v45  ;;  %2958 = vst [vmem:[#allocation5] sm:$0xff] %v2946_v11  ;;  %2959 = vst [vmem:[#allocation5 + $0x8] sm:$0xff] %v2947_v14 }
 0x81f   :  { %3200 = vst [vmem:[#allocation5 + $0x120] sm:$0xff] %v8296_v16 }
 0x820   :  { %v2981_v6 = vpop.permute.xlu0 %2980 }
 0x821   :  { %v3223_v22 = vpop.permute.xlu1 %3222  ;;  %v2992_v46 = vsel %vm1031_vm6, %v2979_v56, %v2981_v6  ;;  %v2993_v2 = vsel %vm1031_vm6, %v2981_v6, %v8279_v37 }
 0x822   :  { %v3234_v52 = vsel %vm313_vm0, %v3221_v4, %v3223_v22  ;;  %3004 = vst [vmem:[#allocation5 + $0x30] sm:$0xff] %v2992_v46  ;;  %3005 = vst [vmem:[#allocation5 + $0x38] sm:$0xff] %v2993_v2  ;;  %v6131_v0 = vpack.c.bf16 %v2993_v2, %v2947_v14  ;;  %v6133_v23 = vpack.c.bf16 %v2992_v46, %v2946_v11 }
 0x823   :  { %3246 = vst [vmem:[#allocation5 + $0x150] sm:$0xff] %v3234_v52  ;;  %v6141_v2 = vpack.c.bf16 %v8282_v38, %v8144_v63 }
 0x824   :  { %v3027_v19 = vpop.permute.xlu0 %3026  ;;  %6132 = vmatprep.subr.bf16.mxu1 %v6131_v0 }
 0x825   :  { %v3269_v57 = vpop.permute.xlu1 %3268  ;;  %v3038_v41 = vsel %vm987_vm5, %v3025_v42, %v3027_v19  ;;  %v3039_v31 = vsel %vm987_vm5, %v3027_v19, %v8285_v3  ;;  %6134 = vmatpush1.bf16.msra.mxu1 %v6133_v23 }
 0x826   :  { %v3280_v29 = vsel %vm397_vm1, %v3267_v50, %v3269_v57  ;;  %3050 = vst [vmem:[#allocation5 + $0x60] sm:$0xff] %v3038_v41  ;;  %3051 = vst [vmem:[#allocation5 + $0x68] sm:$0xff] %v3039_v31 }
 0x827   :  { %3292 = vst [vmem:[#allocation5 + $0x180] sm:$0xff] %v3280_v29 }
 0x828   :  { %v3073_v24 = vpop.permute.xlu0 %3072 }
 0x829   :  { %v3133_v25 = vpop.permute.xlu1 %3132  ;;  %v3084_v56 = vsel %vm943_vm4, %v3071_v54, %v3073_v24  ;;  %v3085_v50 = vsel %vm943_vm4, %v3073_v24, %v8289_v10 }
 0x82a   :  { %v3143_v4 = vsel %vm201_vm3, %v3131_v30, %v3133_v25  ;;  %v8312_v60 = vsel %vm201_vm3, %v3133_v25, %v8287_v44  ;;  %3096 = vst [vmem:[#allocation5 + $0x90] sm:$0xff] %v3084_v56  ;;  %3097 = vst [vmem:[#allocation5 + $0x98] sm:$0xff] %v3085_v50  ;;  %v6135_v42 = vpack.c.bf16 %v3085_v50, %v3039_v31  ;;  %v8346_v31 = vld [vmem:[%s9699_s3] sm:$0x7] }
 0x82b   :  { %3155 = vst [vmem:[#allocation5 + $0xf8] sm:$0xff] %v3143_v4  ;;  %3156 = vst [vmem:[#allocation5 + $0x100] sm:$0xff] %v8312_v60  ;;  %v6137_v1 = vpack.c.bf16 %v3084_v56, %v3038_v41  ;;  %v6139_v30 = vpack.c.bf16 %v3143_v4, %v8150_v8  ;;  %v6145_v41 = vpack.c.bf16 %v3234_v52, %v8296_v16 }
 0x82c   :  { %v3179_v14 = vpop.permute.xlu0 %3178  ;;  %6136 = vmatprep.subr.bf16.mxu1 %v6135_v42 }
 0x82d   :  { %v2939_v11 = vpop.permute.xlu1 %2938  ;;  %v3189_v46 = vsel %vm838_vm2, %v3177_v45, %v3179_v14  ;;  %v8323_v54 = vsel %vm838_vm2, %v3179_v14, %v8291_v51  ;;  %6138 = vmatpush1.bf16.msra.mxu1 %v6137_v1 }
 0x82e   :  { %v2948_v6 = vsel %vm706_vm7, %v2937_v21, %v2939_v11  ;;  %3201 = vst [vmem:[#allocation5 + $0x128] sm:$0xff] %v3189_v46  ;;  %3202 = vst [vmem:[#allocation5 + $0x130] sm:$0xff] %v8323_v54  ;;  %6140 = vmatprep.subr.bf16.mxu1 %v6139_v30 }
 0x82f   :  { %2960 = vst [vmem:[#allocation5 + $0x10] sm:$0xff] %v2948_v6 }
 0x830   :  { %v3225_v23 = vpop.permute.xlu0 %3224 }
 0x831   :  { %v2985_v0 = vpop.permute.xlu1 %2984  ;;  %v3235_v21 = vsel %vm313_vm0, %v3223_v22, %v3225_v23  ;;  %v8333_v45 = vsel %vm313_vm0, %v3225_v23, %v8293_v17  ;;  %6142 = vmatpush1.bf16.msra.mxu1 %v6141_v2 }
 0x832   :  { %v2994_v8 = vsel %vm1031_vm6, %v8279_v37, %v2985_v0  ;;  %3247 = vst [vmem:[#allocation5 + $0x158] sm:$0xff] %v3235_v21  ;;  %3248 = vst [vmem:[#allocation5 + $0x160] sm:$0xff] %v8333_v45  ;;  %v6143_v19 = vpack.c.bf16 %v3235_v21, %v3189_v46 }
 0x833   :  { %3006 = vst [vmem:[#allocation5 + $0x40] sm:$0xff] %v2994_v8  ;;  %v6149_v50 = vpack.c.bf16 %v2994_v8, %v2948_v6 }
 0x834   :  { %v8337_v38 = vpop.permute.xlu0 %3270  ;;  %6144 = vmatprep.subr.bf16.mxu1 %v6143_v19 }
 0x835   :  { %v3031_v63 = vpop.permute.xlu1 %3030  ;;  %v3281_v22 = vsel %vm397_vm1, %v3269_v57, %v8337_v38  ;;  %6146 = vmatpush1.bf16.msra.mxu1 %v6145_v41 }
 0x836   :  { %v3040_v37 = vsel %vm987_vm5, %v8285_v3, %v3031_v63  ;;  %3293 = vst [vmem:[#allocation5 + $0x188] sm:$0xff] %v3281_v22  ;;  %3372 = vmatprep.subr.mxu1 %v3281_v22 }
 0x837   :  { %3052 = vst [vmem:[#allocation5 + $0x70] sm:$0xff] %v3040_v37 }
 0x838   :  { %v2941_v52 = vpop.permute.xlu0 %2940 }
 0x839   :  { %v3077_v16 = vpop.permute.xlu1 %3076  ;;  %v2949_v24 = vsel %vm706_vm7, %v2939_v11, %v2941_v52  ;;  %3373 = vmatpush1.msra.mxu1 %v3280_v29 }
 0x83a   :  { %v3086_v25 = vsel %vm943_vm4, %v8289_v10, %v3077_v16  ;;  %2961 = vst [vmem:[#allocation5 + $0x18] sm:$0xff] %v2949_v24  ;;  %5966 = vmatmul.mubr.msk.f32.vlgmr.msra.gmra.mrb[8].mxu1 %vm1154_vm8, %v8346_v31 }
 0x83b   :  { %3098 = vst [vmem:[#allocation5 + $0xa0] sm:$0xff] %v3086_v25  ;;  %3562 = vmatprep.mubr.f32.mxu1 %v9707_v5  ;;  %v6153_v2 = vpack.c.bf16 %v3086_v25, %v3040_v37 }
 0x83c   :  { %v2987_v57 = vpop.permute.xlu0 %2986 }
 0x83d   :  { %v3137_v3 = vpop.permute.xlu1 %3136  ;;  %v2995_v56 = vsel %vm1031_vm6, %v2985_v0, %v2987_v57 }
 0x83e   :  { %v3145_v4 = vsel %vm201_vm3, %v8287_v44, %v3137_v3  ;;  %3007 = vst [vmem:[#allocation5 + $0x48] sm:$0xff] %v2995_v56  ;;  %v6147_v10 = vpack.c.bf16 %v2995_v56, %v2949_v24 }
 0x83f   :  { %3157 = vst [vmem:[#allocation5 + $0x108] sm:$0xff] %v3145_v4  ;;  %v6155_v23 = vpack.c.bf16 %v3145_v4, %v8153_v35 }
 0x840   :  { %v3033_v29 = vpop.permute.xlu0 %3032  ;;  %6148 = vmatprep.subr.bf16.mxu0 %v6147_v10 }
 0x841   :  { %v8357_v42 = vpop.permute.xlu1 %3182  ;;  %v3041_v11 = vsel %vm987_vm5, %v3031_v63, %v3033_v29  ;;  %6150 = vmatpush1.bf16.msra.mxu0 %v6149_v50 }
 0x842   :  { %v3191_v1 = vsel %vm838_vm2, %v8291_v51, %v8357_v42  ;;  %3053 = vst [vmem:[#allocation5 + $0x78] sm:$0xff] %v3041_v11 }
 0x843   :  { %3203 = vst [vmem:[#allocation5 + $0x138] sm:$0xff] %v3191_v1 }
 0x844   :  { %v3079_v14 = vpop.permute.xlu0 %3078 }
 0x845   :  { %v8363_v44 = vpop.permute.xlu1 %3228  ;;  %v3087_v6 = vsel %vm943_vm4, %v3077_v16, %v3079_v14 }
 0x846   :  { %v3237_v30 = vsel %vm313_vm0, %v8293_v17, %v8363_v44  ;;  %3099 = vst [vmem:[#allocation5 + $0xa8] sm:$0xff] %v3087_v6  ;;  %v6151_v46 = vpack.c.bf16 %v3087_v6, %v3041_v11  ;;  %v6157_v17 = vpack.c.bf16 %v8312_v60, %v8147_v33 }
 0x847   :  { %3249 = vst [vmem:[#allocation5 + $0x168] sm:$0xff] %v3237_v30  ;;  %v6159_v37 = vpack.c.bf16 %v3237_v30, %v3191_v1 }
 0x848   :  { %v3139_v51 = vpop.permute.xlu0 %3138  ;;  %6152 = vmatprep.subr.bf16.mxu0 %v6151_v46 }
 0x849   :  { %v2943_v0 = vpop.permute.xlu1 %2942  ;;  %v3146_v19 = vsel %vm201_vm3, %v3137_v3, %v3139_v51  ;;  %6154 = vmatpush1.bf16.msra.mxu0 %v6153_v2 }
 0x84a   :  { %v2950_v8 = vsel %vm706_vm7, %v2941_v52, %v2943_v0  ;;  %v2951_v21 = vsel %vm706_vm7, %v2943_v0, %v8273_v20  ;;  %3158 = vst [vmem:[#allocation5 + $0x110] sm:$0xff] %v3146_v19  ;;  %6156 = vmatprep.subr.bf16.mxu0 %v6155_v23  ;;  %v6161_v52 = vpack.c.bf16 %v8333_v45, %v8323_v54 }
 0x84b   :  { %2962 = vst [vmem:[#allocation5 + $0x20] sm:$0xff] %v2950_v8  ;;  %2963 = vst [vmem:[#allocation5 + $0x28] sm:$0xff] %v2951_v21 }
 0x84c   :  { %v3035_v63 = vpop.permute.xlu0 %3034 }
 0x84d   :  { %v2989_v41 = vpop.permute.xlu1 %2988  ;;  %v3042_v20 = vsel %vm987_vm5, %v3033_v29, %v3035_v63  ;;  %v3043_v16 = vsel %vm987_vm5, %v3035_v63, %v8271_v13  ;;  %6158 = vmatpush1.bf16.msra.mxu0 %v6157_v17 }
 0x84e   :  { %v2996_v35 = vsel %vm1031_vm6, %v2987_v57, %v2989_v41  ;;  %v2997_v22 = vsel %vm1031_vm6, %v2989_v41, %v8277_v18  ;;  %3054 = vst [vmem:[#allocation5 + $0x80] sm:$0xff] %v3042_v20  ;;  %3055 = vst [vmem:[#allocation5 + $0x88] sm:$0xff] %v3043_v16  ;;  %6160 = vmatprep.subr.bf16.mxu0 %v6159_v37 }
 0x84f   :  { %3008 = vst [vmem:[#allocation5 + $0x50] sm:$0xff] %v2996_v35  ;;  %3009 = vst [vmem:[#allocation5 + $0x58] sm:$0xff] %v2997_v22  ;;  %v6163_v33 = vpack.c.bf16 %v2997_v22, %v2951_v21  ;;  %v6165_v60 = vpack.c.bf16 %v2996_v35, %v2950_v8 }
 0x850   :  { %v3081_v24 = vpop.permute.xlu0 %3080 }
 0x851   :  { %v3141_v25 = vpop.permute.xlu1 %3140  ;;  %6164 = vmatprep.subr.bf16.mxu1 %v6163_v33  ;;  %v3088_v3 = vsel %vm943_vm4, %v3079_v14, %v3081_v24  ;;  %v3089_v13 = vsel %vm943_vm4, %v3081_v24, %v8275_v62  ;;  %6162 = vmatpush1.bf16.msra.mxu0 %v6161_v52  ;;  %v6173_v62 = vpack.c.bf16 %v3146_v19, %v8188_v59 }
 0x852   :  { %v3147_v18 = vsel %vm201_vm3, %v3139_v51, %v3141_v25  ;;  %6166 = vmatpush1.bf16.msra.mxu1 %v6165_v60  ;;  %3100 = vst [vmem:[#allocation5 + $0xb0] sm:$0xff] %v3088_v3  ;;  %3101 = vst [vmem:[#allocation5 + $0xb8] sm:$0xff] %v3089_v13  ;;  %v6167_v57 = vpack.c.bf16 %v3089_v13, %v3043_v16  ;;  %v6169_v4 = vpack.c.bf16 %v3088_v3, %v3042_v20 }
 0x853   :  { %3159 = vst [vmem:[#allocation5 + $0x118] sm:$0xff] %v3147_v18  ;;  %v6171_v54 = vpack.c.bf16 %v3147_v18, %v8191_v47 }
 0x854   :  { %v3185_v10 = vpop.permute.xlu0 %3184  ;;  %6168 = vmatprep.subr.bf16.mxu1 %v6167_v57 }
 0x855   :  { %v3187_v56 = vpop.permute.xlu1 %3186  ;;  %v3192_v45 = vsel %vm838_vm2, %v8357_v42, %v3185_v10 }
 0x856   :  { %v3193_v50 = vsel %vm838_vm2, %v3185_v10, %v3187_v56  ;;  %6170 = vmatpush1.bf16.msra.mxu1 %v6169_v4  ;;  %3204 = vst [vmem:[#allocation5 + $0x140] sm:$0xff] %v3192_v45 }
 0x857   :  { %3205 = vst [vmem:[#allocation5 + $0x148] sm:$0xff] %v3193_v50  ;;  %6172 = vmatprep.subr.bf16.mxu1 %v6171_v54 }
 0x858   :  { %v3231_v1 = vpop.permute.xlu0 %3230 }
 0x859   :  { %v3233_v29 = vpop.permute.xlu1 %3232  ;;  %v3238_v11 = vsel %vm313_vm0, %v8363_v44, %v3231_v1 }
 0x85a   :  { %v3239_v14 = vsel %vm313_vm0, %v3231_v1, %v3233_v29  ;;  %6174 = vmatpush1.bf16.msra.mxu1 %v6173_v62  ;;  %3250 = vst [vmem:[#allocation5 + $0x170] sm:$0xff] %v3238_v11  ;;  %v6177_v42 = vpack.c.bf16 %v3238_v11, %v3192_v45 }
 0x85b   :  { %3251 = vst [vmem:[#allocation5 + $0x178] sm:$0xff] %v3239_v14  ;;  %v6175_v47 = vpack.c.bf16 %v3239_v14, %v3193_v50 }
 0x85c   :  { %v3273_v6 = vpop.permute.xlu0 %3272 }
 0x85d   :  { %v3275_v30 = vpop.permute.xlu1 %3274  ;;  %6176 = vmatprep.subr.bf16.mxu1 %v6175_v47  ;;  %v3282_v46 = vsel %vm397_vm1, %v8337_v38, %v3273_v6 }
 0x85e   :  { %v3283_v59 = vsel %vm397_vm1, %v3273_v6, %v3275_v30  ;;  %6178 = vmatpush1.bf16.msra.mxu1 %v6177_v42  ;;  %3294 = vst [vmem:[#allocation5 + $0x190] sm:$0xff] %v3282_v46 }
 0x85f   :  { %3295 = vst [vmem:[#allocation5 + $0x198] sm:$0xff] %v3283_v59  ;;  %3443 = vmatprep.subr.mxu0 %v3283_v59 }
 0x860   :  { %3444 = vmatpush1.msra.mxu0 %v3282_v46  ;;  %v3277_v2 = vpop.permute.xlu0 %3276 }
 0x861   :  { %v3279_v44 = vpop.permute.xlu1 %3278  ;;  %5967 = vmatmul.mubr.msk.f32.vlgmr.msra.gmra.mrb[10].mxu0 %vm1154_vm8, %v8346_v31  ;;  %v3284_v0 = vsel %vm397_vm1, %v3275_v30, %v3277_v2 }
 0x862   :  { %v3285_v51 = vsel %vm397_vm1, %v3277_v2, %v3279_v44  ;;  %4180 = vmatprep.mubr.f32.mxu0 %v9707_v5  ;;  %3296 = vst [vmem:[#allocation5 + $0x1a0] sm:$0xff] %v3284_v0 }
 0x863   :  { %3297 = vst [vmem:[#allocation5 + $0x1a8] sm:$0xff] %v3285_v51  ;;  %3514 = vmatprep.subr.mxu1 %v3285_v51 }
 0x864   :  { %3515 = vmatpush1.msra.mxu1 %v3284_v0 }
 0x865   :  { %5968 = vmatmul.mubr.msk.f32.vlgmr.msra.gmra.mrb[10].mxu1 %vm1154_vm8, %v8346_v31 }
 0x866   :  { %4251 = vmatprep.mubr.f32.mxu1 %v9707_v5 }
 0x90d   :  { %v8407_v38 = vpop.f32.mrb[8].mxu1 }
 0x90e   :  { %v3569_v23 = vmul.f32 %v8407_v38, %v8128_v28  ;;  %v8411_v8 = vpop.f32.mrb[9].mxu1 }
 0x90f   :  { %v3570_v21 = vmul.f32 %v8411_v8, %v8134_v9 }
 0x910   :  { %v3575_v19 = vsel %vm2095_vm13, %v3569_v23, 0.0 }
 0x911   :  { %v3576_v17 = vsel %vm2095_vm13, %v3570_v21, 0.0 }
 0x912   :  { %v3577_v41 = vadd.f32 %v3576_v17, %v3575_v19 }
 0x934   :  { %v8417_v63 = vpop.f32.mrb[10].mxu0 }
 0x935   :  { %v3571_v31 = vmul.f32 %v8417_v63, %v8131_v26  ;;  %v8421_v37 = vpop.f32.mrb[11].mxu0 }
 0x936   :  { %v3572_v35 = vmul.f32 %v8421_v37, %v8137_v27 }
 0x937   :  { %v3578_v22 = vsel %vm2095_vm13, %v3571_v31, 0.0 }
 0x938   :  { %v3579_v20 = vadd.f32 %v3578_v22, %v3577_v41  ;;  %v3580_v16 = vsel %vm2095_vm13, %v3572_v35, 0.0  ;;  %v8427_v33 = vpop.f32.mrb[10].mxu1 }
 0x939   :  { %v3573_v60 = vmul.f32 %v8427_v33, %v8176_v48  ;;  %v8431_v52 = vpop.f32.mrb[11].mxu1 }
 0x93a   :  { %v3581_v25 = vadd.f32 %v3580_v16, %v3579_v20  ;;  %v3574_v24 = vmul.f32 %v8431_v52, %v8180_v61 }
 0x93b   :  { %v3582_v18 = vsel %vm2095_vm13, %v3573_v60, 0.0 }
 0x93c   :  { %v3583_v3 = vadd.f32 %v3582_v18, %v3581_v25  ;;  %v3584_v13 = vsel %vm2095_vm13, %v3574_v24, 0.0 }
 0x93e   :  { %v3585_v57 = vadd.f32 %v3584_v13, %v3583_v3 }
 0x940   :  { %3586 = vadd.xlane.f32.xlu0 %v3585_v57 }
 0x9cd   :  { %v3587_v4 = vpop.xlane.xlu0 %3586 }
 0x9ce   :  { %v3588_v56 = vrot.slane %v3587_v4, 4 }
 0x9d0   :  { %v3589_v10 = vadd.f32 %v3588_v56, %v3587_v4  ;;  %v3883_v4 = vld [vmem:[%s9705_s9 + $0x1c] sm:$0x7] }
 0x9d2   :  { %v3590_v54 = vrot.slane %v3589_v10, 2 }
 0x9d4   :  { %v3591_v45 = vadd.f32 %v3590_v54, %v3589_v10 }
 0x9d6   :  { %v3592_v50 = vrot.slane %v3591_v45, 1 }
 0x9d8   :  { %v3593_v62 = vadd.f32 %v3592_v50, %v3591_v45 }
 0x9da   :  { %6327 = vpush %v3593_v62 }
 0xa0b   :  { %s6328_s23 = spop %6327 }
 0xa0c   :  { %v3595_v29 = vstv %s6328_s23  ;;  %s5936_s23 = sshll.u32 %s6524_s22, 4  ;;  %s5937_s23 = int_to_ptr.vmem [resolvable:$true] %s5936_s23 }
 0xa0d   :  { %v3596_v1 = vmul.f32 0.0006510417, %v3595_v29  ;;  %s6485_s24 = scalar_lea.vmem %s5937_s23, 16  ;;  %s6489_s26 = scalar_lea.vmem %s5937_s23, 32 }
 0xa0e   :  { %p6486_p0 = scmp.ne.s32.totalorder %s5937_s23, %s6485_s24  ;;  %p6490_p1 = scmp.lt.s32.totalorder %s5937_s23, %s5937_s23 }
 0xa0f   :  { %v3597_v11 = vsub.f32 %v8407_v38, %v3596_v1  ;;  %v3598_v14 = vsub.f32 %v8411_v8, %v3596_v1  ;;  %v3599_v47 = vsub.f32 %v8417_v63, %v3596_v1  ;;  %v3600_v42 = vsub.f32 %v8421_v37, %v3596_v1  ;;  %p6491_p2 = scmp.lt.s32.totalorder %s6489_s26, %s6485_s24 }
 0xa10   :  { %v3601_v30 = vsub.f32 %v8427_v33, %v3596_v1  ;;  %v3602_v6 = vsub.f32 %v8431_v52, %v3596_v1 }
 0xa11   :  { %v3603_v46 = vmul.f32 %v3597_v11, %v8128_v28  ;;  %v3604_v59 = vmul.f32 %v3598_v14, %v8134_v9  ;;  %v3605_v44 = vmul.f32 %v3599_v47, %v8131_v26  ;;  %v3606_v2 = vmul.f32 %v3600_v42, %v8137_v27  ;;  %p6492_p3 = por %p6491_p2, %p6490_p1 }
 0xa12   :  { %v3607_v0 = vmul.f32 %v3601_v30, %v8176_v48  ;;  %v3608_v19 = vmul.f32 %v3602_v6, %v8180_v61 }
 0xa13   :  { %v3609_v51 = vmul.f32 %v3603_v46, %v3603_v46  ;;  %v3610_v23 = vmul.f32 %v3604_v59, %v3604_v59  ;;  %v3611_v21 = vmul.f32 %v3605_v44, %v3605_v44  ;;  %v3612_v17 = vmul.f32 %v3606_v2, %v3606_v2  ;;  %p6493_p4 = pnand %p6492_p3, %p6486_p0 }
 0xa14   :  { %v3613_v22 = vmul.f32 %v3607_v0, %v3607_v0  ;;  %v3614_v60 = vmul.f32 %v3608_v19, %v3608_v19 }
 0xa15   :  { %v3615_v41 = vsel %vm2095_vm13, %v3609_v51, 0.0  ;;  %v3616_v31 = vsel %vm2095_vm13, %v3610_v23, 0.0  ;;  %v3618_v20 = vsel %vm2095_vm13, %v3611_v21, 0.0  ;;  %v3620_v25 = vsel %vm2095_vm13, %v3612_v17, 0.0 }
 0xa16   :  { %v3617_v35 = vadd.f32 %v3616_v31, %v3615_v41  ;;  %v3622_v18 = vsel %vm2095_vm13, %v3613_v22, 0.0  ;;  %v3624_v13 = vsel %vm2095_vm13, %v3614_v60, 0.0  ;;  %v3647_v31 = vld [vmem:[%s9705_s9 + $0x4] sm:$0x77]  ;;  %v3679_v22 = vcombine.low %v8176_v48, %v8180_v61 }
 0xa18   :  { %v3619_v16 = vadd.f32 %v3618_v20, %v3617_v35 }
 0xa1a   :  { %v3621_v24 = vadd.f32 %v3620_v25, %v3619_v16 }
 0xa1c   :  { %v3623_v3 = vadd.f32 %v3622_v18, %v3621_v24 }
 0xa1e   :  { %v3625_v57 = vadd.f32 %v3624_v13, %v3623_v3 }
 0xa20   :  { %3626 = vadd.xlane.f32.xlu1 %v3625_v57 }
 0xa31   :  { %3903 = vrot.lane.b32.xlu1 %v3883_v4, %s6515_s25 }
 0xaad   :  { %v3627_v56 = vpop.xlane.xlu1 %3626 }
 0xaae   :  { %v3628_v10 = vrot.slane %v3627_v56, 4 }
 0xab0   :  { %v3629_v54 = vadd.f32 %v3628_v10, %v3627_v56 }
 0xab2   :  { %v3630_v45 = vrot.slane %v3629_v54, 2 }
 0xab4   :  { %v3631_v50 = vadd.f32 %v3630_v45, %v3629_v54 }
 0xab6   :  { %v3632_v62 = vrot.slane %v3631_v50, 1 }
 0xab8   :  { %v3633_v29 = vadd.f32 %v3632_v62, %v3631_v50 }
 0xaba   :  { %6329 = vpush %v3633_v29 }
 0xaeb   :  { %s6330_s27 = spop %6329 }
 0xaec   :  { %v3635_v1 = vstv %s6330_s27 }
 0xaed   :  { %v3636_v11 = vmul.f32 0.0006514658, %v3635_v1 }
 0xaef   :  { %6477 = vrsqrt.f32 %v3636_v11  ;;  %vm3639_vm9 = vcmp.eq.f32.partialorder %v3636_v11, inf  ;;  %v3642_v42 = vand.u32 2147483648, %v3636_v11  ;;  %vm3641_vm10 = vcmp.eq.f32.partialorder %v3636_v11, 0.0 }
 0xaf9   :  { %v6478_v14 = vpop.eup %6477 }
 0xafa   :  { %v3638_v47 = vmul.f32 %v6478_v14, %v3636_v11 }
 0xafc   :  { %v3640_v30 = vsel %vm3639_vm9, %v3636_v11, %v3638_v47 }
 0xafd   :  { %v3643_v6 = vsel %vm3641_vm10, %v3642_v42, %v3640_v30 }
 0xafe   :  { %v3644_v46 = vadd.f32 1e-08, %v3643_v6 }
 0xb00   :  { %6479 = vrcp.f32 %v3644_v46 }
 0xb0a   :  { %v6480_v59 = vpop.eup %6479 }
 0xb0b   :  { %v3646_v44 = vmul.f32 %v6480_v59, %v7717_v43 }
 0xb0d   :  { %v3650_v2 = vmul.f32 %v3646_v44, %v8407_v38  ;;  %v3651_v0 = vmul.f32 %v3646_v44, %v8411_v8  ;;  %v3652_v51 = vmul.f32 %v3646_v44, %v8417_v63  ;;  %v3653_v23 = vmul.f32 %v3646_v44, %v8421_v37  ;;  %v3648_v38 = vld [vmem:[%s9705_s9 + $0xc] sm:$0x77]  ;;  %v3649_v37 = vld [vmem:[%s9705_s9 + $0x14] sm:$0x77] }
 0xb0e   :  { %v3654_v21 = vmul.f32 %v3646_v44, %v8427_v33  ;;  %v3655_v19 = vmul.f32 %v3646_v44, %v8431_v52  ;;  %v3677_v8 = vcombine.low %v8128_v28, %v8134_v9  ;;  %v3678_v63 = vcombine.low %v8131_v26, %v8137_v27 }
 0xb0f   :  { %v3662_v17 = vcombine.low %v3650_v2, %v3651_v0  ;;  %v3663_v41 = vcombine.low %v3652_v51, %v3653_v23 }
 0xb10   :  { %v3664_v35 = vcombine.low %v3654_v21, %v3655_v19 }
 0xb11   :  { %v3668_v33 = vadd.f32 %v3662_v17, %v3647_v31  ;;  %v3669_v52 = vadd.f32 %v3663_v41, %v3648_v38 }
 0xb12   :  { %v3670_v20 = vadd.f32 %v3664_v35, %v3649_v37 }
 0xb13   :  { %v5969_v16 = vclamps-f32 %v3668_v33, 1.0  ;;  %v5970_v60 = vclamps-f32 %v3669_v52, 1.0 }
 0xb14   :  { %v5971_v25 = vclamps-f32 %v3670_v20, 1.0 }
 0xb15   :  { %v3683_v24 = vmul.f32 %v5969_v16, %v3677_v8  ;;  %v3684_v18 = vmul.f32 %v5970_v60, %v3678_v63 }
 0xb16   :  { %v3685_v3 = vmul.f32 %v5971_v25, %v3679_v22 }
 0xb17   :  { %3686 = vst [vmem:[%s9705_s9 + $0x4] sm:$0x77] %v3683_v24  ;;  %3687 = vst [vmem:[%s9705_s9 + $0xc] sm:$0x77] %v3684_v18 }
 0xb18   :  { %3688 = vst [vmem:[%s9705_s9 + $0x14] sm:$0x77] %v3685_v3 }
 0xb1e   :  { %v8493_v28 = vld [vmem:[%s9705_s9 + $0x8] sm:$0x77]  ;;  %v3690_v26 = vld [vmem:[%s9705_s9] sm:$0x77] }
 0xb1f   :  { %3705 = vrot.lane.b32.xlu1 %v8493_v28, %s6512_s13  ;;  %3701 = vrot.lane.b32.xlu0 %v3690_v26, %s6512_s13  ;;  %v8504_v9 = vld [vmem:[%s9705_s9 + $0x8] sm:$0x77]  ;;  %v8509_v27 = vld [vmem:[%s9705_s9] sm:$0x77]  ;;  %v3698_v21 = vcombine.high %v3690_v26, %v3690_v26  ;;  %v3699_v52 = vcombine.high %v8493_v28, %v8493_v28 }
 0xb20   :  { %v3733_v48 = vld [vmem:[%s9705_s9] sm:$0x77]  ;;  %v3863_v57 = vld [vmem:[%s9705_s9 + $0xc] sm:$0x77]  ;;  %v3864_v10 = vld [vmem:[%s9705_s9 + $0x14] sm:$0x77]  ;;  %v3784_v31 = vcombine.high %v8509_v27, %v8509_v27  ;;  %v3742_v20 = vcombine.high %v8504_v9, %v8504_v9 }
 0xb21   :  { %v8521_v61 = vld [vmem:[%s9705_s9 + $0x4] sm:$0x77]  ;;  %v3869_v56 = vcombine.high %v3863_v57, %v3863_v57  ;;  %3876 = vst [vmem:[#allocation5 + $0xd0] sm:$0x7] %v3863_v57  ;;  %v8543_v45 = vld [vmem:[%s9705_s9 + $0xc] sm:$0x77]  ;;  %v3870_v50 = vcombine.high %v3864_v10, %v3864_v10  ;;  %v3741_v17 = vcombine.high %v3733_v48, %v3733_v48 }
 0xb22   :  { %v3862_v13 = vld [vmem:[%s9705_s9 + $0x4] sm:$0x77]  ;;  %3878 = vst [vmem:[#allocation5 + $0xe0] sm:$0x7] %v3864_v10  ;;  %v8555_v29 = vld [vmem:[%s9705_s9 + $0xc] sm:$0x77]  ;;  %v3888_v63 = vcombine.high %v8521_v61, %v8521_v61  ;;  %v3932_v16 = vcombine.high %v8543_v45, %v8543_v45 }
 0xb23   :  { %3748 = vrot.lane.b32.xlu1 %v8504_v9, %s6511_s12  ;;  %3787 = vrot.lane.b32.xlu0 %v8509_v27, %s6513_s28  ;;  %v3868_v4 = vcombine.high %v3862_v13, %v3862_v13  ;;  %3874 = vst [vmem:[#allocation5 + $0xc0] sm:$0x7] %v3862_v13  ;;  %v8538_v54 = vld [vmem:[%s9705_s9 + $0x8] sm:$0x77]  ;;  %3877 = vst [vmem:[#allocation5 + $0xd8] sm:$0x7] %v3869_v56  ;;  %v3975_v25 = vcombine.high %v8555_v29, %v8555_v29 }
 0xb24   :  { %3879 = vst [vmem:[#allocation5 + $0xe8] sm:$0x7] %v3870_v50  ;;  %v3820_v62 = vld [vmem:[%s9705_s9 + $0x8] sm:$0x77]  ;;  %v3819_v1 = vld [vmem:[%s9705_s9] sm:$0x77]  ;;  %v3785_v33 = vcombine.high %v8538_v54, %v8538_v54 }
 0xb25   :  { %3875 = vst [vmem:[#allocation5 + $0xc8] sm:$0x7] %v3868_v4  ;;  %v8566_v11 = vld [vmem:[%s9705_s9 + $0x10] sm:$0x77]  ;;  %v3966_v30 = vld [vmem:[%s9705_s9 + $0x4] sm:$0x77]  ;;  %v3827_v35 = vcombine.high %v3819_v1, %v3819_v1  ;;  %v3828_v22 = vcombine.high %v3820_v62, %v3820_v62 }
 0xb26   :  { %v3881_v14 = vld [vmem:[%s9705_s9 + $0xc] sm:$0x77]  ;;  %v3882_v46 = vld [vmem:[%s9705_s9 + $0x14] sm:$0x77]  ;;  %v3923_v59 = vld [vmem:[%s9705_s9 + $0x4] sm:$0x77]  ;;  %v3974_v37 = vcombine.high %v3966_v30, %v3966_v30  ;;  %v3786_v3 = vcombine.high %v8566_v11, %v8566_v11 }
 0xb27   :  { %3744 = vrot.lane.b32.xlu1 %v3733_v48, %s6511_s12  ;;  %3891 = vrot.lane.b32.xlu0 %v8521_v61, %s6515_s25  ;;  %v8577_v47 = vld [vmem:[%s9705_s9 + $0x10] sm:$0x77]  ;;  %v3693_v44 = vld [vmem:[%s9705_s9 + $0x18] sm:$0x7]  ;;  %v3931_v8 = vcombine.high %v3923_v59, %v3923_v59  ;;  %v3889_v60 = vcombine.high %v3881_v14, %v3881_v14  ;;  %v3890_v9 = vcombine.high %v3882_v46, %v3882_v46 }
 0xb28   :  { %v3692_v42 = vld [vmem:[%s9705_s9 + $0x10] sm:$0x77]  ;;  %v4009_v2 = vld [vmem:[%s9705_s9 + $0x4] sm:$0x77]  ;;  %v3736_v0 = vld [vmem:[%s9705_s9 + $0x18] sm:$0x7]  ;;  %v3829_v26 = vcombine.high %v8577_v47, %v8577_v47 }
 0xb29   :  { %v3735_v6 = vld [vmem:[%s9705_s9 + $0x10] sm:$0x77]  ;;  %v3779_v41 = vld [vmem:[%s9705_s9 + $0x18] sm:$0x7]  ;;  %v3700_v24 = vcombine.high %v3692_v42, %v3692_v42  ;;  %v4017_v28 = vcombine.high %v4009_v2, %v4009_v2  ;;  %v3926_v48 = vld [vmem:[%s9705_s9 + $0x1c] sm:$0x7] }
 0xb2a   :  { %v3925_v51 = vld [vmem:[%s9705_s9 + $0x14] sm:$0x77]  ;;  %v4010_v23 = vld [vmem:[%s9705_s9 + $0xc] sm:$0x77]  ;;  %v3743_v18 = vcombine.high %v3735_v6, %v3735_v6  ;;  %v3969_v13 = vld [vmem:[%s9705_s9 + $0x1c] sm:$0x7] }
 0xb2b   :  { %3791 = vrot.lane.b32.xlu1 %v8538_v54, %s6513_s28  ;;  %3938 = vrot.lane.b32.xlu0 %v8543_v45, %s6516_s15  ;;  %v3968_v19 = vld [vmem:[%s9705_s9 + $0x14] sm:$0x77]  ;;  %v4018_v61 = vcombine.high %v4010_v23, %v4010_v23  ;;  %v3933_v57 = vcombine.high %v3925_v51, %v3925_v51  ;;  %v4012_v4 = vld [vmem:[%s9705_s9 + $0x1c] sm:$0x7]  ;;  %v8692_v54 = vpop.permute.xlu1 %3903 }
 0xb2c   :  { %v3822_v38 = vld [vmem:[%s9705_s9 + $0x18] sm:$0x7]  ;;  %v3976_v56 = vcombine.high %v3968_v19, %v3968_v19  ;;  %v4107_v45 = vld [vmem:[%s9702_s6] sm:$0xff] }
 0xb2d   :  { %v4011_v27 = vld [vmem:[%s9705_s9 + $0x14] sm:$0x77] }
 0xb2e   :  { %v4019_v10 = vcombine.high %v4011_v27, %v4011_v27 }
 0xb2f   :  { %3834 = vrot.lane.b32.xlu1 %v3820_v62, %s6514_s30  ;;  %3981 = vrot.lane.b32.xlu0 %v8555_v29, %s6517_s18 }
 0xb33   :  { %3830 = vrot.lane.b32.xlu1 %v3819_v1, %s6514_s30  ;;  %3795 = vrot.lane.b32.xlu0 %v8566_v11, %s6513_s28 }
 0xb37   :  { %3895 = vrot.lane.b32.xlu1 %v3881_v14, %s6515_s25  ;;  %3838 = vrot.lane.b32.xlu0 %v8577_v47, %s6514_s30 }
 0xb3b   :  { %3709 = vrot.lane.b32.xlu1 %v3692_v42, %s6512_s13  ;;  %3977 = vrot.lane.b32.xlu0 %v3966_v30, %s6517_s18 }
 0xb3f   :  { %3752 = vrot.lane.b32.xlu1 %v3735_v6, %s6511_s12  ;;  %3899 = vrot.lane.b32.xlu0 %v3882_v46, %s6515_s25 }
 0xb43   :  { %3934 = vrot.lane.b32.xlu1 %v3923_v59, %s6516_s15  ;;  %3713 = vrot.lane.b32.xlu0 %v3693_v44, %s6512_s13 }
 0xb47   :  { %4020 = vrot.lane.b32.xlu1 %v4009_v2, %s6518_s16  ;;  %3756 = vrot.lane.b32.xlu0 %v3736_v0, %s6511_s12 }
 0xb4b   :  { %3942 = vrot.lane.b32.xlu1 %v3925_v51, %s6516_s15  ;;  %4024 = vrot.lane.b32.xlu0 %v4010_v23, %s6518_s16 }
 0xb4f   :  { %3985 = vrot.lane.b32.xlu1 %v3968_v19, %s6517_s18  ;;  %3703 = vrot.lane.b32.xlu0 %v3698_v21, %s6512_s13 }
 0xb53   :  { %3799 = vrot.lane.b32.xlu1 %v3779_v41, %s6513_s28  ;;  %3746 = vrot.lane.b32.xlu0 %v3741_v17, %s6511_s12 }
 0xb57   :  { %3842 = vrot.lane.b32.xlu1 %v3822_v38, %s6514_s30  ;;  %3789 = vrot.lane.b32.xlu0 %v3784_v31, %s6513_s28 }
 0xb5b   :  { %3936 = vrot.lane.b32.xlu1 %v3931_v8, %s6516_s15  ;;  %3832 = vrot.lane.b32.xlu0 %v3827_v35, %s6514_s30 }
 0xb5f   :  { %3979 = vrot.lane.b32.xlu1 %v3974_v37, %s6517_s18  ;;  %3893 = vrot.lane.b32.xlu0 %v3888_v63, %s6515_s25 }
 0xb63   :  { %3793 = vrot.lane.b32.xlu1 %v3785_v33, %s6513_s28  ;;  %3707 = vrot.lane.b32.xlu0 %v3699_v52, %s6512_s13 }
 0xb67   :  { %3836 = vrot.lane.b32.xlu1 %v3828_v22, %s6514_s30  ;;  %3750 = vrot.lane.b32.xlu0 %v3742_v20, %s6511_s12 }
 0xb6b   :  { %3897 = vrot.lane.b32.xlu1 %v3889_v60, %s6515_s25  ;;  %3940 = vrot.lane.b32.xlu0 %v3932_v16, %s6516_s15 }
 0xb6f   :  { %3711 = vrot.lane.b32.xlu1 %v3700_v24, %s6512_s13  ;;  %3983 = vrot.lane.b32.xlu0 %v3975_v25, %s6517_s18 }
 0xb73   :  { %3754 = vrot.lane.b32.xlu1 %v3743_v18, %s6511_s12  ;;  %3797 = vrot.lane.b32.xlu0 %v3786_v3, %s6513_s28 }
 0xb77   :  { %4022 = vrot.lane.b32.xlu1 %v4017_v28, %s6518_s16  ;;  %3840 = vrot.lane.b32.xlu0 %v3829_v26, %s6514_s30 }
 0xb7b   :  { %4028 = vrot.lane.b32.xlu1 %v4011_v27, %s6518_s16  ;;  %3901 = vrot.lane.b32.xlu0 %v3890_v9, %s6515_s25 }
 0xb7f   :  { %4026 = vrot.lane.b32.xlu0 %v4018_v61, %s6518_s16  ;;  %3946 = vrot.lane.b32.xlu1 %v3926_v48, %s6516_s15 }
 0xb83   :  { %3944 = vrot.lane.b32.xlu0 %v3933_v57, %s6516_s15  ;;  %3989 = vrot.lane.b32.xlu1 %v3969_v13, %s6517_s18 }
 0xb87   :  { %3987 = vrot.lane.b32.xlu0 %v3976_v56, %s6517_s18  ;;  %4032 = vrot.lane.b32.xlu1 %v4012_v4, %s6518_s16 }
 0xb8b   :  { %4030 = vrot.lane.b32.xlu0 %v4019_v10, %s6518_s16  ;;  %4392 = vrot.lane.b32.xlu1 %v9707_v5, %s6512_s13 }
 0xb8f   :  { %4110 = vperm.xlu0 %6355, %v4107_v45   ;;  %6363 = vrot.lane.b32.xlu1 %v9707_v5, %s6513_s28 }
 0xb91   :  { %v3702_v50 = vpop.permute.xlu0 %3701  ;;  %v8701_v62 = vpop.permute.xlu1 %3705 }
 0xb93   :  { %6358 = vrot.lane.b32.xlu0 %v9707_v5, %s6511_s12  ;;  %5505 = vrot.lane.b32.xlu1 %v9707_v5, %s6512_s13 }
 0xb95   :  { %v3788_v29 = vpop.permute.xlu0 %3787  ;;  %v8707_v1 = vpop.permute.xlu1 %3748 }
 0xb97   :  { %6368 = vrot.lane.b32.xlu0 %v9707_v5, %s6514_s30 }
 0xb99   :  { %v3892_v11 = vpop.permute.xlu0 %3891  ;;  %v3745_v14 = vpop.permute.xlu1 %3744 }
 0xb9b   :  { %6373 = vrot.lane.b32.xlu0 %v9707_v5, %s6515_s25 }
 0xb9d   :  { %v8713_v47 = vpop.permute.xlu0 %3938  ;;  %v8715_v42 = vpop.permute.xlu1 %3791 }
 0xb9f   :  { %6378 = vrot.lane.b32.xlu0 %v9707_v5, %s6516_s15 }
 0xba1   :  { %v8717_v30 = vpop.permute.xlu0 %3981  ;;  %v8719_v6 = vpop.permute.xlu1 %3834 }
 0xba3   :  { %6383 = vrot.lane.b32.xlu0 %v9707_v5, %s6517_s18 }
 0xba5   :  { %v8721_v46 = vpop.permute.xlu0 %3795  ;;  %v3831_v59 = vpop.permute.xlu1 %3830 }
 0xba7   :  { %6388 = vrot.lane.b32.xlu0 %v9707_v5, %s6518_s16 }
 0xba9   :  { %v8723_v44 = vpop.permute.xlu0 %3838  ;;  %v8725_v2 = vpop.permute.xlu1 %3895 }
 0xbad   :  { %v3978_v0 = vpop.permute.xlu0 %3977  ;;  %v8727_v51 = vpop.permute.xlu1 %3709 }
 0xbb1   :  { %v8729_v23 = vpop.permute.xlu0 %3899  ;;  %v8731_v21 = vpop.permute.xlu1 %3752 }
 0xbb5   :  { %v8733_v19 = vpop.permute.xlu0 %3713  ;;  %v3935_v17 = vpop.permute.xlu1 %3934 }
 0xbb9   :  { %v8735_v41 = vpop.permute.xlu0 %3756  ;;  %v8737_v31 = vpop.permute.xlu1 %4020 }
 0xbbd   :  { %v8739_v38 = vpop.permute.xlu0 %4024  ;;  %v8741_v35 = vpop.permute.xlu1 %3942 }
 0xbc1   :  { %v3704_v8 = vpop.permute.xlu0 %3703  ;;  %v8743_v63 = vpop.permute.xlu1 %3985 }
 0xbc2   :  { %v3715_v37 = vsel %vm397_vm1, %v3702_v50, %v3704_v8  ;;  %v3716_v33 = vsel %vm397_vm1, %v3704_v8, %v8701_v62 }
 0xbc3   :  { %3727 = vst [vmem:[#allocation5] sm:$0x7] %v3715_v37  ;;  %3728 = vst [vmem:[#allocation5 + $0x8] sm:$0x7] %v3716_v33 }
 0xbc5   :  { %v3747_v52 = vpop.permute.xlu0 %3746  ;;  %v8748_v22 = vpop.permute.xlu1 %3799 }
 0xbc6   :  { %v3758_v20 = vsel %vm313_vm0, %v3745_v14, %v3747_v52  ;;  %v3759_v16 = vsel %vm313_vm0, %v3747_v52, %v8707_v1 }
 0xbc7   :  { %3770 = vst [vmem:[#allocation5 + $0x30] sm:$0x7] %v3758_v20  ;;  %3771 = vst [vmem:[#allocation5 + $0x38] sm:$0x7] %v3759_v16 }
 0xbc9   :  { %v3790_v60 = vpop.permute.xlu0 %3789  ;;  %v8753_v25 = vpop.permute.xlu1 %3842 }
 0xbca   :  { %v3801_v24 = vsel %vm838_vm2, %v3788_v29, %v3790_v60  ;;  %v3802_v18 = vsel %vm838_vm2, %v3790_v60, %v8715_v42  ;;  %v4054_v26 = vld [vmem:[#allocation5 + $0x8] sm:$0xff]  ;;  %v4053_v57 = vld [vmem:[#allocation5] sm:$0xff] }
 0xbcb   :  { %3813 = vst [vmem:[#allocation5 + $0x60] sm:$0x7] %v3801_v24  ;;  %3814 = vst [vmem:[#allocation5 + $0x68] sm:$0x7] %v3802_v18 }
 0xbcd   :  { %v3833_v3 = vpop.permute.xlu0 %3832  ;;  %v3937_v28 = vpop.permute.xlu1 %3936 }
 0xbce   :  { %v3844_v9 = vsel %vm201_vm3, %v3831_v59, %v3833_v3  ;;  %v3845_v27 = vsel %vm201_vm3, %v3833_v3, %v8719_v6  ;;  %v3948_v48 = vsel %vm987_vm5, %v3935_v17, %v3937_v28  ;;  %v3949_v61 = vsel %vm987_vm5, %v3937_v28, %v8713_v47  ;;  %v4060_v13 = vld [vmem:[#allocation5 + $0x38] sm:$0xff]  ;;  %v4059_v4 = vld [vmem:[#allocation5 + $0x30] sm:$0xff] }
 0xbcf   :  { %3856 = vst [vmem:[#allocation5 + $0x90] sm:$0x7] %v3844_v9  ;;  %3857 = vst [vmem:[#allocation5 + $0x98] sm:$0x7] %v3845_v27  ;;  %v6179_v56 = vpack.c.bf16 %v4060_v13, %v4054_v26  ;;  %v6181_v10 = vpack.c.bf16 %v4059_v4, %v4053_v57  ;;  %v4078_v26 = vld [vmem:[#allocation5 + $0xc8] sm:$0xff]  ;;  %v4077_v9 = vld [vmem:[#allocation5 + $0xc0] sm:$0xff] }
 0xbd0   :  { %3960 = vst [vmem:[#allocation5 + $0x120] sm:$0x7] %v3948_v48  ;;  %3961 = vst [vmem:[#allocation5 + $0x128] sm:$0x7] %v3949_v61 }
 0xbd1   :  { %v3894_v45 = vpop.permute.xlu0 %3893  ;;  %6180 = vmatprep.subr.bf16.mxu0 %v6179_v56  ;;  %v3980_v50 = vpop.permute.xlu1 %3979 }
 0xbd2   :  { %v3905_v29 = vsel %vm943_vm4, %v3892_v11, %v3894_v45  ;;  %v3906_v14 = vsel %vm943_vm4, %v3894_v45, %v8725_v2  ;;  %v3991_v59 = vsel %vm1031_vm6, %v3978_v0, %v3980_v50  ;;  %v3992_v17 = vsel %vm1031_vm6, %v3980_v50, %v8717_v30  ;;  %6182 = vmatpush1.bf16.msra.mxu0 %v6181_v10  ;;  %v4066_v33 = vld [vmem:[#allocation5 + $0x68] sm:$0xff]  ;;  %v4065_v60 = vld [vmem:[#allocation5 + $0x60] sm:$0xff] }
 0xbd3   :  { %3917 = vst [vmem:[#allocation5 + $0xf0] sm:$0x7] %v3905_v29  ;;  %3918 = vst [vmem:[#allocation5 + $0xf8] sm:$0x7] %v3906_v14 }
 0xbd4   :  { %4003 = vst [vmem:[#allocation5 + $0x150] sm:$0x7] %v3991_v59  ;;  %4004 = vst [vmem:[#allocation5 + $0x158] sm:$0x7] %v3992_v17 }
 0xbd5   :  { %v3708_v8 = vpop.permute.xlu0 %3707  ;;  %v3794_v37 = vpop.permute.xlu1 %3793 }
 0xbd6   :  { %v3717_v52 = vsel %vm397_vm1, %v8701_v62, %v3708_v8  ;;  %v3718_v11 = vsel %vm397_vm1, %v3708_v8, %v8727_v51  ;;  %v3803_v0 = vsel %vm838_vm2, %v8715_v42, %v3794_v37  ;;  %v3804_v20 = vsel %vm838_vm2, %v3794_v37, %v8721_v46  ;;  %v4072_v16 = vld [vmem:[#allocation5 + $0x98] sm:$0xff]  ;;  %v4071_v24 = vld [vmem:[#allocation5 + $0x90] sm:$0xff] }
 0xbd7   :  { %3729 = vst [vmem:[#allocation5 + $0x10] sm:$0x7] %v3717_v52  ;;  %3730 = vst [vmem:[#allocation5 + $0x18] sm:$0x7] %v3718_v11  ;;  %v6183_v18 = vpack.c.bf16 %v4072_v16, %v4066_v33  ;;  %v6185_v3 = vpack.c.bf16 %v4071_v24, %v4065_v60  ;;  %v4089_v37 = vld [vmem:[#allocation5 + $0x120] sm:$0xff] }
 0xbd8   :  { %3815 = vst [vmem:[#allocation5 + $0x70] sm:$0x7] %v3803_v0  ;;  %3816 = vst [vmem:[#allocation5 + $0x78] sm:$0x7] %v3804_v20 }
 0xbd9   :  { %v3751_v28 = vpop.permute.xlu0 %3750  ;;  %6184 = vmatprep.subr.bf16.mxu0 %v6183_v18  ;;  %v3837_v62 = vpop.permute.xlu1 %3836 }
 0xbda   :  { %v3760_v42 = vsel %vm313_vm0, %v8707_v1, %v3751_v28  ;;  %v3761_v27 = vsel %vm313_vm0, %v3751_v28, %v8731_v21  ;;  %v3846_v48 = vsel %vm201_vm3, %v8719_v6, %v3837_v62  ;;  %v3847_v61 = vsel %vm201_vm3, %v3837_v62, %v8723_v44  ;;  %6186 = vmatpush1.bf16.msra.mxu0 %v6185_v3  ;;  %v4084_v13 = vld [vmem:[#allocation5 + $0xf8] sm:$0xff]  ;;  %v4083_v57 = vld [vmem:[#allocation5 + $0xf0] sm:$0xff]  ;;  %v4090_v1 = vld [vmem:[#allocation5 + $0x128] sm:$0xff] }
 0xbdb   :  { %v4096_v4 = vld [vmem:[#allocation5 + $0x158] sm:$0xff]  ;;  %3772 = vst [vmem:[#allocation5 + $0x40] sm:$0x7] %v3760_v42  ;;  %3773 = vst [vmem:[#allocation5 + $0x48] sm:$0x7] %v3761_v27  ;;  %v6187_v56 = vpack.c.bf16 %v4084_v13, %v4078_v26  ;;  %v6189_v10 = vpack.c.bf16 %v4083_v57, %v4077_v9  ;;  %v4095_v14 = vld [vmem:[#allocation5 + $0x150] sm:$0xff] }
 0xbdc   :  { %3858 = vst [vmem:[#allocation5 + $0xa0] sm:$0x7] %v3846_v48  ;;  %3859 = vst [vmem:[#allocation5 + $0xa8] sm:$0x7] %v3847_v61  ;;  %v6191_v29 = vpack.c.bf16 %v4096_v4, %v4090_v1  ;;  %v6193_v33 = vpack.c.bf16 %v4095_v14, %v4089_v37  ;;  %v4079_v14 = vld [vmem:[#allocation5 + $0xd0] sm:$0xff] }
 0xbdd   :  { %v3941_v45 = vpop.permute.xlu0 %3940  ;;  %6188 = vmatprep.subr.bf16.mxu0 %v6187_v56  ;;  %v3898_v50 = vpop.permute.xlu1 %3897  ;;  %v4080_v56 = vld [vmem:[#allocation5 + $0xd8] sm:$0xff] }
 0xbde   :  { %v3950_v6 = vsel %vm987_vm5, %v8713_v47, %v3941_v45  ;;  %v3951_v59 = vsel %vm987_vm5, %v3941_v45, %v8741_v35  ;;  %v3907_v17 = vsel %vm943_vm4, %v8725_v2, %v3898_v50  ;;  %v3908_v8 = vsel %vm943_vm4, %v3898_v50, %v8729_v23  ;;  %6190 = vmatpush1.bf16.msra.mxu0 %v6189_v10  ;;  %v4056_v47 = vld [vmem:[#allocation5 + $0x18] sm:$0xff]  ;;  %v4055_v0 = vld [vmem:[#allocation5 + $0x10] sm:$0xff] }
 0xbdf   :  { %3962 = vst [vmem:[#allocation5 + $0x130] sm:$0x7] %v3950_v6  ;;  %3963 = vst [vmem:[#allocation5 + $0x138] sm:$0x7] %v3951_v59  ;;  %6192 = vmatprep.subr.bf16.mxu0 %v6191_v29  ;;  %v4067_v57 = vld [vmem:[#allocation5 + $0x70] sm:$0xff] }
 0xbe0   :  { %3919 = vst [vmem:[#allocation5 + $0x100] sm:$0x7] %v3907_v17  ;;  %3920 = vst [vmem:[#allocation5 + $0x108] sm:$0x7] %v3908_v8 }
 0xbe1   :  { %v3984_v52 = vpop.permute.xlu0 %3983  ;;  %v3712_v11 = vpop.permute.xlu1 %3711 }
 0xbe2   :  { %v3993_v20 = vsel %vm1031_vm6, %v8717_v30, %v3984_v52  ;;  %v3994_v2 = vsel %vm1031_vm6, %v3984_v52, %v8743_v63  ;;  %v3719_v16 = vsel %vm397_vm1, %v8727_v51, %v3712_v11  ;;  %v3720_v60 = vsel %vm397_vm1, %v3712_v11, %v8733_v19  ;;  %6194 = vmatpush1.bf16.msra.mxu0 %v6193_v33  ;;  %v4062_v24 = vld [vmem:[#allocation5 + $0x48] sm:$0xff]  ;;  %v4061_v18 = vld [vmem:[#allocation5 + $0x40] sm:$0xff]  ;;  %v4068_v30 = vld [vmem:[#allocation5 + $0x78] sm:$0xff] }
 0xbe3   :  { %v4074_v3 = vld [vmem:[#allocation5 + $0xa8] sm:$0xff]  ;;  %4005 = vst [vmem:[#allocation5 + $0x160] sm:$0x7] %v3993_v20  ;;  %4006 = vst [vmem:[#allocation5 + $0x168] sm:$0x7] %v3994_v2  ;;  %v6195_v28 = vpack.c.bf16 %v4062_v24, %v4056_v47  ;;  %v6197_v62 = vpack.c.bf16 %v4061_v18, %v4055_v0  ;;  %v4073_v27 = vld [vmem:[#allocation5 + $0xa0] sm:$0xff] }
 0xbe4   :  { %3731 = vst [vmem:[#allocation5 + $0x20] sm:$0x7] %v3719_v16  ;;  %3732 = vst [vmem:[#allocation5 + $0x28] sm:$0x7] %v3720_v60  ;;  %v6199_v42 = vpack.c.bf16 %v4074_v3, %v4068_v30  ;;  %v6201_v4 = vpack.c.bf16 %v4073_v27, %v4067_v57  ;;  %v8827_v0 = vld [vmem:[%s9698_s2] sm:$0xff] }
 0xbe5   :  { %v3798_v26 = vpop.permute.xlu0 %3797  ;;  %6196 = vmatprep.subr.bf16.mxu1 %v6195_v28  ;;  %v3755_v9 = vpop.permute.xlu1 %3754 }
 0xbe6   :  { %v3805_v51 = vsel %vm838_vm2, %v8721_v46, %v3798_v26  ;;  %v3806_v19 = vsel %vm838_vm2, %v3798_v26, %v8748_v22  ;;  %v3762_v48 = vsel %vm313_vm0, %v8731_v21, %v3755_v9  ;;  %v3763_v61 = vsel %vm313_vm0, %v3755_v9, %v8735_v41  ;;  %6198 = vmatpush1.bf16.msra.mxu1 %v6197_v62  ;;  %v4092_v59 = vld [vmem:[#allocation5 + $0x138] sm:$0xff]  ;;  %v4091_v33 = vld [vmem:[#allocation5 + $0x130] sm:$0xff] }
 0xbe7   :  { %v4086_v13 = vld [vmem:[#allocation5 + $0x108] sm:$0xff]  ;;  %3817 = vst [vmem:[#allocation5 + $0x80] sm:$0x7] %v3805_v51  ;;  %3818 = vst [vmem:[#allocation5 + $0x88] sm:$0x7] %v3806_v19  ;;  %6200 = vmatprep.subr.bf16.mxu1 %v6199_v42  ;;  %v4085_v22 = vld [vmem:[#allocation5 + $0x100] sm:$0xff] }
 0xbe8   :  { %3774 = vst [vmem:[#allocation5 + $0x50] sm:$0x7] %v3762_v48  ;;  %3775 = vst [vmem:[#allocation5 + $0x58] sm:$0x7] %v3763_v61  ;;  %v6203_v1 = vpack.c.bf16 %v4086_v13, %v4080_v56  ;;  %v6205_v6 = vpack.c.bf16 %v4085_v22, %v4079_v14  ;;  %v4082_v13 = vld [vmem:[#allocation5 + $0xe8] sm:$0xff] }
 0xbe9   :  { %v3841_v46 = vpop.permute.xlu0 %3840  ;;  %v4023_v10 = vpop.permute.xlu1 %4022 }
 0xbea   :  { %v3848_v21 = vsel %vm201_vm3, %v8723_v44, %v3841_v46  ;;  %v3849_v41 = vsel %vm201_vm3, %v3841_v46, %v8753_v25  ;;  %v4034_v45 = vsel %vm706_vm7, %v8737_v31, %v4023_v10  ;;  %v4035_v50 = vsel %vm706_vm7, %v4023_v10, %v8739_v38  ;;  %6202 = vmatpush1.bf16.msra.mxu1 %v6201_v4  ;;  %v4098_v29 = vld [vmem:[#allocation5 + $0x168] sm:$0xff]  ;;  %v4097_v8 = vld [vmem:[#allocation5 + $0x160] sm:$0xff] }
 0xbeb   :  { %3860 = vst [vmem:[#allocation5 + $0xb0] sm:$0x7] %v3848_v21  ;;  %3861 = vst [vmem:[#allocation5 + $0xb8] sm:$0x7] %v3849_v41  ;;  %6204 = vmatprep.subr.bf16.mxu1 %v6203_v1  ;;  %v6207_v25 = vpack.c.bf16 %v4098_v29, %v4092_v59  ;;  %v6209_v52 = vpack.c.bf16 %v4097_v8, %v4091_v33  ;;  %v4058_v20 = vld [vmem:[#allocation5 + $0x28] sm:$0xff]  ;;  %v4057_v28 = vld [vmem:[#allocation5 + $0x20] sm:$0xff] }
 0xbec   :  { %4046 = vst [vmem:[#allocation5 + $0x180] sm:$0x7] %v4034_v45  ;;  %4047 = vst [vmem:[#allocation5 + $0x188] sm:$0x7] %v4035_v50  ;;  %v4081_v21 = vld [vmem:[#allocation5 + $0xe0] sm:$0xff] }
 0xbed   :  { %v3902_v44 = vpop.permute.xlu0 %3901  ;;  %v8818_v17 = vpop.permute.xlu1 %4028 }
 0xbee   :  { %v3909_v31 = vsel %vm943_vm4, %v8729_v23, %v3902_v44  ;;  %v3910_v37 = vsel %vm943_vm4, %v3902_v44, %v8692_v54  ;;  %6206 = vmatpush1.bf16.msra.mxu1 %v6205_v6  ;;  %v4070_v30 = vld [vmem:[#allocation5 + $0x88] sm:$0xff]  ;;  %v4069_v48 = vld [vmem:[#allocation5 + $0x80] sm:$0xff] }
 0xbef   :  { %3921 = vst [vmem:[#allocation5 + $0x110] sm:$0x7] %v3909_v31  ;;  %3922 = vst [vmem:[#allocation5 + $0x118] sm:$0x7] %v3910_v37  ;;  %6208 = vmatprep.subr.bf16.mxu1 %v6207_v25  ;;  %v4064_v11 = vld [vmem:[#allocation5 + $0x58] sm:$0xff]  ;;  %v4063_v16 = vld [vmem:[#allocation5 + $0x50] sm:$0xff] }
 0xbf0   :  { %v6211_v3 = vpack.c.bf16 %v4064_v11, %v4058_v20  ;;  %v6213_v62 = vpack.c.bf16 %v4063_v16, %v4057_v28 }
 0xbf1   :  { %v4027_v47 = vpop.permute.xlu0 %4026  ;;  %v3947_v2 = vpop.permute.xlu1 %3946 }
 0xbf2   :  { %v4036_v23 = vsel %vm706_vm7, %v8739_v38, %v4027_v47  ;;  %v4037_v54 = vsel %vm706_vm7, %v4027_v47, %v8818_v17  ;;  %6210 = vmatpush1.bf16.msra.mxu1 %v6209_v52  ;;  %v4076_v18 = vld [vmem:[#allocation5 + $0xb8] sm:$0xff]  ;;  %v4075_v42 = vld [vmem:[#allocation5 + $0xb0] sm:$0xff] }
 0xbf3   :  { %v4102_v60 = vld [vmem:[#allocation5 + $0x188] sm:$0xff]  ;;  %v4101_v24 = vld [vmem:[#allocation5 + $0x180] sm:$0xff]  ;;  %4048 = vst [vmem:[#allocation5 + $0x190] sm:$0x7] %v4036_v23  ;;  %4049 = vst [vmem:[#allocation5 + $0x198] sm:$0x7] %v4037_v54  ;;  %v6215_v38 = vpack.c.bf16 %v4076_v18, %v4070_v30  ;;  %v6217_v61 = vpack.c.bf16 %v4075_v42, %v4069_v48 }
 0xbf4   :  { %4132 = vmatprep.subr.mxu0 %v4102_v60 }
 0xbf5   :  { %4133 = vmatpush1.msra.mxu0 %v4101_v24  ;;  %v3945_v26 = vpop.permute.xlu0 %3944  ;;  %v3990_v9 = vpop.permute.xlu1 %3989 }
 0xbf6   :  { %5972 = vmatmul.mubr.msk.f32.vlgmr.msra.gmra.mrb[12].mxu0 %vm1154_vm8, %v8827_v0  ;;  %6212 = vmatprep.subr.bf16.mxu0 %v6211_v3  ;;  %v3952_v27 = vsel %vm987_vm5, %v8741_v35, %v3945_v26  ;;  %v3953_v51 = vsel %vm987_vm5, %v3945_v26, %v3947_v2  ;;  %v4088_v19 = vld [vmem:[#allocation5 + $0x118] sm:$0xff]  ;;  %v4087_v56 = vld [vmem:[#allocation5 + $0x110] sm:$0xff] }
 0xbf7   :  { %6214 = vmatpush1.bf16.msra.mxu0 %v6213_v62  ;;  %4322 = vmatprep.mubr.f32.mxu0 %v9707_v5  ;;  %3964 = vst [vmem:[#allocation5 + $0x140] sm:$0x7] %v3952_v27  ;;  %3965 = vst [vmem:[#allocation5 + $0x148] sm:$0x7] %v3953_v51  ;;  %v6219_v4 = vpack.c.bf16 %v4088_v19, %v4082_v13  ;;  %v6221_v41 = vpack.c.bf16 %v4087_v56, %v4081_v21 }
 0xbf8   :  { %6216 = vmatprep.subr.bf16.mxu0 %v6215_v38 }
 0xbf9   :  { %v3988_v57 = vpop.permute.xlu0 %3987  ;;  %v4033_v22 = vpop.permute.xlu1 %4032 }
 0xbfa   :  { %v3995_v46 = vsel %vm1031_vm6, %v8743_v63, %v3988_v57  ;;  %v3996_v35 = vsel %vm1031_vm6, %v3988_v57, %v3990_v9  ;;  %v4104_v10 = vld [vmem:[#allocation5 + $0x198] sm:$0xff]  ;;  %v4103_v1 = vld [vmem:[#allocation5 + $0x190] sm:$0xff] }
 0xbfb   :  { %6218 = vmatpush1.bf16.msra.mxu0 %v6217_v61  ;;  %4007 = vst [vmem:[#allocation5 + $0x170] sm:$0x7] %v3995_v46  ;;  %4008 = vst [vmem:[#allocation5 + $0x178] sm:$0x7] %v3996_v35  ;;  %4203 = vmatprep.subr.mxu1 %v4104_v10 }
 0xbfc   :  { %6220 = vmatprep.subr.bf16.mxu0 %v6219_v4  ;;  %4204 = vmatpush1.msra.mxu1 %v4103_v1 }
 0xbfd   :  { %v4031_v45 = vpop.permute.xlu0 %4030  ;;  %5973 = vmatmul.mubr.msk.f32.vlgmr.msra.gmra.mrb[12].mxu1 %vm1154_vm8, %v8827_v0 }
 0xbfe   :  { %v4038_v63 = vsel %vm706_vm7, %v8818_v17, %v4031_v45  ;;  %v4039_v50 = vsel %vm706_vm7, %v4031_v45, %v4033_v22  ;;  %4896 = vmatprep.mubr.f32.mxu1 %v9707_v5  ;;  %v4094_v29 = vld [vmem:[#allocation5 + $0x148] sm:$0xff]  ;;  %v4093_v6 = vld [vmem:[#allocation5 + $0x140] sm:$0xff] }
 0xbff   :  { %6222 = vmatpush1.bf16.msra.mxu0 %v6221_v41  ;;  %4050 = vst [vmem:[#allocation5 + $0x1a0] sm:$0x7] %v4038_v63  ;;  %4051 = vst [vmem:[#allocation5 + $0x1a8] sm:$0x7] %v4039_v50  ;;  %v3689_v17 = vld [vmem:[%s9697_s1 + $0x1] sm:$0x3f] }
 0xc00   :  { %v8861_v37 = vrot.slane %v3689_v17, %v6978_v34  ;;  %v8864_v11 = vrot.slane %v3689_v17, %v6975_v32  ;;  %v8879_v28 = vrot.slane %v3689_v17, %v6992_v40  ;;  %v8885_v30 = vrot.slane %v3689_v17, %v6989_v39 }
 0xc01   :  { %v8915_v4 = vrot.slane %v3689_v17, %v7077_v12  ;;  %v8918_v46 = vrot.slane %v3689_v17, %v7120_v36 }
 0xc02   :  { %v4100_v14 = vld [vmem:[#allocation5 + $0x178] sm:$0xff]  ;;  %v4099_v59 = vld [vmem:[#allocation5 + $0x170] sm:$0xff]  ;;  %9732 = vst [vmem:[#allocation11_spill] sm:$0xff] %v8861_v37  ;;  %9733 = vst [vmem:[#allocation12_spill] sm:$0xff] %v8864_v11 }
 0xc03   :  { %v6223_v44 = vpack.c.bf16 %v4100_v14, %v4094_v29  ;;  %v6225_v25 = vpack.c.bf16 %v4099_v59, %v4093_v6  ;;  %9734 = vst [vmem:[#allocation13_spill] sm:$0xff] %v8879_v28  ;;  %9735 = vst [vmem:[#allocation14_spill] sm:$0xff] %v8885_v30 }
 0xc04   :  { %9737 = vst [vmem:[#allocation16_spill] sm:$0xff] %v8915_v4  ;;  %9738 = vst [vmem:[#allocation17_spill] sm:$0xff] %v8918_v46 }
 0xc05   :  { %6224 = vmatprep.subr.bf16.mxu0 %v6223_v44 }
 0xc06   :  { %6226 = vmatpush1.bf16.msra.mxu0 %v6225_v25  ;;  %v4106_v8 = vld [vmem:[#allocation5 + $0x1a8] sm:$0xff]  ;;  %v4105_v31 = vld [vmem:[#allocation5 + $0x1a0] sm:$0xff]  ;;  %v4393_v25 = vpop.permute.xlu1 %4392 }
 0xc07   :  { %4274 = vmatprep.subr.mxu0 %v4106_v8 }
 0xc0a   :  { %4275 = vmatpush1.msra.mxu0 %v4105_v31  ;;  %v9042_v31 = vpop.permute.xlu1 %6363 }
 0xc0b   :  { %5974 = vmatmul.mubr.msk.f32.vlgmr.msra.gmra.mrb[14].mxu0 %vm1154_vm8, %v8827_v0 }
 0xc0c   :  { %4973 = vmatprep.mubr.f32.mxu0 %v9707_v5 }
 0xc0e   :  { %v4111_v33 = vpop.permute.xlu0 %4110 }
 0xc12   :  { %v9020_v59 = vpop.permute.xlu0 %6358 }
 0xc16   :  { %v9030_v44 = vpop.permute.xlu0 %6368 }
 0xc1a   :  { %v9036_v8 = vpop.permute.xlu0 %6373 }
 0xc1e   :  { %v9048_v17 = vpop.permute.xlu0 %6378 }
 0xcc9   :  { %v4182_v52 = vpop.f32.mrb[12].mxu0 }
 0xcca   :  { %v4183_v47 = vadd.f32 %v4182_v52, %v4111_v33  ;;  %v4184_v0 = vpop.f32.mrb[13].mxu0  ;;  %v9056_v52 = vpop.permute.xlu0 %6383 }
 0xccb   :  { %v4185_v20 = vadd.f32 %v4184_v0, %v4111_v33 }
 0xccc   :  { %v4329_v2 = vmax.f32 %v4183_v47, 0.0  ;;  %v5063_v16 = vmul.f32 %v8861_v37, %v4183_v47  ;;  %vm5121_vm11 = vcmp.gt.f32.partialorder %v4183_v47, 0.0 }
 0xccd   :  { %v5133_v23 = vsel %vm5121_vm11, %v7383_v15, 0.0  ;;  %v5064_v54 = vmul.f32 %v8864_v11, %v4185_v20  ;;  %vm5122_vm12 = vcmp.gt.f32.partialorder %v4185_v20, 0.0 }
 0xcce   :  { %v8870_v34 = vmul.f32 %v8861_v37, %v4329_v2  ;;  %v5139_v60 = vadd.f32 0.00024414063, %v5133_v23  ;;  %v5134_v24 = vsel %vm5122_vm12, %v7400_v55, 0.0  ;;  %v9066_v0 = vpop.permute.xlu0 %6388 }
 0xccf   :  { %v5069_v32 = vadd.f32 %v5064_v54, %v5063_v16  ;;  %v5140_v18 = vadd.f32 0.00024414063, %v5134_v24 }
 0xcd0   :  { %v8874_v3 = vmul.f32 %v5139_v60, %v8861_v37  ;;  %4394 = vrot.lane.b32.xlu1 %v8870_v34, %s6512_s13  ;;  %v4253_v62 = vpop.f32.mrb[12].mxu1 }
 0xcd1   :  { %v8882_v15 = vmul.f32 %v5140_v18, %v8864_v11  ;;  %v4254_v26 = vadd.f32 %v4253_v62, %v4111_v33  ;;  %v4255_v55 = vpop.f32.mrb[13].mxu1 }
 0xcd2   :  { %5347 = vst [vmem:[#allocation5 + $0xc0] sm:$0xff] %v8874_v3  ;;  %v4256_v38 = vadd.f32 %v4255_v55, %v4111_v33 }
 0xcd3   :  { %5348 = vst [vmem:[#allocation5 + $0xc8] sm:$0xff] %v8882_v15  ;;  %v4331_v9 = vmax.f32 %v4254_v26, 0.0  ;;  %v5065_v42 = vmul.f32 %v8879_v28, %v4254_v26  ;;  %vm5123_vm14 = vcmp.gt.f32.partialorder %v4254_v26, 0.0 }
 0xcd4   :  { %4440 = vrot.lane.b32.xlu1 %v8870_v34, %s6511_s12  ;;  %v5135_v40 = vsel %vm5123_vm14, %v7403_v53, 0.0  ;;  %v5066_v27 = vmul.f32 %v8885_v30, %v4256_v38  ;;  %vm5124_vm15 = vcmp.gt.f32.partialorder %v4256_v38, 0.0  ;;  %v4332_v29 = vmax.f32 %v4256_v38, 0.0 }
 0xcd5   :  { %v8895_v39 = vmul.f32 %v8879_v28, %v4331_v9  ;;  %v5070_v51 = vadd.f32 %v5069_v32, %v5065_v42  ;;  %v5141_v19 = vadd.f32 0.00024414063, %v5135_v40  ;;  %v5136_v48 = vsel %vm5124_vm15, %v7447_v58, 0.0 }
 0xcd6   :  { %v5142_v61 = vadd.f32 0.00024414063, %v5136_v48  ;;  %v4330_v58 = vmax.f32 %v4185_v20, 0.0  ;;  %v6360_v38 = vunpack.i.l.bf16 %v9020_v59 }
 0xcd7   :  { %v8899_v13 = vmul.f32 %v5141_v19, %v8879_v28  ;;  %v5071_v57 = vadd.f32 %v5070_v51, %v5066_v27  ;;  %4592 = vrot.lane.b32.xlu0 %v8895_v39, %s6515_s25 }
 0xcd8   :  { %4398 = vrot.lane.b32.xlu1 %v8895_v39, %s6512_s13  ;;  %v8906_v53 = vmul.f32 %v5142_v61, %v8885_v30  ;;  %v8929_v22 = vmul.f32 %v8864_v11, %v4330_v58 }
 0xcd9   :  { %9736 = vst [vmem:[#allocation15_spill] sm:$0xff] %v8899_v13  ;;  %5349 = vst [vmem:[#allocation5 + $0xd0] sm:$0xff] %v8899_v13 }
 0xcda   :  { %5350 = vst [vmem:[#allocation5 + $0xd8] sm:$0xff] %v8906_v53 }
 0xcdb   :  { %4634 = vrot.lane.b32.xlu0 %v8870_v34, %s6516_s15 }
 0xcdc   :  { %4444 = vrot.lane.b32.xlu1 %v8895_v39, %s6511_s12 }
 0xcde   :  { %v4324_v56 = vpop.f32.mrb[14].mxu0 }
 0xcdf   :  { %v8920_v35 = vadd.f32 %v4324_v56, %v4111_v33  ;;  %4726 = vrot.lane.b32.xlu0 %v8870_v34, %s6518_s16  ;;  %v4326_v10 = vpop.f32.mrb[15].mxu0 }
 0xce0   :  { %4486 = vrot.lane.b32.xlu1 %v8870_v34, %s6513_s28  ;;  %v8926_v1 = vadd.f32 %v4326_v10, %v4111_v33  ;;  %v9054_v33 = vpop.permute.xlu1 %5505 }
 0xce1   :  { %v5067_v12 = vmul.f32 %v8915_v4, %v8920_v35  ;;  %vm5125_vm9 = vcmp.gt.f32.partialorder %v8920_v35, 0.0  ;;  %v4333_v2 = vmax.f32 %v8920_v35, 0.0 }
 0xce2   :  { %v5137_v36 = vsel %vm5125_vm9, %v7466_v7, 0.0  ;;  %v5068_v21 = vmul.f32 %v8918_v46, %v8926_v1  ;;  %vm5126_vm10 = vcmp.gt.f32.partialorder %v8926_v1, 0.0  ;;  %v4334_v62 = vmax.f32 %v8926_v1, 0.0 }
 0xce3   :  { %v5143_v41 = vadd.f32 0.00024414063, %v5137_v36  ;;  %v5138_v45 = vsel %vm5126_vm10, %v7484_v49, 0.0  ;;  %4396 = vrot.lane.b32.xlu0 %v8929_v22, %s6512_s13  ;;  %v5072_v63 = vadd.f32 %v5071_v57, %v5067_v12  ;;  %v8958_v49 = vmul.f32 %v8885_v30, %v4332_v29 }
 0xce4   :  { %4532 = vrot.lane.b32.xlu1 %v8870_v34, %s6514_s30  ;;  %v5144_v50 = vadd.f32 0.00024414063, %v5138_v45  ;;  %v9080_v54 = vmul.f32 %v8915_v4, %v4333_v2  ;;  %v9101_v9 = vmul.f32 %v8918_v46, %v4334_v62  ;;  %v6370_v29 = vunpack.i.l.bf16 %v9030_v44 }
 0xce5   :  { %v8944_v14 = vmul.f32 %v5143_v41, %v8915_v4  ;;  %v8946_v7 = vadd.f32 %v5072_v63, %v5068_v21 }
 0xce6   :  { %v8949_v6 = vmul.f32 %v5144_v50, %v8918_v46 }
 0xce7   :  { %9739 = vst [vmem:[#allocation18_spill] sm:$0xff] %v8944_v14  ;;  %4442 = vrot.lane.b32.xlu0 %v8929_v22, %s6511_s12  ;;  %5351 = vst [vmem:[#allocation5 + $0xe0] sm:$0xff] %v8944_v14 }
 0xce8   :  { %9740 = vst [vmem:[#allocation19_spill] sm:$0xff] %v8949_v6  ;;  %4490 = vrot.lane.b32.xlu1 %v8895_v39, %s6513_s28  ;;  %5352 = vst [vmem:[#allocation5 + $0xe8] sm:$0xff] %v8949_v6 }
 0xceb   :  { %4400 = vrot.lane.b32.xlu0 %v8958_v49, %s6512_s13 }
 0xcec   :  { %4536 = vrot.lane.b32.xlu1 %v8895_v39, %s6514_s30 }
 0xcef   :  { %4446 = vrot.lane.b32.xlu0 %v8958_v49, %s6511_s12 }
 0xcf0   :  { %4588 = vrot.lane.b32.xlu1 %v8870_v34, %s6515_s25 }
 0xcf3   :  { %4488 = vrot.lane.b32.xlu0 %v8929_v22, %s6513_s28 }
 0xcf4   :  { %4638 = vrot.lane.b32.xlu1 %v8895_v39, %s6516_s15 }
 0xcf7   :  { %4534 = vrot.lane.b32.xlu0 %v8929_v22, %s6514_s30 }
 0xcf8   :  { %4684 = vrot.lane.b32.xlu1 %v8895_v39, %s6517_s18 }
 0xcfb   :  { %4492 = vrot.lane.b32.xlu0 %v8958_v49, %s6513_s28 }
 0xcfc   :  { %4680 = vrot.lane.b32.xlu1 %v8870_v34, %s6517_s18 }
 0xcff   :  { %4538 = vrot.lane.b32.xlu0 %v8958_v49, %s6514_s30 }
 0xd00   :  { %4730 = vrot.lane.b32.xlu1 %v8895_v39, %s6518_s16 }
 0xd03   :  { %4594 = vrot.lane.b32.xlu0 %v8958_v49, %s6515_s25 }
 0xd04   :  { %4590 = vrot.lane.b32.xlu1 %v8929_v22, %s6515_s25 }
 0xd07   :  { %4636 = vrot.lane.b32.xlu0 %v8929_v22, %s6516_s15 }
 0xd08   :  { %4732 = vrot.lane.b32.xlu1 %v8958_v49, %s6518_s16 }
 0xd0b   :  { %4682 = vrot.lane.b32.xlu0 %v8929_v22, %s6517_s18 }
 0xd0c   :  { %5171 = vrot.lane.b32.xlu1 %v8874_v3, %s6518_s16 }
 0xd0f   :  { %4640 = vrot.lane.b32.xlu0 %v8958_v49, %s6516_s15 }
 0xd10   :  { %5263 = vrot.lane.b32.xlu1 %v8874_v3, %s6516_s15 }
 0xd13   :  { %4686 = vrot.lane.b32.xlu0 %v8958_v49, %s6517_s18 }
 0xd14   :  { %5369 = vrot.lane.b32.xlu1 %v8874_v3, %s6514_s30 }
 0xd17   :  { %4728 = vrot.lane.b32.xlu0 %v8929_v22, %s6518_s16 }
 0xd18   :  { %5415 = vrot.lane.b32.xlu1 %v8874_v3, %s6513_s28 }
 0xd1b   :  { %5175 = vrot.lane.b32.xlu0 %v8899_v13, %s6518_s16 }
 0xd1c   :  { %5461 = vrot.lane.b32.xlu1 %v8874_v3, %s6511_s12 }
 0xd1f   :  { %5221 = vrot.lane.b32.xlu0 %v8899_v13, %s6517_s18 }
 0xd20   :  { %5507 = vrot.lane.b32.xlu1 %v8874_v3, %s6512_s13 }
 0xd23   :  { %5217 = vrot.lane.b32.xlu0 %v8874_v3, %s6517_s18 }
 0xd24   :  { %5173 = vrot.lane.b32.xlu1 %v8882_v15, %s6518_s16 }
 0xd27   :  { %5267 = vrot.lane.b32.xlu0 %v8899_v13, %s6516_s15 }
 0xd28   :  { %5219 = vrot.lane.b32.xlu1 %v8882_v15, %s6517_s18 }
 0xd2b   :  { %5313 = vrot.lane.b32.xlu0 %v8899_v13, %s6515_s25 }
 0xd2c   :  { %5265 = vrot.lane.b32.xlu1 %v8882_v15, %s6516_s15 }
 0xd2f   :  { %5309 = vrot.lane.b32.xlu0 %v8874_v3, %s6515_s25 }
 0xd30   :  { %5311 = vrot.lane.b32.xlu1 %v8882_v15, %s6515_s25 }
 0xd33   :  { %5373 = vrot.lane.b32.xlu0 %v8899_v13, %s6514_s30 }
 0xd34   :  { %5177 = vrot.lane.b32.xlu1 %v8906_v53, %s6518_s16 }
 0xd37   :  { %5419 = vrot.lane.b32.xlu0 %v8899_v13, %s6513_s28 }
 0xd38   :  { %5223 = vrot.lane.b32.xlu1 %v8906_v53, %s6517_s18 }
 0xd3b   :  { %5465 = vrot.lane.b32.xlu0 %v8899_v13, %s6511_s12 }
 0xd3c   :  { %5269 = vrot.lane.b32.xlu1 %v8906_v53, %s6516_s15 }
 0xd3f   :  { %5371 = vrot.lane.b32.xlu0 %v8882_v15, %s6514_s30 }
 0xd40   :  { %5315 = vrot.lane.b32.xlu1 %v8906_v53, %s6515_s25 }
 0xd42   :  { %v4395_v47 = vpop.permute.xlu1 %4394 }
 0xd43   :  { %5417 = vrot.lane.b32.xlu0 %v8882_v15, %s6513_s28  ;;  %v4406_v48 = vsel %vm397_vm1, %v4393_v25, %v4395_v47  ;;  %v6365_v25 = vunpack.i.l.bf16 %v9042_v31 }
 0xd44   :  { %5375 = vrot.lane.b32.xlu1 %v8906_v53, %s6514_s30 }
 0xd46   :  { %v4441_v20 = vpop.permute.xlu1 %4440 }
 0xd47   :  { %5463 = vrot.lane.b32.xlu0 %v8882_v15, %s6511_s12  ;;  %v4452_v42 = vsel %vm313_vm0, %v6360_v38, %v4441_v20 }
 0xd48   :  { %5421 = vrot.lane.b32.xlu1 %v8906_v53, %s6513_s28  ;;  %v6229_v57 = vpack.c.bf16 %v4452_v42, %v4406_v48 }
 0xd49   :  { %v9073_v16 = vpop.permute.xlu0 %4592 }
 0xd4a   :  { %v4399_v23 = vpop.permute.xlu1 %4398 }
 0xd4b   :  { %5509 = vrot.lane.b32.xlu0 %v8882_v15, %s6512_s13 }
 0xd4c   :  { %5467 = vrot.lane.b32.xlu1 %v8906_v53, %s6511_s12 }
 0xd4d   :  { %v9082_v60 = vpop.permute.xlu0 %4634 }
 0xd4e   :  { %v4445_v24 = vpop.permute.xlu1 %4444 }
 0xd4f   :  { %4402 = vrot.lane.b32.xlu0 %v9080_v54, %s6512_s13 }
 0xd50   :  { %4596 = vrot.lane.b32.xlu1 %v9080_v54, %s6515_s25 }
 0xd51   :  { %v9088_v32 = vpop.permute.xlu0 %4726 }
 0xd52   :  { %v4487_v18 = vpop.permute.xlu1 %4486 }
 0xd53   :  { %4448 = vrot.lane.b32.xlu0 %v9080_v54, %s6511_s12  ;;  %v4498_v62 = vsel %vm838_vm2, %v6365_v25, %v4487_v18 }
 0xd54   :  { %4642 = vrot.lane.b32.xlu1 %v9080_v54, %s6516_s15 }
 0xd55   :  { %v4397_v26 = vpop.permute.xlu0 %4396 }
 0xd56   :  { %v4533_v55 = vpop.permute.xlu1 %4532  ;;  %v4407_v51 = vsel %vm397_vm1, %v4395_v47, %v4397_v26  ;;  %v4408_v21 = vsel %vm397_vm1, %v4397_v26, %v4399_v23 }
 0xd57   :  { %4734 = vrot.lane.b32.xlu0 %v9080_v54, %s6518_s16  ;;  %v4544_v47 = vsel %vm201_vm3, %v6370_v29, %v4533_v55 }
 0xd58   :  { %4688 = vrot.lane.b32.xlu1 %v9080_v54, %s6517_s18  ;;  %v6233_v38 = vpack.c.bf16 %v4544_v47, %v4498_v62 }
 0xd59   :  { %v4443_v40 = vpop.permute.xlu0 %4442 }
 0xd5a   :  { %v4491_v27 = vpop.permute.xlu1 %4490  ;;  %v4453_v19 = vsel %vm313_vm0, %v4441_v20, %v4443_v40  ;;  %v4454_v35 = vsel %vm313_vm0, %v4443_v40, %v4445_v24 }
 0xd5b   :  { %4496 = vrot.lane.b32.xlu0 %v9101_v9, %s6513_s28  ;;  %v6227_v61 = vpack.c.bf16 %v4453_v19, %v4407_v51  ;;  %v6245_v45 = vpack.c.bf16 %v4454_v35, %v4408_v21 }
 0xd5c   :  { %4494 = vrot.lane.b32.xlu1 %v9080_v54, %s6513_s28 }
 0xd5d   :  { %v9111_v58 = vpop.permute.xlu0 %4400  ;;  %6228 = vmatprep.subr.bf16.mxu1 %v6227_v61 }
 0xd5e   :  { %v4537_v56 = vpop.permute.xlu1 %4536  ;;  %6230 = vmatpush1.bf16.msra.mxu1 %v6229_v57  ;;  %v4409_v12 = vsel %vm397_vm1, %v4399_v23, %v9111_v58 }
 0xd5f   :  { %4542 = vrot.lane.b32.xlu0 %v9101_v9, %s6514_s30 }
 0xd60   :  { %4540 = vrot.lane.b32.xlu1 %v9080_v54, %s6514_s30 }
 0xd61   :  { %v9118_v10 = vpop.permute.xlu0 %4446 }
 0xd62   :  { %v4589_v1 = vpop.permute.xlu1 %4588  ;;  %v4455_v36 = vsel %vm313_vm0, %v4445_v24, %v9118_v10 }
 0xd63   :  { %5179 = vrot.lane.b32.xlu0 %v8944_v14, %s6518_s16  ;;  %v6243_v41 = vpack.c.bf16 %v4455_v36, %v4409_v12 }
 0xd64   :  { %4404 = vrot.lane.b32.xlu1 %v9101_v9, %s6512_s13 }
 0xd65   :  { %v4489_v63 = vpop.permute.xlu0 %4488  ;;  %6244 = vmatprep.subr.bf16.mxu0 %v6243_v41 }
 0xd66   :  { %v9129_v50 = vpop.permute.xlu1 %4638  ;;  %6246 = vmatpush1.bf16.msra.mxu0 %v6245_v45  ;;  %v4499_v23 = vsel %vm838_vm2, %v4487_v18, %v4489_v63  ;;  %v4500_v61 = vsel %vm838_vm2, %v4489_v63, %v4491_v27 }
 0xd67   :  { %5225 = vrot.lane.b32.xlu0 %v8944_v14, %s6517_s18 }
 0xd68   :  { %4450 = vrot.lane.b32.xlu1 %v9101_v9, %s6511_s12 }
 0xd69   :  { %v4535_v20 = vpop.permute.xlu0 %4534 }
 0xd6a   :  { %v4685_v2 = vpop.permute.xlu1 %4684  ;;  %v4545_v24 = vsel %vm201_vm3, %v4533_v55, %v4535_v20  ;;  %v4546_v18 = vsel %vm201_vm3, %v4535_v20, %v4537_v56 }
 0xd6b   :  { %5271 = vrot.lane.b32.xlu0 %v8944_v14, %s6516_s15  ;;  %v6231_v26 = vpack.c.bf16 %v4545_v24, %v4499_v23  ;;  %v6249_v35 = vpack.c.bf16 %v4546_v18, %v4500_v61 }
 0xd6c   :  { %4598 = vrot.lane.b32.xlu1 %v9101_v9, %s6515_s25 }
 0xd6d   :  { %v9145_v42 = vpop.permute.xlu0 %4492  ;;  %6232 = vmatprep.subr.bf16.mxu1 %v6231_v26 }
 0xd6e   :  { %v4681_v40 = vpop.permute.xlu1 %4680  ;;  %6234 = vmatpush1.bf16.msra.mxu1 %v6233_v38  ;;  %v4501_v19 = vsel %vm838_vm2, %v4491_v27, %v9145_v42 }
 0xd6f   :  { %5317 = vrot.lane.b32.xlu0 %v8944_v14, %s6515_s25 }
 0xd70   :  { %4644 = vrot.lane.b32.xlu1 %v9101_v9, %s6516_s15 }
 0xd71   :  { %v9152_v55 = vpop.permute.xlu0 %4538 }
 0xd72   :  { %v9154_v51 = vpop.permute.xlu1 %4730  ;;  %v4547_v48 = vsel %vm201_vm3, %v4537_v56, %v9152_v55 }
 0xd73   :  { %5377 = vrot.lane.b32.xlu0 %v8944_v14, %s6514_s30  ;;  %v6247_v57 = vpack.c.bf16 %v4547_v48, %v4501_v19 }
 0xd74   :  { %4690 = vrot.lane.b32.xlu1 %v9101_v9, %s6517_s18 }
 0xd75   :  { %v9165_v12 = vpop.permute.xlu0 %4594  ;;  %6248 = vmatprep.subr.bf16.mxu0 %v6247_v57 }
 0xd76   :  { %v4591_v36 = vpop.permute.xlu1 %4590  ;;  %6250 = vmatpush1.bf16.msra.mxu0 %v6249_v35 }
 0xd77   :  { %v4602_v21 = vsel %vm943_vm4, %v4589_v1, %v4591_v36  ;;  %v4603_v41 = vsel %vm943_vm4, %v4591_v36, %v9073_v16  ;;  %5227 = vrot.lane.b32.xlu0 %v8949_v6, %s6517_s18  ;;  %v4814_v36 = vld [vmem:[%s9703_s7] sm:$0xff] }
 0xd78   :  { %4736 = vrot.lane.b32.xlu1 %v9101_v9, %s6518_s16  ;;  %v6235_v27 = vpack.c.bf16 %v4603_v41, %v8929_v22  ;;  %v6237_v56 = vpack.c.bf16 %v4602_v21, %v8870_v34 }
 0xd79   :  { %v4637_v45 = vpop.permute.xlu0 %4636 }
 0xd7a   :  { %v9176_v63 = vpop.permute.xlu1 %4732  ;;  %6236 = vmatprep.subr.bf16.mxu1 %v6235_v27  ;;  %v4648_v25 = vsel %vm987_vm5, %v9082_v60, %v4637_v45  ;;  %v4649_v22 = vsel %vm987_vm5, %v4637_v45, %v9129_v50  ;;  %v6371_v60 = vunpack.i.h.bf16 %v9030_v44 }
 0xd7b   :  { %6238 = vmatpush1.bf16.msra.mxu1 %v6237_v56  ;;  %5273 = vrot.lane.b32.xlu0 %v8949_v6, %s6516_s15 }
 0xd7c   :  { %5181 = vrot.lane.b32.xlu1 %v8949_v6, %s6518_s16 }
 0xd7d   :  { %v4683_v1 = vpop.permute.xlu0 %4682 }
 0xd7e   :  { %v5172_v29 = vpop.permute.xlu1 %5171  ;;  %v4694_v34 = vsel %vm1031_vm6, %v4681_v40, %v4683_v1  ;;  %v4695_v47 = vsel %vm1031_vm6, %v4683_v1, %v4685_v2 }
 0xd7f   :  { %5423 = vrot.lane.b32.xlu0 %v8944_v14, %s6513_s28  ;;  %v6241_v20 = vpack.c.bf16 %v4694_v34, %v4648_v25  ;;  %v6239_v23 = vpack.c.bf16 %v4695_v47, %v4649_v22  ;;  %v4815_v22 = vld [vmem:[%s9703_s7 + $0x8] sm:$0xff] }
 0xd80   :  { %5319 = vrot.lane.b32.xlu1 %v8949_v6, %s6515_s25 }
 0xd81   :  { %v9192_v24 = vpop.permute.xlu0 %4640  ;;  %6240 = vmatprep.subr.bf16.mxu1 %v6239_v23 }
 0xd82   :  { %v9194_v62 = vpop.permute.xlu1 %5263  ;;  %6242 = vmatpush1.bf16.msra.mxu1 %v6241_v20  ;;  %v9208_v40 = vsel %vm987_vm5, %v9129_v50, %v9192_v24  ;;  %v6366_v50 = vunpack.i.h.bf16 %v9042_v31  ;;  %v9244_v31 = vld [vmem:[%s9700_s4] sm:$0xff] }
 0xd83   :  { %5469 = vrot.lane.b32.xlu0 %v8944_v14, %s6511_s12 }
 0xd84   :  { %5379 = vrot.lane.b32.xlu1 %v8949_v6, %s6514_s30 }
 0xd85   :  { %v9201_v26 = vpop.permute.xlu0 %4686 }
 0xd86   :  { %v9203_v38 = vpop.permute.xlu1 %5369  ;;  %v9212_v18 = vsel %vm1031_vm6, %v4685_v2, %v9201_v26 }
 0xd87   :  { %v9216_v19 = vsel %vm201_vm3, %v6371_v60, %v9203_v38  ;;  %5511 = vrot.lane.b32.xlu0 %v8899_v13, %s6512_s13 }
 0xd88   :  { %5393 = vst [vmem:[#allocation5 + $0xf0] sm:$0xff] %v9216_v19  ;;  %5425 = vrot.lane.b32.xlu1 %v8949_v6, %s6513_s28 }
 0xd89   :  { %v4729_v48 = vpop.permute.xlu0 %4728 }
 0xd8a   :  { %v9226_v2 = vpop.permute.xlu1 %5415  ;;  %v4740_v61 = vsel %vm706_vm7, %v9088_v32, %v4729_v48  ;;  %v4741_v57 = vsel %vm706_vm7, %v4729_v48, %v9154_v51  ;;  %v6361_v32 = vunpack.i.h.bf16 %v9020_v59  ;;  %v9264_v59 = vld [vmem:[%s9700_s4 + $0x8] sm:$0xff] }
 0xd8b   :  { %v9234_v35 = vsel %vm838_vm2, %v6366_v50, %v9226_v2  ;;  %5515 = vrot.lane.b32.xlu0 %v8944_v14, %s6512_s13  ;;  %4848 = vmatprep.subr.mxu1 %v4741_v57 }
 0xd8c   :  { %5439 = vst [vmem:[#allocation5 + $0x120] sm:$0xff] %v9234_v35  ;;  %5471 = vrot.lane.b32.xlu1 %v8949_v6, %s6511_s12  ;;  %4849 = vmatpush1.msra.mxu1 %v4740_v61 }
 0xd8d   :  { %v5176_v21 = vpop.permute.xlu0 %5175  ;;  %5975 = vmatmul.mubr.msk.f32.vlgmr.msra.gmra.mrb[14].mxu1 %vm1154_vm8, %v9244_v31 }
 0xd8e   :  { %v9250_v41 = vpop.permute.xlu1 %5461  ;;  %4902 = vmatprep.mubr.f32.mxu1 %v9707_v5 }
 0xd8f   :  { %v9254_v27 = vsel %vm313_vm0, %v6361_v32, %v9250_v41  ;;  %4818 = vperm.xlu0 %6355, %v4814_v36  }
 0xd90   :  { %5485 = vst [vmem:[#allocation5 + $0x150] sm:$0xff] %v9254_v27  ;;  %5513 = vrot.lane.b32.xlu1 %v8906_v53, %s6512_s13 }
 0xd91   :  { %v5222_v45 = vpop.permute.xlu0 %5221  ;;  %5976 = vmatmul.mubr.msk.f32.gmra.mrb[16].mxu1 %vm1154_vm8, %v9264_v59 }
 0xd92   :  { %v9269_v1 = vpop.permute.xlu1 %5507  ;;  %5050 = vmatprep.mubr.f32.mxu1 %v9707_v5 }
 0xd93   :  { %v9274_v25 = vsel %vm397_vm1, %v9054_v33, %v9269_v1 }
 0xd94   :  { %5517 = vrot.lane.b32.xlu1 %v8949_v6, %s6512_s13  ;;  %5531 = vst [vmem:[#allocation5 + $0x180] sm:$0xff] %v9274_v25 }
 0xd95   :  { %v5218_v34 = vpop.permute.xlu0 %5217 }
 0xd96   :  { %v5174_v47 = vpop.permute.xlu1 %5173 }
 0xd97   :  { %v9286_v20 = vsel %vm706_vm7, %v5172_v29, %v5174_v47  ;;  %v9289_v33 = vsel %vm706_vm7, %v5174_v47, %v5176_v21 }
 0xd98   :  { %5197 = vst [vmem:[#allocation5] sm:$0xff] %v9286_v20  ;;  %5198 = vst [vmem:[#allocation5 + $0x8] sm:$0xff] %v9289_v33  ;;  %4823 = vperm.xlu1 %6356, %v4815_v22  }
 0xd99   :  { %v5268_v23 = vpop.permute.xlu0 %5267 }
 0xd9a   :  { %v5220_v60 = vpop.permute.xlu1 %5219 }
 0xd9b   :  { %v9294_v50 = vsel %vm1031_vm6, %v5218_v34, %v5220_v60  ;;  %v9297_v48 = vsel %vm1031_vm6, %v5220_v60, %v5222_v45 }
 0xd9c   :  { %5243 = vst [vmem:[#allocation5 + $0x30] sm:$0xff] %v9294_v50  ;;  %5244 = vst [vmem:[#allocation5 + $0x38] sm:$0xff] %v9297_v48 }
 0xd9d   :  { %v5314_v29 = vpop.permute.xlu0 %5313 }
 0xd9e   :  { %v5266_v61 = vpop.permute.xlu1 %5265 }
 0xd9f   :  { %v9303_v57 = vsel %vm987_vm5, %v9194_v62, %v5266_v61  ;;  %v9306_v32 = vsel %vm987_vm5, %v5266_v61, %v5268_v23 }
 0xda0   :  { %5289 = vst [vmem:[#allocation5 + $0x60] sm:$0xff] %v9303_v57  ;;  %5290 = vst [vmem:[#allocation5 + $0x68] sm:$0xff] %v9306_v32 }
 0xda1   :  { %v5310_v36 = vpop.permute.xlu0 %5309 }
 0xda2   :  { %v5312_v22 = vpop.permute.xlu1 %5311 }
 0xda3   :  { %v9311_v34 = vsel %vm943_vm4, %v5310_v36, %v5312_v22  ;;  %v9314_v47 = vsel %vm943_vm4, %v5312_v22, %v5314_v29 }
 0xda4   :  { %5335 = vst [vmem:[#allocation5 + $0x90] sm:$0xff] %v9311_v34  ;;  %5336 = vst [vmem:[#allocation5 + $0x98] sm:$0xff] %v9314_v47 }
 0xda5   :  { %v5374_v62 = vpop.permute.xlu0 %5373 }
 0xda6   :  { %v9318_v60 = vpop.permute.xlu1 %5177 }
 0xda7   :  { %v9322_v61 = vsel %vm706_vm7, %v5176_v21, %v9318_v60 }
 0xda8   :  { %5199 = vst [vmem:[#allocation5 + $0x10] sm:$0xff] %v9322_v61 }
 0xda9   :  { %v5420_v56 = vpop.permute.xlu0 %5419 }
 0xdaa   :  { %v9325_v5 = vpop.permute.xlu1 %5223 }
 0xdab   :  { %v9329_v36 = vsel %vm1031_vm6, %v5222_v45, %v9325_v5 }
 0xdac   :  { %5245 = vst [vmem:[#allocation5 + $0x40] sm:$0xff] %v9329_v36 }
 0xdad   :  { %v5466_v44 = vpop.permute.xlu0 %5465 }
 0xdae   :  { %v9334_v43 = vpop.permute.xlu1 %5269  ;;  %5074 = vadd.xlane.f32.xlu0 %v8946_v7 }
 0xdaf   :  { %v9338_v21 = vsel %vm987_vm5, %v5268_v23, %v9334_v43 }
 0xdb0   :  { %5291 = vst [vmem:[#allocation5 + $0x70] sm:$0xff] %v9338_v21 }
 0xdb1   :  { %v5372_v46 = vpop.permute.xlu0 %5371 }
 0xdb2   :  { %v9342_v4 = vpop.permute.xlu1 %5315  ;;  %v9346_v45 = vsel %vm201_vm3, %v9203_v38, %v5372_v46  ;;  %v9349_v22 = vsel %vm201_vm3, %v5372_v46, %v5374_v62 }
 0xdb3   :  { %9741 = vst [vmem:[#allocation20_spill] sm:$0xff] %v9349_v22  ;;  %v9353_v30 = vsel %vm943_vm4, %v5314_v29, %v9342_v4  ;;  %5394 = vst [vmem:[#allocation5 + $0xf8] sm:$0xff] %v9346_v45 }
 0xdb4   :  { %5395 = vst [vmem:[#allocation5 + $0x100] sm:$0xff] %v9349_v22  ;;  %5337 = vst [vmem:[#allocation5 + $0xa0] sm:$0xff] %v9353_v30 }
 0xdb5   :  { %v5418_v7 = vpop.permute.xlu0 %5417 }
 0xdb6   :  { %v9358_v23 = vpop.permute.xlu1 %5375  ;;  %v9362_v38 = vsel %vm838_vm2, %v9226_v2, %v5418_v7  ;;  %v9365_v46 = vsel %vm838_vm2, %v5418_v7, %v5420_v56 }
 0xdb7   :  { %9742 = vst [vmem:[#allocation21_spill] sm:$0xff] %v9365_v46  ;;  %v9369_v29 = vsel %vm201_vm3, %v5374_v62, %v9358_v23  ;;  %5440 = vst [vmem:[#allocation5 + $0x128] sm:$0xff] %v9362_v38 }
 0xdb8   :  { %5441 = vst [vmem:[#allocation5 + $0x130] sm:$0xff] %v9365_v46  ;;  %5396 = vst [vmem:[#allocation5 + $0x108] sm:$0xff] %v9369_v29 }
 0xdb9   :  { %v5464_v28 = vpop.permute.xlu0 %5463 }
 0xdba   :  { %v9374_v11 = vpop.permute.xlu1 %5421  ;;  %v9378_v2 = vsel %vm313_vm0, %v9250_v41, %v5464_v28  ;;  %v9381_v7 = vsel %vm313_vm0, %v5464_v28, %v5466_v44 }
 0xdbb   :  { %9743 = vst [vmem:[#allocation22_spill] sm:$0xff] %v9381_v7  ;;  %v9385_v62 = vsel %vm838_vm2, %v5420_v56, %v9374_v11  ;;  %5486 = vst [vmem:[#allocation5 + $0x158] sm:$0xff] %v9378_v2  ;;  %v4604_v56 = vsel %vm943_vm4, %v9073_v16, %v9165_v12 }
 0xdbc   :  { %9744 = vst [vmem:[#allocation23_spill] sm:$0xff] %v9385_v62  ;;  %5487 = vst [vmem:[#allocation5 + $0x160] sm:$0xff] %v9381_v7 }
 0xdbd   :  { %5442 = vst [vmem:[#allocation5 + $0x138] sm:$0xff] %v9385_v62  ;;  %v9390_v37 = vpop.permute.xlu0 %5509 }
 0xdbe   :  { %9745 = vst [vmem:[#allocation24_spill] sm:$0xff] %v9390_v37  ;;  %v9392_v46 = vpop.permute.xlu1 %5467  ;;  %v9397_v41 = vsel %vm397_vm1, %v9269_v1, %v9390_v37 }
 0xdbf   :  { %v9401_v28 = vsel %vm313_vm0, %v5466_v44, %v9392_v46  ;;  %5532 = vst [vmem:[#allocation5 + $0x188] sm:$0xff] %v9397_v41  ;;  %v6253_v44 = vpack.c.bf16 %v4604_v56, %v8895_v39  ;;  %v9747_v56 = vpack.c.bf16 %v9212_v18, %v9208_v40  ;;  %v6279_v40 = vpack.c.bf16 %v9314_v47, %v9306_v32 }
 0xdc0   :  { %9746 = vst [vmem:[#allocation25_spill] sm:$0xff] %v9401_v28  ;;  %5488 = vst [vmem:[#allocation5 + $0x168] sm:$0xff] %v9401_v28  ;;  %v9748_v18 = vmov 0.0  }
 0xdc1   :  { %v4403_v7 = vpop.permute.xlu0 %4402 }
 0xdc2   :  { %v9408_v14 = vpop.permute.xlu1 %4596 }
 0xdc3   :  { %v4605_v1 = vsel %vm943_vm4, %v9165_v12, %v9408_v14 }
 0xdc4   :  { %v6251_v37 = vpack.c.bf16 %v4605_v1, %v8958_v49 }
 0xdc5   :  { %v4449_v6 = vpop.permute.xlu0 %4448 }
 0xdc6   :  { %v9415_v62 = vpop.permute.xlu1 %4642  ;;  %6252 = vmatprep.subr.bf16.mxu0 %v6251_v37 }
 0xdc7   :  { %6254 = vmatpush1.bf16.msra.mxu0 %v6253_v44  ;;  %v4651_v16 = vsel %vm987_vm5, %v9192_v24, %v9415_v62  ;;  %v4742_v24 = vsel %vm706_vm7, %v9154_v51, %v9176_v63 }
 0xdc9   :  { %v9417_v28 = vpop.permute.xlu0 %4734 }
 0xdca   :  { %v9419_v22 = vpop.permute.xlu1 %4688  ;;  %v4743_v37 = vsel %vm706_vm7, %v9176_v63, %v9417_v28 }
 0xdcb   :  { %v4697_v12 = vsel %vm1031_vm6, %v9201_v26, %v9419_v22  ;;  %v6275_v26 = vpack.c.bf16 %v9297_v48, %v9289_v33  ;;  %v4456_v48 = vsel %vm313_vm0, %v9118_v10, %v4449_v6  ;;  %v4410_v10 = vsel %vm397_vm1, %v9111_v58, %v4403_v7 }
 0xdcc   :  { %v6255_v49 = vpack.c.bf16 %v4697_v12, %v4651_v16  ;;  %v6277_v16 = vpack.c.bf16 %v9294_v50, %v9286_v20  ;;  %v6281_v20 = vpack.c.bf16 %v9311_v34, %v9303_v57  ;;  %v6283_v50 = vpack.c.bf16 %v9346_v45, %v8882_v15 }
 0xdcd   :  { %v4497_v1 = vpop.permute.xlu0 %4496  ;;  %v6285_v57 = vpack.c.bf16 %v9216_v19, %v8874_v3  ;;  %v6287_v3 = vpack.c.bf16 %v9378_v2, %v9362_v38  ;;  %v6375_v19 = vunpack.i.l.bf16 %v9036_v8 }
 0xdce   :  { %v4495_v39 = vpop.permute.xlu1 %4494  ;;  %6256 = vmatprep.subr.bf16.mxu0 %v6255_v49 }
 0xdcf   :  { %6258 = vmatpush1.bf16.msra.mxu0 %v9747_v56  ;;  %v4503_v49 = vsel %vm838_vm2, %v4495_v39, %v4497_v1  ;;  %v4502_v2 = vsel %vm838_vm2, %v9145_v42, %v4495_v39 }
 0xdd0   :  { %4925 = vmatprep.subr.mxu0 %v4743_v37  ;;  %v6261_v37 = vpack.c.bf16 %v4456_v48, %v4410_v10 }
 0xdd1   :  { %v4543_v44 = vpop.permute.xlu0 %4542 }
 0xdd2   :  { %v4541_v13 = vpop.permute.xlu1 %4540 }
 0xdd3   :  { %4926 = vmatpush1.msra.mxu0 %v4742_v24  ;;  %v4549_v34 = vsel %vm201_vm3, %v4541_v13, %v4543_v44 }
 0xdd4   :  { %5977 = vmatmul.mubr.msk.f32.vlgmr.msra.gmra.mrb[16].mxu0 %vm1154_vm8, %v9244_v31  ;;  %6276 = vmatprep.subr.bf16.mxu0 %v6275_v26  ;;  %v6263_v58 = vpack.c.bf16 %v4549_v34, %v4503_v49 }
 0xdd5   :  { %6278 = vmatpush1.bf16.msra.mxu0 %v6277_v16  ;;  %4979 = vmatprep.mubr.f32.mxu0 %v9748_v18  ;;  %v9445_v51 = vpop.permute.xlu0 %5179 }
 0xdd6   :  { %v4405_v63 = vpop.permute.xlu1 %4404  ;;  %6280 = vmatprep.subr.bf16.mxu0 %v6279_v40  ;;  %v9450_v33 = vsel %vm706_vm7, %v9318_v60, %v9445_v51 }
 0xdd7   :  { %5200 = vst [vmem:[#allocation5 + $0x18] sm:$0xff] %v9450_v33  ;;  %v4411_v60 = vsel %vm397_vm1, %v4403_v7, %v4405_v63  ;;  %v6386_v63 = vunpack.i.h.bf16 %v9056_v52 }
 0xdd8   :  { %5978 = vmatmul.mubr.msk.f32.gmra.mrb[18].mxu0 %vm1154_vm8, %v9264_v59 }
 0xdd9   :  { %6282 = vmatpush1.bf16.msra.mxu0 %v6281_v20  ;;  %5659 = vmatprep.mubr.f32.mxu0 %v9748_v18  ;;  %v9462_v32 = vpop.permute.xlu0 %5225  ;;  %v6390_v20 = vunpack.i.l.bf16 %v9066_v0 }
 0xdda   :  { %v4451_v47 = vpop.permute.xlu1 %4450  ;;  %6284 = vmatprep.subr.bf16.mxu0 %v6283_v50  ;;  %v9471_v15 = vsel %vm1031_vm6, %v9325_v5, %v9462_v32  ;;  %v4548_v5 = vsel %vm201_vm3, %v9152_v55, %v4541_v13  ;;  %v9749_v13 = vpack.c.bf16 %v9254_v27, %v9234_v35  ;;  %v9506_v35 = vld [vmem:[%s9699_s3] sm:$0x7]  ;;  %v6380_v27 = vunpack.i.l.bf16 %v9048_v17 }
 0xddb   :  { %v4457_v45 = vsel %vm313_vm0, %v4449_v6, %v4451_v47  ;;  %5246 = vst [vmem:[#allocation5 + $0x48] sm:$0xff] %v9471_v15  ;;  %v6265_v55 = vpack.c.bf16 %v4548_v5, %v4502_v2  ;;  %v9755_v2 = vld [vmem:[#allocation19_spill] sm:$0xff] }
 0xddc   :  { %v6259_v12 = vpack.c.bf16 %v4457_v45, %v4411_v60 }
 0xddd   :  { %6286 = vmatpush1.bf16.msra.mxu0 %v6285_v57  ;;  %v5272_v56 = vpop.permute.xlu0 %5271  ;;  %v6381_v57 = vunpack.i.h.bf16 %v9048_v17 }
 0xdde   :  { %v4599_v6 = vpop.permute.xlu1 %4598  ;;  %6260 = vmatprep.subr.bf16.mxu1 %v6259_v12  ;;  %6288 = vmatprep.subr.bf16.mxu0 %v6287_v3  ;;  %v9485_v7 = vsel %vm987_vm5, %v9334_v43, %v5272_v56 }
 0xddf   :  { %v4607_v38 = vsel %vm943_vm4, %v4599_v6, %v6375_v19  ;;  %6262 = vmatpush1.bf16.msra.mxu1 %v6261_v37  ;;  %5292 = vst [vmem:[#allocation5 + $0x78] sm:$0xff] %v9485_v7  ;;  %v4606_v1 = vsel %vm943_vm4, %v9408_v14, %v4599_v6  ;;  %v6385_v14 = vunpack.i.l.bf16 %v9056_v52  ;;  %v6391_v52 = vunpack.i.h.bf16 %v9066_v0 }
 0xde0   :  { %6264 = vmatprep.subr.bf16.mxu1 %v6263_v58  ;;  %v6267_v44 = vpack.c.bf16 %v4607_v38, %v9101_v9  ;;  %v9752_v58 = vld [vmem:[#allocation20_spill] sm:$0xff] }
 0xde1   :  { %6290 = vmatpush1.bf16.msra.mxu0 %v9749_v13  ;;  %v9496_v24 = vpop.permute.xlu0 %5317 }
 0xde2   :  { %v4645_v43 = vpop.permute.xlu1 %4644  ;;  %5611 = vmatprep.subr.mxu0 %v9397_v41  ;;  %v5326_v42 = vsel %vm943_vm4, %v9342_v4, %v9496_v24  ;;  %v6269_v41 = vpack.c.bf16 %v4606_v1, %v9080_v54 }
 0xde3   :  { %6266 = vmatpush1.bf16.msra.mxu1 %v6265_v55  ;;  %5338 = vst [vmem:[#allocation5 + $0xa8] sm:$0xff] %v5326_v42  ;;  %v4652_v9 = vsel %vm987_vm5, %v9415_v62, %v4645_v43  ;;  %v4653_v4 = vsel %vm987_vm5, %v4645_v43, %v6380_v27  ;;  %v6295_v17 = vpack.c.bf16 %v5326_v42, %v9485_v7  ;;  %v9756_v55 = vld [vmem:[#allocation18_spill] sm:$0xff]  ;;  %v9757_v43 = vld [vmem:[#allocation24_spill] sm:$0xff]  ;;  %v9758_v27 = vld [vmem:[#allocation21_spill] sm:$0xff] }
 0xde4   :  { %6268 = vmatprep.subr.bf16.mxu1 %v6267_v44 }
 0xde5   :  { %5612 = vmatpush1.msra.mxu0 %v9274_v25  ;;  %v9515_v39 = vpop.permute.xlu0 %5377 }
 0xde6   :  { %v4691_v26 = vpop.permute.xlu1 %4690  ;;  %5981 = vmatmul.mubr.msk.f32.vlgmr.msra.gmra.mrb[20].mxu0 %vm1154_vm8, %v9506_v35  ;;  %v9522_v16 = vsel %vm201_vm3, %v9358_v23, %v9515_v39 }
 0xde7   :  { %v4698_v54 = vsel %vm1031_vm6, %v9419_v22, %v4691_v26  ;;  %v4699_v25 = vsel %vm1031_vm6, %v4691_v26, %v6385_v14  ;;  %6270 = vmatpush1.bf16.msra.mxu1 %v6269_v41  ;;  %5801 = vmatprep.mubr.f32.mxu0 %v9748_v18  ;;  %5397 = vst [vmem:[#allocation5 + $0x110] sm:$0xff] %v9522_v16  ;;  %v9759_v14 = vld [vmem:[#allocation22_spill] sm:$0xff] }
 0xde8   :  { %v6273_v62 = vpack.c.bf16 %v4698_v54, %v4652_v9  ;;  %v6271_v40 = vpack.c.bf16 %v4699_v25, %v4653_v4  ;;  %v6317_v1 = vpack.c.bf16 %v9522_v16, %v9756_v55  ;;  %v6305_v41 = vpack.c.bf16 %v9759_v14, %v9758_v27 }
 0xde9   :  { %v5228_v50 = vpop.permute.xlu0 %5227 }
 0xdea   :  { %v4737_v48 = vpop.permute.xlu1 %4736  ;;  %6272 = vmatprep.subr.bf16.mxu1 %v6271_v40  ;;  %v5235_v23 = vsel %vm1031_vm6, %v9462_v32, %v5228_v50  ;;  %v5236_v22 = vsel %vm1031_vm6, %v5228_v50, %v6386_v63  ;;  %v6291_v32 = vpack.c.bf16 %v9471_v15, %v9450_v33  ;;  %v6376_v33 = vunpack.i.h.bf16 %v9036_v8 }
 0xdeb   :  { %v4745_v47 = vsel %vm706_vm7, %v4737_v48, %v6390_v20  ;;  %6274 = vmatpush1.bf16.msra.mxu1 %v6273_v62  ;;  %5247 = vst [vmem:[#allocation5 + $0x50] sm:$0xff] %v5235_v23  ;;  %5248 = vst [vmem:[#allocation5 + $0x58] sm:$0xff] %v5236_v22  ;;  %v4744_v34 = vsel %vm706_vm7, %v9417_v28, %v4737_v48  ;;  %v6297_v8 = vpack.c.bf16 %v9353_v30, %v9338_v21 }
 0xdec   :  { %5002 = vmatprep.subr.mxu1 %v4745_v47 }
 0xded   :  { %v5274_v60 = vpop.permute.xlu0 %5273 }
 0xdee   :  { %v5182_v45 = vpop.permute.xlu1 %5181  ;;  %v5281_v10 = vsel %vm987_vm5, %v5272_v56, %v5274_v60  ;;  %v5282_v12 = vsel %vm987_vm5, %v5274_v60, %v6381_v57 }
 0xdef   :  { %v5189_v3 = vsel %vm706_vm7, %v9445_v51, %v5182_v45  ;;  %v5190_v19 = vsel %vm706_vm7, %v5182_v45, %v6391_v52  ;;  %5003 = vmatpush1.msra.mxu1 %v4744_v34  ;;  %5293 = vst [vmem:[#allocation5 + $0x80] sm:$0xff] %v5281_v10  ;;  %5294 = vst [vmem:[#allocation5 + $0x88] sm:$0xff] %v5282_v12  ;;  %v9750_v51 = vpack.c.bf16 %v9329_v36, %v9322_v61 }
 0xdf0   :  { %5201 = vst [vmem:[#allocation5 + $0x20] sm:$0xff] %v5189_v3  ;;  %5202 = vst [vmem:[#allocation5 + $0x28] sm:$0xff] %v5190_v19  ;;  %5979 = vmatmul.mubr.msk.f32.vlgmr.msra.gmra.mrb[18].mxu1 %vm1154_vm8, %v9244_v31  ;;  %6292 = vmatprep.subr.bf16.mxu1 %v6291_v32  ;;  %v6307_v0 = vpack.c.bf16 %v5236_v22, %v5190_v19  ;;  %v6309_v28 = vpack.c.bf16 %v5235_v23, %v5189_v3  ;;  %v9761_v3 = vld [vmem:[#allocation12_spill] sm:$0xff] }
 0xdf1   :  { %6294 = vmatpush1.bf16.msra.mxu1 %v9750_v51  ;;  %5056 = vmatprep.mubr.f32.mxu1 %v9748_v18  ;;  %v5424_v15 = vpop.permute.xlu0 %5423  ;;  %v6299_v61 = vpack.c.bf16 %v9369_v29, %v8906_v53  ;;  %v9753_v53 = vld [vmem:[#allocation23_spill] sm:$0xff]  ;;  %v9754_v29 = vld [vmem:[#allocation25_spill] sm:$0xff] }
 0xdf2   :  { %v5320_v49 = vpop.permute.xlu1 %5319  ;;  %6296 = vmatprep.subr.bf16.mxu1 %v6295_v17  ;;  %6308 = vmatprep.subr.bf16.mxu0 %v6307_v0  ;;  %v5431_v31 = vsel %vm838_vm2, %v9374_v11, %v5424_v15  ;;  %v6303_v38 = vpack.c.bf16 %v9754_v29, %v9753_v53 }
 0xdf3   :  { %v5327_v37 = vsel %vm943_vm4, %v9496_v24, %v5320_v49  ;;  %v5328_v5 = vsel %vm943_vm4, %v5320_v49, %v6376_v33  ;;  %6310 = vmatpush1.bf16.msra.mxu0 %v6309_v28  ;;  %5443 = vst [vmem:[#allocation5 + $0x140] sm:$0xff] %v5431_v31  ;;  %v9762_v49 = vld [vmem:[#allocation13_spill] sm:$0xff] }
 0xdf4   :  { %5339 = vst [vmem:[#allocation5 + $0xb0] sm:$0xff] %v5327_v37  ;;  %5340 = vst [vmem:[#allocation5 + $0xb8] sm:$0xff] %v5328_v5  ;;  %5980 = vmatmul.mubr.msk.f32.gmra.mrb[20].mxu1 %vm1154_vm8, %v9264_v59  ;;  %v6311_v36 = vpack.c.bf16 %v5328_v5, %v5282_v12  ;;  %v6313_v11 = vpack.c.bf16 %v5327_v37, %v5281_v10  ;;  %v9751_v59 = vld [vmem:[#allocation15_spill] sm:$0xff]  ;;  %v9763_v37 = vld [vmem:[#allocation14_spill] sm:$0xff] }
 0xdf5   :  { %6298 = vmatpush1.bf16.msra.mxu1 %v6297_v8  ;;  %5730 = vmatprep.mubr.f32.mxu1 %v9748_v18  ;;  %v5470_v56 = vpop.permute.xlu0 %5469  ;;  %v6301_v7 = vpack.c.bf16 %v9752_v58, %v9751_v59  ;;  %v9760_v10 = vld [vmem:[#allocation11_spill] sm:$0xff] }
 0xdf6   :  { %v5380_v6 = vpop.permute.xlu1 %5379  ;;  %6300 = vmatprep.subr.bf16.mxu1 %v6299_v61  ;;  %6312 = vmatprep.subr.bf16.mxu0 %v6311_v36  ;;  %v5477_v30 = vsel %vm313_vm0, %v9392_v46, %v5470_v56 }
 0xdf7   :  { %v5386_v21 = vsel %vm201_vm3, %v9515_v39, %v5380_v6  ;;  %6314 = vmatpush1.bf16.msra.mxu0 %v6313_v11  ;;  %5489 = vst [vmem:[#allocation5 + $0x170] sm:$0xff] %v5477_v30  ;;  %v6321_v26 = vpack.c.bf16 %v5477_v30, %v5431_v31 }
 0xdf8   :  { %5398 = vst [vmem:[#allocation5 + $0x118] sm:$0xff] %v5386_v21  ;;  %v6315_v13 = vpack.c.bf16 %v5386_v21, %v9755_v2 }
 0xdf9   :  { %6302 = vmatpush1.bf16.msra.mxu1 %v6301_v7  ;;  %v5512_v24 = vpop.permute.xlu0 %5511 }
 0xdfa   :  { %v5426_v46 = vpop.permute.xlu1 %5425  ;;  %6304 = vmatprep.subr.bf16.mxu1 %v6303_v38  ;;  %6316 = vmatprep.subr.bf16.mxu0 %v6315_v13  ;;  %v5521_v44 = vsel %vm397_vm1, %v9757_v43, %v5512_v24 }
 0xdfb   :  { %v5432_v42 = vsel %vm838_vm2, %v5424_v15, %v5426_v46  ;;  %6318 = vmatpush1.bf16.msra.mxu0 %v6317_v1  ;;  %5533 = vst [vmem:[#allocation5 + $0x190] sm:$0xff] %v5521_v44  ;;  %v9764_v1 = vld [vmem:[#allocation16_spill] sm:$0xff]  ;;  %v9765_v46 = vld [vmem:[#allocation17_spill] sm:$0xff] }
 0xdfc   :  { %5444 = vst [vmem:[#allocation5 + $0x148] sm:$0xff] %v5432_v42 }
 0xdfd   :  { %6306 = vmatpush1.bf16.msra.mxu1 %v6305_v41  ;;  %v5516_v16 = vpop.permute.xlu0 %5515 }
 0xdfe   :  { %v5472_v9 = vpop.permute.xlu1 %5471 }
 0xdff   :  { %v5478_v4 = vsel %vm313_vm0, %v5470_v56, %v5472_v9  ;;  %vm114_vm0 = vcmask 0  }
 0xe00   :  { %5490 = vst [vmem:[#allocation5 + $0x178] sm:$0xff] %v5478_v4  ;;  %v6319_v39 = vpack.c.bf16 %v5478_v4, %v5432_v42  ;;  %115 = vst.msk [vmem:[#allocation7] sm:$0x1] %vm114_vm0, %v9748_v18 }
 0xe02   :  { %v5514_v54 = vpop.permute.xlu1 %5513  ;;  %6320 = vmatprep.subr.bf16.mxu0 %v6319_v39 }
 0xe03   :  { %v5522_v25 = vsel %vm397_vm1, %v5512_v24, %v5514_v54  ;;  %v5523_v62 = vsel %vm397_vm1, %v5514_v54, %v5516_v16  ;;  %6322 = vmatpush1.bf16.msra.mxu0 %v6321_v26 }
 0xe04   :  { %5534 = vst [vmem:[#allocation5 + $0x198] sm:$0xff] %v5522_v25  ;;  %5535 = vst [vmem:[#allocation5 + $0x1a0] sm:$0xff] %v5523_v62  ;;  %5682 = vmatprep.subr.mxu1 %v5522_v25 }
 0xe05   :  { %5683 = vmatpush1.msra.mxu1 %v5521_v44 }
 0xe06   :  { %v5518_v40 = vpop.permute.xlu1 %5517  ;;  %5982 = vmatmul.mubr.msk.f32.vlgmr.msra.gmra.mrb[22].mxu1 %vm1154_vm8, %v9506_v35 }
 0xe07   :  { %v5524_v63 = vsel %vm397_vm1, %v5516_v16, %v5518_v40 }
 0xe08   :  { %5536 = vst [vmem:[#allocation5 + $0x1a8] sm:$0xff] %v5524_v63  ;;  %5753 = vmatprep.subr.mxu0 %v5524_v63 }
 0xe09   :  { %5754 = vmatpush1.msra.mxu0 %v5523_v62 }
 0xe0a   :  { %5983 = vmatmul.mubr.msk.f32.vlgmr.msra.gmra.mrb[22].mxu0 %vm1154_vm8, %v9506_v35 }
 0xe0e   :  { %v4819_v20 = vpop.permute.xlu0 %4818 }
 0xe17   :  { %v4824_v2 = vpop.permute.xlu1 %4823 }
 0xe3b   :  { %v5075_v50 = vpop.xlane.xlu0 %5074 }
 0xe3c   :  { %v5076_v48 = vrot.slane %v5075_v50, 4 }
 0xe3e   :  { %v5077_v23 = vadd.f32 %v5076_v48, %v5075_v50 }
 0xe40   :  { %v5078_v22 = vrot.slane %v5077_v23, 2 }
 0xe42   :  { %v5079_v47 = vadd.f32 %v5078_v22, %v5077_v23 }
 0xe44   :  { %v5080_v57 = vrot.slane %v5079_v47, 1 }
 0xe46   :  { %v5081_v52 = vadd.f32 %v5080_v57, %v5079_v47 }
 0xe48   :  { %6331 = vpush %v5081_v52 }
 0xe60   :  { %v4898_v34 = vpop.f32.mrb[14].mxu1 }
 0xe61   :  { %v4899_v60 = vadd.f32 %v4898_v34, %v4819_v20  ;;  %v4900_v45 = vpop.f32.mrb[15].mxu1 }
 0xe62   :  { %v4901_v32 = vadd.f32 %v4900_v45, %v4819_v20 }
 0xe63   :  { %v5085_v12 = vmul.f32 %v4899_v60, %v9760_v10 }
 0xe64   :  { %v5086_v19 = vmul.f32 %v4901_v32, %v9761_v3  ;;  %v4904_v17 = vpop.f32.mrb[16].mxu1 }
 0xe65   :  { %v4906_v0 = vpop.f32.mrb[17].mxu1  ;;  %v4905_v55 = vadd.f32 %v4904_v17, %v4824_v2 }
 0xe66   :  { %v5097_v35 = vadd.f32 %v5086_v19, %v5085_v12  ;;  %v4907_v42 = vadd.f32 %v4906_v0, %v4824_v2 }
 0xe67   :  { %v5091_v41 = vmul.f32 %v4905_v55, %v9760_v10 }
 0xe68   :  { %v5092_v39 = vmul.f32 %v4907_v42, %v9761_v3 }
 0xe79   :  { %s6332_s3 = spop %6331 }
 0xea7   :  { %v4975_v28 = vpop.f32.mrb[16].mxu0 }
 0xea8   :  { %v4976_v33 = vadd.f32 %v4975_v28, %v4819_v20  ;;  %v4977_v51 = vpop.f32.mrb[17].mxu0 }
 0xea9   :  { %v4978_v15 = vadd.f32 %v4977_v51, %v4819_v20 }
 0xeaa   :  { %v5087_v31 = vmul.f32 %v4976_v33, %v9762_v49 }
 0xeab   :  { %v5088_v5 = vmul.f32 %v4978_v15, %v9763_v37  ;;  %v4981_v8 = vpop.f32.mrb[18].mxu0 }
 0xeac   :  { %v5098_v61 = vadd.f32 %v5097_v35, %v5087_v31  ;;  %v4983_v36 = vpop.f32.mrb[19].mxu0  ;;  %v4982_v9 = vadd.f32 %v4981_v8, %v4824_v2 }
 0xead   :  { %v4984_v26 = vadd.f32 %v4983_v36, %v4824_v2 }
 0xeae   :  { %v5099_v11 = vadd.f32 %v5098_v61, %v5088_v5  ;;  %v5093_v54 = vmul.f32 %v4982_v9, %v9762_v49 }
 0xeaf   :  { %v5094_v40 = vmul.f32 %v4984_v26, %v9763_v37 }
 0xeb9   :  { %v9594_v56 = vpop.f32.mrb[20].mxu0 }
 0xeba   :  { %v5808_v6 = vmul.f32 %v9594_v56, %v9760_v10  ;;  %v9598_v30 = vpop.f32.mrb[21].mxu0 }
 0xebb   :  { %v5809_v21 = vmul.f32 %v9598_v30, %v9761_v3 }
 0xebc   :  { %v5814_v59 = vsel %vm2095_vm13, %v5808_v6, 0.0 }
 0xebd   :  { %v5815_v58 = vsel %vm2095_vm13, %v5809_v21, 0.0 }
 0xebe   :  { %v5816_v7 = vadd.f32 %v5815_v58, %v5814_v59 }
 0xec3   :  { %v5052_v53 = vpop.f32.mrb[18].mxu1 }
 0xec4   :  { %v5053_v29 = vadd.f32 %v5052_v53, %v4819_v20  ;;  %v5054_v38 = vpop.f32.mrb[19].mxu1 }
 0xec5   :  { %v5055_v13 = vadd.f32 %v5054_v38, %v4819_v20 }
 0xec6   :  { %v5089_v24 = vmul.f32 %v5053_v29, %v9764_v1 }
 0xec7   :  { %v5090_v43 = vmul.f32 %v5055_v13, %v9765_v46  ;;  %v5058_v44 = vpop.f32.mrb[20].mxu1  ;;  %v5083_v13 = vstv %s6332_s3 }
 0xec8   :  { %v5100_v27 = vadd.f32 %v5099_v11, %v5089_v24  ;;  %v5060_v14 = vpop.f32.mrb[21].mxu1  ;;  %v5059_v62 = vadd.f32 %v5058_v44, %v4824_v2  ;;  %v5084_v55 = vmul.f32 0.00024414063, %v5083_v13 }
 0xec9   :  { %v5061_v20 = vadd.f32 %v5060_v14, %v4824_v2 }
 0xeca   :  { %v5101_v4 = vadd.f32 %v5100_v27, %v5090_v43  ;;  %v5095_v50 = vmul.f32 %v5059_v62, %v9764_v1 }
 0xecb   :  { %v5096_v22 = vmul.f32 %v5061_v20, %v9765_v46 }
 0xecc   :  { %v5102_v16 = vadd.f32 %v5101_v4, %v5091_v41 }
 0xece   :  { %v5103_v25 = vadd.f32 %v5102_v16, %v5092_v39 }
 0xed0   :  { %v5104_v63 = vadd.f32 %v5103_v25, %v5093_v54 }
 0xed2   :  { %v5105_v48 = vadd.f32 %v5104_v63, %v5094_v40 }
 0xed4   :  { %v5106_v23 = vadd.f32 %v5105_v48, %v5095_v50 }
 0xed6   :  { %v5107_v47 = vadd.f32 %v5106_v23, %v5096_v22 }
 0xed8   :  { %5108 = vadd.xlane.f32.xlu1 %v5107_v47 }
 0xed9   :  { %v9612_v57 = vpop.f32.mrb[22].mxu1 }
 0xeda   :  { %v5810_v52 = vmul.f32 %v9612_v57, %v9762_v49  ;;  %v9616_v34 = vpop.f32.mrb[23].mxu1 }
 0xedb   :  { %v5811_v60 = vmul.f32 %v9616_v34, %v9763_v37 }
 0xedc   :  { %v5817_v45 = vsel %vm2095_vm13, %v5810_v52, 0.0 }
 0xedd   :  { %v5818_v32 = vadd.f32 %v5817_v45, %v5816_v7  ;;  %v5819_v12 = vsel %vm2095_vm13, %v5811_v60, 0.0  ;;  %v9622_v19 = vpop.f32.mrb[22].mxu0 }
 0xede   :  { %v5812_v17 = vmul.f32 %v9622_v19, %v9764_v1  ;;  %v9626_v0 = vpop.f32.mrb[23].mxu0 }
 0xedf   :  { %v5820_v35 = vadd.f32 %v5819_v12, %v5818_v32  ;;  %v5813_v28 = vmul.f32 %v9626_v0, %v9765_v46 }
 0xee0   :  { %v5821_v33 = vsel %vm2095_vm13, %v5812_v17, 0.0 }
 0xee1   :  { %v5823_v51 = vsel %vm2095_vm13, %v5813_v28, 0.0  ;;  %v5822_v15 = vadd.f32 %v5821_v33, %v5820_v35 }
 0xee3   :  { %v5824_v31 = vadd.f32 %v5823_v51, %v5822_v15 }
 0xee5   :  { %5825 = vadd.xlane.f32.xlu0 %v5824_v31 }
 0xf65   :  { %v5109_v5 = vpop.xlane.xlu1 %5108 }
 0xf66   :  { %v5110_v8 = vrot.slane %v5109_v5, 4 }
 0xf68   :  { %v5111_v61 = vadd.f32 %v5110_v8, %v5109_v5 }
 0xf6a   :  { %v5112_v36 = vrot.slane %v5111_v61, 2 }
 0xf6c   :  { %v5113_v11 = vadd.f32 %v5112_v36, %v5111_v61 }
 0xf6e   :  { %v5114_v6 = vrot.slane %v5113_v11, 1 }
 0xf70   :  { %v5115_v21 = vadd.f32 %v5114_v6, %v5113_v11 }
 0xf72   :  { %v5826_v59 = vpop.xlane.xlu0 %5825  ;;  %6333 = vpush %v5115_v21 }
 0xf73   :  { %v5827_v58 = vrot.slane %v5826_v59, 4 }
 0xf75   :  { %v5828_v7 = vadd.f32 %v5827_v58, %v5826_v59 }
 0xf77   :  { %v5829_v53 = vrot.slane %v5828_v7, 2 }
 0xf79   :  { %v5830_v29 = vadd.f32 %v5829_v53, %v5828_v7 }
 0xf7b   :  { %v5831_v38 = vrot.slane %v5830_v29, 1 }
 0xf7d   :  { %v5832_v2 = vadd.f32 %v5831_v38, %v5830_v29 }
 0xf7f   :  { %6335 = vpush %v5832_v2 }
 0xfa3   :  { %s6334_s16 = spop %6333 }
 0xfa4   :  { %v5117_v18 = vstv %s6334_s16 }
 0xfa5   :  { %v5118_v24 = vmul.f32 0.00012207031, %v5117_v18 }
 0xfa7   :  { %v5119_v43 = vadd.f32 %v5118_v24, %v5084_v55 }
 0xfa9   :  { %5120 = vst.msk [vmem:[#allocation7] sm:$0x1] %vm114_vm0, %v5119_v43 }
 0xfb0   :  { %s6336_s21 = spop %6335 }
 0xfb1   :  { %v5834_v44 = vstv %s6336_s21 }
 0xfb2   :  { %v5835_v42 = vmul.f32 0.0006510417, %v5834_v44 }
 0xfb4   :  { %v5836_v27 = vsub.f32 %v9594_v56, %v5835_v42  ;;  %v5837_v14 = vsub.f32 %v9598_v30, %v5835_v42  ;;  %v5838_v41 = vsub.f32 %v9612_v57, %v5835_v42  ;;  %v5839_v9 = vsub.f32 %v9616_v34, %v5835_v42 }
 0xfb5   :  { %v5840_v4 = vsub.f32 %v9622_v19, %v5835_v42  ;;  %v5841_v39 = vsub.f32 %v9626_v0, %v5835_v42 }
 0xfb6   :  { %v5842_v26 = vmul.f32 %v5836_v27, %v9760_v10  ;;  %v5843_v16 = vmul.f32 %v5837_v14, %v9761_v3  ;;  %v5844_v54 = vmul.f32 %v5838_v41, %v9762_v49  ;;  %v5845_v25 = vmul.f32 %v5839_v9, %v9763_v37 }
 0xfb7   :  { %v5846_v62 = vmul.f32 %v5840_v4, %v9764_v1  ;;  %v5847_v50 = vmul.f32 %v5841_v39, %v9765_v46 }
 0xfb8   :  { %v5848_v40 = vmul.f32 %v5842_v26, %v5842_v26  ;;  %v5849_v63 = vmul.f32 %v5843_v16, %v5843_v16  ;;  %v5850_v20 = vmul.f32 %v5844_v54, %v5844_v54  ;;  %v5851_v48 = vmul.f32 %v5845_v25, %v5845_v25 }
 0xfb9   :  { %v5852_v52 = vmul.f32 %v5846_v62, %v5846_v62  ;;  %v5853_v32 = vmul.f32 %v5847_v50, %v5847_v50 }
 0xfba   :  { %v5854_v23 = vsel %vm2095_vm13, %v5848_v40, 0.0  ;;  %v5855_v22 = vsel %vm2095_vm13, %v5849_v63, 0.0  ;;  %v5857_v60 = vsel %vm2095_vm13, %v5850_v20, 0.0  ;;  %v5859_v12 = vsel %vm2095_vm13, %v5851_v48, 0.0 }
 0xfbb   :  { %v5856_v47 = vadd.f32 %v5855_v22, %v5854_v23  ;;  %v5861_v35 = vsel %vm2095_vm13, %v5852_v52, 0.0  ;;  %v5863_v33 = vsel %vm2095_vm13, %v5853_v32, 0.0 }
 0xfbd   :  { %v5858_v45 = vadd.f32 %v5857_v60, %v5856_v47 }
 0xfbf   :  { %v5860_v17 = vadd.f32 %v5859_v12, %v5858_v45 }
 0xfc1   :  { %v5862_v28 = vadd.f32 %v5861_v35, %v5860_v17 }
 0xfc3   :  { %v5864_v51 = vadd.f32 %v5863_v33, %v5862_v28 }
 0xfc5   :  { %5865 = vadd.xlane.f32.xlu0 %v5864_v51 }
 0xfc6   :  { %6496 = shalt.err (!%p6493_p4)
}
 0xfc7   :  { %s6497_s0 = scalar_lea.hbm %s9706_s10, 16 }
 0xfc8   :  { %p6498_p5 = scmp.ne.s32.totalorder %s9706_s10, %s6497_s0  ;;  %p6501_p6 = scmp.lt.u32.totalorder %s6497_s0, %s9706_s10 }
 0xfca   :  { %p6503_p7 = pnand %p6501_p6, %p6498_p5 }
 0xfcc   :  { %6506 = shalt.err (!%p6503_p7)
}
 0xfcd   :  { %5939 = dma.vmem_to_hbm [thread:$0]  %s5937_s23, 16, %s9706_s10, [#allocation8]   ;;  %v9766_v13 = vld [vmem:[#allocation10_spill] sm:$0xff]  ;;  %v5886_v9 = vld [vmem:[%s9705_s9 + $0x4] sm:$0x77]  ;;  %v5918_v26 = vcombine.low %v9764_v1, %v9765_v46 }
0x1052   :  { %v5866_v15 = vpop.xlane.xlu0 %5865 }
0x1053   :  { %v5867_v31 = vrot.slane %v5866_v15, 4 }
0x1055   :  { %v5868_v5 = vadd.f32 %v5867_v31, %v5866_v15 }
0x1057   :  { %v5869_v8 = vrot.slane %v5868_v5, 2 }
0x1059   :  { %v5870_v61 = vadd.f32 %v5869_v8, %v5868_v5 }
0x105b   :  { %v5871_v36 = vrot.slane %v5870_v61, 1 }
0x105d   :  { %v5872_v11 = vadd.f32 %v5871_v36, %v5870_v61 }
0x105f   :  { %6337 = vpush %v5872_v11 }
0x1090   :  { %s6338_s19 = spop %6337 }
0x1091   :  { %v5874_v6 = vstv %s6338_s19 }
0x1092   :  { %v5875_v21 = vmul.f32 0.0006514658, %v5874_v6 }
0x1094   :  { %6481 = vrsqrt.f32 %v5875_v21  ;;  %vm5878_vm1 = vcmp.eq.f32.partialorder %v5875_v21, inf  ;;  %v5881_v7 = vand.u32 2147483648, %v5875_v21  ;;  %vm5880_vm2 = vcmp.eq.f32.partialorder %v5875_v21, 0.0 }
0x109e   :  { %v6482_v59 = vpop.eup %6481 }
0x109f   :  { %v5877_v58 = vmul.f32 %v6482_v59, %v5875_v21 }
0x10a1   :  { %v5879_v53 = vsel %vm5878_vm1, %v5875_v21, %v5877_v58 }
0x10a2   :  { %v5882_v29 = vsel %vm5880_vm2, %v5881_v7, %v5879_v53 }
0x10a3   :  { %v5883_v38 = vadd.f32 1e-08, %v5882_v29 }
0x10a5   :  { %6483 = vrcp.f32 %v5883_v38 }
0x10af   :  { %v6484_v2 = vpop.eup %6483 }
0x10b0   :  { %v5885_v18 = vmul.f32 %v6484_v2, %v9766_v13 }
0x10b2   :  { %v5889_v55 = vmul.f32 %v5885_v18, %v9594_v56  ;;  %v5890_v24 = vmul.f32 %v5885_v18, %v9598_v30  ;;  %v5891_v43 = vmul.f32 %v5885_v18, %v9612_v57  ;;  %v5892_v44 = vmul.f32 %v5885_v18, %v9616_v34  ;;  %v5887_v56 = vld [vmem:[%s9705_s9 + $0xc] sm:$0x77]  ;;  %v5888_v30 = vld [vmem:[%s9705_s9 + $0x14] sm:$0x77] }
0x10b3   :  { %v5893_v42 = vmul.f32 %v5885_v18, %v9622_v19  ;;  %v5894_v27 = vmul.f32 %v5885_v18, %v9626_v0  ;;  %v5916_v19 = vcombine.low %v9760_v10, %v9761_v3  ;;  %v5917_v0 = vcombine.low %v9762_v49, %v9763_v37 }
0x10b4   :  { %v5901_v14 = vcombine.low %v5889_v55, %v5890_v24  ;;  %v5902_v41 = vcombine.low %v5891_v43, %v5892_v44 }
0x10b5   :  { %v5903_v4 = vcombine.low %v5893_v42, %v5894_v27 }
0x10b6   :  { %v5907_v57 = vadd.f32 %v5901_v14, %v5886_v9  ;;  %v5908_v34 = vadd.f32 %v5902_v41, %v5887_v56 }
0x10b7   :  { %v5909_v39 = vadd.f32 %v5903_v4, %v5888_v30 }
0x10b8   :  { %v5984_v16 = vclamps-f32 %v5907_v57, 1.0  ;;  %v5985_v54 = vclamps-f32 %v5908_v34, 1.0 }
0x10b9   :  { %v5986_v25 = vclamps-f32 %v5909_v39, 1.0 }
0x10ba   :  { %v5922_v62 = vmul.f32 %v5984_v16, %v5916_v19  ;;  %v5923_v40 = vmul.f32 %v5985_v54, %v5917_v0 }
0x10bb   :  { %v5924_v63 = vmul.f32 %v5986_v25, %v5918_v26 }
0x10bc   :  { %5925 = vst [vmem:[%s9705_s9 + $0x4] sm:$0x77] %v5922_v62  ;;  %5926 = vst [vmem:[%s9705_s9 + $0xc] sm:$0x77] %v5923_v40 }
0x10bd   :  { %5927 = vst [vmem:[%s9705_s9 + $0x14] sm:$0x77] %v5924_v63 }
0x10be   :  { %6507 = dma.done.wait [#allocation8], 16  }
0x10bf   :  { %6508 = vsyncadd [#allocation8], 4294967280 }
0x10c0   :  { %5945 = vsyncpa [#allocation8], 1 }

</bundles_post_ra>
